<compile_context>
chip_gen: v7x
topology: tpu7x:2x2x1
jax: 0.10.0
libtpu: 0.0.40
codegen_flags: <defaults>
</compile_context>

<pallas_src>
import functools

import jax
import jax.numpy as jnp
from jax.experimental import pallas as pl
from jax.experimental.pallas import tpu as pltpu


# ------------------------------ Pallas kernel -------------------------------

def _double_conv_kernel(x_ref, w1_ref, b1_ref, w2_ref, b2_ref, o_ref,
                        mid_ref, *, H, W, Wp, Cm, Co, Lm):
    # x_ref  : ((H+3)*Wp, Cin)  bf16  -- zero-padded, width-padded, flattened
    # w1_ref : (9, Cin, Cm)     bf16  -- taps leading; BN1 scale folded in
    # b1_ref : (1, Cm)          f32   -- folded BN1 bias
    # w2_ref : (9, Cm, Co)      bf16  -- BN2 scale folded in
    # b2_ref : (1, Co)          f32
    # o_ref  : (H*Wp, Co)       bf16
    # mid_ref: (Lm, Cm)         bf16  VMEM scratch, mid activation (padded)
    HW = H * Wp
    OFF = Wp + 8                 # 8-aligned placement of mid data (Wp % 8 == 0)
    TAIL = Lm - OFF - HW         # rows past the live data conv2 may read

    # Zero ONLY the pad regions of the mid scratch (head rows read by conv2's
    # top taps, tail rows past the data). The data region [OFF, OFF+HW) is
    # fully overwritten below and its garbage columns (j >= W) are re-zeroed
    # by the mask, so everything conv2 reads outside live data is zero.
    mid_ref[pl.ds(0, OFF), :] = jnp.zeros((OFF, Cm), mid_ref.dtype)
    mid_ref[pl.ds(OFF + HW, TAIL), :] = jnp.zeros((TAIL, Cm), mid_ref.dtype)

    def conv3x3(src_ref, w_ref, base, n_out):
        # out[i*Wp + j] = sum_{dy,dx} src[base + (i+dy)*Wp + (j+dx)] @ w[dy,dx]
        # Each tap is a static offset slice of the ref -> one MXU matmul.
        acc = jnp.zeros((HW, n_out), jnp.float32)
        for dy in range(3):
            for dx in range(3):
                slab = src_ref[pl.ds(base + dy * Wp + dx, HW), :]
                acc = acc + jnp.dot(slab, w_ref[3 * dy + dx],
                                    preferred_element_type=jnp.float32)
        return acc

    # ---- conv1 -> (+bias) -> ReLU, kept resident in VMEM ----
    mid = jnp.maximum(conv3x3(x_ref, w1_ref, 0, Cm) + b1_ref[...], 0.0)
    # Zero the (Wp - W) garbage columns: they double as conv2's left/right pad.
    col = jax.lax.broadcasted_iota(jnp.int32, (HW, 1), 0) % Wp
    mid = jnp.where(col < W, mid, 0.0).astype(mid_ref.dtype)
    mid_ref[pl.ds(OFF, HW), :] = mid      # 8-row-aligned, lane-dense store

    # ---- conv2 -> (+bias) -> ReLU -> bf16 output ----
    # mid data sits at OFF = Wp+8, so tap (dy,dx) reads at dy*Wp + dx + 7.
    out = jnp.maximum(conv3x3(mid_ref, w2_ref, 7, Co) + b2_ref[...], 0.0)
    o_ref[...] = out.astype(o_ref.dtype)


# ------------------------------ host wrappers --------------------------------

def _round_up(x, m):
    return (x + m - 1) // m * m


def _compiler_params():
    kwargs = dict(dimension_semantics=("parallel",))   # batch axis
    try:
        cap = pltpu.get_tpu_info().vmem_capacity_bytes  # generation-aware limit
        kwargs["vmem_limit_bytes"] = int(min(cap * 3 // 4, 96 * 1024 * 1024))
    except Exception:                                   # fall back to default
        pass
    return pltpu.CompilerParams(**kwargs)


def fold_bn(gamma, beta, mean, var, eps=1e-5):
    """Eval-mode BatchNorm -> per-channel (scale, bias), f32."""
    scale = gamma / jnp.sqrt(var + eps)
    bias = beta - mean * scale
    return scale.astype(jnp.float32), bias.astype(jnp.float32)


def pack_conv_weight(w_oihw, bn_scale, kin_pad, kout_pad):
    """(Cout, Cin, 3, 3) OIHW * scale[Cout] -> (9, kin_pad, kout_pad) bf16."""
    cout, cin = w_oihw.shape[0], w_oihw.shape[1]
    w = w_oihw.astype(jnp.float32) * bn_scale[:, None, None, None]
    w = jnp.transpose(w, (2, 3, 1, 0)).reshape(9, cin, cout)
    w = jnp.pad(w, ((0, 0), (0, kin_pad - cin), (0, kout_pad - cout)))
    return w.astype(jnp.bfloat16)


def make_params(w1, g1, b1, m1, v1, w2, g2, b2, m2, v2, eps=1e-5):
    """Fold BN into the conv weights/bias and pad channels to lane multiples."""
    cmid, cin = w1.shape[0], w1.shape[1]
    cout = w2.shape[0]
    cm = _round_up(cmid, 128)
    co = _round_up(cout, 128)
    s1, bb1 = fold_bn(g1, b1, m1, v1, eps)
    s2, bb2 = fold_bn(g2, b2, m2, v2, eps)
    return dict(
        w1=pack_conv_weight(w1, s1, cin, cm),
        b1=jnp.pad(bb1, (0, cm - cmid)).reshape(1, cm),
        w2=pack_conv_weight(w2, s2, cm, co),
        b2=jnp.pad(bb2, (0, co - cout)).reshape(1, co),
    )


def double_conv_forward(x_nchw, params, *, out_channels):
    """DoubleConv forward. x: (N, Cin, H, W) f32 NCHW -> (N, Cout, H, W) f32."""
    N, Cin, H, W = x_nchw.shape
    Cm = params["w1"].shape[-1]      # padded mid channels (multiple of 128)
    Co = params["w2"].shape[-1]      # padded out channels (multiple of 128)
    Wp = _round_up(W + 2, 8)         # width padded to a sublane multiple
    HW = H * Wp
    L = (H + 3) * Wp                 # 1 top pad row + H data rows + 2 tail rows
    Lm = HW + 3 * Wp + 16            # mid scratch rows (8-aligned data + pads)

    x = jnp.transpose(x_nchw, (0, 2, 3, 1)).astype(jnp.bfloat16)       # NHWC
    x = jnp.pad(x, ((0, 0), (1, 2), (1, Wp - W - 1), (0, 0)))
    x = x.reshape(N, L, Cin)

    kernel = functools.partial(_double_conv_kernel, H=H, W=W, Wp=Wp,
                               Cm=Cm, Co=Co, Lm=Lm)
    out_flat = pl.pallas_call(
        kernel,
        out_shape=jax.ShapeDtypeStruct((N, HW, Co), jnp.bfloat16),
        grid=(N,),
        in_specs=[
            pl.BlockSpec((None, L, Cin), lambda n: (n, 0, 0)),
            pl.BlockSpec((9, Cin, Cm), lambda n: (0, 0, 0)),
            pl.BlockSpec((1, Cm), lambda n: (0, 0)),
            pl.BlockSpec((9, Cm, Co), lambda n: (0, 0, 0)),
            pl.BlockSpec((1, Co), lambda n: (0, 0)),
        ],
        out_specs=pl.BlockSpec((None, HW, Co), lambda n: (n, 0, 0)),
        scratch_shapes=[pltpu.VMEM((Lm, Cm), jnp.bfloat16)],
        compiler_params=_compiler_params(),
    )(x, params["w1"], params["b1"], params["w2"], params["b2"])

    out = out_flat.reshape(N, H, Wp, Co)[:, :, :W, :out_channels]
    return jnp.transpose(out.astype(jnp.float32), (0, 3, 1, 2))        # NCHW


def _reference(x_nchw, params, out_channels):
    """Pure-JAX DoubleConv mirroring the kernel's bf16/f32 numerics."""
    def conv(x_nhwc, w9):
        cin, c = w9.shape[1], w9.shape[2]
        w = w9.astype(jnp.float32).reshape(3, 3, cin, c)
        return jax.lax.conv_general_dilated(
            x_nhwc, w, window_strides=(1, 1), padding=((1, 1), (1, 1)),
            dimension_numbers=("NHWC", "HWIO", "NHWC"),
            precision=jax.lax.Precision.HIGHEST)

    x = jnp.transpose(x_nchw, (0, 2, 3, 1)).astype(jnp.bfloat16).astype(jnp.float32)
    y = jnp.maximum(conv(x, params["w1"]) + params["b1"][0], 0.0)
    y = y.astype(jnp.bfloat16).astype(jnp.float32)    # kernel keeps mid in bf16
    z = jnp.maximum(conv(y, params["w2"]) + params["b2"][0], 0.0)
    z = z.astype(jnp.bfloat16).astype(jnp.float32)    # kernel emits bf16 output
    return jnp.transpose(z[..., :out_channels], (0, 3, 1, 2))


# ----------------------------------- demo ------------------------------------

if __name__ == "__main__":
    key = jax.random.PRNGKey(0)
    N, Cin, H, W = 2, 4, 16, 16
    Cmid = Cout = 32                 # DoubleConv(4, 32): mid defaults to out

    ks = jax.random.split(key, 11)
    x = jax.random.normal(ks[0], (N, Cin, H, W), jnp.float32)

    # PyTorch-layout parameters (Conv2d OIHW weights, BN eval-mode stats).
    w1 = jax.random.normal(ks[1], (Cmid, Cin, 3, 3), jnp.float32) * 0.2
    g1 = 1.0 + 0.1 * jax.random.normal(ks[2], (Cmid,), jnp.float32)
    b1 = 0.1 * jax.random.normal(ks[3], (Cmid,), jnp.float32)
    m1 = 0.1 * jax.random.normal(ks[4], (Cmid,), jnp.float32)
    v1 = jax.random.uniform(ks[5], (Cmid,), jnp.float32, minval=0.5, maxval=1.5)
    w2 = jax.random.normal(ks[6], (Cout, Cmid, 3, 3), jnp.float32) * 0.2
    g2 = 1.0 + 0.1 * jax.random.normal(ks[7], (Cout,), jnp.float32)
    b2 = 0.1 * jax.random.normal(ks[8], (Cout,), jnp.float32)
    m2 = 0.1 * jax.random.normal(ks[9], (Cout,), jnp.float32)
    v2 = jax.random.uniform(ks[10], (Cout,), jnp.float32, minval=0.5, maxval=1.5)

    params = make_params(w1, g1, b1, m1, v1, w2, g2, b2, m2, v2)

    fwd = jax.jit(double_conv_forward, static_argnames="out_channels")
    out = fwd(x, params, out_channels=Cout)
    jax.block_until_ready(out)

    assert out.shape == (N, Cout, H, W), out.shape
    assert bool(jnp.all(jnp.isfinite(out)))
    ref = _reference(x, params, Cout)
    max_err = float(jnp.max(jnp.abs(out - ref)))
    assert max_err < 2e-2, max_err
    print("KERNEL_OK")
</pallas_src>

<mosaic_0001>
module attributes {stable_mosaic.version = 11 : i64} {
  func.func @_double_conv_kernel(%arg0: i32, %arg1: memref<1x456x4xbf16, #tpu.memory_space<vmem>>, %arg2: memref<9x4x128xbf16, #tpu.memory_space<vmem>>, %arg3: memref<1x128xf32, #tpu.memory_space<vmem>>, %arg4: memref<9x128x128xbf16, #tpu.memory_space<vmem>>, %arg5: memref<1x128xf32, #tpu.memory_space<vmem>>, %arg6: memref<1x384x128xbf16, #tpu.memory_space<vmem>>, %arg7: memref<472x128xbf16, #tpu.memory_space<vmem>>) attributes {dimension_semantics = [#tpu.dimension_semantics<parallel>], iteration_bounds = array<i64: 2>, scalar_prefetch = 0 : i64, scratch_operands = 1 : i64, tpu.core_type = #tpu.core_type<tc>, window_params = [{transform_indices = @transform_0, window_bounds = array<i64: 1, 456, 4>}, {pipeline_mode = #tpu.pipeline_mode<synchronous>, transform_indices = @transform_1, window_bounds = array<i64: 9, 4, 128>}, {pipeline_mode = #tpu.pipeline_mode<synchronous>, transform_indices = @transform_2, window_bounds = array<i64: 1, 128>}, {pipeline_mode = #tpu.pipeline_mode<synchronous>, transform_indices = @transform_3, window_bounds = array<i64: 9, 128, 128>}, {pipeline_mode = #tpu.pipeline_mode<synchronous>, transform_indices = @transform_4, window_bounds = array<i64: 1, 128>}, {transform_indices = @transform_5, window_bounds = array<i64: 1, 384, 128>}]} {
    %cst = arith.constant 0.000000e+00 : bf16
    %0 = vector.broadcast %cst : bf16 to vector<32x128xbf16>
    %c0 = arith.constant 0 : index
    %c0_0 = arith.constant 0 : index
    %1 = vector.load %arg7[%c0, %c0_0] : memref<472x128xbf16, #tpu.memory_space<vmem>>, vector<32x128xbf16>
    tpu.vector_store %arg7[%c0, %c0_0], %0 {strides = array<i32>} : memref<472x128xbf16, #tpu.memory_space<vmem>>, vector<32x128xbf16>,
    %cst_1 = arith.constant 0.000000e+00 : bf16
    %2 = vector.broadcast %cst_1 : bf16 to vector<56x128xbf16>
    %c416 = arith.constant 416 : index
    %c0_2 = arith.constant 0 : index
    %3 = vector.load %arg7[%c416, %c0_2] : memref<472x128xbf16, #tpu.memory_space<vmem>>, vector<56x128xbf16>
    tpu.vector_store %arg7[%c416, %c0_2], %2 {strides = array<i32>} : memref<472x128xbf16, #tpu.memory_space<vmem>>, vector<56x128xbf16>,
    %cst_3 = arith.constant 0.000000e+00 : f32
    %4 = vector.broadcast %cst_3 : f32 to vector<384x128xf32>
    %c0_4 = arith.constant 0 : index
    %c0_5 = arith.constant 0 : index
    %c0_6 = arith.constant 0 : index
    %5 = vector.load %arg1[%c0_4, %c0_5, %c0_6] : memref<1x456x4xbf16, #tpu.memory_space<vmem>>, vector<1x384x4xbf16>
    %6 = vector.shape_cast %5 : vector<1x384x4xbf16> to vector<384x4xbf16>
    %c0_7 = arith.constant 0 : index
    %c0_8 = arith.constant 0 : index
    %c0_9 = arith.constant 0 : index
    %7 = vector.load %arg2[%c0_7, %c0_8, %c0_9] : memref<9x4x128xbf16, #tpu.memory_space<vmem>>, vector<1x4x128xbf16>
    %8 = vector.shape_cast %7 : vector<1x4x128xbf16> to vector<4x128xbf16>
    %cst_10 = arith.constant dense<0.000000e+00> : vector<384x128xf32>
    %9 = tpu.matmul %6, %8, %cst_10 {dimension_numbers = #tpu.dot_dimension_numbers<[1], [0], [0], [1], [0, 0, 1, 1], [], []>} : vector<384x4xbf16>, vector<4x128xbf16>, vector<384x128xf32> -> vector<384x128xf32>
    %10 = arith.addf %4, %9 : vector<384x128xf32>
    %c0_11 = arith.constant 0 : index
    %c1 = arith.constant 1 : index
    %c0_12 = arith.constant 0 : index
    %11 = vector.load %arg1[%c0_11, %c1, %c0_12] : memref<1x456x4xbf16, #tpu.memory_space<vmem>>, vector<1x384x4xbf16>
    %12 = vector.shape_cast %11 : vector<1x384x4xbf16> to vector<384x4xbf16>
    %c1_13 = arith.constant 1 : index
    %c0_14 = arith.constant 0 : index
    %c0_15 = arith.constant 0 : index
    %13 = vector.load %arg2[%c1_13, %c0_14, %c0_15] : memref<9x4x128xbf16, #tpu.memory_space<vmem>>, vector<1x4x128xbf16>
    %14 = vector.shape_cast %13 : vector<1x4x128xbf16> to vector<4x128xbf16>
    %cst_16 = arith.constant dense<0.000000e+00> : vector<384x128xf32>
    %15 = tpu.matmul %12, %14, %cst_16 {dimension_numbers = #tpu.dot_dimension_numbers<[1], [0], [0], [1], [0, 0, 1, 1], [], []>} : vector<384x4xbf16>, vector<4x128xbf16>, vector<384x128xf32> -> vector<384x128xf32>
    %16 = arith.addf %10, %15 : vector<384x128xf32>
    %c0_17 = arith.constant 0 : index
    %c2 = arith.constant 2 : index
    %c0_18 = arith.constant 0 : index
    %17 = vector.load %arg1[%c0_17, %c2, %c0_18] : memref<1x456x4xbf16, #tpu.memory_space<vmem>>, vector<1x384x4xbf16>
    %18 = vector.shape_cast %17 : vector<1x384x4xbf16> to vector<384x4xbf16>
    %c2_19 = arith.constant 2 : index
    %c0_20 = arith.constant 0 : index
    %c0_21 = arith.constant 0 : index
    %19 = vector.load %arg2[%c2_19, %c0_20, %c0_21] : memref<9x4x128xbf16, #tpu.memory_space<vmem>>, vector<1x4x128xbf16>
    %20 = vector.shape_cast %19 : vector<1x4x128xbf16> to vector<4x128xbf16>
    %cst_22 = arith.constant dense<0.000000e+00> : vector<384x128xf32>
    %21 = tpu.matmul %18, %20, %cst_22 {dimension_numbers = #tpu.dot_dimension_numbers<[1], [0], [0], [1], [0, 0, 1, 1], [], []>} : vector<384x4xbf16>, vector<4x128xbf16>, vector<384x128xf32> -> vector<384x128xf32>
    %22 = arith.addf %16, %21 : vector<384x128xf32>
    %c0_23 = arith.constant 0 : index
    %c24 = arith.constant 24 : index
    %c0_24 = arith.constant 0 : index
    %23 = vector.load %arg1[%c0_23, %c24, %c0_24] : memref<1x456x4xbf16, #tpu.memory_space<vmem>>, vector<1x384x4xbf16>
    %24 = vector.shape_cast %23 : vector<1x384x4xbf16> to vector<384x4xbf16>
    %c3 = arith.constant 3 : index
    %c0_25 = arith.constant 0 : index
    %c0_26 = arith.constant 0 : index
    %25 = vector.load %arg2[%c3, %c0_25, %c0_26] : memref<9x4x128xbf16, #tpu.memory_space<vmem>>, vector<1x4x128xbf16>
    %26 = vector.shape_cast %25 : vector<1x4x128xbf16> to vector<4x128xbf16>
    %cst_27 = arith.constant dense<0.000000e+00> : vector<384x128xf32>
    %27 = tpu.matmul %24, %26, %cst_27 {dimension_numbers = #tpu.dot_dimension_numbers<[1], [0], [0], [1], [0, 0, 1, 1], [], []>} : vector<384x4xbf16>, vector<4x128xbf16>, vector<384x128xf32> -> vector<384x128xf32>
    %28 = arith.addf %22, %27 : vector<384x128xf32>
    %c0_28 = arith.constant 0 : index
    %c25 = arith.constant 25 : index
    %c0_29 = arith.constant 0 : index
    %29 = vector.load %arg1[%c0_28, %c25, %c0_29] : memref<1x456x4xbf16, #tpu.memory_space<vmem>>, vector<1x384x4xbf16>
    %30 = vector.shape_cast %29 : vector<1x384x4xbf16> to vector<384x4xbf16>
    %c4 = arith.constant 4 : index
    %c0_30 = arith.constant 0 : index
    %c0_31 = arith.constant 0 : index
    %31 = vector.load %arg2[%c4, %c0_30, %c0_31] : memref<9x4x128xbf16, #tpu.memory_space<vmem>>, vector<1x4x128xbf16>
    %32 = vector.shape_cast %31 : vector<1x4x128xbf16> to vector<4x128xbf16>
    %cst_32 = arith.constant dense<0.000000e+00> : vector<384x128xf32>
    %33 = tpu.matmul %30, %32, %cst_32 {dimension_numbers = #tpu.dot_dimension_numbers<[1], [0], [0], [1], [0, 0, 1, 1], [], []>} : vector<384x4xbf16>, vector<4x128xbf16>, vector<384x128xf32> -> vector<384x128xf32>
    %34 = arith.addf %28, %33 : vector<384x128xf32>
    %c0_33 = arith.constant 0 : index
    %c26 = arith.constant 26 : index
    %c0_34 = arith.constant 0 : index
    %35 = vector.load %arg1[%c0_33, %c26, %c0_34] : memref<1x456x4xbf16, #tpu.memory_space<vmem>>, vector<1x384x4xbf16>
    %36 = vector.shape_cast %35 : vector<1x384x4xbf16> to vector<384x4xbf16>
    %c5 = arith.constant 5 : index
    %c0_35 = arith.constant 0 : index
    %c0_36 = arith.constant 0 : index
    %37 = vector.load %arg2[%c5, %c0_35, %c0_36] : memref<9x4x128xbf16, #tpu.memory_space<vmem>>, vector<1x4x128xbf16>
    %38 = vector.shape_cast %37 : vector<1x4x128xbf16> to vector<4x128xbf16>
    %cst_37 = arith.constant dense<0.000000e+00> : vector<384x128xf32>
    %39 = tpu.matmul %36, %38, %cst_37 {dimension_numbers = #tpu.dot_dimension_numbers<[1], [0], [0], [1], [0, 0, 1, 1], [], []>} : vector<384x4xbf16>, vector<4x128xbf16>, vector<384x128xf32> -> vector<384x128xf32>
    %40 = arith.addf %34, %39 : vector<384x128xf32>
    %c0_38 = arith.constant 0 : index
    %c48 = arith.constant 48 : index
    %c0_39 = arith.constant 0 : index
    %41 = vector.load %arg1[%c0_38, %c48, %c0_39] : memref<1x456x4xbf16, #tpu.memory_space<vmem>>, vector<1x384x4xbf16>
    %42 = vector.shape_cast %41 : vector<1x384x4xbf16> to vector<384x4xbf16>
    %c6 = arith.constant 6 : index
    %c0_40 = arith.constant 0 : index
    %c0_41 = arith.constant 0 : index
    %43 = vector.load %arg2[%c6, %c0_40, %c0_41] : memref<9x4x128xbf16, #tpu.memory_space<vmem>>, vector<1x4x128xbf16>
    %44 = vector.shape_cast %43 : vector<1x4x128xbf16> to vector<4x128xbf16>
    %cst_42 = arith.constant dense<0.000000e+00> : vector<384x128xf32>
    %45 = tpu.matmul %42, %44, %cst_42 {dimension_numbers = #tpu.dot_dimension_numbers<[1], [0], [0], [1], [0, 0, 1, 1], [], []>} : vector<384x4xbf16>, vector<4x128xbf16>, vector<384x128xf32> -> vector<384x128xf32>
    %46 = arith.addf %40, %45 : vector<384x128xf32>
    %c0_43 = arith.constant 0 : index
    %c49 = arith.constant 49 : index
    %c0_44 = arith.constant 0 : index
    %47 = vector.load %arg1[%c0_43, %c49, %c0_44] : memref<1x456x4xbf16, #tpu.memory_space<vmem>>, vector<1x384x4xbf16>
    %48 = vector.shape_cast %47 : vector<1x384x4xbf16> to vector<384x4xbf16>
    %c7 = arith.constant 7 : index
    %c0_45 = arith.constant 0 : index
    %c0_46 = arith.constant 0 : index
    %49 = vector.load %arg2[%c7, %c0_45, %c0_46] : memref<9x4x128xbf16, #tpu.memory_space<vmem>>, vector<1x4x128xbf16>
    %50 = vector.shape_cast %49 : vector<1x4x128xbf16> to vector<4x128xbf16>
    %cst_47 = arith.constant dense<0.000000e+00> : vector<384x128xf32>
    %51 = tpu.matmul %48, %50, %cst_47 {dimension_numbers = #tpu.dot_dimension_numbers<[1], [0], [0], [1], [0, 0, 1, 1], [], []>} : vector<384x4xbf16>, vector<4x128xbf16>, vector<384x128xf32> -> vector<384x128xf32>
    %52 = arith.addf %46, %51 : vector<384x128xf32>
    %c0_48 = arith.constant 0 : index
    %c50 = arith.constant 50 : index
    %c0_49 = arith.constant 0 : index
    %53 = vector.load %arg1[%c0_48, %c50, %c0_49] : memref<1x456x4xbf16, #tpu.memory_space<vmem>>, vector<1x384x4xbf16>
    %54 = vector.shape_cast %53 : vector<1x384x4xbf16> to vector<384x4xbf16>
    %c8 = arith.constant 8 : index
    %c0_50 = arith.constant 0 : index
    %c0_51 = arith.constant 0 : index
    %55 = vector.load %arg2[%c8, %c0_50, %c0_51] : memref<9x4x128xbf16, #tpu.memory_space<vmem>>, vector<1x4x128xbf16>
    %56 = vector.shape_cast %55 : vector<1x4x128xbf16> to vector<4x128xbf16>
    %cst_52 = arith.constant dense<0.000000e+00> : vector<384x128xf32>
    %57 = tpu.matmul %54, %56, %cst_52 {dimension_numbers = #tpu.dot_dimension_numbers<[1], [0], [0], [1], [0, 0, 1, 1], [], []>} : vector<384x4xbf16>, vector<4x128xbf16>, vector<384x128xf32> -> vector<384x128xf32>
    %58 = arith.addf %52, %57 : vector<384x128xf32>
    %c0_53 = arith.constant 0 : index
    %c0_54 = arith.constant 0 : index
    %59 = vector.load %arg3[%c0_53, %c0_54] : memref<1x128xf32, #tpu.memory_space<vmem>>, vector<1x128xf32>
    %60 = vector.broadcast %59 : vector<1x128xf32> to vector<384x128xf32>
    %61 = arith.addf %58, %60 : vector<384x128xf32>
    %cst_55 = arith.constant 0.000000e+00 : f32
    %62 = vector.broadcast %cst_55 : f32 to vector<384x128xf32>
    %63 = arith.maximumf %61, %62 : vector<384x128xf32>
    %64 = tpu.iota {dimensions = array<i32: 0>} : vector<384x1xi32>
    %c24_i32 = arith.constant 24 : i32
    %c0_i32 = arith.constant 0 : i32
    %65 = arith.cmpi eq, %c24_i32, %c0_i32 : i32
    %c1_i32 = arith.constant 1 : i32
    %66 = arith.select %65, %c1_i32, %c24_i32 : i32
    %67 = vector.broadcast %66 : i32 to vector<384x1xi32>
    %68 = arith.remsi %64, %67 : vector<384x1xi32>
    %c0_i32_56 = arith.constant 0 : i32
    %69 = vector.broadcast %c0_i32_56 : i32 to vector<384x1xi32>
    %70 = arith.cmpi ne, %68, %69 : vector<384x1xi32>
    %c0_i32_57 = arith.constant 0 : i32
    %71 = vector.broadcast %c0_i32_57 : i32 to vector<384x1xi32>
    %72 = arith.cmpi slt, %68, %71 : vector<384x1xi32>
    %c0_i32_58 = arith.constant 0 : i32
    %73 = arith.cmpi slt, %66, %c0_i32_58 : i32
    %74 = vector.broadcast %73 : i1 to vector<384x1xi1>
    %75 = vector.broadcast %74 : vector<384x1xi1> to vector<384x1xi1>
    %76 = arith.xori %72, %75 : vector<384x1xi1>
    %77 = arith.andi %76, %70 : vector<384x1xi1>
    %78 = vector.broadcast %66 : i32 to vector<384x1xi32>
    %79 = arith.addi %68, %78 : vector<384x1xi32>
    %80 = arith.select %77, %79, %68 : vector<384x1xi1>, vector<384x1xi32>
    %c16_i32 = arith.constant 16 : i32
    %81 = vector.broadcast %c16_i32 : i32 to vector<384x1xi32>
    %82 = arith.cmpi slt, %80, %81 : vector<384x1xi32>
    %cst_59 = arith.constant 0.000000e+00 : f32
    %83 = vector.shape_cast %82 : vector<384x1xi1> to vector<384x1xi1>
    %84 = vector.broadcast %83 : vector<384x1xi1> to vector<384x128xi1>
    %85 = vector.broadcast %cst_59 : f32 to vector<384x128xf32>
    %86 = arith.select %84, %63, %85 : vector<384x128xi1>, vector<384x128xf32>
    %87 = arith.truncf %86 : vector<384x128xf32> to vector<384x128xbf16>
    %c32 = arith.constant 32 : index
    %c0_60 = arith.constant 0 : index
    %88 = vector.load %arg7[%c32, %c0_60] : memref<472x128xbf16, #tpu.memory_space<vmem>>, vector<384x128xbf16>
    tpu.vector_store %arg7[%c32, %c0_60], %87 {strides = array<i32>} : memref<472x128xbf16, #tpu.memory_space<vmem>>, vector<384x128xbf16>,
    %cst_61 = arith.constant 0.000000e+00 : f32
    %89 = vector.broadcast %cst_61 : f32 to vector<384x128xf32>
    %c7_62 = arith.constant 7 : index
    %c0_63 = arith.constant 0 : index
    %90 = vector.load %arg7[%c7_62, %c0_63] : memref<472x128xbf16, #tpu.memory_space<vmem>>, vector<384x128xbf16>
    %c0_64 = arith.constant 0 : index
    %c0_65 = arith.constant 0 : index
    %c0_66 = arith.constant 0 : index
    %91 = vector.load %arg4[%c0_64, %c0_65, %c0_66] : memref<9x128x128xbf16, #tpu.memory_space<vmem>>, vector<1x128x128xbf16>
    %92 = vector.shape_cast %91 : vector<1x128x128xbf16> to vector<128x128xbf16>
    %cst_67 = arith.constant dense<0.000000e+00> : vector<384x128xf32>
    %93 = tpu.matmul %90, %92, %cst_67 {dimension_numbers = #tpu.dot_dimension_numbers<[1], [0], [0], [1], [0, 0, 1, 1], [], []>} : vector<384x128xbf16>, vector<128x128xbf16>, vector<384x128xf32> -> vector<384x128xf32>
    %94 = arith.addf %89, %93 : vector<384x128xf32>
    %c8_68 = arith.constant 8 : index
    %c0_69 = arith.constant 0 : index
    %95 = vector.load %arg7[%c8_68, %c0_69] : memref<472x128xbf16, #tpu.memory_space<vmem>>, vector<384x128xbf16>
    %c1_70 = arith.constant 1 : index
    %c0_71 = arith.constant 0 : index
    %c0_72 = arith.constant 0 : index
    %96 = vector.load %arg4[%c1_70, %c0_71, %c0_72] : memref<9x128x128xbf16, #tpu.memory_space<vmem>>, vector<1x128x128xbf16>
    %97 = vector.shape_cast %96 : vector<1x128x128xbf16> to vector<128x128xbf16>
    %cst_73 = arith.constant dense<0.000000e+00> : vector<384x128xf32>
    %98 = tpu.matmul %95, %97, %cst_73 {dimension_numbers = #tpu.dot_dimension_numbers<[1], [0], [0], [1], [0, 0, 1, 1], [], []>} : vector<384x128xbf16>, vector<128x128xbf16>, vector<384x128xf32> -> vector<384x128xf32>
    %99 = arith.addf %94, %98 : vector<384x128xf32>
    %c9 = arith.constant 9 : index
    %c0_74 = arith.constant 0 : index
    %100 = vector.load %arg7[%c9, %c0_74] : memref<472x128xbf16, #tpu.memory_space<vmem>>, vector<384x128xbf16>
    %c2_75 = arith.constant 2 : index
    %c0_76 = arith.constant 0 : index
    %c0_77 = arith.constant 0 : index
    %101 = vector.load %arg4[%c2_75, %c0_76, %c0_77] : memref<9x128x128xbf16, #tpu.memory_space<vmem>>, vector<1x128x128xbf16>
    %102 = vector.shape_cast %101 : vector<1x128x128xbf16> to vector<128x128xbf16>
    %cst_78 = arith.constant dense<0.000000e+00> : vector<384x128xf32>
    %103 = tpu.matmul %100, %102, %cst_78 {dimension_numbers = #tpu.dot_dimension_numbers<[1], [0], [0], [1], [0, 0, 1, 1], [], []>} : vector<384x128xbf16>, vector<128x128xbf16>, vector<384x128xf32> -> vector<384x128xf32>
    %104 = arith.addf %99, %103 : vector<384x128xf32>
    %c31 = arith.constant 31 : index
    %c0_79 = arith.constant 0 : index
    %105 = vector.load %arg7[%c31, %c0_79] : memref<472x128xbf16, #tpu.memory_space<vmem>>, vector<384x128xbf16>
    %c3_80 = arith.constant 3 : index
    %c0_81 = arith.constant 0 : index
    %c0_82 = arith.constant 0 : index
    %106 = vector.load %arg4[%c3_80, %c0_81, %c0_82] : memref<9x128x128xbf16, #tpu.memory_space<vmem>>, vector<1x128x128xbf16>
    %107 = vector.shape_cast %106 : vector<1x128x128xbf16> to vector<128x128xbf16>
    %cst_83 = arith.constant dense<0.000000e+00> : vector<384x128xf32>
    %108 = tpu.matmul %105, %107, %cst_83 {dimension_numbers = #tpu.dot_dimension_numbers<[1], [0], [0], [1], [0, 0, 1, 1], [], []>} : vector<384x128xbf16>, vector<128x128xbf16>, vector<384x128xf32> -> vector<384x128xf32>
    %109 = arith.addf %104, %108 : vector<384x128xf32>
    %c32_84 = arith.constant 32 : index
    %c0_85 = arith.constant 0 : index
    %110 = vector.load %arg7[%c32_84, %c0_85] : memref<472x128xbf16, #tpu.memory_space<vmem>>, vector<384x128xbf16>
    %c4_86 = arith.constant 4 : index
    %c0_87 = arith.constant 0 : index
    %c0_88 = arith.constant 0 : index
    %111 = vector.load %arg4[%c4_86, %c0_87, %c0_88] : memref<9x128x128xbf16, #tpu.memory_space<vmem>>, vector<1x128x128xbf16>
    %112 = vector.shape_cast %111 : vector<1x128x128xbf16> to vector<128x128xbf16>
    %cst_89 = arith.constant dense<0.000000e+00> : vector<384x128xf32>
    %113 = tpu.matmul %110, %112, %cst_89 {dimension_numbers = #tpu.dot_dimension_numbers<[1], [0], [0], [1], [0, 0, 1, 1], [], []>} : vector<384x128xbf16>, vector<128x128xbf16>, vector<384x128xf32> -> vector<384x128xf32>
    %114 = arith.addf %109, %113 : vector<384x128xf32>
    %c33 = arith.constant 33 : index
    %c0_90 = arith.constant 0 : index
    %115 = vector.load %arg7[%c33, %c0_90] : memref<472x128xbf16, #tpu.memory_space<vmem>>, vector<384x128xbf16>
    %c5_91 = arith.constant 5 : index
    %c0_92 = arith.constant 0 : index
    %c0_93 = arith.constant 0 : index
    %116 = vector.load %arg4[%c5_91, %c0_92, %c0_93] : memref<9x128x128xbf16, #tpu.memory_space<vmem>>, vector<1x128x128xbf16>
    %117 = vector.shape_cast %116 : vector<1x128x128xbf16> to vector<128x128xbf16>
    %cst_94 = arith.constant dense<0.000000e+00> : vector<384x128xf32>
    %118 = tpu.matmul %115, %117, %cst_94 {dimension_numbers = #tpu.dot_dimension_numbers<[1], [0], [0], [1], [0, 0, 1, 1], [], []>} : vector<384x128xbf16>, vector<128x128xbf16>, vector<384x128xf32> -> vector<384x128xf32>
    %119 = arith.addf %114, %118 : vector<384x128xf32>
    %c55 = arith.constant 55 : index
    %c0_95 = arith.constant 0 : index
    %120 = vector.load %arg7[%c55, %c0_95] : memref<472x128xbf16, #tpu.memory_space<vmem>>, vector<384x128xbf16>
    %c6_96 = arith.constant 6 : index
    %c0_97 = arith.constant 0 : index
    %c0_98 = arith.constant 0 : index
    %121 = vector.load %arg4[%c6_96, %c0_97, %c0_98] : memref<9x128x128xbf16, #tpu.memory_space<vmem>>, vector<1x128x128xbf16>
    %122 = vector.shape_cast %121 : vector<1x128x128xbf16> to vector<128x128xbf16>
    %cst_99 = arith.constant dense<0.000000e+00> : vector<384x128xf32>
    %123 = tpu.matmul %120, %122, %cst_99 {dimension_numbers = #tpu.dot_dimension_numbers<[1], [0], [0], [1], [0, 0, 1, 1], [], []>} : vector<384x128xbf16>, vector<128x128xbf16>, vector<384x128xf32> -> vector<384x128xf32>
    %124 = arith.addf %119, %123 : vector<384x128xf32>
    %c56 = arith.constant 56 : index
    %c0_100 = arith.constant 0 : index
    %125 = vector.load %arg7[%c56, %c0_100] : memref<472x128xbf16, #tpu.memory_space<vmem>>, vector<384x128xbf16>
    %c7_101 = arith.constant 7 : index
    %c0_102 = arith.constant 0 : index
    %c0_103 = arith.constant 0 : index
    %126 = vector.load %arg4[%c7_101, %c0_102, %c0_103] : memref<9x128x128xbf16, #tpu.memory_space<vmem>>, vector<1x128x128xbf16>
    %127 = vector.shape_cast %126 : vector<1x128x128xbf16> to vector<128x128xbf16>
    %cst_104 = arith.constant dense<0.000000e+00> : vector<384x128xf32>
    %128 = tpu.matmul %125, %127, %cst_104 {dimension_numbers = #tpu.dot_dimension_numbers<[1], [0], [0], [1], [0, 0, 1, 1], [], []>} : vector<384x128xbf16>, vector<128x128xbf16>, vector<384x128xf32> -> vector<384x128xf32>
    %129 = arith.addf %124, %128 : vector<384x128xf32>
    %c57 = arith.constant 57 : index
    %c0_105 = arith.constant 0 : index
    %130 = vector.load %arg7[%c57, %c0_105] : memref<472x128xbf16, #tpu.memory_space<vmem>>, vector<384x128xbf16>
    %c8_106 = arith.constant 8 : index
    %c0_107 = arith.constant 0 : index
    %c0_108 = arith.constant 0 : index
    %131 = vector.load %arg4[%c8_106, %c0_107, %c0_108] : memref<9x128x128xbf16, #tpu.memory_space<vmem>>, vector<1x128x128xbf16>
    %132 = vector.shape_cast %131 : vector<1x128x128xbf16> to vector<128x128xbf16>
    %cst_109 = arith.constant dense<0.000000e+00> : vector<384x128xf32>
    %133 = tpu.matmul %130, %132, %cst_109 {dimension_numbers = #tpu.dot_dimension_numbers<[1], [0], [0], [1], [0, 0, 1, 1], [], []>} : vector<384x128xbf16>, vector<128x128xbf16>, vector<384x128xf32> -> vector<384x128xf32>
    %134 = arith.addf %129, %133 : vector<384x128xf32>
    %c0_110 = arith.constant 0 : index
    %c0_111 = arith.constant 0 : index
    %135 = vector.load %arg5[%c0_110, %c0_111] : memref<1x128xf32, #tpu.memory_space<vmem>>, vector<1x128xf32>
    %136 = vector.broadcast %135 : vector<1x128xf32> to vector<384x128xf32>
    %137 = arith.addf %134, %136 : vector<384x128xf32>
    %cst_112 = arith.constant 0.000000e+00 : f32
    %138 = vector.broadcast %cst_112 : f32 to vector<384x128xf32>
    %139 = arith.maximumf %137, %138 : vector<384x128xf32>
    %140 = arith.truncf %139 : vector<384x128xf32> to vector<384x128xbf16>
    %c0_113 = arith.constant 0 : index
    %c0_114 = arith.constant 0 : index
    %c0_115 = arith.constant 0 : index
    %141 = vector.load %arg6[%c0_113, %c0_114, %c0_115] : memref<1x384x128xbf16, #tpu.memory_space<vmem>>, vector<1x384x128xbf16>
    %142 = vector.shape_cast %141 : vector<1x384x128xbf16> to vector<384x128xbf16>
    %143 = vector.shape_cast %140 : vector<384x128xbf16> to vector<1x384x128xbf16>
    tpu.vector_store %arg6[%c0_113, %c0_114, %c0_115], %143 {strides = array<i32>} : memref<1x384x128xbf16, #tpu.memory_space<vmem>>, vector<1x384x128xbf16>,
    return
  }
  func.func @transform_0(%arg0: i32) -> (i32, i32, i32) {
    %c0_i32 = arith.constant 0 : i32
    %c0_i32_0 = arith.constant 0 : i32
    %c0_i32_1 = arith.constant 0 : i32
    return %arg0, %c0_i32, %c0_i32_0 : i32, i32, i32
  }
  func.func @transform_1(%arg0: i32) -> (i32, i32, i32) {
    %c0_i32 = arith.constant 0 : i32
    %c0_i32_0 = arith.constant 0 : i32
    %c0_i32_1 = arith.constant 0 : i32
    %c0_i32_2 = arith.constant 0 : i32
    return %c0_i32, %c0_i32_0, %c0_i32_1 : i32, i32, i32
  }
  func.func @transform_2(%arg0: i32) -> (i32, i32) {
    %c0_i32 = arith.constant 0 : i32
    %c0_i32_0 = arith.constant 0 : i32
    %c0_i32_1 = arith.constant 0 : i32
    return %c0_i32, %c0_i32_0 : i32, i32
  }
  func.func @transform_3(%arg0: i32) -> (i32, i32, i32) {
    %c0_i32 = arith.constant 0 : i32
    %c0_i32_0 = arith.constant 0 : i32
    %c0_i32_1 = arith.constant 0 : i32
    %c0_i32_2 = arith.constant 0 : i32
    return %c0_i32, %c0_i32_0, %c0_i32_1 : i32, i32, i32
  }
  func.func @transform_4(%arg0: i32) -> (i32, i32) {
    %c0_i32 = arith.constant 0 : i32
    %c0_i32_0 = arith.constant 0 : i32
    %c0_i32_1 = arith.constant 0 : i32
    return %c0_i32, %c0_i32_0 : i32, i32
  }
  func.func @transform_5(%arg0: i32) -> (i32, i32, i32) {
    %c0_i32 = arith.constant 0 : i32
    %c0_i32_0 = arith.constant 0 : i32
    %c0_i32_1 = arith.constant 0 : i32
    return %arg0, %c0_i32, %c0_i32_0 : i32, i32, i32
  }
}

</mosaic_0001>

<bundles_post_ra>
// kernel: double_conv_forward.1
= control target key start
LH: loop header
LB: loop body
LE: loop exit
PB: predicated region body
PF: predicated region fallthrough
CT: control target
= control target key end

     0   :  { %s16382_s18 = smov 0   ;;  %s20379_s0 = inlined_call_operand.vmem [shape: bf16[2,456,4], index: 0, kind: input, shape index: {}]   ;;  %s20380_s1 = inlined_call_operand.vmem [shape: bf16[9,4,128], index: 1, kind: input, shape index: {}]   ;;  %s20381_s2 = inlined_call_operand.vmem [shape: f32[1,128], index: 2, kind: input, shape index: {}]   ;;  %s20382_s3 = inlined_call_operand.vmem [shape: bf16[9,128,128], index: 3, kind: input, shape index: {}]   ;;  %s20383_s4 = inlined_call_operand.vmem [shape: f32[1,128], index: 4, kind: input, shape index: {}]   ;;  %s20384_s5 = inlined_call_operand.vmem [shape: bf16[2,384,128], index: 5, kind: output, shape index: {}]  }
   0x1 LB: > { %s12145_s19 = sadd.s32 4294967295, %s16349_s18   ;;  %p12149_p0 = scmp.ge.s32.totalorder %s16349_s18, 1  ;;  %s16349_s18 = sphi %s16382_s18, %s15_s18  }
   0x2   : > { %p187_p1 = scmp.lt.s32.totalorder %s16349_s18, 3 }
   0x4   : > { %p188_p2 = pnand %p12149_p0, %p187_p1 }
   0x6   : > { %191 = sbr.rel (%p188_p2) target bundleno = 2142 (0x85e), region = 40 }
   0xd   : > { %v12152_v0 = vld [vmem:[%s20380_s1 + $0x2] sm:$0x3]  ;;  %vm682_vm0 = vcmask 1041408   ;;  %p215_p3 = scmp.lt.s32.totalorder %s12145_s19, 1  ;;  %v285_v2 = vld [vmem:[%s20380_s1] sm:$0x3] }
   0xe   : > { %15730 = vmatprep.subr.msk.bf16.mxu0 %vm682_vm0, %v12152_v0  ;;  %v684_v1 = vsel %vm682_vm0, %v12152_v0, 0  ;;  %vm20385_vm1 = vsmask.f32 7424  ;;  %vm609_vm2 = vcmask 31744   ;;  %v960_v24 = vsel %vm682_vm0, %v285_v2, 0 }
   0xf   : > { %13921 = vmatpush3.bf16.msra.mxu0 %v684_v1  ;;  %s21467_s19 = smov (!%p215_p3, %s12145_s19), 1  ;;  %v16445_v33 = vld [vmem:[%s20380_s1 + $0x4] sm:$0x3]  ;;  %vm1193_vm3 = vcmask 1046528  }
  0x10   : > { %15731 = vmatprep.subr.msk.bf16.mxu0 %vm682_vm0, %v285_v2  ;;  %s15739_s24 = smul.u32 228, %s21467_s19 }
  0x11   : > { %s15740_s8 = smul.u32 192, %s21467_s19 }
  0x12   : > { %s16405_s27 = scalar_lea.vmem %s20379_s0, %s15739_s24 }
  0x13   : > { %v237_v3 = vld [vmem:[%s16405_s27] sm:$0xf]  ;;  %v238_v4 = vld [vmem:[%s16405_s27 + $0x4] sm:$0xf]  ;;  %v16412_v6 = vld [vmem:[%s16405_s27 + $0x8] sm:$0xff]   ;;  %s20306_s11 = scalar_lea.vmem %s20384_s5, %s15740_s8 }
  0x14   : > { %v16409_v5 = vcombine.low %v237_v3, %v238_v4  ;;  %v16415_v7 = vld [vmem:[%s16405_s27 + $0x10] sm:$0xff]   ;;  %v421_v10 = vshll.u32 %v16412_v6, 16  ;;  %v425_v11 = vshrl.u32 %v16412_v6, 16  ;;  %v16423_v13 = vld [vmem:[%s16405_s27 + $0x18] sm:$0xff]   ;;  %v16427_v15 = vld [vmem:[%s16405_s27 + $0x20] sm:$0xff]  }
  0x15   : > { %v429_v12 = vshll.u32 %v16415_v7, 16  ;;  %v433_v14 = vshrl.u32 %v16415_v7, 16  ;;  %v437_v19 = vshll.u32 %v16423_v13, 16  ;;  %v445_v22 = vshll.u32 %v16427_v15, 16  ;;  %v16432_v23 = vld [vmem:[%s16405_s27 + $0x28] sm:$0xff]   ;;  %v16449_v35 = vld [vmem:[%s16405_s27 + $0x30] sm:$0xff]  }
  0x16   : > { %v414_v8 = vshrl.u32 %v16409_v5, 16  ;;  %v416_v9 = vshll.u32 %v16409_v5, 16  ;;  %v423_v17 = vrot.slane %v421_v10, 1  ;;  %v441_v27 = vshrl.u32 %v16423_v13, 16  ;;  %v16453_v39 = vld [vmem:[%s16405_s27 + $0x38] sm:$0xff]   ;;  %v16459_v41 = vld [vmem:[%s16405_s27 + $0x40] sm:$0xff]  }
  0x17   : > { %v431_v18 = vrot.slane %v429_v12, 1  ;;  %v439_v26 = vrot.slane %v437_v19, 1  ;;  %v449_v30 = vshrl.u32 %v16427_v15, 16  ;;  %v453_v31 = vshll.u32 %v16432_v23, 16  ;;  %v16467_v47 = vld [vmem:[%s16405_s27 + $0x48] sm:$0xff]   ;;  %v16472_v50 = vld [vmem:[%s16405_s27 + $0x50] sm:$0xff]  }
  0x18   : > { %v418_v16 = vrot.slane %v416_v9, 1  ;;  %v427_v21 = vor.u32 %v425_v11, %v423_v17  ;;  %v447_v34 = vrot.slane %v445_v22, 1  ;;  %v461_v40 = vshll.u32 %v16449_v35, 16  ;;  %v16476_v52 = vld [vmem:[%s16405_s27 + $0x58] sm:$0xff]   ;;  %v16481_v57 = vld [vmem:[%s16405_s27 + $0x60] sm:$0xff]   ;;  %v16485_v59 = vld [vmem:[%s16405_s27 + $0x68] sm:$0xff]  }
  0x19   : > { %v435_v25 = vor.u32 %v433_v14, %v431_v18  ;;  %v443_v36 = vor.u32 %v441_v27, %v439_v26  ;;  %v455_v38 = vrot.slane %v453_v31, 1  ;;  %v457_v43 = vshrl.u32 %v16432_v23, 16  ;;  %v16490_v63 = vld [vmem:[%s16405_s27 + $0x70] sm:$0xff]   ;;  %v16495_v2 = vld [vmem:[%s16405_s27 + $0x78] sm:$0xff]   ;;  %v16501_v10 = vld [vmem:[%s16405_s27 + $0x80] sm:$0xff]  }
  0x1a   : > { %v419_v20 = vor.u32 %v418_v16, %v414_v8  ;;  %v432_v29 = vsel %vm20385_vm1, %v427_v21, %v431_v18  ;;  %v451_v37 = vor.u32 %v449_v30, %v447_v34  ;;  %v465_v44 = vshrl.u32 %v16449_v35, 16  ;;  %v16505_v12 = vld [vmem:[%s16405_s27 + $0x88] sm:$0xff]  }
  0x1b   : > { %v440_v32 = vsel %vm20385_vm1, %v435_v25, %v439_v26  ;;  %v448_v42 = vsel %vm20385_vm1, %v443_v36, %v447_v34  ;;  %v469_v46 = vshll.u32 %v16453_v39, 16  ;;  %v463_v48 = vrot.slane %v461_v40, 1  ;;  %v16515_v25 = vld [vmem:[%s16405_s27 + $0x90] sm:$0xff]   ;;  %v16525_v40 = vld [vmem:[%s16405_s27 + $0x98] sm:$0xff]  }
  0x1c   : > { %v424_v28 = vsel %vm20385_vm1, %v419_v20, %v423_v17  ;;  %v456_v45 = vsel %vm20385_vm1, %v451_v37, %v455_v38  ;;  %v477_v49 = vshll.u32 %v16459_v41, 16  ;;  %v459_v51 = vor.u32 %v457_v43, %v455_v38 }
  0x1d   : > { %13922 = vmatprep.mubr.msk.bf16.mxu0 %vm609_vm2, %v424_v28  ;;  %v467_v53 = vor.u32 %v465_v44, %v463_v48  ;;  %v471_v54 = vrot.slane %v469_v46, 1  ;;  %v473_v55 = vshrl.u32 %v16453_v39, 16  ;;  %v485_v56 = vshll.u32 %v16467_v47, 16 }
  0x1e   : > { %13923 = vmatmul.mubr.msk.bf16.vlgmr.msra.gmra.mrb[0].mxu0 %vm609_vm2, %v432_v29  ;;  %v481_v58 = vshrl.u32 %v16459_v41, 16  ;;  %v479_v60 = vrot.slane %v477_v49, 1  ;;  %v489_v61 = vshrl.u32 %v16467_v47, 16  ;;  %v493_v62 = vshll.u32 %v16472_v50, 16 }
  0x1f   : > { %13971 = vmatpush3.bf16.msra.mxu0 %v960_v24  ;;  %13926 = vmatprep.mubr.msk.bf16.mxu0 %vm609_vm2, %v440_v32  ;;  %v464_v0 = vsel %vm20385_vm1, %v459_v51, %v463_v48  ;;  %v501_v1 = vshll.u32 %v16476_v52, 16  ;;  %v472_v3 = vsel %vm20385_vm1, %v467_v53, %v471_v54  ;;  %v487_v4 = vrot.slane %v485_v56, 1 }
  0x20   : > { %15732 = vmatprep.subr.msk.bf16.mxu0 %vm682_vm0, %v16445_v33  ;;  %v497_v8 = vshrl.u32 %v16472_v50, 16  ;;  %v509_v9 = vshll.u32 %v16481_v57, 16  ;;  %v517_v11 = vshll.u32 %v16485_v59, 16  ;;  %v475_v14 = vor.u32 %v473_v55, %v471_v54 }
  0x21   : > { %v495_v16 = vrot.slane %v493_v62, 1  ;;  %v525_v17 = vshll.u32 %v16490_v63, 16  ;;  %v503_v18 = vrot.slane %v501_v1, 1  ;;  %v505_v19 = vshrl.u32 %v16476_v52, 16 }
  0x22   : > { %v513_v20 = vshrl.u32 %v16481_v57, 16  ;;  %v533_v21 = vshll.u32 %v16495_v2, 16  ;;  %v483_v22 = vor.u32 %v481_v58, %v479_v60  ;;  %v541_v24 = vshll.u32 %v16501_v10, 16 }
  0x23   : > { %v511_v26 = vrot.slane %v509_v9, 1  ;;  %v519_v27 = vrot.slane %v517_v11, 1  ;;  %v521_v28 = vshrl.u32 %v16485_v59, 16  ;;  %v549_v29 = vshll.u32 %v16505_v12, 16  ;;  %v16550_v11 = vld [vmem:[%s16405_s27 + $0xa8] sm:$0xff]  }
  0x24   : > { %v480_v30 = vsel %vm20385_vm1, %v475_v14, %v479_v60  ;;  %v527_v31 = vrot.slane %v525_v17, 1  ;;  %v529_v32 = vshrl.u32 %v16490_v63, 16  ;;  %v535_v34 = vrot.slane %v533_v21, 1 }
  0x25   : > { %v537_v36 = vshrl.u32 %v16495_v2, 16  ;;  %v545_v37 = vshrl.u32 %v16501_v10, 16  ;;  %v553_v38 = vshrl.u32 %v16505_v12, 16  ;;  %v488_v43 = vsel %vm20385_vm1, %v483_v22, %v487_v4 }
  0x26   : > { %13927 = vmatmul.mubr.msk.bf16.gmra.mrb[4].mxu0 %vm609_vm2, %v448_v42  ;;  %v16528_v42 = vld [vmem:[%s16405_s27 + $0xa0] sm:$0xff]   ;;  %v543_v44 = vrot.slane %v541_v24, 1  ;;  %v551_v46 = vrot.slane %v549_v29, 1  ;;  %v561_v48 = vshrl.u32 %v16515_v25, 16  ;;  %v491_v49 = vor.u32 %v489_v61, %v487_v4  ;;  %v16564_v29 = vld [vmem:[%s16405_s27 + $0xb8] sm:$0xff]  }
  0x27   : > { %13930 = vmatprep.mubr.msk.bf16.mxu0 %vm609_vm2, %v456_v45  ;;  %v557_v45 = vshll.u32 %v16515_v25, 16  ;;  %v565_v51 = vshll.u32 %v16525_v40, 16  ;;  %v573_v53 = vshll.u32 %v16528_v42, 16  ;;  %v499_v54 = vor.u32 %v497_v8, %v495_v16 }
  0x28   : > { %v496_v55 = vsel %vm20385_vm1, %v491_v49, %v495_v16  ;;  %v507_v58 = vor.u32 %v505_v19, %v503_v18  ;;  %v515_v60 = vor.u32 %v513_v20, %v511_v26  ;;  %v531_v1 = vor.u32 %v529_v32, %v527_v31 }
  0x29   : > { %v504_v56 = vsel %vm20385_vm1, %v499_v54, %v503_v18  ;;  %v539_v8 = vor.u32 %v537_v36, %v535_v34  ;;  %v547_v9 = vor.u32 %v545_v37, %v543_v44  ;;  %v555_v17 = vor.u32 %v553_v38, %v551_v46 }
  0x2a   : > { %v512_v62 = vsel %vm20385_vm1, %v507_v58, %v511_v26  ;;  %v520_v61 = vsel %vm20385_vm1, %v515_v60, %v519_v27  ;;  %v536_v4 = vsel %vm20385_vm1, %v531_v1, %v535_v34  ;;  %v559_v18 = vrot.slane %v557_v45, 1  ;;  %v12252_v1 = vld [vmem:[%s20380_s1 + $0x6] sm:$0x3] }
  0x2b   : > { %v544_v14 = vsel %vm20385_vm1, %v539_v8, %v543_v44  ;;  %v552_v16 = vsel %vm20385_vm1, %v547_v9, %v551_v46  ;;  %v569_v19 = vshrl.u32 %v16525_v40, 16  ;;  %v567_v20 = vrot.slane %v565_v51, 1  ;;  %v16574_v44 = vld [vmem:[%s16405_s27 + $0xc0] ss:$0 sps:$4 sm:$0x11]   ;;  %v16272_v8 = vld [vmem:[%s16405_s27 + $0x30] sm:$0xff]  }
  0x2c   : > { %v575_v21 = vrot.slane %v573_v53, 1  ;;  %v577_v22 = vshrl.u32 %v16528_v42, 16  ;;  %v581_v24 = vshll.u32 %v16550_v11, 16  ;;  %v563_v26 = vor.u32 %v561_v48, %v559_v18 }
  0x2d   : > { %v571_v36 = vor.u32 %v569_v19, %v567_v20  ;;  %v597_v38 = vshll.u32 %v16564_v29, 16  ;;  %v601_v49 = vshrl.u32 %v16564_v29, 16  ;;  %v605_v54 = vshll.u32 %v16574_v44, 16  ;;  %v16274_v19 = vld [vmem:[%s16405_s27 + $0x40] sm:$0xff]  }
  0x2e   : > { %13931 = vmatmul.mubr.msk.bf16.gmra.mrb[8].mxu0 %vm609_vm2, %v464_v0  ;;  %v523_v0 = vor.u32 %v521_v28, %v519_v27  ;;  %v16560_v27 = vld [vmem:[%s16405_s27 + $0xb0] sm:$0xff]   ;;  %v585_v28 = vshrl.u32 %v16550_v11, 16  ;;  %v583_v37 = vrot.slane %v581_v24, 1  ;;  %v1205_v9 = vrot.slane %v16272_v8, 1 }
  0x2f   : > { %13934 = vmatprep.mubr.msk.bf16.mxu0 %vm609_vm2, %v472_v3  ;;  %v589_v32 = vshll.u32 %v16560_v27, 16  ;;  %v593_v34 = vshrl.u32 %v16560_v27, 16  ;;  %v576_v45 = vsel %vm20385_vm1, %v571_v36, %v575_v21  ;;  %v599_v53 = vrot.slane %v597_v38, 1  ;;  %v15884_v8 = vld [vmem:[%s16405_s27 + $0x6c] sm:$0xff]  }
  0x30   : > { %v528_v3 = vsel %vm20385_vm1, %v523_v0, %v527_v31  ;;  %v568_v31 = vsel %vm20385_vm1, %v563_v26, %v567_v20  ;;  %v587_v51 = vor.u32 %v585_v28, %v583_v37  ;;  %v1316_v0 = vsel %vm682_vm0, %v16445_v33, 0  ;;  %v16276_v28 = vld [vmem:[%s16405_s27 + $0x50] sm:$0xff]  }
  0x31   : > { %v591_v48 = vrot.slane %v589_v32, 1  ;;  %v603_v60 = vor.u32 %v601_v49, %v599_v53  ;;  %v1209_v20 = vrot.slane %v16274_v19, 1  ;;  %v16280_v49 = vld [vmem:[%s16405_s27 + $0x70] sm:$0xff]   ;;  %v15890_v19 = vld [vmem:[%s16405_s27 + $0x9c] sm:$0xff]  }
  0x36   : > { %13935 = vmatmul.mubr.msk.bf16.gmra.mrb[12].mxu0 %vm609_vm2, %v480_v30  ;;  %v560_v30 = vsel %vm20385_vm1, %v555_v17, %v559_v18 }
  0x37   : > { %13938 = vmatprep.mubr.msk.bf16.mxu0 %vm609_vm2, %v488_v43  ;;  %v579_v43 = vor.u32 %v577_v22, %v575_v21  ;;  %v16275_v21 = vld [vmem:[%s16405_s27 + $0x48] sm:$0xff]  }
  0x38   : > { %v1211_v22 = vrot.slane %v16275_v21, 1  ;;  %v16773_v21 = vld [vmem:[%s16405_s27 + $0x10] sm:$0xf] }
  0x39   : > { %v584_v46 = vsel %vm20385_vm1, %v579_v43, %v583_v37  ;;  %v16278_v37 = vld [vmem:[%s16405_s27 + $0x60] sm:$0xff]   ;;  %v16279_v43 = vld [vmem:[%s16405_s27 + $0x68] sm:$0xff]  }
  0x3a   : > { %v1212_v26 = vsel %vm1193_vm3, %v1209_v20, %v1211_v22  ;;  %v1217_v38 = vrot.slane %v16278_v37, 1 }
  0x3e   : > { %13939 = vmatmul.mubr.msk.bf16.gmra.mrb[16].mxu0 %vm609_vm2, %v496_v55  ;;  %v595_v55 = vor.u32 %v593_v34, %v591_v48 }
  0x3f   : > { %13942 = vmatprep.mubr.msk.bf16.mxu0 %vm609_vm2, %v504_v56  ;;  %v592_v56 = vsel %vm20385_vm1, %v587_v51, %v591_v48  ;;  %v1221_v51 = vrot.slane %v16280_v49, 1 }
  0x40   : > { %v600_v58 = vsel %vm20385_vm1, %v595_v55, %v599_v53  ;;  %v16281_v53 = vld [vmem:[%s16405_s27 + $0x78] sm:$0xff]  }
  0x46   : > { %13943 = vmatmul.mubr.msk.bf16.gmra.mrb[20].mxu0 %vm609_vm2, %v512_v62  ;;  %v607_v62 = vrot.slane %v605_v54, 1  ;;  %v1223_v54 = vrot.slane %v16281_v53, 1 }
  0x47   : > { %13946 = vmatprep.mubr.msk.bf16.mxu0 %vm609_vm2, %v520_v61 }
  0x48   : > { %v608_v61 = vsel %vm20385_vm1, %v603_v60, %v607_v62  ;;  %v16283_v62 = vld [vmem:[%s16405_s27 + $0x88] sm:$0xff]  }
  0x4e   : > { %13947 = vmatmul.mubr.msk.bf16.gmra.mrb[24].mxu0 %vm609_vm2, %v528_v3 }
  0x4f   : > { %13950 = vmatprep.mubr.msk.bf16.mxu0 %vm609_vm2, %v536_v4 }
  0x56   : > { %13951 = vmatmul.mubr.msk.bf16.gmra.mrb[28].mxu0 %vm609_vm2, %v544_v14  ;;  %v16273_v14 = vld [vmem:[%s16405_s27 + $0x38] sm:$0xff]  }
  0x57   : > { %13954 = vmatprep.mubr.msk.bf16.mxu0 %vm609_vm2, %v552_v16  ;;  %v1207_v16 = vrot.slane %v16273_v14, 1  ;;  %v15886_v14 = vld [vmem:[%s16405_s27 + $0x7c] sm:$0xff]  }
  0x59   : > { %v1208_v18 = vsel %vm1193_vm3, %v1205_v9, %v1207_v16  ;;  %v1210_v24 = vsel %vm1193_vm3, %v1207_v16, %v1209_v20  ;;  %v15887_v16 = vld [vmem:[%s16405_s27 + $0x84] sm:$0xff]   ;;  %v2109_v20 = vld [vmem:[%s16405_s27 + $0xc] sm:$0xf] }
  0x5e   : > { %13955 = vmatmul.mubr.msk.bf16.gmra.mrb[32].mxu0 %vm609_vm2, %v560_v30  ;;  %v1213_v30 = vrot.slane %v16276_v28, 1  ;;  %v16781_v28 = vld [vmem:[%s16405_s27 + $0x14] sm:$0xff]  }
  0x5f   : > { %13958 = vmatprep.mubr.msk.bf16.mxu0 %vm609_vm2, %v568_v31  ;;  %v16277_v31 = vld [vmem:[%s16405_s27 + $0x58] sm:$0xff]   ;;  %v2291_v37 = vshll.u32 %v16781_v28, 16 }
  0x60   : > { %v1215_v32 = vrot.slane %v16277_v31, 1  ;;  %v1214_v34 = vsel %vm1193_vm3, %v1211_v22, %v1213_v30  ;;  %v15891_v22 = vld [vmem:[%s16405_s27 + $0xa4] sm:$0xff]   ;;  %v15893_v31 = vld [vmem:[%s16405_s27 + $0xb4] sm:$0xff]  }
  0x62   : > { %v1216_v36 = vsel %vm1193_vm3, %v1213_v30, %v1215_v32 }
  0x66   : > { %13959 = vmatmul.mubr.msk.bf16.gmra.mrb[36].mxu0 %vm609_vm2, %v576_v45  ;;  %v1219_v45 = vrot.slane %v16279_v43, 1 }
  0x67   : > { %13962 = vmatprep.mubr.msk.bf16.mxu0 %vm609_vm2, %v584_v46  ;;  %v1218_v46 = vsel %vm1193_vm3, %v1215_v32, %v1217_v38  ;;  %v15894_v32 = vld [vmem:[%s16405_s27 + $0xbc] sm:$0xff]  }
  0x68   : > { %v1220_v48 = vsel %vm1193_vm3, %v1217_v38, %v1219_v45  ;;  %v1222_v55 = vsel %vm1193_vm3, %v1219_v45, %v1221_v51  ;;  %v16788_v38 = vld [vmem:[%s16405_s27 + $0x1c] sm:$0xff]   ;;  %v2293_v45 = vrot.slane %v2291_v37, 1  ;;  %v16867_v37 = vld [vmem:[%s16405_s27 + $0x6c] sm:$0xff]  }
  0x69   : > { %v2299_v49 = vshll.u32 %v16788_v38, 16 }
  0x6e   : > { %13963 = vmatmul.mubr.msk.bf16.gmra.mrb[40].mxu0 %vm609_vm2, %v592_v56  ;;  %v1224_v56 = vsel %vm1193_vm3, %v1221_v51, %v1223_v54  ;;  %v2295_v51 = vshrl.u32 %v16781_v28, 16 }
  0x6f   : > { %13966 = vmatprep.mubr.msk.bf16.mxu0 %vm609_vm2, %v600_v58  ;;  %v16282_v58 = vld [vmem:[%s16405_s27 + $0x80] sm:$0xff]  }
  0x70   : > { %v1225_v60 = vrot.slane %v16282_v58, 1  ;;  %v16802_v58 = vld [vmem:[%s16405_s27 + $0x2c] sm:$0xff]  }
  0x76   : > { %13967 = vmatmul.mubr.msk.bf16.gmra.mrb[44].mxu0 %vm609_vm2, %v608_v61  ;;  %v1227_v61 = vrot.slane %v16283_v62, 1 }
  0x77   : > { %13972 = vmatprep.mubr.msk.bf16.mxu0 %vm609_vm2, %v16409_v5  ;;  %v1187_v5 = vld [vmem:[%s16405_s27] sm:$0xe] }
  0x7e   : > { %13973 = vmatmul.mubr.msk.bf16.vlgmr.msra.gmra.mrb[0].mxu0 %vm609_vm2, %v16412_v6  ;;  %v16266_v6 = vld [vmem:[%s16405_s27 + $0x4] sm:$0xf] }
  0x7f   : > { %14021 = vmatpush3.bf16.msra.mxu0 %v1316_v0  ;;  %13976 = vmatprep.mubr.msk.bf16.mxu0 %vm609_vm2, %v16415_v7  ;;  %v12227_v7 = vcombine.low %v1187_v5, %v16266_v6  ;;  %v1226_v0 = vsel %vm1193_vm3, %v1223_v54, %v1225_v60  ;;  %v1229_v5 = vrot.slane %v16515_v25, 1  ;;  %v1231_v6 = vrot.slane %v16525_v40, 1 }
  0x80   : > { %15733 = vmatprep.subr.msk.bf16.mxu0 %vm682_vm0, %v12252_v1  ;;  %v2303_v54 = vshrl.u32 %v16788_v38, 16 }
  0x86   : > { %13977 = vmatmul.mubr.msk.bf16.gmra.mrb[4].mxu0 %vm609_vm2, %v16423_v13  ;;  %v1194_v13 = vrot.slane %v12227_v7, 1  ;;  %v1230_v7 = vsel %vm1193_vm3, %v1227_v61, %v1229_v5 }
  0x87   : > { %13980 = vmatprep.mubr.msk.bf16.mxu0 %vm609_vm2, %v16427_v15  ;;  %v16267_v15 = vld [vmem:[%s16405_s27 + $0x8] sm:$0xff]  }
  0x8e   : > { %13981 = vmatmul.mubr.msk.bf16.gmra.mrb[8].mxu0 %vm609_vm2, %v16432_v23  ;;  %v1195_v23 = vrot.slane %v16267_v15, 1  ;;  %v1233_v15 = vrot.slane %v16528_v42, 1 }
  0x8f   : > { %13984 = vmatprep.mubr.msk.bf16.mxu0 %vm609_vm2, %v16449_v35  ;;  %v16268_v35 = vld [vmem:[%s16405_s27 + $0x10] sm:$0xff]  }
  0x90   : > { %v1196_v33 = vsel %vm1193_vm3, %v1194_v13, %v1195_v23  ;;  %v1232_v13 = vsel %vm1193_vm3, %v1229_v5, %v1231_v6 }
  0x96   : > { %13985 = vmatmul.mubr.msk.bf16.gmra.mrb[12].mxu0 %vm609_vm2, %v16453_v39  ;;  %v1197_v39 = vrot.slane %v16268_v35, 1  ;;  %v1239_v35 = vrot.slane %v16564_v29, 1 }
  0x97   : > { %13988 = vmatprep.mubr.msk.bf16.mxu0 %vm609_vm2, %v16459_v41  ;;  %v16269_v41 = vld [vmem:[%s16405_s27 + $0x18] sm:$0xff]  }
  0x9e   : > { %13989 = vmatmul.mubr.msk.bf16.gmra.mrb[16].mxu0 %vm609_vm2, %v16467_v47  ;;  %v1199_v47 = vrot.slane %v16269_v41, 1 }
  0x9f   : > { %13992 = vmatprep.mubr.msk.bf16.mxu0 %vm609_vm2, %v16472_v50  ;;  %v1198_v50 = vsel %vm1193_vm3, %v1195_v23, %v1197_v39  ;;  %v1235_v23 = vrot.slane %v16550_v11, 1 }
  0xa6   : > { %13993 = vmatmul.mubr.msk.bf16.gmra.mrb[20].mxu0 %vm609_vm2, %v16476_v52  ;;  %v1834_v52 = vsel %vm682_vm0, %v12252_v1, 0  ;;  %v1228_v1 = vsel %vm1193_vm3, %v1225_v60, %v1227_v61  ;;  %v2297_v60 = vor.u32 %v2295_v51, %v2293_v45  ;;  %v2379_v51 = vshll.u32 %v16867_v37, 16 }
  0xa7   : > { %13996 = vmatprep.mubr.msk.bf16.mxu0 %vm609_vm2, %v16481_v57  ;;  %v1200_v57 = vsel %vm1193_vm3, %v1197_v39, %v1199_v47 }
  0xae   : > { %13997 = vmatmul.mubr.msk.bf16.gmra.mrb[24].mxu0 %vm609_vm2, %v16485_v59  ;;  %v16655_v59 = vld [vmem:[%s20380_s1 + $0x8] sm:$0x3] }
  0xaf   : > { %14000 = vmatprep.mubr.msk.bf16.mxu0 %vm609_vm2, %v16490_v63  ;;  %v16270_v63 = vld [vmem:[%s16405_s27 + $0x20] sm:$0xff]  }
  0xb6   : > { %14001 = vmatmul.mubr.msk.bf16.gmra.mrb[28].mxu0 %vm609_vm2, %v16495_v2  ;;  %v1201_v2 = vrot.slane %v16270_v63, 1  ;;  %v15878_v63 = vld [vmem:[%s16405_s27 + $0x3c] sm:$0xff]  }
  0xb7   : > { %14004 = vmatprep.mubr.msk.bf16.mxu0 %vm609_vm2, %v16501_v10  ;;  %v16271_v10 = vld [vmem:[%s16405_s27 + $0x28] sm:$0xff]  }
  0xb8   : > { %v1202_v3 = vsel %vm1193_vm3, %v1199_v47, %v1201_v2  ;;  %v15872_v47 = vld [vmem:[%s16405_s27 + $0xc] sm:$0xff]  }
  0xbe   : > { %14005 = vmatmul.mubr.msk.bf16.gmra.mrb[32].mxu0 %vm609_vm2, %v16505_v12  ;;  %v1203_v12 = vrot.slane %v16271_v10, 1  ;;  %v15880_v10 = vld [vmem:[%s16405_s27 + $0x4c] sm:$0xff]  }
  0xbf   : > { %14008 = vmatprep.mubr.msk.bf16.mxu0 %vm609_vm2, %v16515_v25  ;;  %v1236_v25 = vsel %vm1193_vm3, %v1233_v15, %v1235_v23 }
  0xc0   : > { %v1204_v4 = vsel %vm1193_vm3, %v1201_v2, %v1203_v12  ;;  %v1206_v17 = vsel %vm1193_vm3, %v1203_v12, %v1205_v9  ;;  %v15879_v2 = vld [vmem:[%s16405_s27 + $0x44] sm:$0xff]   ;;  %v15881_v12 = vld [vmem:[%s16405_s27 + $0x54] sm:$0xff]  }
  0xc1   : > { %v15885_v9 = vld [vmem:[%s16405_s27 + $0x74] sm:$0xff]  }
  0xc6   : > { %14009 = vmatmul.mubr.msk.bf16.gmra.mrb[36].mxu0 %vm609_vm2, %v16525_v40  ;;  %v1237_v40 = vrot.slane %v16560_v27, 1 }
  0xc7   : > { %14012 = vmatprep.mubr.msk.bf16.mxu0 %vm609_vm2, %v16528_v42 }
  0xc8   : > { %v1238_v39 = vsel %vm1193_vm3, %v1235_v23, %v1237_v40  ;;  %v1240_v42 = vsel %vm1193_vm3, %v1237_v40, %v1239_v35  ;;  %v16823_v40 = vld [vmem:[%s16405_s27 + $0x3c] sm:$0xff]  }
  0xce   : > { %14013 = vmatmul.mubr.msk.bf16.gmra.mrb[40].mxu0 %vm609_vm2, %v16550_v11  ;;  %v1241_v11 = vrot.slane %v16574_v44, 1  ;;  %v16733_v44 = vld [vmem:[%s20380_s1 + $0xa] sm:$0x3] }
  0xcf   : > { %14016 = vmatprep.mubr.msk.bf16.mxu0 %vm609_vm2, %v16560_v27  ;;  %v15873_v27 = vld [vmem:[%s16405_s27 + $0x14] sm:$0xff]  }
  0xd0   : > { %v1242_v41 = vsel %vm1193_vm3, %v1239_v35, %v1241_v11  ;;  %v16827_v11 = vld [vmem:[%s16405_s27 + $0x44] sm:$0xff]  }
  0xd6   : > { %14017 = vmatmul.mubr.msk.bf16.gmra.mrb[44].mxu0 %vm609_vm2, %v16564_v29  ;;  %v15874_v29 = vld [vmem:[%s16405_s27 + $0x1c] sm:$0xff]  }
  0xd7   : > { %14022 = vmatprep.mubr.msk.bf16.mxu0 %vm609_vm2, %v1196_v33  ;;  %v1234_v33 = vsel %vm1193_vm3, %v1231_v6, %v1233_v15  ;;  %v2319_v15 = vshrl.u32 %v16802_v58, 16 }
  0xde   : > { %14023 = vmatmul.mubr.msk.bf16.vlgmr.msra.gmra.mrb[0].mxu0 %vm609_vm2, %v1198_v50  ;;  %v2552_v50 = vsel %vm682_vm0, %v16655_v59, 0 }
  0xdf   : > { %14071 = vmatpush3.bf16.msra.mxu0 %v1834_v52  ;;  %14026 = vmatprep.mubr.msk.bf16.mxu0 %vm609_vm2, %v1200_v57  ;;  %v15875_v52 = vld [vmem:[%s16405_s27 + $0x24] sm:$0xff]   ;;  %v15876_v57 = vld [vmem:[%s16405_s27 + $0x2c] sm:$0xff]  }
  0xe0   : > { %15734 = vmatprep.subr.msk.bf16.mxu0 %vm682_vm0, %v16655_v59  ;;  %v15877_v59 = vld [vmem:[%s16405_s27 + $0x34] sm:$0xff]  }
  0xe6   : > { %14027 = vmatmul.mubr.msk.bf16.gmra.mrb[4].mxu0 %vm609_vm2, %v1202_v3  ;;  %v15882_v3 = vld [vmem:[%s16405_s27 + $0x5c] sm:$0xff]  }
  0xe7   : > { %14030 = vmatprep.mubr.msk.bf16.mxu0 %vm609_vm2, %v1204_v4  ;;  %v15883_v4 = vld [vmem:[%s16405_s27 + $0x64] sm:$0xff]  }
  0xee   : > { %14031 = vmatmul.mubr.msk.bf16.gmra.mrb[8].mxu0 %vm609_vm2, %v1206_v17  ;;  %v15888_v17 = vld [vmem:[%s16405_s27 + $0x8c] sm:$0xff]  }
  0xef   : > { %14034 = vmatprep.mubr.msk.bf16.mxu0 %vm609_vm2, %v1208_v18  ;;  %v15889_v18 = vld [vmem:[%s16405_s27 + $0x94] sm:$0xff]  }
  0xf6   : > { %14035 = vmatmul.mubr.msk.bf16.gmra.mrb[12].mxu0 %vm609_vm2, %v1210_v24  ;;  %v15892_v24 = vld [vmem:[%s16405_s27 + $0xac] sm:$0xff]  }
  0xf7   : > { %14038 = vmatprep.mubr.msk.bf16.mxu0 %vm609_vm2, %v1212_v26  ;;  %v12302_v26 = vcombine.low %v2109_v20, %v16773_v21 }
  0xf9   : > { %v2286_v30 = vshll.u32 %v12302_v26, 16 }
  0xfe   : > { %14039 = vmatmul.mubr.msk.bf16.gmra.mrb[16].mxu0 %vm609_vm2, %v1214_v34  ;;  %v2284_v34 = vshrl.u32 %v12302_v26, 16 }
  0xff   : > { %14042 = vmatprep.mubr.msk.bf16.mxu0 %vm609_vm2, %v1216_v36  ;;  %v2288_v36 = vrot.slane %v2286_v30, 1 }
 0x101   : > { %v2289_v43 = vor.u32 %v2288_v36, %v2284_v34 }
 0x103   : > { %v2294_v53 = vsel %vm20385_vm1, %v2289_v43, %v2293_v45 }
 0x106   : > { %14043 = vmatmul.mubr.msk.bf16.gmra.mrb[20].mxu0 %vm609_vm2, %v1218_v46  ;;  %v16792_v46 = vld [vmem:[%s16405_s27 + $0x24] sm:$0xff]  }
 0x107   : > { %14046 = vmatprep.mubr.msk.bf16.mxu0 %vm609_vm2, %v1220_v48  ;;  %v15895_v48 = vld [vmem:[%s16405_s27 + $0xc4] sm:$0xff]   ;;  %v2311_v6 = vshrl.u32 %v16792_v46, 16 }
 0x10e   : > { %14047 = vmatmul.mubr.msk.bf16.gmra.mrb[24].mxu0 %vm609_vm2, %v1222_v55  ;;  %v2307_v55 = vshll.u32 %v16792_v46, 16 }
 0x10f   : > { %14050 = vmatprep.mubr.msk.bf16.mxu0 %vm609_vm2, %v1224_v56  ;;  %v2301_v56 = vrot.slane %v2299_v49, 1  ;;  %v16871_v49 = vld [vmem:[%s16405_s27 + $0x74] sm:$0xff]  }
 0x110   : > { %v2309_v61 = vrot.slane %v2307_v55, 1 }
 0x111   : > { %v2305_v62 = vor.u32 %v2303_v54, %v2301_v56  ;;  %v2302_v5 = vsel %vm20385_vm1, %v2297_v60, %v2301_v56  ;;  %v2383_v56 = vshrl.u32 %v16867_v37, 16  ;;  %v2387_v60 = vshll.u32 %v16871_v49, 16 }
 0x112   : > { %v2313_v35 = vor.u32 %v2311_v6, %v2309_v61 }
 0x113   : > { %v2389_v6 = vrot.slane %v2387_v60, 1 }
 0x116   : > { %14051 = vmatmul.mubr.msk.bf16.gmra.mrb[28].mxu0 %vm609_vm2, %v1226_v0  ;;  %v16806_v0 = vld [vmem:[%s16405_s27 + $0x34] sm:$0xff]  }
 0x117   : > { %14054 = vmatprep.mubr.msk.bf16.mxu0 %vm609_vm2, %v1228_v1  ;;  %v2315_v1 = vshll.u32 %v16802_v58, 16  ;;  %v2323_v23 = vshll.u32 %v16806_v0, 16 }
 0x11e   : > { %14055 = vmatmul.mubr.msk.bf16.gmra.mrb[32].mxu0 %vm609_vm2, %v1230_v7  ;;  %v2955_v7 = vsel %vm682_vm0, %v16733_v44, 0 }
 0x11f   : > { %14058 = vmatprep.mubr.msk.bf16.mxu0 %vm609_vm2, %v1232_v13  ;;  %v2310_v13 = vsel %vm20385_vm1, %v2305_v62, %v2309_v61  ;;  %v2381_v62 = vrot.slane %v2379_v51, 1  ;;  %v16881_v61 = vld [vmem:[%s16405_s27 + $0x7c] sm:$0xff]  }
 0x126   : > { %14059 = vmatmul.mubr.msk.bf16.gmra.mrb[36].mxu0 %vm609_vm2, %v1234_v33  ;;  %v16819_v33 = vld [vmem:[%s20380_s1 + $0xc] sm:$0x3] }
 0x127   : > { %14062 = vmatprep.mubr.msk.bf16.mxu0 %vm609_vm2, %v1236_v25  ;;  %v2317_v25 = vrot.slane %v2315_v1, 1 }
 0x12e   : > { %14063 = vmatmul.mubr.msk.bf16.gmra.mrb[40].mxu0 %vm609_vm2, %v1238_v39  ;;  %v2321_v39 = vor.u32 %v2319_v15, %v2317_v25 }
 0x12f   : > { %14066 = vmatprep.mubr.msk.bf16.mxu0 %vm609_vm2, %v1240_v42  ;;  %v2325_v42 = vrot.slane %v2323_v23, 1  ;;  %v2391_v23 = vshrl.u32 %v16871_v49, 16 }
 0x136   : > { %14067 = vmatmul.mubr.msk.bf16.gmra.mrb[44].mxu0 %vm609_vm2, %v1242_v41  ;;  %v2331_v41 = vshll.u32 %v16823_v40, 16 }
 0x137   : > { %14072 = vmatprep.mubr.msk.bf16.mxu0 %vm609_vm2, %v15872_v47  ;;  %v2318_v47 = vsel %vm20385_vm1, %v2313_v35, %v2317_v25  ;;  %v2399_v35 = vshrl.u32 %v16881_v61, 16 }
 0x13e   : > { %14073 = vmatmul.mubr.msk.bf16.vlgmr.msra.gmra.mrb[0].mxu0 %vm609_vm2, %v15873_v27  ;;  %v2327_v27 = vshrl.u32 %v16806_v0, 16 }
 0x13f   : > { %14121 = vmatpush3.bf16.msra.mxu0 %v2552_v50  ;;  %14076 = vmatprep.mubr.msk.bf16.mxu0 %vm609_vm2, %v15874_v29  ;;  %v2326_v29 = vsel %vm20385_vm1, %v2321_v39, %v2325_v42  ;;  %v2335_v50 = vshrl.u32 %v16823_v40, 16 }
 0x140   : > { %15735 = vmatprep.subr.msk.bf16.mxu0 %vm682_vm0, %v16733_v44  ;;  %v2339_v44 = vshll.u32 %v16827_v11, 16 }
 0x146   : > { %14077 = vmatmul.mubr.msk.bf16.gmra.mrb[4].mxu0 %vm609_vm2, %v15875_v52  ;;  %v2333_v52 = vrot.slane %v2331_v41, 1  ;;  %v16895_v41 = vld [vmem:[%s16405_s27 + $0x8c] sm:$0xff]  }
 0x147   : > { %14080 = vmatprep.mubr.msk.bf16.mxu0 %vm609_vm2, %v15876_v57  ;;  %v16839_v57 = vld [vmem:[%s16405_s27 + $0x4c] sm:$0xff]  }
 0x14e   : > { %14081 = vmatmul.mubr.msk.bf16.gmra.mrb[8].mxu0 %vm609_vm2, %v15877_v59  ;;  %v2329_v59 = vor.u32 %v2327_v27, %v2325_v42 }
 0x14f   : > { %14084 = vmatprep.mubr.msk.bf16.mxu0 %vm609_vm2, %v15878_v63  ;;  %v2337_v63 = vor.u32 %v2335_v50, %v2333_v52  ;;  %v16899_v50 = vld [vmem:[%s16405_s27 + $0x94] sm:$0xff]  }
 0x156   : > { %14085 = vmatmul.mubr.msk.bf16.gmra.mrb[12].mxu0 %vm609_vm2, %v15879_v2  ;;  %v2341_v2 = vrot.slane %v2339_v44, 1  ;;  %v2411_v44 = vshll.u32 %v16895_v41, 16 }
 0x157   : > { %14088 = vmatprep.mubr.msk.bf16.mxu0 %vm609_vm2, %v15880_v10  ;;  %v16843_v10 = vld [vmem:[%s16405_s27 + $0x54] sm:$0xff]  }
 0x158   : > { %v2359_v30 = vshrl.u32 %v16843_v10, 16 }
 0x15e   : > { %14089 = vmatmul.mubr.msk.bf16.gmra.mrb[16].mxu0 %vm609_vm2, %v15881_v12  ;;  %v2347_v12 = vshll.u32 %v16839_v57, 16 }
 0x15f   : > { %14092 = vmatprep.mubr.msk.bf16.mxu0 %vm609_vm2, %v15882_v3  ;;  %v2334_v3 = vsel %vm20385_vm1, %v2329_v59, %v2333_v52 }
 0x166   : > { %14093 = vmatmul.mubr.msk.bf16.gmra.mrb[20].mxu0 %vm609_vm2, %v15883_v4  ;;  %v2343_v4 = vshrl.u32 %v16827_v11, 16 }
 0x167   : > { %14096 = vmatprep.mubr.msk.bf16.mxu0 %vm609_vm2, %v15884_v8  ;;  %v2342_v8 = vsel %vm20385_vm1, %v2337_v63, %v2341_v2 }
 0x16e   : > { %14097 = vmatmul.mubr.msk.bf16.gmra.mrb[24].mxu0 %vm609_vm2, %v15885_v9  ;;  %v2351_v9 = vshrl.u32 %v16839_v57, 16 }
 0x16f   : > { %14100 = vmatprep.mubr.msk.bf16.mxu0 %vm609_vm2, %v15886_v14  ;;  %v2355_v14 = vshll.u32 %v16843_v10, 16 }
 0x171   : > { %v2357_v20 = vrot.slane %v2355_v14, 1 }
 0x173   : > { %v2361_v43 = vor.u32 %v2359_v30, %v2357_v20 }
 0x176   : > { %14101 = vmatmul.mubr.msk.bf16.gmra.mrb[28].mxu0 %vm609_vm2, %v15887_v16  ;;  %v2349_v16 = vrot.slane %v2347_v12, 1  ;;  %v2419_v12 = vshll.u32 %v16899_v50, 16 }
 0x177   : > { %14104 = vmatprep.mubr.msk.bf16.mxu0 %vm609_vm2, %v15888_v17  ;;  %v16853_v17 = vld [vmem:[%s16405_s27 + $0x5c] sm:$0xff]  }
 0x178   : > { %v2421_v14 = vrot.slane %v2419_v12, 1 }
 0x17e   : > { %14105 = vmatmul.mubr.msk.bf16.gmra.mrb[32].mxu0 %vm609_vm2, %v15889_v18  ;;  %v2345_v18 = vor.u32 %v2343_v4, %v2341_v2  ;;  %v2415_v2 = vshrl.u32 %v16895_v41, 16  ;;  %v16909_v4 = vld [vmem:[%s16405_s27 + $0x9c] sm:$0xff]  }
 0x17f   : > { %14108 = vmatprep.mubr.msk.bf16.mxu0 %vm609_vm2, %v15890_v19  ;;  %v2353_v19 = vor.u32 %v2351_v9, %v2349_v16 }
 0x180   : > { %v2350_v26 = vsel %vm20385_vm1, %v2345_v18, %v2349_v16  ;;  %v16913_v16 = vld [vmem:[%s16405_s27 + $0xa4] sm:$0xff]   ;;  %v2427_v18 = vshll.u32 %v16909_v4, 16 }
 0x181   : > { %v2435_v30 = vshll.u32 %v16913_v16, 16 }
 0x186   : > { %14109 = vmatmul.mubr.msk.bf16.gmra.mrb[36].mxu0 %vm609_vm2, %v15891_v22  ;;  %v16857_v22 = vld [vmem:[%s16405_s27 + $0x64] sm:$0xff]  }
 0x187   : > { %14112 = vmatprep.mubr.msk.bf16.mxu0 %vm609_vm2, %v15892_v24  ;;  %v2363_v24 = vshll.u32 %v16853_v17, 16  ;;  %v2371_v34 = vshll.u32 %v16857_v22, 16  ;;  %v2375_v54 = vshrl.u32 %v16857_v22, 16 }
 0x189   : > { %v2365_v36 = vrot.slane %v2363_v24, 1 }
 0x18e   : > { %14113 = vmatmul.mubr.msk.bf16.gmra.mrb[40].mxu0 %vm609_vm2, %v15893_v31  ;;  %v2358_v31 = vsel %vm20385_vm1, %v2353_v19, %v2357_v20  ;;  %v2423_v20 = vshrl.u32 %v16899_v50, 16 }
 0x18f   : > { %14116 = vmatprep.mubr.msk.bf16.mxu0 %vm609_vm2, %v15894_v32  ;;  %v2367_v32 = vshrl.u32 %v16853_v17, 16 }
 0x191   : > { %v2369_v45 = vor.u32 %v2367_v32, %v2365_v36  ;;  %v16923_v32 = vld [vmem:[%s16405_s27 + $0xac] sm:$0xff]  }
 0x196   : > { %14117 = vmatmul.mubr.msk.bf16.gmra.mrb[44].mxu0 %vm609_vm2, %v15895_v48  ;;  %v2373_v48 = vrot.slane %v2371_v34, 1  ;;  %v2425_v34 = vor.u32 %v2423_v20, %v2421_v14 }
 0x197   : > { %14122 = vmatprep.mubr.msk.bf16.mxu0 %vm609_vm2, %v2294_v53  ;;  %v2366_v53 = vsel %vm20385_vm1, %v2361_v43, %v2365_v36  ;;  %v2437_v43 = vrot.slane %v2435_v30, 1 }
 0x198   : > { %v2374_v55 = vsel %vm20385_vm1, %v2369_v45, %v2373_v48  ;;  %v2377_v1 = vor.u32 %v2375_v54, %v2373_v48  ;;  %v16927_v45 = vld [vmem:[%s16405_s27 + $0xb4] sm:$0xff]   ;;  %v2443_v48 = vshll.u32 %v16923_v32, 16 }
 0x19a   : > { %v2382_v15 = vsel %vm20385_vm1, %v2377_v1, %v2381_v62  ;;  %v2445_v60 = vrot.slane %v2443_v48, 1  ;;  %v2846_v48 = vrot.slane %v16827_v11, 1  ;;  %v2854_v11 = vrot.slane %v16857_v22, 1 }
 0x19e   : > { %14123 = vmatmul.mubr.msk.bf16.vlgmr.msra.gmra.mrb[0].mxu0 %vm609_vm2, %v2302_v5  ;;  %v2385_v5 = vor.u32 %v2383_v56, %v2381_v62  ;;  %v2451_v56 = vshll.u32 %v16927_v45, 16  ;;  %v16937_v62 = vld [vmem:[%s16405_s27 + $0xbc] sm:$0xff]  }
 0x19f   : > { %14171 = vmatpush3.bf16.msra.mxu0 %v2955_v7  ;;  %14126 = vmatprep.mubr.msk.bf16.mxu0 %vm609_vm2, %v2310_v13  ;;  %v16885_v7 = vld [vmem:[%s16405_s27 + $0x84] sm:$0xff]   ;;  %v2395_v13 = vshll.u32 %v16881_v61, 16 }
 0x1a0   : > { %15736 = vmatprep.subr.msk.bf16.mxu0 %vm682_vm0, %v16819_v33  ;;  %v2390_v25 = vsel %vm20385_vm1, %v2385_v5, %v2389_v6  ;;  %v2403_v39 = vshll.u32 %v16885_v7, 16  ;;  %v2407_v59 = vshrl.u32 %v16885_v7, 16  ;;  %v2862_v22 = vrot.slane %v16885_v7, 1 }
 0x1a1   : > { %v2397_v42 = vrot.slane %v2395_v13, 1  ;;  %v16941_v13 = vld [vmem:[%s16405_s27 + $0xc4] sm:$0xff]   ;;  %v2870_v7 = vrot.slane %v16913_v16, 1 }
 0x1a3   : > { %v2401_v27 = vor.u32 %v2399_v35, %v2397_v42 }
 0x1a6   : > { %14127 = vmatmul.mubr.msk.bf16.gmra.mrb[4].mxu0 %vm609_vm2, %v2318_v47  ;;  %v2393_v47 = vor.u32 %v2391_v23, %v2389_v6  ;;  %v2453_v6 = vrot.slane %v2451_v56, 1 }
 0x1a7   : > { %14130 = vmatprep.mubr.msk.bf16.mxu0 %vm609_vm2, %v2326_v29  ;;  %v2405_v29 = vrot.slane %v2403_v39, 1  ;;  %v2463_v39 = vshrl.u32 %v16937_v62, 16 }
 0x1a8   : > { %v2398_v52 = vsel %vm20385_vm1, %v2393_v47, %v2397_v42  ;;  %v2467_v42 = vshll.u32 %v16941_v13, 16 }
 0x1a9   : > { %v2406_v63 = vsel %vm20385_vm1, %v2401_v27, %v2405_v29 }
 0x1ae   : > { %14131 = vmatmul.mubr.msk.bf16.gmra.mrb[8].mxu0 %vm609_vm2, %v2334_v3  ;;  %v2413_v3 = vrot.slane %v2411_v44, 1 }
 0x1af   : > { %14134 = vmatprep.mubr.msk.bf16.mxu0 %vm609_vm2, %v2342_v8  ;;  %v2409_v8 = vor.u32 %v2407_v59, %v2405_v29  ;;  %v16952_v29 = vld [vmem:[%s16405_s27 + $0xcc] ss:$0 sps:$4 sm:$0x11]   ;;  %v2827_v59 = vld [vmem:[%s16405_s27 + $0xc] sm:$0xe] }
 0x1b0   : > { %v2417_v9 = vor.u32 %v2415_v2, %v2413_v3  ;;  %v2471_v2 = vshrl.u32 %v16941_v13, 16  ;;  %v2475_v12 = vshll.u32 %v16952_v29, 16 }
 0x1b1   : > { %v2414_v19 = vsel %vm20385_vm1, %v2409_v8, %v2413_v3  ;;  %v12352_v8 = vcombine.low %v2827_v59, %v16773_v21  ;;  %v2838_v21 = vrot.slane %v16792_v46, 1  ;;  %v2842_v46 = vrot.slane %v16806_v0, 1 }
 0x1b2   : > { %v2422_v24 = vsel %vm20385_vm1, %v2417_v9, %v2421_v14  ;;  %v2477_v14 = vrot.slane %v2475_v12, 1  ;;  %v2848_v0 = vrot.slane %v16839_v57, 1  ;;  %v2856_v57 = vrot.slane %v16867_v37, 1  ;;  %v15927_v12 = vld [vmem:[%s16405_s27 + $0x40] sm:$0xff]  }
 0x1b3   : > { %v2864_v37 = vrot.slane %v16895_v41, 1  ;;  %v2872_v41 = vrot.slane %v16923_v32, 1 }
 0x1b6   : > { %14135 = vmatmul.mubr.msk.bf16.gmra.mrb[12].mxu0 %vm609_vm2, %v2350_v26  ;;  %v2431_v26 = vshrl.u32 %v16909_v4, 16 }
 0x1b7   : > { %14138 = vmatprep.mubr.msk.bf16.mxu0 %vm609_vm2, %v2358_v31  ;;  %v2429_v31 = vrot.slane %v2427_v18, 1  ;;  %v2833_v18 = vrot.slane %v12352_v8, 1  ;;  %v15929_v8 = vld [vmem:[%s16405_s27 + $0x50] sm:$0xff]  }
 0x1b9   : > { %v2433_v36 = vor.u32 %v2431_v26, %v2429_v31  ;;  %v2430_v51 = vsel %vm20385_vm1, %v2425_v34, %v2429_v31  ;;  %v2836_v26 = vrot.slane %v16788_v38, 1  ;;  %v3473_v31 = vsel %vm682_vm0, %v16819_v33, 0 }
 0x1ba   : > { %v2840_v38 = vrot.slane %v16802_v58, 1 }
 0x1bb   : > { %v2438_v54 = vsel %vm20385_vm1, %v2433_v36, %v2437_v43  ;;  %v2839_v34 = vsel %vm1193_vm3, %v2836_v26, %v2838_v21 }
 0x1bc   : > { %v2841_v33 = vsel %vm1193_vm3, %v2838_v21, %v2840_v38  ;;  %v2843_v36 = vsel %vm1193_vm3, %v2840_v38, %v2842_v46  ;;  %v15937_v21 = vld [vmem:[%s16405_s27 + $0x90] sm:$0xff]   ;;  %v17094_v38 = vld [vmem:[%s16405_s27 + $0x1c] sm:$0xf] }
 0x1be   : > { %14139 = vmatmul.mubr.msk.bf16.gmra.mrb[16].mxu0 %vm609_vm2, %v2366_v53  ;;  %v2439_v53 = vshrl.u32 %v16913_v16, 16  ;;  %v2876_v16 = vrot.slane %v16937_v62, 1 }
 0x1bf   : > { %14142 = vmatprep.mubr.msk.bf16.mxu0 %vm609_vm2, %v2374_v55  ;;  %v2447_v55 = vshrl.u32 %v16923_v32, 16 }
 0x1c0   : > { %v2441_v1 = vor.u32 %v2439_v53, %v2437_v43  ;;  %v2844_v43 = vrot.slane %v16823_v40, 1  ;;  %v2850_v53 = vrot.slane %v16843_v10, 1  ;;  %v2852_v40 = vrot.slane %v16853_v17, 1 }
 0x1c1   : > { %v2449_v5 = vor.u32 %v2447_v55, %v2445_v60  ;;  %v2858_v10 = vrot.slane %v16871_v49, 1  ;;  %v2860_v17 = vrot.slane %v16881_v61, 1  ;;  %v2866_v49 = vrot.slane %v16899_v50, 1 }
 0x1c2   : > { %v2446_v23 = vsel %vm20385_vm1, %v2441_v1, %v2445_v60  ;;  %v2847_v58 = vsel %vm1193_vm3, %v2844_v43, %v2846_v48  ;;  %v2851_v55 = vsel %vm1193_vm3, %v2848_v0, %v2850_v53  ;;  %v2853_v56 = vsel %vm1193_vm3, %v2850_v53, %v2852_v40 }
 0x1c3   : > { %v2454_v35 = vsel %vm20385_vm1, %v2449_v5, %v2453_v6  ;;  %v2855_v60 = vsel %vm1193_vm3, %v2852_v40, %v2854_v11  ;;  %v2857_v1 = vsel %vm1193_vm3, %v2854_v11, %v2856_v57  ;;  %v2859_v5 = vsel %vm1193_vm3, %v2856_v57, %v2858_v10 }
 0x1c4   : > { %v2868_v61 = vrot.slane %v16909_v4, 1  ;;  %v2874_v50 = vrot.slane %v16927_v45, 1 }
 0x1c6   : > { %14143 = vmatmul.mubr.msk.bf16.gmra.mrb[20].mxu0 %vm609_vm2, %v2382_v15  ;;  %v2459_v15 = vshll.u32 %v16937_v62, 16  ;;  %v2875_v4 = vsel %vm1193_vm3, %v2872_v41, %v2874_v50  ;;  %v15923_v62 = vld [vmem:[%s16405_s27 + $0x20] sm:$0xff]  }
 0x1c7   : > { %14146 = vmatprep.mubr.msk.bf16.mxu0 %vm609_vm2, %v2390_v25  ;;  %v2455_v25 = vshrl.u32 %v16927_v45, 16  ;;  %v2880_v45 = vrot.slane %v16952_v29, 1  ;;  %v17054_v29 = vld [vmem:[%s20380_s1 + $0x10] sm:$0x3] }
 0x1c8   : > { %v2461_v47 = vrot.slane %v2459_v15, 1  ;;  %v2863_v15 = vsel %vm1193_vm3, %v2860_v17, %v2862_v22 }
 0x1c9   : > { %v2457_v27 = vor.u32 %v2455_v25, %v2453_v6  ;;  %v2861_v6 = vsel %vm1193_vm3, %v2858_v10, %v2860_v17  ;;  %v2867_v25 = vsel %vm1193_vm3, %v2864_v37, %v2866_v49 }
 0x1ca   : > { %v2465_v44 = vor.u32 %v2463_v39, %v2461_v47  ;;  %v2871_v39 = vsel %vm1193_vm3, %v2868_v61, %v2870_v7 }
 0x1ce   : > { %14147 = vmatmul.mubr.msk.bf16.gmra.mrb[24].mxu0 %vm609_vm2, %v2398_v52  ;;  %v2469_v52 = vrot.slane %v2467_v42, 1  ;;  %v2873_v42 = vsel %vm1193_vm3, %v2870_v7, %v2872_v41 }
 0x1cf   : > { %14150 = vmatprep.mubr.msk.bf16.mxu0 %vm609_vm2, %v2406_v63  ;;  %v2462_v63 = vsel %vm20385_vm1, %v2457_v27, %v2461_v47  ;;  %v2878_v47 = vrot.slane %v16941_v13, 1  ;;  %v2877_v27 = vsel %vm1193_vm3, %v2874_v50, %v2876_v16  ;;  %v15924_v13 = vld [vmem:[%s16405_s27 + $0x28] sm:$0xff]  }
 0x1d0   : > { %v2470_v3 = vsel %vm20385_vm1, %v2465_v44, %v2469_v52  ;;  %v2473_v9 = vor.u32 %v2471_v2, %v2469_v52  ;;  %v15922_v52 = vld [vmem:[%s16405_s27 + $0x18] sm:$0xff]  }
 0x1d1   : > { %v2879_v32 = vsel %vm1193_vm3, %v2876_v16, %v2878_v47  ;;  %v2881_v44 = vsel %vm1193_vm3, %v2878_v47, %v2880_v45  ;;  %v15926_v2 = vld [vmem:[%s16405_s27 + $0x38] sm:$0xff]  }
 0x1d2   : > { %v2478_v20 = vsel %vm20385_vm1, %v2473_v9, %v2477_v14  ;;  %v15930_v9 = vld [vmem:[%s16405_s27 + $0x58] sm:$0xff]   ;;  %v15931_v14 = vld [vmem:[%s16405_s27 + $0x60] sm:$0xff]  }
 0x1d6   : > { %14151 = vmatmul.mubr.msk.bf16.gmra.mrb[28].mxu0 %vm609_vm2, %v2414_v19  ;;  %v2834_v19 = vrot.slane %v16781_v28, 1  ;;  %v16976_v28 = vld [vmem:[%s20380_s1 + $0xe] sm:$0x3] }
 0x1d7   : > { %14154 = vmatprep.mubr.msk.bf16.mxu0 %vm609_vm2, %v2422_v24  ;;  %v4191_v59 = vsel %vm682_vm0, %v16976_v28, 0 }
 0x1d8   : > { %v2835_v24 = vsel %vm1193_vm3, %v2833_v18, %v2834_v19  ;;  %v2837_v30 = vsel %vm1193_vm3, %v2834_v19, %v2836_v26  ;;  %v15932_v18 = vld [vmem:[%s16405_s27 + $0x68] sm:$0xff]   ;;  %v15933_v19 = vld [vmem:[%s16405_s27 + $0x70] sm:$0xff]  }
 0x1d9   : > { %v15936_v26 = vld [vmem:[%s16405_s27 + $0x88] sm:$0xff]  }
 0x1de   : > { %14155 = vmatmul.mubr.msk.bf16.gmra.mrb[32].mxu0 %vm609_vm2, %v2430_v51  ;;  %v2845_v51 = vsel %vm1193_vm3, %v2842_v46, %v2844_v43  ;;  %v15941_v46 = vld [vmem:[%s16405_s27 + $0xb0] sm:$0xff]   ;;  %v17102_v43 = vld [vmem:[%s16405_s27 + $0x20] sm:$0xff]  }
 0x1df   : > { %14158 = vmatprep.mubr.msk.bf16.mxu0 %vm609_vm2, %v2438_v54  ;;  %v2849_v54 = vsel %vm1193_vm3, %v2846_v48, %v2848_v0  ;;  %v3934_v10 = vshrl.u32 %v17102_v43, 16 }
 0x1e6   : > { %14159 = vmatmul.mubr.msk.bf16.gmra.mrb[36].mxu0 %vm609_vm2, %v2446_v23  ;;  %v2865_v23 = vsel %vm1193_vm3, %v2862_v22, %v2864_v37 }
 0x1e7   : > { %14162 = vmatprep.mubr.msk.bf16.mxu0 %vm609_vm2, %v2454_v35  ;;  %v2869_v35 = vsel %vm1193_vm3, %v2866_v49, %v2868_v61 }
 0x1ee   : > { %14163 = vmatmul.mubr.msk.bf16.gmra.mrb[40].mxu0 %vm609_vm2, %v2462_v63  ;;  %v15925_v63 = vld [vmem:[%s16405_s27 + $0x30] sm:$0xff]  }
 0x1ef   : > { %14166 = vmatprep.mubr.msk.bf16.mxu0 %vm609_vm2, %v2470_v3  ;;  %v15928_v3 = vld [vmem:[%s16405_s27 + $0x48] sm:$0xff]  }
 0x1f6   : > { %14167 = vmatmul.mubr.msk.bf16.gmra.mrb[44].mxu0 %vm609_vm2, %v2478_v20  ;;  %v15934_v20 = vld [vmem:[%s16405_s27 + $0x78] sm:$0xff]  }
 0x1f7   : > { %14172 = vmatprep.mubr.msk.bf16.mxu0 %vm609_vm2, %v2835_v24  ;;  %v15935_v24 = vld [vmem:[%s16405_s27 + $0x80] sm:$0xff]  }
 0x1fe   : > { %14173 = vmatmul.mubr.msk.bf16.vlgmr.msra.gmra.mrb[0].mxu0 %vm609_vm2, %v2837_v30  ;;  %v15938_v30 = vld [vmem:[%s16405_s27 + $0x98] sm:$0xff]  }
 0x1ff   : > { %14221 = vmatpush3.bf16.msra.mxu0 %v3473_v31  ;;  %14176 = vmatprep.mubr.msk.bf16.mxu0 %vm609_vm2, %v2839_v34  ;;  %v15939_v31 = vld [vmem:[%s16405_s27 + $0xa0] sm:$0xff]   ;;  %v15940_v34 = vld [vmem:[%s16405_s27 + $0xa8] sm:$0xff]  }
 0x200   : > { %15737 = vmatprep.subr.msk.bf16.mxu0 %vm682_vm0, %v16976_v28  ;;  %v3748_v28 = vld [vmem:[%s16405_s27 + $0x18] sm:$0xf] }
 0x206   : > { %14177 = vmatmul.mubr.msk.bf16.gmra.mrb[4].mxu0 %vm609_vm2, %v2841_v33  ;;  %v15942_v33 = vld [vmem:[%s16405_s27 + $0xb8] sm:$0xff]  }
 0x207   : > { %14180 = vmatprep.mubr.msk.bf16.mxu0 %vm609_vm2, %v2843_v36  ;;  %v12427_v36 = vcombine.low %v3748_v28, %v17094_v38  ;;  %v17171_v28 = vld [vmem:[%s16405_s27 + $0x70] sm:$0xff]  }
 0x209   : > { %v3925_v48 = vshll.u32 %v12427_v36, 16  ;;  %v3923_v0 = vshrl.u32 %v12427_v36, 16 }
 0x20b   : > { %v3927_v53 = vrot.slane %v3925_v48, 1 }
 0x20d   : > { %v3928_v40 = vor.u32 %v3927_v53, %v3923_v0  ;;  %v17181_v53 = vld [vmem:[%s16405_s27 + $0x78] sm:$0xff]  }
 0x20e   : > { %14181 = vmatmul.mubr.msk.bf16.gmra.mrb[8].mxu0 %vm609_vm2, %v2845_v51  ;;  %v15943_v51 = vld [vmem:[%s16405_s27 + $0xc0] sm:$0xff]  }
 0x20f   : > { %14184 = vmatprep.mubr.msk.bf16.mxu0 %vm609_vm2, %v2847_v58  ;;  %v15944_v58 = vld [vmem:[%s16405_s27 + $0xc8] sm:$0xff]  }
 0x216   : > { %14185 = vmatmul.mubr.msk.bf16.gmra.mrb[12].mxu0 %vm609_vm2, %v2849_v54  ;;  %v3930_v54 = vshll.u32 %v17102_v43, 16 }
 0x217   : > { %14188 = vmatprep.mubr.msk.bf16.mxu0 %vm609_vm2, %v2851_v55  ;;  %v17109_v55 = vld [vmem:[%s16405_s27 + $0x28] sm:$0xff]  }
 0x218   : > { %v3932_v11 = vrot.slane %v3930_v54, 1  ;;  %v3938_v57 = vshll.u32 %v17109_v55, 16 }
 0x21a   : > { %v3940_v22 = vrot.slane %v3938_v57, 1  ;;  %v4018_v57 = vshll.u32 %v17181_v53, 16 }
 0x21e   : > { %14189 = vmatmul.mubr.msk.bf16.gmra.mrb[16].mxu0 %vm609_vm2, %v2853_v56  ;;  %v17113_v56 = vld [vmem:[%s16405_s27 + $0x30] sm:$0xff]  }
 0x21f   : > { %14192 = vmatprep.mubr.msk.bf16.mxu0 %vm609_vm2, %v2855_v60  ;;  %v15945_v60 = vld [vmem:[%s16405_s27 + $0xd0] sm:$0xff]   ;;  %v3946_v17 = vshll.u32 %v17113_v56, 16  ;;  %v3950_v7 = vshrl.u32 %v17113_v56, 16 }
 0x221   : > { %v3948_v49 = vrot.slane %v3946_v17, 1  ;;  %v4022_v17 = vshrl.u32 %v17181_v53, 16 }
 0x223   : > { %v3952_v16 = vor.u32 %v3950_v7, %v3948_v49  ;;  %v17199_v7 = vld [vmem:[%s16405_s27 + $0x90] sm:$0xff]  }
 0x226   : > { %14193 = vmatmul.mubr.msk.bf16.gmra.mrb[20].mxu0 %vm609_vm2, %v2857_v1  ;;  %v3933_v1 = vsel %vm20385_vm1, %v3928_v40, %v3932_v11 }
 0x227   : > { %14196 = vmatprep.mubr.msk.bf16.mxu0 %vm609_vm2, %v2859_v5  ;;  %v3942_v5 = vshrl.u32 %v17109_v55, 16 }
 0x229   : > { %v3944_v37 = vor.u32 %v3942_v5, %v3940_v22 }
 0x22e   : > { %14197 = vmatmul.mubr.msk.bf16.gmra.mrb[24].mxu0 %vm609_vm2, %v2861_v6  ;;  %v17123_v6 = vld [vmem:[%s16405_s27 + $0x38] sm:$0xff]  }
 0x22f   : > { %14200 = vmatprep.mubr.msk.bf16.mxu0 %vm609_vm2, %v2863_v15  ;;  %v3936_v15 = vor.u32 %v3934_v10, %v3932_v11  ;;  %v3958_v41 = vshrl.u32 %v17123_v6, 16 }
 0x231   : > { %v3941_v61 = vsel %vm20385_vm1, %v3936_v15, %v3940_v22  ;;  %v4020_v15 = vrot.slane %v4018_v57, 1 }
 0x236   : > { %14201 = vmatmul.mubr.msk.bf16.gmra.mrb[28].mxu0 %vm609_vm2, %v2865_v23  ;;  %v17127_v23 = vld [vmem:[%s16405_s27 + $0x40] sm:$0xff]  }
 0x237   : > { %14204 = vmatprep.mubr.msk.bf16.mxu0 %vm609_vm2, %v2867_v25  ;;  %v3954_v25 = vshll.u32 %v17123_v6, 16  ;;  %v3962_v50 = vshll.u32 %v17127_v23, 16 }
 0x23e   : > { %14205 = vmatmul.mubr.msk.bf16.gmra.mrb[32].mxu0 %vm609_vm2, %v2869_v35  ;;  %v4594_v35 = vsel %vm682_vm0, %v17054_v29, 0 }
 0x23f   : > { %14208 = vmatprep.mubr.msk.bf16.mxu0 %vm609_vm2, %v2871_v39  ;;  %v3949_v39 = vsel %vm20385_vm1, %v3944_v37, %v3948_v49  ;;  %v17195_v37 = vld [vmem:[%s16405_s27 + $0x88] sm:$0xff]  }
 0x246   : > { %14209 = vmatmul.mubr.msk.bf16.gmra.mrb[36].mxu0 %vm609_vm2, %v2873_v42  ;;  %v3956_v42 = vrot.slane %v3954_v25, 1  ;;  %v4024_v25 = vor.u32 %v4022_v17, %v4020_v15 }
 0x247   : > { %14212 = vmatprep.mubr.msk.bf16.mxu0 %vm609_vm2, %v2875_v4  ;;  %v17139_v4 = vld [vmem:[%s16405_s27 + $0x48] sm:$0xff]  }
 0x248   : > { %v3960_v47 = vor.u32 %v3958_v41, %v3956_v42  ;;  %v3970_v45 = vshll.u32 %v17139_v4, 16 }
 0x24e   : > { %14213 = vmatmul.mubr.msk.bf16.gmra.mrb[40].mxu0 %vm609_vm2, %v2877_v27  ;;  %v3964_v27 = vrot.slane %v3962_v50, 1 }
 0x24f   : > { %14216 = vmatprep.mubr.msk.bf16.mxu0 %vm609_vm2, %v2879_v32  ;;  %v17143_v32 = vld [vmem:[%s16405_s27 + $0x50] sm:$0xff]  }
 0x256   : > { %14217 = vmatmul.mubr.msk.bf16.gmra.mrb[44].mxu0 %vm609_vm2, %v2881_v44  ;;  %v3957_v44 = vsel %vm20385_vm1, %v3952_v16, %v3956_v42  ;;  %v4038_v42 = vshrl.u32 %v17195_v37, 16  ;;  %v4042_v16 = vshll.u32 %v17199_v7, 16 }
 0x257   : > { %14222 = vmatprep.mubr.msk.bf16.mxu0 %vm609_vm2, %v15922_v52  ;;  %v3966_v52 = vshrl.u32 %v17127_v23, 16 }
 0x25e   : > { %14223 = vmatmul.mubr.msk.bf16.vlgmr.msra.gmra.mrb[0].mxu0 %vm609_vm2, %v15923_v62  ;;  %v3965_v62 = vsel %vm20385_vm1, %v3960_v47, %v3964_v27 }
 0x25f   : > { %14271 = vmatpush3.bf16.msra.mxu0 %v4191_v59  ;;  %14226 = vmatprep.mubr.msk.bf16.mxu0 %vm609_vm2, %v15924_v13  ;;  %v3974_v13 = vshrl.u32 %v17139_v4, 16  ;;  %v3978_v59 = vshll.u32 %v17143_v32, 16 }
 0x260   : > { %15738 = vmatprep.subr.msk.bf16.mxu0 %vm682_vm0, %v17054_v29  ;;  %v3972_v29 = vrot.slane %v3970_v45, 1 }
 0x266   : > { %14227 = vmatmul.mubr.msk.bf16.gmra.mrb[4].mxu0 %vm609_vm2, %v15925_v63  ;;  %v17153_v63 = vld [vmem:[%s16405_s27 + $0x58] sm:$0xff]  }
 0x267   : > { %14230 = vmatprep.mubr.msk.bf16.mxu0 %vm609_vm2, %v15926_v2  ;;  %v3968_v2 = vor.u32 %v3966_v52, %v3964_v27  ;;  %v17209_v27 = vld [vmem:[%s16405_s27 + $0x98] sm:$0xff]   ;;  %v4044_v52 = vrot.slane %v4042_v16, 1 }
 0x26e   : > { %14231 = vmatmul.mubr.msk.bf16.gmra.mrb[8].mxu0 %vm609_vm2, %v15927_v12  ;;  %v3976_v12 = vor.u32 %v3974_v13, %v3972_v29  ;;  %v4050_v13 = vshll.u32 %v17209_v27, 16 }
 0x26f   : > { %14234 = vmatprep.mubr.msk.bf16.mxu0 %vm609_vm2, %v15928_v3  ;;  %v3980_v3 = vrot.slane %v3978_v59, 1 }
 0x276   : > { %14235 = vmatmul.mubr.msk.bf16.gmra.mrb[12].mxu0 %vm609_vm2, %v15929_v8  ;;  %v17157_v8 = vld [vmem:[%s16405_s27 + $0x60] sm:$0xff]  }
 0x277   : > { %14238 = vmatprep.mubr.msk.bf16.mxu0 %vm609_vm2, %v15930_v9  ;;  %v3986_v9 = vshll.u32 %v17153_v63, 16  ;;  %v3998_v36 = vshrl.u32 %v17157_v8, 16 }
 0x27e   : > { %14239 = vmatmul.mubr.msk.bf16.gmra.mrb[16].mxu0 %vm609_vm2, %v15931_v14  ;;  %v3973_v14 = vsel %vm20385_vm1, %v3968_v2, %v3972_v29  ;;  %v4046_v29 = vshrl.u32 %v17199_v7, 16 }
 0x27f   : > { %14242 = vmatprep.mubr.msk.bf16.mxu0 %vm609_vm2, %v15932_v18  ;;  %v3982_v18 = vshrl.u32 %v17143_v32, 16 }
 0x286   : > { %14243 = vmatmul.mubr.msk.bf16.gmra.mrb[20].mxu0 %vm609_vm2, %v15933_v19  ;;  %v3981_v19 = vsel %vm20385_vm1, %v3976_v12, %v3980_v3  ;;  %v4054_v12 = vshrl.u32 %v17209_v27, 16 }
 0x287   : > { %14246 = vmatprep.mubr.msk.bf16.mxu0 %vm609_vm2, %v15934_v20  ;;  %v3990_v20 = vshrl.u32 %v17153_v63, 16 }
 0x28e   : > { %14247 = vmatmul.mubr.msk.bf16.gmra.mrb[24].mxu0 %vm609_vm2, %v15935_v24  ;;  %v3994_v24 = vshll.u32 %v17157_v8, 16 }
 0x28f   : > { %14250 = vmatprep.mubr.msk.bf16.mxu0 %vm609_vm2, %v15936_v26  ;;  %v3988_v26 = vrot.slane %v3986_v9, 1  ;;  %v4052_v9 = vrot.slane %v4050_v13, 1 }
 0x296   : > { %14251 = vmatmul.mubr.msk.bf16.gmra.mrb[28].mxu0 %vm609_vm2, %v15937_v21  ;;  %v17167_v21 = vld [vmem:[%s16405_s27 + $0x68] sm:$0xff]  }
 0x297   : > { %14254 = vmatprep.mubr.msk.bf16.mxu0 %vm609_vm2, %v15938_v30  ;;  %v3984_v30 = vor.u32 %v3982_v18, %v3980_v3  ;;  %v4048_v18 = vor.u32 %v4046_v29, %v4044_v52 }
 0x29e   : > { %14255 = vmatmul.mubr.msk.bf16.gmra.mrb[32].mxu0 %vm609_vm2, %v15939_v31  ;;  %v3992_v31 = vor.u32 %v3990_v20, %v3988_v26 }
 0x29f   : > { %14258 = vmatprep.mubr.msk.bf16.mxu0 %vm609_vm2, %v15940_v34  ;;  %v3996_v34 = vrot.slane %v3994_v24, 1  ;;  %v17227_v24 = vld [vmem:[%s16405_s27 + $0xb0] sm:$0xff]  }
 0x2a1   : > { %v3997_v48 = vsel %vm20385_vm1, %v3992_v31, %v3996_v34  ;;  %v4000_v54 = vor.u32 %v3998_v36, %v3996_v34 }
 0x2a6   : > { %14259 = vmatmul.mubr.msk.bf16.gmra.mrb[36].mxu0 %vm609_vm2, %v15941_v46  ;;  %v4002_v46 = vshll.u32 %v17167_v21, 16 }
 0x2a7   : > { %14262 = vmatprep.mubr.msk.bf16.mxu0 %vm609_vm2, %v15942_v33  ;;  %v3989_v33 = vsel %vm20385_vm1, %v3984_v30, %v3988_v26  ;;  %v4053_v30 = vsel %vm20385_vm1, %v4048_v18, %v4052_v9 }
 0x2a8   : > { %v4004_v0 = vrot.slane %v4002_v46, 1 }
 0x2aa   : > { %v4005_v10 = vsel %vm20385_vm1, %v4000_v54, %v4004_v0 }
 0x2ae   : > { %14263 = vmatmul.mubr.msk.bf16.gmra.mrb[40].mxu0 %vm609_vm2, %v15943_v51  ;;  %v4006_v51 = vshrl.u32 %v17167_v21, 16 }
 0x2af   : > { %14266 = vmatprep.mubr.msk.bf16.mxu0 %vm609_vm2, %v15944_v58  ;;  %v4010_v58 = vshll.u32 %v17171_v28, 16 }
 0x2b0   : > { %v4008_v40 = vor.u32 %v4006_v51, %v4004_v0  ;;  %v17242_v51 = vld [vmem:[%s20382_s3 + $0x40] sm:$0xff]  }
 0x2b1   : > { %v4012_v11 = vrot.slane %v4010_v58, 1  ;;  %14946 = vmatprep.subr.bf16.mxu1 %v17242_v51 }
 0x2b2   : > { %14954 = vmatpush3.bf16.msra.mxu1 %v17242_v51 }
 0x2b3   : > { %v4013_v5 = vsel %vm20385_vm1, %v4008_v40, %v4012_v11  ;;  %v17246_v40 = vld [vmem:[%s16405_s27 + $0xc0] sm:$0xff]  }
 0x2b4   : > { %v4094_v16 = vshrl.u32 %v17246_v40, 16 }
 0x2b6   : > { %14267 = vmatmul.mubr.msk.bf16.gmra.mrb[44].mxu0 %vm609_vm2, %v15945_v60  ;;  %v17185_v60 = vld [vmem:[%s16405_s27 + $0x80] sm:$0xff]  }
 0x2b7   : > { %14272 = vmatprep.mubr.msk.bf16.mxu0 %vm609_vm2, %v3933_v1  ;;  %v4014_v1 = vshrl.u32 %v17171_v28, 16  ;;  %v4026_v22 = vshll.u32 %v17185_v60, 16  ;;  %v4030_v41 = vshrl.u32 %v17185_v60, 16 }
 0x2b9   : > { %v4016_v49 = vor.u32 %v4014_v1, %v4012_v11  ;;  %v17252_v11 = vld [vmem:[%s20382_s3 + $0x48] sm:$0xff]   ;;  %v4078_v1 = vshrl.u32 %v17227_v24, 16 }
 0x2ba   : > { %14947 = vmatprep.subr.bf16.mxu1 %v17252_v11 }
 0x2bb   : > { %14955 = vmatpush3.bf16.msra.mxu1 %v17252_v11 }
 0x2be   : > { %14273 = vmatmul.mubr.msk.bf16.vlgmr.msra.gmra.mrb[0].mxu0 %vm609_vm2, %v3941_v61  ;;  %v4028_v61 = vrot.slane %v4026_v22, 1  ;;  %v4090_v22 = vshll.u32 %v17246_v40, 16 }
 0x2bf   : > { %14321 = vmatpush3.bf16.msra.mxu0 %v4594_v35  ;;  %14276 = vmatprep.mubr.msk.bf16.mxu0 %vm609_vm2, %v3949_v39  ;;  %v4034_v35 = vshll.u32 %v17195_v37, 16  ;;  %v4021_v39 = vsel %vm20385_vm1, %v4016_v49, %v4020_v15  ;;  %v15974_v15 = vld [vmem:[%s20382_s3 + $0x50] sm:$0xff]  }
 0x2c0   : > { %v4029_v50 = vsel %vm20385_vm1, %v4024_v25, %v4028_v61  ;;  %v4032_v45 = vor.u32 %v4030_v41, %v4028_v61  ;;  %14370 = vmatprep.subr.bf16.mxu0 %v17242_v51  ;;  %v17269_v25 = vld [vmem:[%s16405_s27 + $0xc8] sm:$0xff]   ;;  %14948 = vmatprep.subr.bf16.mxu1 %v15974_v15  ;;  %v17273_v41 = vld [vmem:[%s16405_s27 + $0xd0] sm:$0xff]  }
 0x2c1   : > { %v4036_v47 = vrot.slane %v4034_v35, 1  ;;  %14956 = vmatpush3.bf16.msra.mxu1 %v15974_v15 }
 0x2c3   : > { %v4037_v59 = vsel %vm20385_vm1, %v4032_v45, %v4036_v47  ;;  %v4102_v45 = vshrl.u32 %v17269_v25, 16 }
 0x2c6   : > { %14277 = vmatmul.mubr.msk.bf16.gmra.mrb[4].mxu0 %vm609_vm2, %v3957_v44  ;;  %v4040_v44 = vor.u32 %v4038_v42, %v4036_v47 }
 0x2c7   : > { %14280 = vmatprep.mubr.msk.bf16.mxu0 %vm609_vm2, %v3965_v62  ;;  %v17213_v62 = vld [vmem:[%s16405_s27 + $0xa0] sm:$0xff]  }
 0x2c8   : > { %v4045_v2 = vsel %vm20385_vm1, %v4040_v44, %v4044_v52  ;;  %v4058_v3 = vshll.u32 %v17213_v62, 16  ;;  %v4062_v31 = vshrl.u32 %v17213_v62, 16  ;;  %v4106_v44 = vshll.u32 %v17273_v41, 16 }
 0x2ca   : > { %v4060_v20 = vrot.slane %v4058_v3, 1 }
 0x2cc   : > { %v4064_v58 = vor.u32 %v4062_v31, %v4060_v20 }
 0x2ce   : > { %14281 = vmatmul.mubr.msk.bf16.gmra.mrb[8].mxu0 %vm609_vm2, %v3973_v14  ;;  %v17223_v14 = vld [vmem:[%s16405_s27 + $0xa8] sm:$0xff]  }
 0x2cf   : > { %14284 = vmatprep.mubr.msk.bf16.mxu0 %vm609_vm2, %v3981_v19  ;;  %v4056_v19 = vor.u32 %v4054_v12, %v4052_v9  ;;  %v4066_v26 = vshll.u32 %v17223_v14, 16  ;;  %v4070_v46 = vshrl.u32 %v17223_v14, 16  ;;  %v4466_v12 = vld [vmem:[%s16405_s27 + $0x18] sm:$0xe]  ;;  %v4110_v9 = vshrl.u32 %v17273_v41, 16 }
 0x2d1   : > { %v4061_v34 = vsel %vm20385_vm1, %v4056_v19, %v4060_v20  ;;  %v4068_v36 = vrot.slane %v4066_v26, 1  ;;  %v12477_v20 = vcombine.low %v4466_v12, %v17094_v38  ;;  %v4477_v38 = vrot.slane %v17113_v56, 1  ;;  %v15978_v12 = vld [vmem:[%s20382_s3 + $0x70] sm:$0xff]  }
 0x2d3   : > { %v4072_v0 = vor.u32 %v4070_v46, %v4068_v36  ;;  %v4472_v31 = vrot.slane %v12477_v20, 1 }
 0x2d6   : > { %14285 = vmatmul.mubr.msk.bf16.gmra.mrb[12].mxu0 %vm609_vm2, %v3989_v33  ;;  %v4074_v33 = vshll.u32 %v17227_v24, 16 }
 0x2d7   : > { %14288 = vmatprep.mubr.msk.bf16.mxu0 %vm609_vm2, %v3997_v48  ;;  %v17237_v48 = vld [vmem:[%s16405_s27 + $0xb8] sm:$0xff]  }
 0x2d8   : > { %v4076_v54 = vrot.slane %v4074_v33, 1  ;;  %v4082_v57 = vshll.u32 %v17237_v48, 16  ;;  %v4086_v17 = vshrl.u32 %v17237_v48, 16 }
 0x2da   : > { %v4084_v49 = vrot.slane %v4082_v57, 1  ;;  %v4080_v61 = vor.u32 %v4078_v1, %v4076_v54  ;;  %v4483_v57 = vrot.slane %v17139_v4, 1  ;;  %v4491_v4 = vrot.slane %v17167_v21, 1 }
 0x2db   : > { %v4499_v21 = vrot.slane %v17195_v37, 1  ;;  %v4507_v37 = vrot.slane %v17223_v14, 1  ;;  %v4515_v14 = vrot.slane %v17269_v25, 1 }
 0x2dc   : > { %v4088_v35 = vor.u32 %v4086_v17, %v4084_v49  ;;  %v4085_v42 = vsel %vm20385_vm1, %v4080_v61, %v4084_v49 }
 0x2de   : > { %14289 = vmatmul.mubr.msk.bf16.gmra.mrb[16].mxu0 %vm609_vm2, %v4005_v10  ;;  %v4069_v10 = vsel %vm20385_vm1, %v4064_v58, %v4068_v36  ;;  %v4475_v36 = vrot.slane %v17109_v55, 1 }
 0x2df   : > { %14292 = vmatprep.mubr.msk.bf16.mxu0 %vm609_vm2, %v4013_v5  ;;  %v4077_v5 = vsel %vm20385_vm1, %v4072_v0, %v4076_v54  ;;  %v4481_v54 = vrot.slane %v17127_v23, 1 }
 0x2e0   : > { %v4478_v0 = vsel %vm1193_vm3, %v4475_v36, %v4477_v38 }
 0x2e1   : > { %v4484_v23 = vsel %vm1193_vm3, %v4481_v54, %v4483_v57 }
 0x2e6   : > { %14293 = vmatmul.mubr.msk.bf16.gmra.mrb[20].mxu0 %vm609_vm2, %v4021_v39  ;;  %v4092_v39 = vrot.slane %v4090_v22, 1 }
 0x2e7   : > { %14296 = vmatprep.mubr.msk.bf16.mxu0 %vm609_vm2, %v4029_v50  ;;  %v4098_v50 = vshll.u32 %v17269_v25, 16 }
 0x2e8   : > { %v4093_v47 = vsel %vm20385_vm1, %v4088_v35, %v4092_v39  ;;  %v4096_v13 = vor.u32 %v4094_v16, %v4092_v39 }
 0x2e9   : > { %v4100_v52 = vrot.slane %v4098_v50, 1 }
 0x2eb   : > { %v4104_v29 = vor.u32 %v4102_v45, %v4100_v52  ;;  %v4101_v3 = vsel %vm20385_vm1, %v4096_v13, %v4100_v52  ;;  %v15976_v13 = vld [vmem:[%s20382_s3 + $0x60] sm:$0xff]  }
 0x2ee   : > { %14297 = vmatmul.mubr.msk.bf16.gmra.mrb[24].mxu0 %vm609_vm2, %v4037_v59  ;;  %v17284_v59 = vld [vmem:[%s16405_s27 + $0xd8] ss:$0 sps:$4 sm:$0x11]  }
 0x2ef   : > { %14300 = vmatprep.mubr.msk.bf16.mxu0 %vm609_vm2, %v4045_v2  ;;  %v4108_v2 = vrot.slane %v4106_v44, 1  ;;  %v4114_v18 = vshll.u32 %v17284_v59, 16 }
 0x2f1   : > { %v4109_v19 = vsel %vm20385_vm1, %v4104_v29, %v4108_v2  ;;  %v4112_v26 = vor.u32 %v4110_v9, %v4108_v2  ;;  %v15977_v29 = vld [vmem:[%s20382_s3 + $0x68] sm:$0xff]  }
 0x2f6   : > { %14301 = vmatmul.mubr.msk.bf16.gmra.mrb[28].mxu0 %vm609_vm2, %v4053_v30  ;;  %v4116_v30 = vrot.slane %v4114_v18, 1 }
 0x2f7   : > { %14304 = vmatprep.mubr.msk.bf16.mxu0 %vm609_vm2, %v4061_v34  ;;  %v4473_v34 = vrot.slane %v17102_v43, 1  ;;  %v4479_v43 = vrot.slane %v17123_v6, 1  ;;  %v4485_v6 = vrot.slane %v17143_v32, 1  ;;  %v4493_v32 = vrot.slane %v17171_v28, 1 }
 0x2f8   : > { %v4117_v46 = vsel %vm20385_vm1, %v4112_v26, %v4116_v30  ;;  %v4501_v28 = vrot.slane %v17199_v7, 1  ;;  %v4509_v7 = vrot.slane %v17227_v24, 1  ;;  %v4517_v24 = vrot.slane %v17273_v41, 1  ;;  %v15979_v26 = vld [vmem:[%s20382_s3 + $0x78] sm:$0xff]  }
 0x2f9   : > { %v4474_v33 = vsel %vm1193_vm3, %v4472_v31, %v4473_v34  ;;  %v4476_v58 = vsel %vm1193_vm3, %v4473_v34, %v4475_v36  ;;  %v4480_v55 = vsel %vm1193_vm3, %v4477_v38, %v4479_v43  ;;  %v4482_v56 = vsel %vm1193_vm3, %v4479_v43, %v4481_v54 }
 0x2fa   : > { %v4494_v22 = vsel %vm1193_vm3, %v4491_v4, %v4493_v32  ;;  %v4502_v35 = vsel %vm1193_vm3, %v4499_v21, %v4501_v28  ;;  %v4510_v16 = vsel %vm1193_vm3, %v4507_v37, %v4509_v7  ;;  %v4518_v52 = vsel %vm1193_vm3, %v4515_v14, %v4517_v24 }
 0x2fb   : > { %v4972_v41 = vlaneseq }
 0x2fe   : > { %14305 = vmatmul.mubr.msk.bf16.gmra.mrb[32].mxu0 %vm609_vm2, %v4069_v10  ;;  %v4489_v10 = vrot.slane %v17157_v8, 1  ;;  %v4497_v8 = vrot.slane %v17185_v60, 1  ;;  %v4505_v60 = vrot.slane %v17213_v62, 1  ;;  %v4513_v62 = vrot.slane %v17246_v40, 1  ;;  %v15975_v40 = vld [vmem:[%s20382_s3 + $0x58] sm:$0xff]  }
 0x2ff   : > { %14308 = vmatprep.mubr.msk.bf16.mxu0 %vm609_vm2, %v4077_v5  ;;  %14949 = vmatprep.subr.bf16.mxu1 %v15975_v40 }
 0x300   : > { %v4492_v17 = vsel %vm1193_vm3, %v4489_v10, %v4491_v4  ;;  %v4500_v61 = vsel %vm1193_vm3, %v4497_v8, %v4499_v21  ;;  %v4516_v44 = vsel %vm1193_vm3, %v4513_v62, %v4515_v14  ;;  %14957 = vmatpush3.bf16.msra.mxu1 %v15975_v40 }
 0x301   : > { %14950 = vmatprep.subr.bf16.mxu1 %v15976_v13 }
 0x304   : > { %14958 = vmatpush3.bf16.msra.mxu1 %v15976_v13 }
 0x305   : > { %14951 = vmatprep.subr.bf16.mxu1 %v15977_v29 }
 0x306   : > { %14309 = vmatmul.mubr.msk.bf16.gmra.mrb[36].mxu0 %vm609_vm2, %v4085_v42  ;;  %v4508_v42 = vsel %vm1193_vm3, %v4505_v60, %v4507_v37 }
 0x307   : > { %14312 = vmatprep.mubr.msk.bf16.mxu0 %vm609_vm2, %v4093_v47 }
 0x308   : > { %14959 = vmatpush3.bf16.msra.mxu1 %v15977_v29 }
 0x309   : > { %14952 = vmatprep.subr.bf16.mxu1 %v15978_v12 }
 0x30c   : > { %14960 = vmatpush3.bf16.msra.mxu1 %v15978_v12 }
 0x30d   : > { %14953 = vmatprep.subr.bf16.mxu1 %v15979_v26 }
 0x30e   : > { %14313 = vmatmul.mubr.msk.bf16.gmra.mrb[40].mxu0 %vm609_vm2, %v4101_v3  ;;  %v16351_v3 = vmov 0  }
 0x30f   : > { %14316 = vmatprep.mubr.msk.bf16.mxu0 %vm609_vm2, %v4109_v19  ;;  %226 = vst [vmem:[#allocation2] sm:$0xf] %v16351_v3  ;;  %227 = vst [vmem:[#allocation2 + $0x4] sm:$0xf] %v16351_v3 }
 0x310   : > { %228 = vst [vmem:[#allocation2 + $0x8] sm:$0xf] %v16351_v3  ;;  %229 = vst [vmem:[#allocation2 + $0xc] sm:$0xf] %v16351_v3  ;;  %14961 = vmatpush3.bf16.msra.mxu1 %v15979_v26 }
 0x311   : > { %230 = vst [vmem:[#allocation2 + $0xd0] sm:$0xf] %v16351_v3  ;;  %231 = vst [vmem:[#allocation2 + $0xd4] sm:$0xf] %v16351_v3 }
 0x312   : > { %232 = vst [vmem:[#allocation2 + $0xd8] sm:$0xf] %v16351_v3  ;;  %233 = vst [vmem:[#allocation2 + $0xdc] sm:$0xf] %v16351_v3 }
 0x316   : > { %14317 = vmatmul.mubr.msk.bf16.gmra.mrb[44].mxu0 %vm609_vm2, %v4117_v46 }
 0x317   : > { %14322 = vmatprep.mubr.msk.bf16.mxu0 %vm609_vm2, %v4474_v33  ;;  %v17409_v54 = vld [vmem:[#allocation2 + $0x8] sm:$0xf] }
 0x31e   : > { %14323 = vmatmul.mubr.msk.bf16.vlgmr.msra.gmra.mrb[0].mxu0 %vm609_vm2, %v4476_v58 }
 0x31f   : > { %14326 = vmatprep.mubr.msk.bf16.mxu0 %vm609_vm2, %v4478_v0  ;;  %14371 = vmatpush3.bf16.msra.mxu0 %v17242_v51  ;;  %v4486_v51 = vsel %vm1193_vm3, %v4483_v57, %v4485_v6  ;;  %v17406_v0 = vld [vmem:[#allocation2 + $0x4] sm:$0xf] }
 0x320   : > { %14372 = vmatprep.subr.bf16.mxu0 %v17252_v11 }
 0x323   : > { %14373 = vmatpush3.bf16.msra.mxu0 %v17252_v11  ;;  %v4487_v11 = vrot.slane %v17153_v63, 1  ;;  %v4495_v63 = vrot.slane %v17181_v53, 1  ;;  %v4503_v53 = vrot.slane %v17209_v27, 1  ;;  %v4511_v27 = vrot.slane %v17237_v48, 1 }
 0x324   : > { %14374 = vmatprep.subr.bf16.mxu0 %v15974_v15  ;;  %v4519_v48 = vrot.slane %v17284_v59, 1  ;;  %v17377_v59 = vshrl.u32 %v4972_v41, 7 }
 0x325   : > { %v4488_v1 = vsel %vm1193_vm3, %v4485_v6, %v4487_v11  ;;  %v4490_v5 = vsel %vm1193_vm3, %v4487_v11, %v4489_v10  ;;  %v4498_v49 = vsel %vm1193_vm3, %v4495_v63, %v4497_v8  ;;  %v4504_v39 = vsel %vm1193_vm3, %v4501_v28, %v4503_v53 }
 0x326   : > { %14327 = vmatmul.mubr.msk.bf16.gmra.mrb[4].mxu0 %vm609_vm2, %v4480_v55  ;;  %v4506_v50 = vsel %vm1193_vm3, %v4503_v53, %v4505_v60  ;;  %v4512_v47 = vsel %vm1193_vm3, %v4509_v7, %v4511_v27  ;;  %v4514_v45 = vsel %vm1193_vm3, %v4511_v27, %v4513_v62  ;;  %v4520_v25 = vsel %vm1193_vm3, %v4517_v24, %v4519_v48 }
 0x327   : > { %14330 = vmatprep.mubr.msk.bf16.mxu0 %vm609_vm2, %v4482_v56  ;;  %14375 = vmatpush3.bf16.msra.mxu0 %v15974_v15  ;;  %v4496_v15 = vsel %vm1193_vm3, %v4493_v32, %v4495_v63  ;;  %v4975_v2 = vadd.s32 16, %v17377_v59  ;;  %v4976_v9 = vadd.s32 24, %v17377_v59  ;;  %v4974_v20 = vadd.s32 8, %v17377_v59 }
 0x328   : > { %14376 = vmatprep.subr.bf16.mxu0 %v15975_v40  ;;  %v17395_v30 = vmul.u32.u64.low 2863311531, %v17377_v59  ;;  %v17396_v31 = vmul.u32.u64.high 2863311531, %v17377_v59, %v17395_v30  ;;  %v4979_v34 = vadd.s32 48, %v17377_v59  ;;  %v4977_v36 = vadd.s32 32, %v17377_v59 }
 0x329   : > { %v17387_v18 = vmul.u32.u64.low 2863311531, %v4975_v2  ;;  %v17388_v19 = vmul.u32.u64.high 2863311531, %v4975_v2, %v17387_v18  ;;  %v17399_v46 = vmul.u32.u64.low 2863311531, %v4976_v9  ;;  %v17400_v33 = vmul.u32.u64.high 2863311531, %v4976_v9, %v17399_v46 }
 0x32a   : > { %v17403_v38 = vmul.u32.u64.low 2863311531, %v4974_v20  ;;  %v17404_v58 = vmul.u32.u64.high 2863311531, %v4974_v20, %v17403_v38  ;;  %v4980_v43 = vadd.s32 56, %v17377_v59  ;;  %v17459_v62 = vadd.s32 72, %v17377_v59 }
 0x32b   : > { %14377 = vmatpush3.bf16.msra.mxu0 %v15975_v40  ;;  %v17411_v55 = vmul.u32.u64.low 2863311531, %v4979_v34  ;;  %v17412_v56 = vmul.u32.u64.high 2863311531, %v4979_v34, %v17411_v55  ;;  %v17414_v57 = vmul.u32.u64.low 2863311531, %v4977_v36  ;;  %v17415_v6 = vmul.u32.u64.high 2863311531, %v4977_v36, %v17414_v57  ;;  %v18486_v38 = vld [vmem:[%s20381_s2] ss:$0 sm:$0xff] }
 0x32c   : > { %14378 = vmatprep.subr.bf16.mxu0 %v15976_v13  ;;  %v17420_v11 = vmul.u32.u64.low 2863311531, %v4980_v43  ;;  %v17421_v10 = vmul.u32.u64.high 2863311531, %v4980_v43, %v17420_v11  ;;  %v5060_v4 = vshrl.u32 %v17400_v33, 4 }
 0x32d   : > { %v5093_v21 = vshrl.u32 %v17412_v56, 4  ;;  %v20612_v11 = vmov 0 }
 0x32e   : > { %14331 = vmatmul.mubr.msk.bf16.gmra.mrb[8].mxu0 %vm609_vm2, %v4484_v23  ;;  %v12567_v23 = vcombine.low %v17406_v0, %v17409_v54  ;;  %v5061_v28 = vmul.u32 24, %v5060_v4 }
 0x32f   : > { %14334 = vmatprep.mubr.msk.bf16.mxu0 %vm609_vm2, %v4486_v51  ;;  %14379 = vmatpush3.bf16.msra.mxu0 %v15976_v13  ;;  %v5049_v51 = vshrl.u32 %v17388_v19, 4  ;;  %v5094_v27 = vmul.u32 24, %v5093_v21 }
 0x330   : > { %14380 = vmatprep.subr.bf16.mxu0 %v15977_v29 }
 0x331   : > { %v5050_v32 = vmul.u32 24, %v5049_v51  ;;  %v17479_v41 = vsub.s32 %v4979_v34, %v5094_v27  ;;  %v17522_v34 = vadd.s32 96, %v17377_v59 }
 0x333   : > { %14381 = vmatpush3.bf16.msra.mxu0 %v15977_v29  ;;  %v17482_v13 = vmul.u32.u64.low 2863311531, %v17459_v62  ;;  %v17483_v29 = vmul.u32.u64.high 2863311531, %v17459_v62, %v17482_v13  ;;  %vm5555_vm14 = vcmp.ne.s32.totalorder %v17479_v41, 0  ;;  %vm5603_vm15 = vcmp.lt.s32.totalorder %v17479_v41, 0 }
 0x334   : > { %14382 = vmatprep.subr.bf16.mxu0 %v15978_v12 }
 0x336   : > { %14335 = vmatmul.mubr.msk.bf16.gmra.mrb[12].mxu0 %vm609_vm2, %v4488_v1  ;;  %v17424_v1 = vadd.s32 40, %v17377_v59 }
 0x337   : > { %14338 = vmatprep.mubr.msk.bf16.mxu0 %vm609_vm2, %v4490_v5  ;;  %14383 = vmatpush3.bf16.msra.mxu0 %v15978_v12  ;;  %v5027_v5 = vshrl.u32 %v17396_v31, 4 }
 0x338   : > { %14384 = vmatprep.subr.bf16.mxu0 %v15979_v26  ;;  %v17433_v63 = vmul.u32.u64.low 2863311531, %v17424_v1  ;;  %v17434_v8 = vmul.u32.u64.high 2863311531, %v17424_v1, %v17433_v63 }
 0x33a   : > { %v5082_v48 = vshrl.u32 %v17434_v8, 4  ;;  %v17771_v8 = vadd.s32 160, %v17377_v59 }
 0x33b   : > { %14385 = vmatpush3.bf16.msra.mxu0 %v15979_v26 }
 0x33e   : > { %14339 = vmatmul.mubr.msk.bf16.gmra.mrb[16].mxu0 %vm609_vm2, %v4492_v17  ;;  %v5038_v17 = vshrl.u32 %v17404_v58, 4 }
 0x33f   : > { %14342 = vmatprep.mubr.msk.bf16.mxu0 %vm609_vm2, %v4494_v22  ;;  %v17430_v22 = vadd.s32 80, %v17377_v59 }
 0x340   : > { %v5039_v53 = vmul.u32 24, %v5038_v17  ;;  %v17583_v17 = vadd.s32 120, %v17377_v59 }
 0x342   : > { %v17468_v24 = vsub.s32 %v4974_v20, %v5039_v53  ;;  %v5083_v20 = vmul.u32 24, %v5082_v48 }
 0x344   : > { %vm5550_vm10 = vcmp.ne.s32.totalorder %v17468_v24, 0  ;;  %vm5598_vm12 = vcmp.lt.s32.totalorder %v17468_v24, 0  ;;  %v17533_v33 = vadd.s32 24, %v17468_v24 }
 0x346   : > { %14343 = vmatmul.mubr.msk.bf16.gmra.mrb[20].mxu0 %vm609_vm2, %v4496_v15  ;;  %v17437_v15 = vadd.s32 64, %v17377_v59 }
 0x347   : > { %14346 = vmatprep.mubr.msk.bf16.mxu0 %vm609_vm2, %v4498_v49  ;;  %v5028_v49 = vmul.u32 24, %v5027_v5  ;;  %v17571_v5 = vmul.u32.u64.low 2863311531, %v17522_v34  ;;  %v17572_v4 = vmul.u32.u64.high 2863311531, %v17522_v34, %v17571_v5 }
 0x348   : > { %v17449_v37 = vmul.u32.u64.low 2863311531, %v17437_v15  ;;  %v17450_v7 = vmul.u32.u64.high 2863311531, %v17437_v15, %v17449_v37  ;;  %v20626_v5 = vmov 0 }
 0x34a   : > { %v5115_v26 = vshrl.u32 %v17450_v7, 4  ;;  %v17625_v7 = vmul.u32.u64.low 2863311531, %v17583_v17  ;;  %v17626_v27 = vmul.u32.u64.high 2863311531, %v17583_v17, %v17625_v7 }
 0x34e   : > { %14347 = vmatmul.mubr.msk.bf16.gmra.mrb[24].mxu0 %vm609_vm2, %v4500_v61  ;;  %v5071_v61 = vshrl.u32 %v17415_v6, 4  ;;  %v17561_v6 = vsub.s32 %v17424_v1, %v5083_v20  ;;  %v17801_v1 = vadd.s32 168, %v17377_v59 }
 0x34f   : > { %14350 = vmatprep.mubr.msk.bf16.mxu0 %vm609_vm2, %v4502_v35  ;;  %v17441_v35 = vsub.s32 %v4975_v2, %v5050_v32 }
 0x350   : > { %20611 = vst [vmem:[#allocation5_spill] sm:$0xff] %v17561_v6  ;;  %v17622_v37 = vadd.s32 24, %v17561_v6 }
 0x351   : > { %vm5551_vm4 = vcmp.ne.s32.totalorder %v17441_v35, 0  ;;  %vm5599_vm5 = vcmp.lt.s32.totalorder %v17441_v35, 0  ;;  %v17466_v14 = vadd.s32 24, %v17441_v35 }
 0x352   : > { %vm17502_vm11 = vmand %vm5599_vm5, %vm5551_vm4  ;;  %20618 = vst [vmem:[#allocation8_spill] sm:$0xff] %v17622_v37 }
 0x353   : > { %vm17544_vm4 = vmand %vm5598_vm12, %vm5550_vm10  ;;  %vm5554_vm10 = vcmp.ne.s32.totalorder %v17561_v6, 0  ;;  %vm5602_vm12 = vcmp.lt.s32.totalorder %v17561_v6, 0 }
 0x354   : > { %vm17555_vm5 = vmand %vm5603_vm15, %vm5555_vm14  ;;  %v20800_v46 = vsel %vm17544_vm4, %v17533_v33, %v17468_v24 }
 0x356   : > { %14351 = vmatmul.mubr.msk.bf16.gmra.mrb[28].mxu0 %vm609_vm2, %v4504_v39  ;;  %v17444_v60 = vmul.u32.u64.low 2863311531, %v17430_v22  ;;  %v17445_v39 = vmul.u32.u64.high 2863311531, %v17430_v22, %v17444_v60 }
 0x357   : > { %14354 = vmatprep.mubr.msk.bf16.mxu0 %vm609_vm2, %v4506_v50  ;;  %v5104_v50 = vshrl.u32 %v17421_v10, 4  ;;  %v5126_v10 = vshrl.u32 %v17483_v29, 4  ;;  %v17659_v29 = vld [vmem:[#allocation2 + $0xc] sm:$0xf] }
 0x358   : > { %v5137_v3 = vshrl.u32 %v17445_v39, 4  ;;  %20625 = vst [vmem:[#allocation13_spill] sm:$0xff] %v17659_v29 }
 0x359   : > { %v5127_v39 = vmul.u32 24, %v5126_v10 }
 0x35b   : > { %v17657_v13 = vsub.s32 %v17459_v62, %v5127_v39  ;;  %v17701_v39 = vadd.s32 176, %v17377_v59 }
 0x35d   : > { %20624 = vst [vmem:[#allocation12_spill] sm:$0xff] %v17657_v13  ;;  %vm5558_vm1 = vcmp.ne.s32.totalorder %v17657_v13, 0 }
 0x35e   : > { %14355 = vmatmul.mubr.msk.bf16.gmra.mrb[32].mxu0 %vm609_vm2, %v4508_v42  ;;  %v17453_v42 = vadd.s32 88, %v17377_v59 }
 0x35f   : > { %14358 = vmatprep.mubr.msk.bf16.mxu0 %vm609_vm2, %v4510_v16  ;;  %v17456_v16 = vsub.s32 %v17377_v59, %v5028_v49 }
 0x361   : > { %vm5549_vm6 = vcmp.ne.s32.totalorder %v17456_v16, 0  ;;  %vm5597_vm7 = vcmp.lt.s32.totalorder %v17456_v16, 0  ;;  %v17487_v2 = vadd.s32 24, %v17456_v16 }
 0x362   : > { %vm17512_vm13 = vmand %vm5597_vm7, %vm5549_vm6 }
 0x366   : > { %14359 = vmatmul.mubr.msk.bf16.gmra.mrb[36].mxu0 %vm609_vm2, %v4512_v47  ;;  %v17461_v47 = vsub.s32 %v4976_v9, %v5061_v28  ;;  %v17496_v9 = vadd.s32 112, %v17377_v59  ;;  %v17741_v28 = vadd.s32 24, %v17657_v13 }
 0x367   : > { %14362 = vmatprep.mubr.msk.bf16.mxu0 %vm609_vm2, %v4514_v45  ;;  %v5072_v45 = vmul.u32 24, %v5071_v61 }
 0x368   : > { %vm5552_vm8 = vcmp.ne.s32.totalorder %v17461_v47, 0  ;;  %vm5600_vm9 = vcmp.lt.s32.totalorder %v17461_v47, 0  ;;  %v17517_v31 = vadd.s32 24, %v17461_v47  ;;  %20638 = vst [vmem:[#allocation20_spill] sm:$0xff] %v17741_v28 }
 0x369   : > { %v17490_v12 = vsub.s32 %v4977_v36, %v5072_v45  ;;  %vm17528_vm0 = vmand %vm5600_vm9, %vm5552_vm8  ;;  %v17536_v36 = vadd.s32 24, %v17479_v41  ;;  %v17552_v55 = vmul.u32.u64.low 2863311531, %v17496_v9  ;;  %v17553_v56 = vmul.u32.u64.high 2863311531, %v17496_v9, %v17552_v55 }
 0x36a   : > { %v17629_v45 = vadd.s32 144, %v17377_v59  ;;  %v17672_v55 = vadd.s32 152, %v17377_v59 }
 0x36b   : > { %20599 = vst [vmem:[#allocation3_spill] sm:$0xff] %v17490_v12  ;;  %vm5601_vm3 = vcmp.lt.s32.totalorder %v17490_v12, 0  ;;  %v17549_v58 = vadd.s32 24, %v17490_v12 }
 0x36d   : > { %20608 = vst [vmem:[#allocation4_spill] sm:$0xff] %v17549_v58 }
 0x36e   : > { %14363 = vmatmul.mubr.msk.bf16.gmra.mrb[40].mxu0 %vm609_vm2, %v4516_v44  ;;  %v15987_v44 = vld [vmem:[%s20382_s3] sm:$0xff]  }
 0x36f   : > { %14366 = vmatprep.mubr.msk.bf16.mxu0 %vm609_vm2, %v4518_v52  ;;  %v5105_v52 = vmul.u32 24, %v5104_v50  ;;  %14434 = vmatprep.subr.bf16.mxu1 %v15987_v44  ;;  %v17619_v50 = vadd.s32 104, %v17377_v59  ;;  %v5181_v44 = vshrl.u32 %v17553_v56, 4 }
 0x371   : > { %v17507_v19 = vsub.s32 %v4980_v43, %v5105_v52  ;;  %v5138_v43 = vmul.u32 24, %v5137_v3  ;;  %v17638_v52 = vadd.s32 128, %v17377_v59  ;;  %v5159_v3 = vshrl.u32 %v17572_v4, 4 }
 0x372   : > { %v5182_v56 = vmul.u32 24, %v5181_v44  ;;  %v20630_v44 = vmov 0 }
 0x373   : > { %vm5556_vm6 = vcmp.ne.s32.totalorder %v17507_v19, 0  ;;  %vm5604_vm8 = vcmp.lt.s32.totalorder %v17507_v19, 0  ;;  %v17594_v49 = vadd.s32 24, %v17507_v19  ;;  %v17597_v21 = vsub.s32 %v17430_v22, %v5138_v43 }
 0x374   : > { %vm17609_vm9 = vmand %vm5604_vm8, %vm5556_vm6  ;;  %v5160_v7 = vmul.u32 24, %v5159_v3  ;;  %v17725_v10 = vsub.s32 %v17496_v9, %v5182_v56  ;;  %v17744_v3 = vmul.u32.u64.low 2863311531, %v17701_v39  ;;  %v17745_v9 = vmul.u32.u64.high 2863311531, %v17701_v39, %v17744_v3 }
 0x375   : > { %20614 = vst [vmem:[#allocation6_spill] sm:$0xff] %v17597_v21  ;;  %vm5559_vm14 = vcmp.ne.s32.totalorder %v17597_v21, 0  ;;  %vm5607_vm15 = vcmp.lt.s32.totalorder %v17597_v21, 0  ;;  %v17642_v48 = vadd.s32 24, %v17597_v21  ;;  %v20639_v56 = vmov 0 }
 0x376   : > { %14367 = vmatmul.mubr.msk.bf16.gmra.mrb[44].mxu0 %vm609_vm2, %v4520_v25  ;;  %v17475_v40 = vmul.u32.u64.low 2863311531, %v17453_v42  ;;  %v17476_v25 = vmul.u32.u64.high 2863311531, %v17453_v42, %v17475_v40  ;;  %vm5553_vm2 = vcmp.ne.s32.totalorder %v17490_v12, 0  ;;  %vm17689_vm8 = vmand %vm5607_vm15, %vm5559_vm14  ;;  %vm5606_vm15 = vcmp.lt.s32.totalorder %v17657_v13, 0  ;;  %20633 = vst [vmem:[#allocation17_spill] sm:$0xff] %v17725_v10 }
 0x377   : > { %14386 = vmatprep.mubr.bf16.mxu0 %v12567_v23  ;;  %v5116_v23 = vmul.u32 24, %v5115_v26  ;;  %vm17564_vm7 = vmand %vm5601_vm3, %vm5553_vm2  ;;  %20619 = vst [vmem:[#allocation9_spill] sm:$0xff] %v17642_v48  ;;  %v17663_v20 = vmul.u32.u64.low 2863311531, %v17619_v50  ;;  %v17664_v26 = vmul.u32.u64.high 2863311531, %v17619_v50, %v17663_v20  ;;  %v20627_v5 = vsel %vm17689_vm8, 4294967295, %v20626_v5 }
 0x378   : > { %v5148_v51 = vshrl.u32 %v17476_v25, 4  ;;  %v20613_v11 = vsel %vm17564_vm7, 4294967295, %v20612_v11  ;;  %vm17652_vm3 = vmand %vm5602_vm12, %vm5554_vm10  ;;  %v20621_v25 = vmov 0  ;;  %20628 = vst [vmem:[#allocation14_spill] sm:$0xff] %v20627_v5  ;;  %v17759_v32 = vsub.s32 %v17522_v34, %v5160_v7 }
 0x379   : > { %v17614_v60 = vsub.s32 %v17437_v15, %v5116_v23  ;;  %v20622_v25 = vsel %vm17652_vm3, 4294967295, %v20621_v25  ;;  %v17675_v62 = vmul.u32.u64.low 2863311531, %v17638_v52  ;;  %v17676_v23 = vmul.u32.u64.high 2863311531, %v17638_v52, %v17675_v62 }
 0x37a   : > { %v5149_v22 = vmul.u32 24, %v5148_v51  ;;  %20623 = vst [vmem:[#allocation11_spill] sm:$0xff] %v20622_v25  ;;  %v17679_v51 = vadd.s32 136, %v17377_v59  ;;  %v6221_v62 = vld [vmem:[#allocation2] sm:$0x8]  ;;  %20642 = vst [vmem:[#allocation22_spill] sm:$0xff] %v17759_v32 }
 0x37b   : > { %20617 = vst [vmem:[#allocation7_spill] sm:$0xff] %v17614_v60  ;;  %vm5557_vm2 = vcmp.ne.s32.totalorder %v17614_v60, 0  ;;  %vm5605_vm6 = vcmp.lt.s32.totalorder %v17614_v60, 0  ;;  %v17694_v4 = vadd.s32 24, %v17614_v60  ;;  %v5170_v63 = vshrl.u32 %v17664_v26, 4 }
 0x37c   : > { %v17646_v40 = vsub.s32 %v17453_v42, %v5149_v22  ;;  %v17668_v42 = vmul.u32.u64.low 2863311531, %v17629_v45  ;;  %v17669_v43 = vmul.u32.u64.high 2863311531, %v17629_v45, %v17668_v42  ;;  %v17698_v22 = vcombine.low %v17409_v54, %v17659_v29  ;;  %vm17710_vm14 = vmand %vm5605_vm6, %vm5557_vm2 }
 0x37d   : > { %20629 = vst [vmem:[#allocation15_spill] sm:$0xff] %v17694_v4  ;;  %v20631_v44 = vsel %vm17710_vm14, 4294967295, %v20630_v44  ;;  %v5192_v54 = vshrl.u32 %v17626_v27, 4  ;;  %v17717_v20 = vmul.u32.u64.low 2863311531, %v17672_v55  ;;  %v17718_v42 = vmul.u32.u64.high 2863311531, %v17672_v55, %v17717_v20  ;;  %vm17753_vm6 = vmand %vm5606_vm15, %vm5558_vm1 }
 0x37e   : > { %20620 = vst [vmem:[#allocation10_spill] sm:$0xff] %v17646_v40  ;;  %vm5560_vm10 = vcmp.ne.s32.totalorder %v17646_v40, 0  ;;  %vm5608_vm12 = vcmp.lt.s32.totalorder %v17646_v40, 0  ;;  %20632 = vst [vmem:[#allocation16_spill] sm:$0xff] %v20631_v44  ;;  %v17728_v61 = vmul.u32.u64.low 2863311531, %v17679_v51  ;;  %v17729_v15 = vmul.u32.u64.high 2863311531, %v17679_v51, %v17728_v61 }
 0x37f   : > { %vm17733_vm2 = vmand %vm5608_vm12, %vm5560_vm10  ;;  %v20634_v27 = vmov 0  ;;  %v17738_v20 = vadd.s32 24, %v17646_v40  ;;  %v20640_v56 = vsel %vm17753_vm6, 4294967295, %v20639_v56  ;;  %v17763_v3 = vcombine.low %v6221_v62, %v17406_v0 }
 0x380   : > { %v20635_v27 = vsel %vm17733_vm2, 4294967295, %v20634_v27  ;;  %20641 = vst [vmem:[#allocation21_spill] sm:$0xff] %v20640_v56  ;;  %v5193_v29 = vmul.u32 24, %v5192_v54  ;;  %v5225_v61 = vshrl.u32 %v17669_v43, 4  ;;  %vm5563_vm1 = vcmp.ne.s32.totalorder %v17725_v10, 0 }
 0x381   : > { %20636 = vst [vmem:[#allocation18_spill] sm:$0xff] %v20635_v27  ;;  %20637 = vst [vmem:[#allocation19_spill] sm:$0xff] %v17738_v20  ;;  %vm5611_vm10 = vcmp.lt.s32.totalorder %v17725_v10, 0  ;;  %v5203_v60 = vshrl.u32 %v17676_v23, 4  ;;  %v17782_v26 = vadd.s32 24, %v17725_v10  ;;  %v17785_v43 = vadd.s32 184, %v17377_v59 }
 0x382   : > { %vm5561_vm12 = vcmp.ne.s32.totalorder %v17759_v32, 0  ;;  %vm5609_vm15 = vcmp.lt.s32.totalorder %v17759_v32, 0  ;;  %v17790_v23 = vadd.s32 24, %v17759_v32  ;;  %v5171_v7 = vmul.u32 24, %v5170_v63  ;;  %vm17792_vm2 = vmand %vm5611_vm10, %vm5563_vm1  ;;  %v20821_v53 = vld [vmem:[#allocation11_spill] sm:$0xff] }
 0x383   : > { %20643 = vst [vmem:[#allocation23_spill] sm:$0xff] %v17782_v26  ;;  %v20645_v54 = vmov 0  ;;  %v17797_v62 = vsub.s32 %v17583_v17, %v5193_v29  ;;  %v5226_v34 = vmul.u32 24, %v5225_v61  ;;  %v5236_v0 = vshrl.u32 %v17718_v42, 4  ;;  %vm17808_vm1 = vmand %vm5609_vm15, %vm5561_vm12 }
 0x384   : > { %20644 = vst [vmem:[#allocation24_spill] sm:$0xff] %v17790_v23  ;;  %v20646_v54 = vsel %vm17792_vm2, 4294967295, %v20645_v54  ;;  %v5204_v13 = vmul.u32 24, %v5203_v60  ;;  %v5214_v28 = vshrl.u32 %v17729_v15, 4  ;;  %v20649_v63 = vmov 0 }
 0x385   : > { %20647 = vst [vmem:[#allocation25_spill] sm:$0xff] %v20646_v54  ;;  %20648 = vst [vmem:[#allocation26_spill] sm:$0xff] %v17797_v62  ;;  %v17805_v56 = vmul.u32.u64.low 2863311531, %v17771_v8  ;;  %v17806_v40 = vmul.u32.u64.high 2863311531, %v17771_v8, %v17805_v56  ;;  %v20650_v63 = vsel %vm17808_vm1, 4294967295, %v20649_v63  ;;  %v5269_v17 = vshrl.u32 %v17745_v9, 4 }
 0x386   : > { %20651 = vst [vmem:[#allocation27_spill] sm:$0xff] %v20650_v63  ;;  %v17814_v29 = vmul.u32.u64.low 2863311531, %v17785_v43  ;;  %v17815_v61 = vmul.u32.u64.high 2863311531, %v17785_v43, %v17814_v29  ;;  %v17818_v42 = vadd.s32 208, %v17377_v59  ;;  %v17827_v20 = vsub.s32 %v17619_v50, %v5171_v7 }
 0x387   : > { %v17830_v9 = vsub.s32 %v17629_v45, %v5226_v34  ;;  %v5237_v27 = vmul.u32 24, %v5236_v0  ;;  %v17833_v29 = vmul.u32.u64.low 2863311531, %v17801_v1  ;;  %v17834_v4 = vmul.u32.u64.high 2863311531, %v17801_v1, %v17833_v29 }
 0x388   : > { %20652 = vst [vmem:[#allocation28_spill] sm:$0xff] %v17827_v20  ;;  %v5215_v60 = vmul.u32 24, %v5214_v28  ;;  %v17842_v56 = vadd.s32 192, %v17377_v59  ;;  %v17845_v50 = vsub.s32 %v17638_v52, %v5204_v13  ;;  %v5270_v45 = vmul.u32 24, %v5269_v17 }
 0x389   : > { %20653 = vst [vmem:[#allocation29_spill] sm:$0xff] %v17830_v9  ;;  %v17848_v0 = vmul.u32.u64.low 2863311531, %v17818_v42  ;;  %v17849_v34 = vmul.u32.u64.high 2863311531, %v17818_v42, %v17848_v0  ;;  %vm5612_vm12 = vcmp.lt.s32.totalorder %v17797_v62, 0  ;;  %v17853_v7 = vadd.s32 24, %v17797_v62 }
 0x38a   : > { %20654 = vst [vmem:[#allocation30_spill] sm:$0xff] %v17845_v50  ;;  %v17858_v28 = vadd.s32 24, %v17827_v20  ;;  %v17863_v52 = vsub.s32 %v17672_v55, %v5237_v27  ;;  %v17866_v13 = vsub.s32 %v17679_v51, %v5215_v60  ;;  %v5247_v17 = vshrl.u32 %v17806_v40, 4 }
 0x38b   : > { %20655 = vst [vmem:[#allocation31_spill] sm:$0xff] %v17853_v7  ;;  %v17870_v29 = vmul.u32.u64.low 2863311531, %v17842_v56  ;;  %v17871_v0 = vmul.u32.u64.high 2863311531, %v17842_v56, %v17870_v29  ;;  %v17874_v15 = vadd.s32 24, %v17830_v9  ;;  %v17878_v32 = vsub.s32 %v17701_v39, %v5270_v45 }
 0x38c   : > { %20656 = vst [vmem:[#allocation32_spill] sm:$0xff] %v17858_v28  ;;  %20657 = vst [vmem:[#allocation33_spill] sm:$0xff] %v17863_v52  ;;  %v5280_v55 = vshrl.u32 %v17815_v61, 4  ;;  %v17883_v51 = vadd.s32 24, %v17845_v50  ;;  %v17886_v40 = vadd.s32 216, %v17377_v59  ;;  %v17889_v27 = vadd.s32 200, %v17377_v59 }
 0x38d   : > { %20658 = vst [vmem:[#allocation34_spill] sm:$0xff] %v17866_v13  ;;  %20659 = vst [vmem:[#allocation35_spill] sm:$0xff] %v17874_v15  ;;  %vm20662_vm1 = vcmp.ne.s32.totalorder %v17797_v62, 0  ;;  %v20663_v39 = vmov 0  ;;  %v17902_v61 = vadd.s32 24, %v17863_v52  ;;  %v5258_v60 = vshrl.u32 %v17834_v4, 4 }
 0x38e   : > { %20660 = vst [vmem:[#allocation36_spill] sm:$0xff] %v17878_v32  ;;  %20661 = vst [vmem:[#allocation37_spill] sm:$0xff] %v17883_v51  ;;  %vm20667_vm6 = vcmp.ne.s32.totalorder %v17827_v20, 0  ;;  %vm20668_vm14 = vcmp.lt.s32.totalorder %v17827_v20, 0  ;;  %v20669_v45 = vmov 0  ;;  %v5248_v29 = vmul.u32 24, %v5247_v17 }
 0x38f   : > { %vm17895_vm10 = vmand %vm5612_vm12, %vm20662_vm1  ;;  %20666 = vst [vmem:[#allocation39_spill] sm:$0xff] %v17902_v61  ;;  %v17916_v23 = vadd.s32 240, %v17377_v59  ;;  %vm20672_vm2 = vcmp.ne.s32.totalorder %v17830_v9, 0  ;;  %vm20673_vm15 = vcmp.lt.s32.totalorder %v17830_v9, 0  ;;  %v20674_v4 = vmov 0 }
 0x390   : > { %v20664_v39 = vsel %vm17895_vm10, 4294967295, %v20663_v39  ;;  %vm17909_vm8 = vmand %vm20668_vm14, %vm20667_vm6  ;;  %v5281_v63 = vmul.u32 24, %v5280_v55  ;;  %v5313_v10 = vshrl.u32 %v17849_v34, 4  ;;  %vm20677_vm12 = vcmp.ne.s32.totalorder %v17845_v50, 0 }
 0x391   : > { %20665 = vst [vmem:[#allocation38_spill] sm:$0xff] %v20664_v39  ;;  %v20670_v45 = vsel %vm17909_vm8, 4294967295, %v20669_v45  ;;  %vm17922_vm3 = vmand %vm20673_vm15, %vm20672_vm2  ;;  %vm20678_vm1 = vcmp.lt.s32.totalorder %v17845_v50, 0  ;;  %v20679_v17 = vmov 0  ;;  %vm20682_vm2 = vcmp.ne.s32.totalorder %v17863_v52, 0 }
 0x392   : > { %20671 = vst [vmem:[#allocation40_spill] sm:$0xff] %v20670_v45  ;;  %v20675_v4 = vsel %vm17922_vm3, 4294967295, %v20674_v4  ;;  %vm17933_vm7 = vmand %vm20678_vm1, %vm20677_vm12  ;;  %v17938_v26 = vmul.u32.u64.low 2863311531, %v17886_v40  ;;  %v17939_v54 = vmul.u32.u64.high 2863311531, %v17886_v40, %v17938_v26  ;;  %vm20683_vm15 = vcmp.lt.s32.totalorder %v17863_v52, 0 }
 0x393   : > { %20676 = vst [vmem:[#allocation41_spill] sm:$0xff] %v20675_v4  ;;  %v20680_v17 = vsel %vm17933_vm7, 4294967295, %v20679_v17  ;;  %v17942_v44 = vmul.u32.u64.low 2863311531, %v17889_v27  ;;  %v17943_v21 = vmul.u32.u64.high 2863311531, %v17889_v27, %v17942_v44  ;;  %vm17949_vm6 = vmand %vm20683_vm15, %vm20682_vm2  ;;  %v20684_v34 = vmov 0 }
 0x394   : > { %20681 = vst [vmem:[#allocation42_spill] sm:$0xff] %v20680_v17  ;;  %v20685_v34 = vsel %vm17949_vm6, 4294967295, %v20684_v34  ;;  %v17954_v55 = vadd.s32 24, %v17866_v13  ;;  %v17957_v48 = vadd.s32 24, %v17878_v32  ;;  %v5259_v5 = vmul.u32 24, %v5258_v60 }
 0x395   : > { %20686 = vst [vmem:[#allocation43_spill] sm:$0xff] %v20685_v34  ;;  %v17960_v26 = vadd.s32 224, %v17377_v59  ;;  %vm20689_vm1 = vcmp.ne.s32.totalorder %v17866_v13, 0  ;;  %vm20690_vm12 = vcmp.lt.s32.totalorder %v17866_v13, 0  ;;  %v20691_v44 = vmov 0 }
 0x396   : > { %20687 = vst [vmem:[#allocation44_spill] sm:$0xff] %v17954_v55  ;;  %20688 = vst [vmem:[#allocation45_spill] sm:$0xff] %v17957_v48  ;;  %v17971_v6 = vsub.s32 %v17771_v8, %v5248_v29  ;;  %v5291_v37 = vshrl.u32 %v17871_v0, 4  ;;  %v17975_v25 = vmul.u32.u64.low 2863311531, %v17916_v23  ;;  %v17976_v12 = vmul.u32.u64.high 2863311531, %v17916_v23, %v17975_v25 }
 0x397   : > { %vm17966_vm14 = vmand %vm20690_vm12, %vm20689_vm1  ;;  %vm20694_vm2 = vcmp.ne.s32.totalorder %v17878_v32, 0  ;;  %vm20695_vm15 = vcmp.lt.s32.totalorder %v17878_v32, 0  ;;  %v20696_v8 = vmov 0  ;;  %v17995_v25 = vsub.s32 %v17785_v43, %v5281_v63 }
 0x398   : > { %v20692_v44 = vsel %vm17966_vm14, 4294967295, %v20691_v44  ;;  %vm17990_vm1 = vmand %vm20695_vm15, %vm20694_vm2  ;;  %v5314_v0 = vmul.u32 24, %v5313_v10  ;;  %v18010_v20 = vadd.s32 248, %v17377_v59  ;;  %v18017_v43 = vsub.s32 %v17801_v1, %v5259_v5 }
 0x399   : > { %20693 = vst [vmem:[#allocation46_spill] sm:$0xff] %v20692_v44  ;;  %v20697_v8 = vsel %vm17990_vm1, 4294967295, %v20696_v8  ;;  %20699 = vst [vmem:[#allocation48_spill] sm:$0xff] %v17995_v25  ;;  %v18020_v63 = vmul.u32.u64.low 2863311531, %v17960_v26  ;;  %v18021_v29 = vmul.u32.u64.high 2863311531, %v17960_v26, %v18020_v63  ;;  %v5292_v58 = vmul.u32 24, %v5291_v37 }
 0x39a   : > { %20698 = vst [vmem:[#allocation47_spill] sm:$0xff] %v20697_v8  ;;  %20700 = vst [vmem:[#allocation49_spill] sm:$0xff] %v18017_v43  ;;  %v18030_v44 = vadd.s32 24, %v17971_v6  ;;  %v18034_v1 = vsub.s32 %v17818_v42, %v5314_v0  ;;  %v18037_v5 = vadd.s32 232, %v17377_v59  ;;  %v5324_v63 = vshrl.u32 %v17939_v54, 4 }
 0x39b   : > { %v5302_v60 = vshrl.u32 %v17943_v21, 4  ;;  %v18042_v10 = vmul.u32.u64.low 2863311531, %v18010_v20  ;;  %v18043_v32 = vmul.u32.u64.high 2863311531, %v18010_v20, %v18042_v10  ;;  %v18047_v37 = vadd.s32 24, %v17995_v25 }
 0x39c   : > { %20701 = vst [vmem:[#allocation50_spill] sm:$0xff] %v18034_v1  ;;  %v18051_v42 = vadd.s32 272, %v17377_v59  ;;  %v18055_v54 = vadd.s32 24, %v18017_v43  ;;  %v18058_v21 = vsub.s32 %v17842_v56, %v5292_v58  ;;  %v5357_v0 = vshrl.u32 %v17976_v12, 4 }
 0x39d   : > { %20702 = vst [vmem:[#allocation51_spill] sm:$0xff] %v18047_v37  ;;  %v18063_v10 = vmul.u32.u64.low 2863311531, %v18037_v5  ;;  %v18064_v48 = vmul.u32.u64.high 2863311531, %v18037_v5, %v18063_v10  ;;  %v18067_v8 = vadd.s32 256, %v17377_v59  ;;  %v5325_v13 = vmul.u32 24, %v5324_v63 }
 0x39e   : > { %20703 = vst [vmem:[#allocation52_spill] sm:$0xff] %v18055_v54  ;;  %20704 = vst [vmem:[#allocation53_spill] sm:$0xff] %v18058_v21  ;;  %v5303_v55 = vmul.u32 24, %v5302_v60  ;;  %v18071_v52 = vadd.s32 280, %v17377_v59  ;;  %vm20705_vm12 = vcmp.ne.s32.totalorder %v17971_v6, 0  ;;  %vm20706_vm1 = vcmp.lt.s32.totalorder %v17971_v6, 0 }
 0x39f   : > { %vm18077_vm14 = vmand %vm20706_vm1, %vm20705_vm12  ;;  %v20707_v12 = vmov 0  ;;  %v5335_v58 = vshrl.u32 %v18021_v29, 4  ;;  %v18083_v56 = vmul.u32.u64.low 2863311531, %v18051_v42  ;;  %v18084_v10 = vmul.u32.u64.high 2863311531, %v18051_v42, %v18083_v56 }
 0x3a0   : > { %v20708_v12 = vsel %vm18077_vm14, 4294967295, %v20707_v12  ;;  %v18087_v63 = vadd.s32 264, %v17377_v59  ;;  %vm20709_vm15 = vcmp.ne.s32.totalorder %v17995_v25, 0  ;;  %vm20710_vm2 = vcmp.lt.s32.totalorder %v17995_v25, 0 }
 0x3a1   : > { %vm18093_vm6 = vmand %vm20710_vm2, %vm20709_vm15  ;;  %v20711_v60 = vmov 0  ;;  %vm5573_vm1 = vcmp.ne.s32.totalorder %v18058_v21, 0  ;;  %vm5621_vm12 = vcmp.lt.s32.totalorder %v18058_v21, 0  ;;  %v5358_v29 = vmul.u32 24, %v5357_v0 }
 0x3a2   : > { %v20712_v60 = vsel %vm18093_vm6, 4294967295, %v20711_v60  ;;  %v18100_v61 = vadd.s32 304, %v17377_v59  ;;  %vm20714_vm7 = vcmp.ne.s32.totalorder %v18017_v43, 0  ;;  %vm20715_vm3 = vcmp.lt.s32.totalorder %v18017_v43, 0 }
 0x3a3   : > { %20713 = vst [vmem:[#allocation54_spill] sm:$0xff] %v20712_v60  ;;  %vm18106_vm8 = vmand %vm20715_vm3, %vm20714_vm7  ;;  %v20716_v56 = vmov 0  ;;  %v18111_v34 = vadd.s32 24, %v18034_v1  ;;  %v18114_v50 = vadd.s32 24, %v18058_v21  ;;  %vm20721_vm2 = vcmp.ne.s32.totalorder %v18034_v1, 0 }
 0x3a4   : > { %v20717_v56 = vsel %vm18106_vm8, 4294967295, %v20716_v56  ;;  %v18117_v51 = vmul.u32.u64.low 2863311531, %v18067_v8  ;;  %v18118_v0 = vmul.u32.u64.high 2863311531, %v18067_v8, %v18117_v51  ;;  %vm20722_vm15 = vcmp.lt.s32.totalorder %v18034_v1, 0  ;;  %vm18136_vm7 = vmand %vm5621_vm12, %vm5573_vm1 }
 0x3a5   : > { %20718 = vst [vmem:[#allocation55_spill] sm:$0xff] %v20717_v56  ;;  %20719 = vst [vmem:[#allocation56_spill] sm:$0xff] %v18111_v34  ;;  %v20723_v17 = vmov 0  ;;  %v18129_v9 = vsub.s32 %v17886_v40, %v5325_v13  ;;  %v5368_v15 = vshrl.u32 %v18043_v32, 4  ;;  %v20727_v45 = vmov 0 }
 0x3a6   : > { %20720 = vst [vmem:[#allocation57_spill] sm:$0xff] %v18114_v50  ;;  %vm18124_vm10 = vmand %vm20722_vm15, %vm20721_vm2  ;;  %v18133_v4 = vmul.u32.u64.low 2863311531, %v18071_v52  ;;  %v18134_v28 = vmul.u32.u64.high 2863311531, %v18071_v52, %v18133_v4  ;;  %v20728_v45 = vsel %vm18136_vm7, 4294967295, %v20727_v45  ;;  %v18141_v51 = vsub.s32 %v17889_v27, %v5303_v55 }
 0x3a7   : > { %v20724_v17 = vsel %vm18124_vm10, 4294967295, %v20723_v17  ;;  %20726 = vst [vmem:[#allocation59_spill] sm:$0xff] %v18129_v9  ;;  %20729 = vst [vmem:[#allocation60_spill] sm:$0xff] %v20728_v45  ;;  %v5336_v62 = vmul.u32 24, %v5335_v58  ;;  %v18144_v7 = vmul.u32.u64.low 2863311531, %v18087_v63  ;;  %v18145_v39 = vmul.u32.u64.high 2863311531, %v18087_v63, %v18144_v7 }
 0x3a8   : > { %20725 = vst [vmem:[#allocation58_spill] sm:$0xff] %v20724_v17  ;;  %20730 = vst [vmem:[#allocation61_spill] sm:$0xff] %v18141_v51  ;;  %v18152_v13 = vsub.s32 %v17916_v23, %v5358_v29  ;;  %v18155_v40 = vmul.u32.u64.low 2863311531, %v18100_v61  ;;  %v18156_v4 = vmul.u32.u64.high 2863311531, %v18100_v61, %v18155_v40  ;;  %v5346_v55 = vshrl.u32 %v18064_v48, 4 }
 0x3a9   : > { %vm5576_vm3 = vcmp.ne.s32.totalorder %v18129_v9, 0  ;;  %v5369_v29 = vmul.u32 24, %v5368_v15  ;;  %v18178_v40 = vadd.s32 24, %v18129_v9  ;;  %v18182_v7 = vsub.s32 %v17960_v26, %v5336_v62 }
 0x3aa   : > { %20731 = vst [vmem:[#allocation62_spill] sm:$0xff] %v18152_v13  ;;  %v5401_v48 = vshrl.u32 %v18084_v10, 4  ;;  %v18187_v23 = vadd.s32 24, %v18141_v51  ;;  %v18191_v58 = vadd.s32 288, %v17377_v59  ;;  %v5347_v15 = vmul.u32 24, %v5346_v55 }
 0x3ab   : > { %20732 = vst [vmem:[#allocation63_spill] sm:$0xff] %v18178_v40  ;;  %20733 = vst [vmem:[#allocation64_spill] sm:$0xff] %v18182_v7  ;;  %v5379_v27 = vshrl.u32 %v18118_v0, 4  ;;  %v18196_v62 = vadd.s32 312, %v17377_v59  ;;  %v18199_v26 = vadd.s32 24, %v18152_v13  ;;  %v18202_v10 = vsub.s32 %v18010_v20, %v5369_v29 }
 0x3ac   : > { %20734 = vst [vmem:[#allocation65_spill] sm:$0xff] %v18187_v23  ;;  %v5412_v32 = vshrl.u32 %v18134_v28, 4  ;;  %v18206_v21 = vadd.s32 296, %v17377_v59  ;;  %vm20736_vm1 = vcmp.lt.s32.totalorder %v18129_v9, 0  ;;  %v20737_v0 = vmov 0 }
 0x3ad   : > { %20735 = vst [vmem:[#allocation66_spill] sm:$0xff] %v18199_v26  ;;  %vm18212_vm15 = vmand %vm20736_vm1, %vm5576_vm3  ;;  %vm5577_vm2 = vcmp.ne.s32.totalorder %v18182_v7, 0  ;;  %vm5625_vm12 = vcmp.lt.s32.totalorder %v18182_v7, 0  ;;  %v5402_v55 = vmul.u32 24, %v5401_v48  ;;  %v5390_v20 = vshrl.u32 %v18145_v39, 4 }
 0x3ae   : > { %v20738_v0 = vsel %vm18212_vm15, 4294967295, %v20737_v0  ;;  %vm20740_vm7 = vcmp.ne.s32.totalorder %v18141_v51, 0  ;;  %vm20741_vm10 = vcmp.lt.s32.totalorder %v18141_v51, 0  ;;  %v20742_v28 = vmov 0 }
 0x3af   : > { %20739 = vst [vmem:[#allocation67_spill] sm:$0xff] %v20738_v0  ;;  %vm18223_vm8 = vmand %vm20741_vm10, %vm20740_vm7  ;;  %v18228_v29 = vadd.s32 24, %v18182_v7  ;;  %v5445_v50 = vshrl.u32 %v18156_v4, 4  ;;  %v18232_v45 = vmul.u32.u64.low 2863311531, %v18191_v58  ;;  %v18233_v1 = vmul.u32.u64.high 2863311531, %v18191_v58, %v18232_v45 }
 0x3b0   : > { %v20743_v28 = vsel %vm18223_vm8, 4294967295, %v20742_v28  ;;  %vm20746_vm3 = vcmp.ne.s32.totalorder %v18152_v13, 0  ;;  %vm20747_vm1 = vcmp.lt.s32.totalorder %v18152_v13, 0  ;;  %v20748_v39 = vmov 0  ;;  %vm18250_vm10 = vmand %vm5625_vm12, %vm5577_vm2 }
 0x3b1   : > { %20744 = vst [vmem:[#allocation68_spill] sm:$0xff] %v20743_v28  ;;  %20745 = vst [vmem:[#allocation69_spill] sm:$0xff] %v18228_v29  ;;  %v18244_v48 = vsub.s32 %v18037_v5, %v5347_v15  ;;  %v5380_v34 = vmul.u32 24, %v5379_v27  ;;  %v18247_v17 = vmul.u32.u64.low 2863311531, %v18196_v62  ;;  %v18248_v43 = vmul.u32.u64.high 2863311531, %v18196_v62, %v18247_v17 }
 0x3b2   : > { %vm18239_vm6 = vmand %vm20747_vm1, %vm20746_vm3  ;;  %v20751_v4 = vmov 0  ;;  %v5413_v45 = vmul.u32 24, %v5412_v32  ;;  %v18255_v54 = vmul.u32.u64.low 2863311531, %v18206_v21  ;;  %v18256_v56 = vmul.u32.u64.high 2863311531, %v18206_v21, %v18255_v54 }
 0x3b3   : > { %v20749_v39 = vsel %vm18239_vm6, 4294967295, %v20748_v39  ;;  %v20752_v4 = vsel %vm18250_vm10, 4294967295, %v20751_v4  ;;  %v18259_v25 = vadd.s32 336, %v17377_v59  ;;  %v18270_v27 = vsub.s32 %v18051_v42, %v5402_v55 }
 0x3b4   : > { %20750 = vst [vmem:[#allocation70_spill] sm:$0xff] %v20749_v39  ;;  %20753 = vst [vmem:[#allocation71_spill] sm:$0xff] %v20752_v4  ;;  %v5391_v32 = vmul.u32 24, %v5390_v20  ;;  %vm5580_vm7 = vcmp.ne.s32.totalorder %v18202_v10, 0  ;;  %v5446_v15 = vmul.u32 24, %v5445_v50  ;;  %v18283_v17 = vadd.s32 24, %v18202_v10 }
 0x3b5   : > { %v18287_v42 = vsub.s32 %v18067_v8, %v5380_v34  ;;  %v18291_v55 = vsub.s32 %v18071_v52, %v5413_v45  ;;  %v18294_v50 = vmul.u32.u64.low 2863311531, %v18259_v25  ;;  %v18295_v20 = vmul.u32.u64.high 2863311531, %v18259_v25, %v18294_v50 }
 0x3b6   : > { %v18298_v54 = vadd.s32 24, %v18244_v48  ;;  %v18303_v5 = vsub.s32 %v18087_v63, %v5391_v32  ;;  %v18306_v34 = vadd.s32 24, %v18270_v27  ;;  %v18309_v52 = vsub.s32 %v18100_v61, %v5446_v15 }
 0x3b7   : > { %v5423_v8 = vshrl.u32 %v18233_v1, 4  ;;  %v18313_v45 = vadd.s32 320, %v17377_v59  ;;  %v18318_v50 = vadd.s32 24, %v18287_v42  ;;  %v5456_v63 = vshrl.u32 %v18248_v43, 4 }
 0x3b8   : > { %20754 = vst [vmem:[#allocation72_spill] sm:$0xff] %v18303_v5  ;;  %20755 = vst [vmem:[#allocation73_spill] sm:$0xff] %v18309_v52  ;;  %vm20756_vm12 = vcmp.lt.s32.totalorder %v18202_v10, 0  ;;  %v5434_v1 = vshrl.u32 %v18256_v56, 4  ;;  %v18333_v32 = vadd.s32 344, %v17377_v59  ;;  %vm20759_vm1 = vcmp.ne.s32.totalorder %v18244_v48, 0 }
 0x3b9   : > { %vm18325_vm2 = vmand %vm20756_vm12, %vm5580_vm7  ;;  %vm20760_vm3 = vcmp.lt.s32.totalorder %v18244_v48, 0  ;;  %v20763_v15 = vshrl.u32 %v17763_v3, 16  ;;  %v20764_v56 = vshll.u32 %v17763_v3, 16  ;;  %vm20765_vm6 = vcmp.ne.s32.totalorder %v18270_v27, 0 }
 0x3ba   : > { %vm18339_vm8 = vmand %vm20760_vm3, %vm20759_vm1  ;;  %vm20766_vm10 = vcmp.lt.s32.totalorder %v18270_v27, 0  ;;  %v20767_v4 = vmov 0  ;;  %v5424_v13 = vmul.u32 24, %v5423_v8  ;;  %vm20769_vm1 = vcmp.ne.s32.totalorder %v18287_v42, 0 }
 0x3bb   : > { %v6751_v7 = vrot.slane %v20763_v15, 3  ;;  %v6754_v29 = vrot.slane %v20764_v56, 4  ;;  %vm18353_vm15 = vmand %vm20766_vm10, %vm20765_vm6  ;;  %v18359_v26 = vmul.u32.u64.low 2863311531, %v18313_v45  ;;  %v18360_v39 = vmul.u32.u64.high 2863311531, %v18313_v45, %v18359_v26 }
 0x3bc   : > { %v20768_v4 = vsel %vm18353_vm15, 4294967295, %v20767_v4  ;;  %vm20770_vm12 = vcmp.lt.s32.totalorder %v18287_v42, 0  ;;  %v20771_v3 = vmov 0  ;;  %v5457_v15 = vmul.u32 24, %v5456_v63 }
 0x3bd   : > { %vm18366_vm7 = vmand %vm20770_vm12, %vm20769_vm1  ;;  %v20773_v56 = vshrl.u32 %v17698_v22, 16  ;;  %v20774_v8 = vshll.u32 %v17698_v22, 16  ;;  %vm20775_vm10 = vcmp.ne.s32.totalorder %v18291_v55, 0  ;;  %vm20776_vm3 = vcmp.lt.s32.totalorder %v18291_v55, 0 }
 0x3be   : > { %v20772_v3 = vsel %vm18366_vm7, 4294967295, %v20771_v3  ;;  %vm18379_vm14 = vmand %vm20776_vm3, %vm20775_vm10  ;;  %v20777_v26 = vmov 0  ;;  %v18384_v28 = vadd.s32 24, %v18291_v55  ;;  %v18387_v9 = vadd.s32 24, %v18303_v5 }
 0x3bf   : > { %v6759_v51 = vrot.slane %v20773_v56, 3  ;;  %v6762_v23 = vrot.slane %v20774_v8, 4  ;;  %v20778_v26 = vsel %vm18379_vm14, 4294967295, %v20777_v26  ;;  %v5435_v63 = vmul.u32 24, %v5434_v1 }
 0x3c0   : > { %v5489_v56 = vshrl.u32 %v18295_v20, 4  ;;  %vm20779_vm12 = vcmp.ne.s32.totalorder %v18303_v5, 0  ;;  %vm20780_vm1 = vcmp.lt.s32.totalorder %v18303_v5, 0  ;;  %v20781_v22 = vmov 0 }
 0x3c1   : > { %vm18394_vm6 = vmand %vm20780_vm1, %vm20779_vm12  ;;  %v18399_v8 = vadd.s32 24, %v18309_v52  ;;  %v18402_v40 = vmul.u32.u64.low 2863311531, %v18333_v32  ;;  %v18403_v0 = vmul.u32.u64.high 2863311531, %v18333_v32, %v18402_v40  ;;  %v6755_v37 = vor.u32 %v6754_v29, %v6751_v7 }
 0x3c2   : > { %v20782_v22 = vsel %vm18394_vm6, 4294967295, %v20781_v22  ;;  %vm20784_vm3 = vcmp.ne.s32.totalorder %v18309_v52, 0  ;;  %vm20785_vm10 = vcmp.lt.s32.totalorder %v18309_v52, 0  ;;  %v20786_v7 = vmov 0 }
 0x3c3   : > { %20783 = vst [vmem:[#allocation74_spill] sm:$0xff] %v18399_v8  ;;  %vm18421_vm12 = vmand %vm20785_vm10, %vm20784_vm3  ;;  %v18426_v40 = vsub.s32 %v18191_v58, %v5424_v13  ;;  %v20790_v29 = vsel %vm17502_vm11, %v17466_v14, %v17441_v35  ;;  %v20793_v60 = vsel %vm17528_vm0, %v17517_v31, %v17461_v47  ;;  %v18451_v35 = vsub.s32 %v18196_v62, %v5457_v15 }
 0x3c4   : > { %v20787_v7 = vsel %vm18421_vm12, 4294967295, %v20786_v7  ;;  %vm18433_vm1 = vcmp.lt.s32.totalorder %v20790_v29, 16  ;;  %vm18442_vm3 = vcmp.lt.s32.totalorder %v20793_v60, 16  ;;  %v18454_v14 = vadd.s32 328, %v17377_v59 }
 0x3c5   : > { %20788 = vst [vmem:[#allocation75_spill] sm:$0xff] %v20787_v7  ;;  %20789 = vst [vmem:[#allocation76_spill] sm:$0xff] %v18426_v40  ;;  %v18456_v13 = vor.u32 %v6762_v23, %v6759_v51  ;;  %v20797_v47 = vsel %vm17512_vm13, %v17487_v2, %v17456_v16  ;;  %vm18472_vm0 = vcmp.lt.s32.totalorder %v20800_v46, 16  ;;  %v18481_v16 = vsub.s32 %v18206_v21, %v5435_v63 }
 0x3c6   : > { %20796 = vst [vmem:[#allocation77_spill] sm:$0xff] %v18451_v35  ;;  %vm18463_vm11 = vcmp.lt.s32.totalorder %v20797_v47, 16  ;;  %v5490_v2 = vmul.u32 24, %v5489_v56  ;;  %vm20481_vm13 = vsmask.f32 4352  ;;  %v18497_v21 = vadd.s32 368, %v17377_v59 }
 0x3c7   : > { %20803 = vst [vmem:[#allocation78_spill] sm:$0xff] %v18481_v16  ;;  %v18501_v51 = vsel %vm20481_vm13, %v6755_v37, %v18456_v13  ;;  %v18506_v23 = vadd.s32 24, %v18426_v40  ;;  %v5467_v58 = vshrl.u32 %v18360_v39, 4  ;;  %v18517_v29 = vadd.s32 24, %v18451_v35 }
 0x3c8   : > { %20804 = vst [vmem:[#allocation79_spill] sm:$0xff] %v18501_v51  ;;  %v18512_v15 = vmul.u32.u64.low 2863311531, %v18454_v14  ;;  %v18513_v63 = vmul.u32.u64.high 2863311531, %v18454_v14, %v18512_v15  ;;  %v18521_v47 = vsub.s32 %v18259_v25, %v5490_v2  ;;  %v5500_v33 = vshrl.u32 %v18403_v0, 4 }
 0x3c9   : > { %20805 = vst [vmem:[#allocation80_spill] sm:$0xff] %v18506_v23  ;;  %20806 = vst [vmem:[#allocation81_spill] sm:$0xff] %v18517_v29  ;;  %v18527_v15 = vadd.s32 352, %v17377_v59  ;;  %v18531_v18 = vadd.s32 24, %v18481_v16  ;;  %v5468_v51 = vmul.u32 24, %v5467_v58  ;;  %vm20829_vm7 = vcmp.lt.s32.totalorder %v18426_v40, 0 }
 0x3ca   : > { %20807 = vst [vmem:[#allocation82_spill] sm:$0xff] %v18521_v47  ;;  %vm20834_vm14 = vcmp.lt.s32.totalorder %v18451_v35, 0 }
 0x3cb   : > { %20808 = vst [vmem:[#allocation83_spill] sm:$0xff] %v18531_v18 }
 0x3f1   : > { %v14324_v62 = vpop.f32.mrb[0].mxu0 }
 0x3f2   : > { %v4878_v37 = vadd.f32 %v14324_v62, %v18486_v38  ;;  %v4630_v56 = vpop.f32.mrb[1].mxu0 }
 0x3f3   : > { %v4876_v39 = vadd.f32 %v18486_v38, %v4630_v56  ;;  %v14325_v46 = vpop.f32.mrb[2].mxu0  ;;  %v20809_v56 = vsel %vm17555_vm5, %v17536_v36, %v17479_v41  ;;  %vm20815_vm5 = vnez %v20613_v11  ;;  %v20816_v41 = vld [vmem:[#allocation4_spill] sm:$0xff]  ;;  %v20817_v36 = vld [vmem:[#allocation3_spill] sm:$0xff]  ;;  %v18577_v11 = vadd.s32 376, %v17377_v59 }
 0x3f4   : > { %v4926_v62 = vmax.f32 %v4878_v37, 0.0  ;;  %v4879_v24 = vadd.f32 %v14325_v46, %v18486_v38  ;;  %v4633_v30 = vpop.f32.mrb[3].mxu0  ;;  %vm18539_vm12 = vcmp.lt.s32.totalorder %v20809_v56, 16  ;;  %v20812_v37 = vsel %vm17609_vm9, %v17594_v49, %v17507_v19  ;;  %v20823_v19 = vld [vmem:[#allocation8_spill] sm:$0xff]  ;;  %v20824_v49 = vld [vmem:[#allocation5_spill] sm:$0xff] }
 0x3f5   : > { %v4924_v25 = vmax.f32 %v4876_v39, 0.0  ;;  %v4877_v2 = vadd.f32 %v18486_v38, %v4633_v30  ;;  %vm18548_vm13 = vcmp.lt.s32.totalorder %v20812_v37, 16  ;;  %v20818_v39 = vsel %vm20815_vm5, %v20816_v41, %v20817_v36 }
 0x3f6   : > { %v18553_v30 = vmul.u32.u64.low 2863311531, %v18497_v21  ;;  %v18554_v58 = vmul.u32.u64.high 2863311531, %v18497_v21, %v18553_v30  ;;  %v4927_v57 = vmax.f32 %v4879_v24, 0.0  ;;  %vm18561_vm6 = vcmp.lt.s32.totalorder %v20818_v39, 16 }
 0x3f7   : > { %vm20822_vm9 = vnez %v20821_v53  ;;  %v4925_v24 = vmax.f32 %v4877_v2, 0.0  ;;  %vm20828_vm5 = vcmp.ne.s32.totalorder %v18426_v40, 0  ;;  %v20830_v30 = vmov 0 }
 0x3f8   : > { %v20825_v37 = vsel %vm20822_vm9, %v20823_v19, %v20824_v49  ;;  %vm18583_vm15 = vmand %vm20829_vm7, %vm20828_vm5  ;;  %v5501_v41 = vmul.u32 24, %v5500_v33  ;;  %v18588_v36 = vmul.u32.u64.low 2863311531, %v18527_v15  ;;  %v18589_v39 = vmul.u32.u64.high 2863311531, %v18527_v15, %v18588_v36 }
 0x3f9   : > { %vm18570_vm10 = vcmp.lt.s32.totalorder %v20825_v37, 16  ;;  %v20831_v30 = vsel %vm18583_vm15, 4294967295, %v20830_v30  ;;  %v5935_v53 = vsel %vm18433_vm1, %v4926_v62, 0.0  ;;  %v5936_v19 = vsel %vm18442_vm3, %v4927_v57, 0.0  ;;  %v14328_v57 = vpop.f32.mrb[4].mxu0 }
 0x3fa   : > { %20832 = vst [vmem:[#allocation4_spill] sm:$0xff] %v20831_v30  ;;  %vm20833_vm9 = vcmp.ne.s32.totalorder %v18451_v35, 0  ;;  %v20835_v2 = vmov 0  ;;  %v18604_v33 = vadd.s32 24, %v18521_v47  ;;  %v18607_v49 = vsub.s32 %v18313_v45, %v5468_v51  ;;  %v4646_v7 = vpop.f32.mrb[5].mxu0 }
 0x3fb   : > { %vm18599_vm4 = vmand %vm20834_vm14, %vm20833_vm9  ;;  %v5933_v1 = vsel %vm18463_vm11, %v4924_v25, 0.0  ;;  %v13128_v62 = vpack.c.bf16 %v5936_v19, %v5935_v53  ;;  %v5934_v20 = vsel %vm18472_vm0, %v4925_v24, 0.0  ;;  %v5478_v37 = vshrl.u32 %v18513_v63, 4  ;;  %v14329_v63 = vpop.f32.mrb[6].mxu0 }
 0x3fc   : > { %v20836_v2 = vsel %vm18599_vm4, 4294967295, %v20835_v2  ;;  %20838 = vst [vmem:[#allocation11_spill] sm:$0xff] %v18604_v33  ;;  %20839 = vst [vmem:[#allocation8_spill] sm:$0xff] %v18607_v49  ;;  %v13123_v36 = vpack.c.bf16 %v5934_v20, %v5933_v1  ;;  %v4882_v8 = vadd.f32 %v14328_v57, %v18486_v38  ;;  %vm20840_vm14 = vcmp.ne.s32.totalorder %v18481_v16, 0  ;;  %v20851_v20 = vld [vmem:[#allocation14_spill] sm:$0xff]  ;;  %v20853_v57 = vld [vmem:[#allocation9_spill] sm:$0xff] }
 0x3fd   : > { %20837 = vst [vmem:[#allocation3_spill] sm:$0xff] %v20836_v2  ;;  %vm20841_vm7 = vcmp.lt.s32.totalorder %v18481_v16, 0  ;;  %v20842_v45 = vmov 0  ;;  %v18624_v31 = vmul.u32.u64.low 2863311531, %v18577_v11  ;;  %v18625_v51 = vmul.u32.u64.high 2863311531, %v18577_v11, %v18624_v31  ;;  %13361 = vst [vmem:[#allocation2 + $0x18] sm:$0xff] %v13128_v62  }
 0x3fe   : > { %vm18619_vm1 = vmand %vm20841_vm7, %vm20840_vm14  ;;  %v4880_v60 = vadd.f32 %v18486_v38, %v4646_v7  ;;  %vm20845_vm3 = vcmp.ne.s32.totalorder %v18521_v47, 0  ;;  %vm20846_vm11 = vcmp.lt.s32.totalorder %v18521_v47, 0  ;;  %v20847_v53 = vmov 0  ;;  %13360 = vst [vmem:[#allocation2 + $0x10] sm:$0xff] %v13123_v36   ;;  %v4649_v62 = vpop.f32.mrb[7].mxu0  ;;  %v20854_v31 = vld [vmem:[#allocation6_spill] sm:$0xff] }
 0x3ff   : > { %v20843_v45 = vsel %vm18619_vm1, 4294967295, %v20842_v45  ;;  %vm18640_vm0 = vmand %vm20846_vm11, %vm20845_vm3  ;;  %v18645_v7 = vsub.s32 %v18333_v32, %v5501_v41  ;;  %v4930_v19 = vmax.f32 %v4882_v8, 0.0  ;;  %v4883_v1 = vadd.f32 %v14329_v63, %v18486_v38  ;;  %v20858_v41 = vld [vmem:[#allocation16_spill] sm:$0xff]  ;;  %v20860_v36 = vld [vmem:[#allocation15_spill] sm:$0xff] }
 0x400   : > { %20844 = vst [vmem:[#allocation5_spill] sm:$0xff] %v20843_v45  ;;  %v20848_v53 = vsel %vm18640_vm0, 4294967295, %v20847_v53  ;;  %vm20852_vm5 = vnez %v20851_v20  ;;  %v18659_v35 = vadd.s32 360, %v17377_v59  ;;  %v4928_v32 = vmax.f32 %v4880_v60, 0.0  ;;  %v20861_v63 = vld [vmem:[#allocation7_spill] sm:$0xff]  ;;  %v20935_v59 = vld [vmem:[#allocation46_spill] sm:$0xff] }
 0x401   : > { %20849 = vst [vmem:[#allocation84_spill] sm:$0xff] %v20848_v53  ;;  %20850 = vst [vmem:[#allocation85_spill] sm:$0xff] %v18645_v7  ;;  %v20855_v24 = vsel %vm20852_vm5, %v20853_v57, %v20854_v31  ;;  %v4881_v8 = vadd.f32 %v18486_v38, %v4649_v62  ;;  %vm20859_vm7 = vnez %v20858_v41  ;;  %v20867_v57 = vld [vmem:[#allocation19_spill] sm:$0xff]  ;;  %v20868_v31 = vld [vmem:[#allocation10_spill] sm:$0xff]  ;;  %vm5637_vm14 = vcmp.lt.s32.totalorder %v18607_v49, 0 }
 0x402   : > { %vm18653_vm9 = vcmp.lt.s32.totalorder %v20855_v24, 16  ;;  %v20862_v20 = vsel %vm20859_vm7, %v20860_v36, %v20861_v63  ;;  %v20865_v24 = vld [vmem:[#allocation18_spill] sm:$0xff]  ;;  %v5533_v60 = vshrl.u32 %v18554_v58, 4  ;;  %v4931_v62 = vmax.f32 %v4883_v1, 0.0  ;;  %v20872_v41 = vld [vmem:[#allocation21_spill] sm:$0xff]  ;;  %v20874_v36 = vld [vmem:[#allocation20_spill] sm:$0xff] }
 0x403   : > { %vm18667_vm3 = vcmp.lt.s32.totalorder %v20862_v20, 16  ;;  %vm20866_vm11 = vnez %v20865_v24  ;;  %vm20873_vm7 = vnez %v20872_v41  ;;  %v20875_v63 = vld [vmem:[#allocation12_spill] sm:$0xff]  ;;  %v5479_v1 = vmul.u32 24, %v5478_v37 }
 0x404   : > { %v20869_v2 = vsel %vm20866_vm11, %v20867_v57, %v20868_v31  ;;  %v20876_v20 = vsel %vm20873_vm7, %v20874_v36, %v20875_v63  ;;  %v4929_v24 = vmax.f32 %v4881_v8, 0.0  ;;  %v18700_v57 = vadd.s32 24, %v18607_v49  ;;  %v6227_v33 = vld [vmem:[#allocation2 + $0x18] sm:$0xf]  ;;  %v18725_v53 = vld [vmem:[#allocation2 + $0x1c] sm:$0xf] }
 0x405   : > { %vm18676_vm5 = vcmp.lt.s32.totalorder %v20869_v2, 16  ;;  %vm18687_vm4 = vcmp.lt.s32.totalorder %v20876_v20, 16  ;;  %v18703_v31 = vadd.s32 24, %v18645_v7  ;;  %v5511_v41 = vshrl.u32 %v18589_v39, 4  ;;  %v6225_v52 = vld [vmem:[#allocation2 + $0x10] sm:$0xf] }
 0x406   : > { %20879 = vst [vmem:[#allocation14_spill] sm:$0xff] %v18700_v57  ;;  %v5939_v36 = vsel %vm18539_vm12, %v4930_v19, 0.0  ;;  %v5940_v63 = vsel %vm18548_vm13, %v4931_v62, 0.0  ;;  %vm20880_vm11 = vcmp.ne.s32.totalorder %v18607_v49, 0  ;;  %v20881_v20 = vmov 0  ;;  %v14332_v19 = vpop.f32.mrb[8].mxu0 }
 0x407   : > { %vm18712_vm7 = vmand %vm5637_vm14, %vm20880_vm11  ;;  %v18717_v37 = vmul.u32.u64.low 2863311531, %v18659_v35  ;;  %v18718_v8 = vmul.u32.u64.high 2863311531, %v18659_v35, %v18717_v37  ;;  %v5937_v58 = vsel %vm18561_vm6, %v4928_v32, 0.0  ;;  %v13138_v39 = vpack.c.bf16 %v5940_v63, %v5939_v36  ;;  %v4662_v47 = vpop.f32.mrb[9].mxu0  ;;  %v20887_v36 = vld [vmem:[#allocation23_spill] sm:$0xff]  ;;  %v20888_v63 = vld [vmem:[#allocation17_spill] sm:$0xff] }
 0x408   : > { %v20882_v20 = vsel %vm18712_vm7, 4294967295, %v20881_v20  ;;  %v5938_v0 = vsel %vm18570_vm10, %v4929_v24, 0.0  ;;  %v5534_v46 = vmul.u32 24, %v5533_v60  ;;  %v4886_v2 = vadd.f32 %v14332_v19, %v18486_v38  ;;  %v14333_v32 = vpop.f32.mrb[10].mxu0  ;;  %v6226_v24 = vld [vmem:[#allocation2 + $0x14] sm:$0xf] }
 0x409   : > { %20883 = vst [vmem:[#allocation9_spill] sm:$0xff] %v20882_v20  ;;  %v13133_v62 = vpack.c.bf16 %v5938_v0, %v5937_v58  ;;  %v18728_v16 = vsub.s32 %v18454_v14, %v5479_v1  ;;  %v5544_v37 = vshrl.u32 %v18625_v51, 4  ;;  %13363 = vst [vmem:[#allocation2 + $0x28] sm:$0xff] %v13138_v39   ;;  %v4884_v56 = vadd.f32 %v18486_v38, %v4662_v47  ;;  %v20885_v58 = vld [vmem:[#allocation25_spill] sm:$0xff]  ;;  %v4665_v39 = vpop.f32.mrb[11].mxu0  ;;  %v20900_v49 = vld [vmem:[#allocation38_spill] sm:$0xff] }
 0x40a   : > { %v12602_v60 = vcombine.low %v6227_v33, %v18725_v53  ;;  %vm20886_vm6 = vnez %v20885_v58  ;;  %v18746_v47 = vmul.u32 24, %v5511_v41  ;;  %v4934_v51 = vmax.f32 %v4886_v2, 0.0  ;;  %v20892_v58 = vld [vmem:[#allocation13_spill] sm:$0xff]  ;;  %v20903_v57 = vld [vmem:[#allocation26_spill] sm:$0xff]  ;;  %v14336_v20 = vpop.f32.mrb[12].mxu0 }
 0x40b   : > { %20884 = vst [vmem:[#allocation6_spill] sm:$0xff] %v18728_v16  ;;  %v20889_v0 = vsel %vm20886_vm6, %v20887_v36, %v20888_v63  ;;  %13362 = vst [vmem:[#allocation2 + $0x20] sm:$0xff] %v13133_v62   ;;  %v4887_v1 = vadd.f32 %v14333_v32, %v18486_v38  ;;  %v12568_v18 = vcombine.low %v20892_v58, %v6225_v52  ;;  %v20893_v36 = vld [vmem:[#allocation27_spill] sm:$0xff]  ;;  %v20895_v63 = vld [vmem:[#allocation24_spill] sm:$0xff]  ;;  %v4932_v14 = vmax.f32 %v4884_v56, 0.0 }
 0x40c   : > { %vm18738_vm12 = vcmp.lt.s32.totalorder %v20889_v0, 16  ;;  %v12569_v45 = vcombine.low %v6226_v24, %v6227_v33  ;;  %vm20894_vm13 = vnez %v20893_v36  ;;  %v20896_v0 = vld [vmem:[#allocation22_spill] sm:$0xff]  ;;  %v4885_v41 = vadd.f32 %v18486_v38, %v4665_v39  ;;  %v20902_v32 = vld [vmem:[#allocation31_spill] sm:$0xff]  ;;  %v20909_v56 = vld [vmem:[#allocation32_spill] sm:$0xff] }
 0x40d   : > { %v20897_v23 = vsel %vm20894_vm13, %v20895_v63, %v20896_v0  ;;  %v12601_v62 = vcombine.low %v6225_v52, %v6226_v24  ;;  %v6775_v2 = vshrl.u32 %v12602_v60, 16  ;;  %vm20901_vm14 = vnez %v20900_v49  ;;  %14387 = vmatmul.mubr.bf16.vlgmr.msra.gmra.mrb[48].mxu0 %v12568_v18  ;;  %v20907_v63 = vld [vmem:[#allocation40_spill] sm:$0xff] }
 0x40e   : > { %vm18755_vm10 = vcmp.lt.s32.totalorder %v20897_v23, 16  ;;  %v20904_v58 = vsel %vm20901_vm14, %v20902_v32, %v20903_v57  ;;  %v4935_v36 = vmax.f32 %v4887_v1, 0.0  ;;  %14390 = vmatprep.mubr.bf16.mxu1 %v12569_v45  ;;  %v6778_v23 = vshll.u32 %v12602_v60, 16  ;;  %v20910_v0 = vld [vmem:[#allocation28_spill] sm:$0xff] }
 0x40f   : > { %vm18765_vm11 = vcmp.lt.s32.totalorder %v20904_v58, 16  ;;  %vm20908_vm6 = vnez %v20907_v63  ;;  %v18779_v49 = vadd.s32 24, %v18728_v16  ;;  %v18781_v57 = vmul.u32 24, %v5544_v37 }
 0x410   : > { %v20911_v39 = vsel %vm20908_vm6, %v20909_v56, %v20910_v0  ;;  %v5943_v24 = vsel %vm18653_vm9, %v4934_v51, 0.0  ;;  %v4933_v18 = vmax.f32 %v4885_v41, 0.0  ;;  %v6766_v45 = vshrl.u32 %v12601_v62, 16  ;;  %v4678_v41 = vpop.f32.mrb[13].mxu0  ;;  %v18792_v5 = vld [vmem:[#allocation2 + $0x2c] sm:$0xf] }
 0x411   : > { %vm18774_vm13 = vcmp.lt.s32.totalorder %v20911_v39, 16  ;;  %v6769_v60 = vshll.u32 %v12601_v62, 16  ;;  %v5941_v1 = vsel %vm18667_vm3, %v4932_v14, 0.0  ;;  %v5944_v32 = vsel %vm18676_vm5, %v4935_v36, 0.0  ;;  %v6231_v62 = vld [vmem:[#allocation2 + $0x28] sm:$0xf] }
 0x412   : > { %v6777_v58 = vrot.slane %v6775_v2, 3  ;;  %v6780_v63 = vrot.slane %v6778_v23, 4  ;;  %v13148_v56 = vpack.c.bf16 %v5944_v32, %v5943_v24  ;;  %v5942_v0 = vsel %vm18687_vm4, %v4933_v18, 0.0  ;;  %v14337_v2 = vpop.f32.mrb[14].mxu0  ;;  %v6229_v36 = vld [vmem:[#allocation2 + $0x20] sm:$0xf] }
 0x413   : > { %v6768_v37 = vrot.slane %v6766_v45, 3  ;;  %v6771_v39 = vrot.slane %v6769_v60, 4  ;;  %v13143_v25 = vpack.c.bf16 %v5942_v0, %v5941_v1  ;;  %v4890_v51 = vadd.f32 %v14336_v20, %v18486_v38  ;;  %v6230_v23 = vld [vmem:[#allocation2 + $0x24] sm:$0xf]  ;;  %v20914_v24 = vld [vmem:[#allocation41_spill] sm:$0xff]  ;;  %v20916_v18 = vld [vmem:[#allocation35_spill] sm:$0xff] }
 0x414   : > { %v18795_v29 = vsub.s32 %v18497_v21, %v5534_v46  ;;  %13365 = vst [vmem:[#allocation2 + $0x38] sm:$0xff] %v13148_v56   ;;  %v4888_v40 = vadd.f32 %v18486_v38, %v4678_v41  ;;  %vm20915_vm4 = vnez %v20914_v24  ;;  %v20917_v20 = vld [vmem:[#allocation29_spill] sm:$0xff]  ;;  %v12604_v21 = vcombine.low %v6231_v62, %v18792_v5  ;;  %v4681_v56 = vpop.f32.mrb[15].mxu0  ;;  %v20924_v24 = vld [vmem:[#allocation30_spill] sm:$0xff] }
 0x415   : > { %v6772_v14 = vor.u32 %v6771_v39, %v6768_v37  ;;  %v20918_v45 = vsel %vm20915_vm4, %v20916_v18, %v20917_v20  ;;  %v18809_v46 = vor.u32 %v6780_v63, %v6777_v58  ;;  %13364 = vst [vmem:[#allocation2 + $0x30] sm:$0xff] %v13143_v25   ;;  %v4938_v1 = vmax.f32 %v4890_v51, 0.0  ;;  %v20921_v39 = vld [vmem:[#allocation42_spill] sm:$0xff]  ;;  %v20923_v41 = vld [vmem:[#allocation37_spill] sm:$0xff]  ;;  %v20928_v51 = vld [vmem:[#allocation43_spill] sm:$0xff] }
 0x416   : > { %vm18804_vm9 = vcmp.lt.s32.totalorder %v20918_v45, 16  ;;  %v4891_v32 = vadd.f32 %v14337_v2, %v18486_v38  ;;  %v12570_v0 = vcombine.low %v18725_v53, %v6229_v36  ;;  %v12571_v37 = vcombine.low %v6230_v23, %v6231_v62  ;;  %v15995_v58 = vld [vmem:[%s20382_s3 + $0x8] sm:$0xff]   ;;  %v20931_v2 = vld [vmem:[#allocation33_spill] sm:$0xff] }
 0x417   : > { %vm20922_vm3 = vnez %v20921_v39  ;;  %v4936_v63 = vmax.f32 %v4888_v40, 0.0  ;;  %v4889_v53 = vadd.f32 %v18486_v38, %v4681_v56  ;;  %v12603_v25 = vcombine.low %v6229_v36, %v6230_v23  ;;  %v20930_v62 = vld [vmem:[#allocation39_spill] sm:$0xff]  ;;  %v20937_v40 = vld [vmem:[#allocation44_spill] sm:$0xff]  ;;  %v20938_v56 = vld [vmem:[#allocation34_spill] sm:$0xff] }
 0x418   : > { %v20925_v18 = vsel %vm20922_vm3, %v20923_v41, %v20924_v24  ;;  %vm20929_vm4 = vnez %v20928_v51  ;;  %v6793_v41 = vshrl.u32 %v12604_v21, 16  ;;  %v5947_v24 = vsel %vm18738_vm12, %v4938_v1, 0.0  ;;  %14391 = vmatmul.mubr.bf16.vlgmr.msra.gmra.mrb[0].mxu1 %v12570_v0  ;;  %v16014_v20 = vld [vmem:[%s20382_s3 + $0x20] sm:$0xff]  }
 0x419   : > { %vm18818_vm5 = vcmp.lt.s32.totalorder %v20925_v18, 16  ;;  %v20932_v45 = vsel %vm20929_vm4, %v20930_v62, %v20931_v2  ;;  %v4939_v18 = vmax.f32 %v4891_v32, 0.0  ;;  %vm20936_vm6 = vnez %v20935_v59  ;;  %v16284_v59 = vld [vmem:[%s20382_s3] sm:$0xff]   ;;  %14394 = vmatprep.mubr.bf16.mxu1 %v12571_v37 }
 0x41a   : > { %vm18833_vm3 = vcmp.lt.s32.totalorder %v20932_v45, 16  ;;  %v20939_v36 = vsel %vm20936_vm6, %v20937_v40, %v20938_v56  ;;  %v6796_v51 = vshll.u32 %v12604_v21, 16  ;;  %vm20942_vm4 = vsmask.f32 4352  ;;  %14435 = vmatpush3.bf16.msra.mxu1 %v16284_v59  ;;  %v14340_v45 = vpop.f32.mrb[16].mxu0 }
 0x41b   : > { %vm18844_vm14 = vcmp.lt.s32.totalorder %v20939_v36, 16  ;;  %v18850_v62 = vsel %vm20942_vm4, %v18456_v13, %v6772_v14  ;;  %v5945_v19 = vsel %vm18755_vm10, %v4936_v63, 0.0  ;;  %v4937_v1 = vmax.f32 %v4889_v53, 0.0  ;;  %14436 = vmatprep.subr.bf16.mxu1 %v15995_v58  ;;  %v16000_v13 = vld [vmem:[%s20382_s3 + $0x10] sm:$0xff]   ;;  %vm20944_vm12 = vmmov %vm20942_vm4  ;;  %v4694_v56 = vpop.f32.mrb[17].mxu0 }
 0x41c   : > { %20943 = vst [vmem:[#allocation16_spill] sm:$0xff] %v18850_v62  ;;  %v6784_v32 = vshrl.u32 %v12603_v25, 16  ;;  %v6787_v0 = vshll.u32 %v12603_v25, 16  ;;  %v5948_v2 = vsel %vm18765_vm11, %v4939_v18, 0.0  ;;  %v18864_v30 = vsel %vm20944_vm12, %v6772_v14, %v18809_v46  ;;  %v6235_v36 = vld [vmem:[#allocation2 + $0x38] sm:$0xf] }
 0x41d   : > { %20945 = vst [vmem:[#allocation15_spill] sm:$0xff] %v18864_v30  ;;  %v6795_v21 = vrot.slane %v6793_v41, 3  ;;  %v6798_v63 = vrot.slane %v6796_v51, 4  ;;  %v13158_v53 = vpack.c.bf16 %v5948_v2, %v5947_v24  ;;  %v5946_v37 = vsel %vm18774_vm13, %v4937_v1, 0.0  ;;  %v18869_v59 = vld [vmem:[#allocation2 + $0x3c] sm:$0xf] }
 0x41e   : > { %v6786_v25 = vrot.slane %v6784_v32, 3  ;;  %v6789_v40 = vrot.slane %v6787_v0, 4  ;;  %v13153_v33 = vpack.c.bf16 %v5946_v37, %v5945_v19  ;;  %v4894_v18 = vadd.f32 %v14340_v45, %v18486_v38  ;;  %v14341_v41 = vpop.f32.mrb[18].mxu0  ;;  %v6233_v24 = vld [vmem:[#allocation2 + $0x30] sm:$0xf]  ;;  %v20948_v1 = vld [vmem:[#allocation45_spill] sm:$0xff]  ;;  %14437 = vmatpush3.bf16.msra.mxu1 %v15995_v58 }
 0x41f   : > { %v18872_v62 = vadd.s32 24, %v18795_v29  ;;  %v18876_v14 = vsub.s32 %v18527_v15, %v18746_v47  ;;  %13367 = vst [vmem:[#allocation2 + $0x48] sm:$0xff] %v13158_v53   ;;  %v4892_v52 = vadd.f32 %v18486_v38, %v4694_v56  ;;  %v6234_v51 = vld [vmem:[#allocation2 + $0x34] sm:$0xf]  ;;  %v20946_v19 = vld [vmem:[#allocation47_spill] sm:$0xff]  ;;  %v12606_v37 = vcombine.low %v6235_v36, %v18869_v59  ;;  %v4697_v56 = vpop.f32.mrb[19].mxu0  ;;  %14438 = vmatprep.subr.bf16.mxu1 %v16000_v13 }
 0x420   : > { %vm20947_vm10 = vnez %v20946_v19  ;;  %v20949_v32 = vld [vmem:[#allocation36_spill] sm:$0xff]  ;;  %v6790_v15 = vor.u32 %v6789_v40, %v6786_v25  ;;  %v18889_v47 = vor.u32 %v6798_v63, %v6795_v21  ;;  %13366 = vst [vmem:[#allocation2 + $0x40] sm:$0xff] %v13153_v33   ;;  %v4942_v53 = vmax.f32 %v4894_v18, 0.0  ;;  %v20957_v25 = vld [vmem:[#allocation54_spill] sm:$0xff] }
 0x421   : > { %v20950_v0 = vsel %vm20947_vm10, %v20948_v1, %v20949_v32  ;;  %v4895_v45 = vadd.f32 %v14341_v41, %v18486_v38  ;;  %v12572_v19 = vcombine.low %v18792_v5, %v6233_v24  ;;  %v12573_v30 = vcombine.low %v6234_v51, %v6235_v36  ;;  %v16007_v21 = vld [vmem:[%s20382_s3 + $0x18] sm:$0xff]   ;;  %v20964_v32 = vld [vmem:[#allocation55_spill] sm:$0xff] }
 0x422   : > { %vm18884_vm11 = vcmp.lt.s32.totalorder %v20950_v0, 16  ;;  %vm20953_vm13 = vnez %v20708_v12  ;;  %v4940_v5 = vmax.f32 %v4892_v52, 0.0  ;;  %v4893_v63 = vadd.f32 %v18486_v38, %v4697_v56  ;;  %v20966_v52 = vld [vmem:[#allocation52_spill] sm:$0xff]  ;;  %v20967_v0 = vld [vmem:[#allocation49_spill] sm:$0xff]  ;;  %14439 = vmatpush3.bf16.msra.mxu1 %v16000_v13 }
 0x423   : > { %v20954_v1 = vsel %vm20953_vm13, %v18030_v44, %v17971_v6  ;;  %v12605_v12 = vcombine.low %v6233_v24, %v6234_v51  ;;  %vm20958_vm10 = vnez %v20957_v25  ;;  %v20959_v6 = vld [vmem:[#allocation51_spill] sm:$0xff]  ;;  %v20960_v44 = vld [vmem:[#allocation48_spill] sm:$0xff]  ;;  %v6811_v18 = vshrl.u32 %v12606_v37, 16  ;;  %14395 = vmatmul.mubr.bf16.gmra.mrb[4].mxu1 %v12572_v19  ;;  %14440 = vmatprep.subr.bf16.mxu1 %v16007_v21 }
 0x424   : > { %vm18898_vm6 = vcmp.lt.s32.totalorder %v20954_v1, 16  ;;  %v20961_v40 = vsel %vm20958_vm10, %v20959_v6, %v20960_v44  ;;  %v5951_v36 = vsel %vm18804_vm9, %v4942_v53, 0.0  ;;  %v4943_v41 = vmax.f32 %v4895_v45, 0.0  ;;  %14398 = vmatprep.mubr.bf16.mxu1 %v12573_v30  ;;  %v16028_v58 = vld [vmem:[%s20382_s3 + $0x30] sm:$0xff]  }
 0x425   : > { %vm18913_vm13 = vcmp.lt.s32.totalorder %v20961_v40, 16  ;;  %vm20965_vm12 = vnez %v20964_v32  ;;  %v6814_v56 = vshll.u32 %v12606_v37, 16  ;;  %vm20971_vm10 = vsmask.f32 4352 }
 0x426   : > { %v20968_v24 = vsel %vm20965_vm12, %v20966_v52, %v20967_v0  ;;  %v18930_v1 = vsel %vm20971_vm10, %v18809_v46, %v6790_v15  ;;  %v5949_v60 = vsel %vm18818_vm5, %v4940_v5, 0.0  ;;  %v4941_v53 = vmax.f32 %v4893_v63, 0.0  ;;  %vm20977_vm5 = vmmov %vm20971_vm10  ;;  %v6239_v32 = vld [vmem:[#allocation2 + $0x48] sm:$0xf]  ;;  %v18954_v52 = vld [vmem:[#allocation2 + $0x4c] sm:$0xf]  ;;  %14441 = vmatpush3.bf16.msra.mxu1 %v16007_v21 }
 0x427   : > { %vm18924_vm4 = vcmp.lt.s32.totalorder %v20968_v24, 16  ;;  %20972 = vst [vmem:[#allocation7_spill] sm:$0xff] %v18930_v1  ;;  %v6802_v45 = vshrl.u32 %v12605_v12, 16  ;;  %v6805_v19 = vshll.u32 %v12605_v12, 16  ;;  %vm20973_vm9 = vcmp.ne.s32.totalorder %v18645_v7, 0  ;;  %v14344_v12 = vpop.f32.mrb[20].mxu0  ;;  %14442 = vmatprep.subr.bf16.mxu1 %v16014_v20 }
 0x428   : > { %vm20974_vm12 = vcmp.lt.s32.totalorder %v18645_v7, 0  ;;  %v20975_v25 = vmov 0  ;;  %v5952_v46 = vsel %vm18833_vm3, %v4943_v41, 0.0  ;;  %v18949_v30 = vsel %vm20977_vm5, %v6790_v15, %v18889_v47  ;;  %v4710_v41 = vpop.f32.mrb[21].mxu0  ;;  %v6237_v0 = vld [vmem:[#allocation2 + $0x40] sm:$0xf] }
 0x429   : > { %vm18938_vm7 = vmand %vm20974_vm12, %vm20973_vm9  ;;  %20978 = vst [vmem:[#allocation18_spill] sm:$0xff] %v18949_v30  ;;  %v6813_v13 = vrot.slane %v6811_v18, 3  ;;  %v6816_v37 = vrot.slane %v6814_v56, 4  ;;  %v13168_v5 = vpack.c.bf16 %v5952_v46, %v5951_v36  ;;  %v5950_v63 = vsel %vm18844_vm14, %v4941_v53, 0.0  ;;  %v14345_v36 = vpop.f32.mrb[22].mxu0  ;;  %v20979_v56 = vld [vmem:[#allocation58_spill] sm:$0xff] }
 0x42a   : > { %v20976_v25 = vsel %vm18938_vm7, 4294967295, %v20975_v25  ;;  %v6804_v6 = vrot.slane %v6802_v45, 3  ;;  %v6807_v44 = vrot.slane %v6805_v19, 4  ;;  %v13163_v39 = vpack.c.bf16 %v5950_v63, %v5949_v60  ;;  %v6238_v24 = vld [vmem:[#allocation2 + $0x44] sm:$0xf]  ;;  %v20981_v60 = vld [vmem:[#allocation56_spill] sm:$0xff]  ;;  %14443 = vmatpush3.bf16.msra.mxu1 %v16014_v20 }
 0x42b   : > { %v4898_v40 = vadd.f32 %v14344_v12, %v18486_v38  ;;  %v18961_v18 = vadd.s32 24, %v18876_v14  ;;  %13369 = vst [vmem:[#allocation2 + $0x58] sm:$0xff] %v13168_v5   ;;  %v4896_v23 = vadd.f32 %v18486_v38, %v4710_v41  ;;  %vm20980_vm14 = vnez %v20979_v56  ;;  %v20982_v53 = vld [vmem:[#allocation50_spill] sm:$0xff]  ;;  %v4713_v15 = vpop.f32.mrb[23].mxu0  ;;  %v20986_v1 = vld [vmem:[#allocation60_spill] sm:$0xff] }
 0x42c   : > { %v20983_v45 = vsel %vm20980_vm14, %v20981_v60, %v20982_v53  ;;  %v12608_v46 = vcombine.low %v6239_v32, %v18954_v52  ;;  %v6808_v63 = vor.u32 %v6807_v44, %v6804_v6  ;;  %v18974_v12 = vor.u32 %v6816_v37, %v6813_v13  ;;  %13368 = vst [vmem:[#allocation2 + $0x50] sm:$0xff] %v13163_v39   ;;  %v20988_v60 = vld [vmem:[#allocation57_spill] sm:$0xff]  ;;  %v16019_v21 = vld [vmem:[%s20382_s3 + $0x28] sm:$0xff]  }
 0x42d   : > { %vm18969_vm3 = vcmp.lt.s32.totalorder %v20983_v45, 16  ;;  %v4946_v5 = vmax.f32 %v4898_v40, 0.0  ;;  %v4899_v41 = vadd.f32 %v14345_v36, %v18486_v38  ;;  %v12574_v56 = vcombine.low %v18869_v59, %v6237_v0  ;;  %v20989_v53 = vld [vmem:[#allocation53_spill] sm:$0xff]  ;;  %v20993_v59 = vld [vmem:[#allocation67_spill] sm:$0xff]  ;;  %14444 = vmatprep.subr.bf16.mxu1 %v16019_v21 }
 0x42e   : > { %v12575_v30 = vcombine.low %v6238_v24, %v6239_v32  ;;  %vm20987_vm10 = vnez %v20986_v1  ;;  %v4944_v13 = vmax.f32 %v4896_v23, 0.0  ;;  %v4897_v37 = vadd.f32 %v18486_v38, %v4713_v15  ;;  %v20995_v44 = vld [vmem:[#allocation63_spill] sm:$0xff]  ;;  %v21002_v23 = vld [vmem:[#allocation65_spill] sm:$0xff]  ;;  %14445 = vmatpush3.bf16.msra.mxu1 %v16019_v21 }
 0x42f   : > { %v20990_v45 = vsel %vm20987_vm10, %v20988_v60, %v20989_v53  ;;  %v12607_v6 = vcombine.low %v6237_v0, %v6238_v24  ;;  %vm20994_vm12 = vnez %v20993_v59  ;;  %v20996_v1 = vld [vmem:[#allocation59_spill] sm:$0xff]  ;;  %v6829_v32 = vshrl.u32 %v12608_v46, 16  ;;  %14399 = vmatmul.mubr.bf16.gmra.mrb[8].mxu1 %v12574_v56  ;;  %v21000_v53 = vld [vmem:[#allocation68_spill] sm:$0xff]  ;;  %v21003_v15 = vld [vmem:[#allocation61_spill] sm:$0xff]  ;;  %14446 = vmatprep.subr.bf16.mxu1 %v16028_v58 }
 0x430   : > { %vm18983_vm9 = vcmp.lt.s32.totalorder %v20990_v45, 16  ;;  %v20997_v39 = vsel %vm20994_vm12, %v20995_v44, %v20996_v1  ;;  %v5955_v36 = vsel %vm18884_vm11, %v4946_v5, 0.0  ;;  %v4947_v60 = vmax.f32 %v4899_v41, 0.0  ;;  %14402 = vmatprep.mubr.bf16.mxu1 %v12575_v30 }
 0x431   : > { %vm18996_vm5 = vcmp.lt.s32.totalorder %v20997_v39, 16  ;;  %vm21001_vm14 = vnez %v21000_v53  ;;  %v6832_v45 = vshll.u32 %v12608_v46, 16  ;;  %vm21007_vm12 = vsmask.f32 4352 }
 0x432   : > { %v21004_v0 = vsel %vm21001_vm14, %v21002_v23, %v21003_v15  ;;  %v19013_v59 = vsel %vm21007_vm12, %v18889_v47, %v6808_v63  ;;  %v5953_v2 = vsel %vm18898_vm6, %v4944_v13, 0.0  ;;  %v4945_v5 = vmax.f32 %v4897_v37, 0.0  ;;  %vm21013_vm6 = vmmov %vm21007_vm12  ;;  %v6243_v23 = vld [vmem:[#allocation2 + $0x58] sm:$0xf]  ;;  %v19037_v15 = vld [vmem:[#allocation2 + $0x5c] sm:$0xf]  ;;  %14447 = vmatpush3.bf16.msra.mxu1 %v16028_v58 }
 0x433   : > { %vm19007_vm10 = vcmp.lt.s32.totalorder %v21004_v0, 16  ;;  %21008 = vst [vmem:[#allocation19_spill] sm:$0xff] %v19013_v59  ;;  %v6820_v41 = vshrl.u32 %v12607_v6, 16  ;;  %v6823_v56 = vshll.u32 %v12607_v6, 16  ;;  %vm21009_vm11 = vcmp.ne.s32.totalorder %v18728_v16, 0  ;;  %v14348_v6 = vpop.f32.mrb[24].mxu0 }
 0x434   : > { %vm21010_vm14 = vcmp.lt.s32.totalorder %v18728_v16, 0  ;;  %v5956_v47 = vsel %vm18913_vm13, %v4947_v60, 0.0  ;;  %v19032_v30 = vsel %vm21013_vm6, %v6808_v63, %v18974_v12  ;;  %v6831_v20 = vrot.slane %v6829_v32, 3  ;;  %v4726_v53 = vpop.f32.mrb[25].mxu0  ;;  %v21026_v59 = vld [vmem:[#allocation64_spill] sm:$0xff] }
 0x435   : > { %vm19021_vm7 = vmand %vm21010_vm14, %vm21009_vm11  ;;  %21014 = vst [vmem:[#allocation10_spill] sm:$0xff] %v19032_v30  ;;  %v6834_v46 = vrot.slane %v6832_v45, 4  ;;  %v13178_v13 = vpack.c.bf16 %v5956_v47, %v5955_v36  ;;  %v5954_v37 = vsel %vm18924_vm4, %v4945_v5, 0.0  ;;  %v6822_v1 = vrot.slane %v6820_v41, 3  ;;  %v14349_v0 = vpop.f32.mrb[26].mxu0  ;;  %v21016_v5 = vld [vmem:[#allocation70_spill] sm:$0xff] }
 0x436   : > { %v6825_v39 = vrot.slane %v6823_v56, 4  ;;  %v13173_v33 = vpack.c.bf16 %v5954_v37, %v5953_v2  ;;  %v4902_v60 = vadd.f32 %v14348_v6, %v18486_v38  ;;  %v21015_v32 = vshrl.u32 %v18718_v8, 4  ;;  %v6241_v45 = vld [vmem:[#allocation2 + $0x50] sm:$0xf]  ;;  %v6242_v2 = vld [vmem:[#allocation2 + $0x54] sm:$0xf] }
 0x437   : > { %13371 = vst [vmem:[#allocation2 + $0x68] sm:$0xff] %v13178_v13   ;;  %v4900_v51 = vadd.f32 %v18486_v38, %v4726_v53  ;;  %vm21017_vm4 = vnez %v21016_v5  ;;  %v21018_v41 = vld [vmem:[#allocation66_spill] sm:$0xff]  ;;  %v12610_v6 = vcombine.low %v6243_v23, %v19037_v15  ;;  %v16033_v8 = vld [vmem:[%s20382_s3 + $0x38] sm:$0xff]   ;;  %v19059_v53 = vor.u32 %v6834_v46, %v6831_v20  ;;  %v4729_v63 = vpop.f32.mrb[27].mxu0 }
 0x438   : > { %v5523_v36 = vmul.u32 24, %v21015_v32  ;;  %v21019_v56 = vld [vmem:[#allocation62_spill] sm:$0xff]  ;;  %v6826_v13 = vor.u32 %v6825_v39, %v6822_v1  ;;  %13370 = vst [vmem:[#allocation2 + $0x60] sm:$0xff] %v13173_v33   ;;  %v4950_v32 = vmax.f32 %v4902_v60, 0.0  ;;  %v4903_v5 = vadd.f32 %v14349_v0, %v18486_v38  ;;  %v21025_v30 = vld [vmem:[#allocation69_spill] sm:$0xff]  ;;  %14448 = vmatprep.subr.bf16.mxu1 %v16033_v8  ;;  %v14352_v58 = vpop.f32.mrb[28].mxu0 }
 0x439   : > { %v21020_v47 = vsel %vm21017_vm4, %v21018_v41, %v21019_v56  ;;  %v12576_v41 = vcombine.low %v18954_v52, %v6241_v45  ;;  %v12577_v56 = vcombine.low %v6242_v2, %v6243_v23  ;;  %vm5595_vm14 = vcmp.ne.s32.totalorder %v18795_v29, 0  ;;  %14449 = vmatpush3.bf16.msra.mxu1 %v16033_v8 }
 0x43a   : > { %vm19051_vm13 = vcmp.lt.s32.totalorder %v21020_v47, 16  ;;  %v21023_v47 = vld [vmem:[#allocation71_spill] sm:$0xff]  ;;  %vm5643_vm6 = vcmp.lt.s32.totalorder %v18795_v29, 0  ;;  %v4948_v20 = vmax.f32 %v4900_v51, 0.0  ;;  %v4901_v46 = vadd.f32 %v18486_v38, %v4729_v63 }
 0x43b   : > { %vm21024_vm12 = vnez %v21023_v47  ;;  %v12609_v1 = vcombine.low %v6241_v45, %v6242_v2  ;;  %v21030_v52 = vsel %vm18325_vm2, %v18283_v17, %v18202_v10  ;;  %v5959_v39 = vsel %vm18969_vm3, %v4950_v32, 0.0  ;;  %14403 = vmatmul.mubr.bf16.gmra.mrb[12].mxu1 %v12576_v41 }
 0x43c   : > { %v21027_v21 = vsel %vm21024_vm12, %v21025_v30, %v21026_v59  ;;  %vm19080_vm4 = vcmp.lt.s32.totalorder %v21030_v52, 16  ;;  %v6847_v30 = vshrl.u32 %v12610_v6, 16  ;;  %v4951_v33 = vmax.f32 %v4903_v5, 0.0  ;;  %14406 = vmatprep.mubr.bf16.mxu1 %v12577_v56  ;;  %v4742_v5 = vpop.f32.mrb[29].mxu0 }
 0x43d   : > { %vm19068_vm11 = vcmp.lt.s32.totalorder %v21027_v21, 16  ;;  %v21033_v60 = vsel %vm18339_vm8, %v18298_v54, %v18244_v48  ;;  %v6850_v10 = vshll.u32 %v12610_v6, 16  ;;  %vm21036_vm2 = vsmask.f32 4352  ;;  %v19106_v54 = vld [vmem:[%s20382_s3 + $0x80] sm:$0xff]   ;;  %v14353_v21 = vpop.f32.mrb[30].mxu0 }
 0x43e   : > { %vm19091_vm12 = vcmp.lt.s32.totalorder %v21033_v60, 16  ;;  %v19097_v17 = vsel %vm21036_vm2, %v18974_v12, %v6826_v13  ;;  %v5957_v19 = vsel %vm18983_vm9, %v4948_v20, 0.0  ;;  %v4949_v23 = vmax.f32 %v4901_v46, 0.0  ;;  %vm21037_vm8 = vmmov %vm21036_vm2  ;;  %v6247_v41 = vld [vmem:[#allocation2 + $0x68] sm:$0xf]  ;;  %14498 = vmatprep.subr.bf16.mxu1 %v19106_v54 }
 0x43f   : > { %v6838_v63 = vshrl.u32 %v12609_v1, 16  ;;  %v6841_v51 = vshll.u32 %v12609_v1, 16  ;;  %v5960_v48 = vsel %vm18996_vm5, %v4951_v33, 0.0  ;;  %v19110_v43 = vsel %vm21037_vm8, %v6826_v13, %v19059_v53  ;;  %v19115_v56 = vld [vmem:[#allocation2 + $0x6c] sm:$0xf] }
 0x440   : > { %v6849_v7 = vrot.slane %v6847_v30, 3  ;;  %v6852_v12 = vrot.slane %v6850_v10, 4  ;;  %v13188_v0 = vpack.c.bf16 %v5960_v48, %v5959_v39  ;;  %v5958_v45 = vsel %vm19007_vm10, %v4949_v23, 0.0  ;;  %v6245_v20 = vld [vmem:[#allocation2 + $0x60] sm:$0xf]  ;;  %v4745_v39 = vpop.f32.mrb[31].mxu0 }
 0x441   : > { %v6840_v2 = vrot.slane %v6838_v63, 3  ;;  %v6843_v40 = vrot.slane %v6841_v51, 4  ;;  %v13183_v6 = vpack.c.bf16 %v5958_v45, %v5957_v19  ;;  %v4906_v32 = vadd.f32 %v14352_v58, %v18486_v38  ;;  %v6246_v46 = vld [vmem:[#allocation2 + $0x64] sm:$0xf]  ;;  %v21051_v23 = vld [vmem:[#allocation72_spill] sm:$0xff]  ;;  %v14356_v58 = vpop.f32.mrb[32].mxu0 }
 0x442   : > { %v19119_v13 = vsub.s32 %v18577_v11, %v18781_v57  ;;  %v19122_v47 = vsub.s32 %v18659_v35, %v5523_v36  ;;  %13373 = vst [vmem:[#allocation2 + $0x78] sm:$0xff] %v13188_v0   ;;  %v4904_v24 = vadd.f32 %v18486_v38, %v4742_v5  ;;  %vm21038_vm3 = vnez %v20768_v4  ;;  %v4758_v5 = vpop.f32.mrb[33].mxu0 }
 0x443   : > { %v21039_v1 = vsel %vm21038_vm3, %v18306_v34, %v18270_v27  ;;  %v12612_v11 = vcombine.low %v6247_v41, %v19115_v56  ;;  %v6844_v35 = vor.u32 %v6843_v40, %v6840_v2  ;;  %v19135_v57 = vor.u32 %v6852_v12, %v6849_v7  ;;  %13372 = vst [vmem:[#allocation2 + $0x70] sm:$0xff] %v13183_v6  }
 0x444   : > { %vm19130_vm9 = vcmp.lt.s32.totalorder %v21039_v1, 16  ;;  %v4954_v36 = vmax.f32 %v4906_v32, 0.0  ;;  %v4907_v30 = vadd.f32 %v14353_v21, %v18486_v38  ;;  %v12578_v4 = vcombine.low %v19037_v15, %v6245_v20 }
 0x445   : > { %v12579_v33 = vcombine.low %v6246_v46, %v6247_v41  ;;  %vm21042_vm5 = vnez %v20772_v3  ;;  %v4952_v8 = vmax.f32 %v4904_v24, 0.0  ;;  %v4905_v60 = vadd.f32 %v18486_v38, %v4745_v39 }
 0x446   : > { %v21043_v27 = vsel %vm21042_vm5, %v18318_v50, %v18287_v42  ;;  %v12611_v15 = vcombine.low %v6245_v20, %v6246_v46  ;;  %vm21046_vm3 = vnez %v20778_v26  ;;  %v6865_v50 = vshrl.u32 %v12612_v11, 16  ;;  %14407 = vmatmul.mubr.bf16.gmra.mrb[16].mxu1 %v12578_v4  ;;  %v14357_v20 = vpop.f32.mrb[34].mxu0  ;;  %v19288_v26 = vld [vmem:[%s20381_s2] ss:$0 sm:$0xff] }
 0x447   : > { %vm19144_vm10 = vcmp.lt.s32.totalorder %v21043_v27, 16  ;;  %v21047_v3 = vsel %vm21046_vm3, %v18384_v28, %v18291_v55  ;;  %v5963_v10 = vsel %vm19051_vm13, %v4954_v36, 0.0  ;;  %v4955_v19 = vmax.f32 %v4907_v30, 0.0  ;;  %14410 = vmatprep.mubr.bf16.mxu1 %v12579_v33  ;;  %vm19182_vm13 = vmand %vm5643_vm6, %vm5595_vm14  ;;  %v21062_v36 = vld [vmem:[#allocation73_spill] sm:$0xff] }
 0x448   : > { %vm19157_vm5 = vcmp.lt.s32.totalorder %v21047_v3, 16  ;;  %vm21050_vm8 = vnez %v20782_v22  ;;  %v6868_v28 = vshll.u32 %v12612_v11, 16  ;;  %vm21055_vm3 = vsmask.f32 4352  ;;  %v21059_v11 = vld [vmem:[#allocation75_spill] sm:$0xff] }
 0x449   : > { %v21052_v63 = vsel %vm21050_vm8, %v18387_v9, %v21051_v23  ;;  %v19174_v55 = vsel %vm21055_vm3, %v19059_v53, %v6844_v35  ;;  %v5961_v37 = vsel %vm19068_vm11, %v4952_v8, 0.0  ;;  %v4953_v51 = vmax.f32 %v4905_v60, 0.0  ;;  %vm21058_vm8 = vmmov %vm21055_vm3  ;;  %v6251_v41 = vld [vmem:[#allocation2 + $0x78] sm:$0xf]  ;;  %v19195_v59 = vld [vmem:[#allocation2 + $0x7c] sm:$0xf] }
 0x44a   : > { %vm19168_vm2 = vcmp.lt.s32.totalorder %v21052_v63, 16  ;;  %v6856_v48 = vshrl.u32 %v12611_v15, 16  ;;  %v6859_v7 = vshll.u32 %v12611_v15, 16  ;;  %v5964_v22 = vsel %vm19080_vm4, %v4955_v19, 0.0  ;;  %v6249_v46 = vld [vmem:[#allocation2 + $0x70] sm:$0xf] }
 0x44b   : > { %v19190_v53 = vsel %vm21058_vm8, %v6844_v35, %v19135_v57  ;;  %v6867_v16 = vrot.slane %v6865_v50, 3  ;;  %v6870_v12 = vrot.slane %v6868_v28, 4  ;;  %v13198_v0 = vpack.c.bf16 %v5964_v22, %v5963_v10  ;;  %v6250_v1 = vld [vmem:[#allocation2 + $0x74] sm:$0xf]  ;;  %v21061_v35 = vld [vmem:[#allocation74_spill] sm:$0xff]  ;;  %v4761_v15 = vpop.f32.mrb[35].mxu0 }
 0x44c   : > { %v5962_v45 = vsel %vm19091_vm12, %v4953_v51, 0.0  ;;  %v6858_v2 = vrot.slane %v6856_v48, 3  ;;  %v6861_v40 = vrot.slane %v6859_v7, 4  ;;  %v4910_v32 = vadd.f32 %v14356_v58, %v18486_v38  ;;  %v21067_v19 = vld [vmem:[#allocation80_spill] sm:$0xff]  ;;  %v21072_v7 = vld [vmem:[#allocation3_spill] sm:$0xff]  ;;  %v21075_v22 = vld [vmem:[#allocation77_spill] sm:$0xff] }
 0x44d   : > { %v13193_v6 = vpack.c.bf16 %v5962_v45, %v5961_v37  ;;  %v5787_v24 = vsel %vm19182_vm13, %v18872_v62, %v18795_v29  ;;  %v19202_v21 = vadd.s32 24, %v19119_v13  ;;  %13375 = vst [vmem:[#allocation2 + $0x88] sm:$0xff] %v13198_v0   ;;  %v4908_v61 = vadd.f32 %v18486_v38, %v4758_v5  ;;  %v21068_v23 = vld [vmem:[#allocation76_spill] sm:$0xff] }
 0x44e   : > { %vm21060_vm11 = vnez %v21059_v11  ;;  %v12614_v4 = vcombine.low %v6251_v41, %v19195_v59  ;;  %vm5596_vm6 = vcmp.ne.s32.totalorder %v19119_v13, 0  ;;  %v6862_v33 = vor.u32 %v6861_v40, %v6858_v2  ;;  %v21080_v40 = vld [vmem:[#allocation83_spill] sm:$0xff] }
 0x44f   : > { %v21063_v30 = vsel %vm21060_vm11, %v21061_v35, %v21062_v36  ;;  %v19217_v27 = vor.u32 %v6870_v12, %v6867_v16  ;;  %13374 = vst [vmem:[#allocation2 + $0x80] sm:$0xff] %v13193_v6   ;;  %v4958_v8 = vmax.f32 %v4910_v32, 0.0  ;;  %v4911_v60 = vadd.f32 %v14357_v20, %v18486_v38  ;;  %v21081_v6 = vld [vmem:[#allocation78_spill] sm:$0xff] }
 0x450   : > { %vm19210_vm14 = vcmp.lt.s32.totalorder %v21063_v30, 16  ;;  %v12580_v3 = vcombine.low %v19115_v56, %v6249_v46  ;;  %v12581_v50 = vcombine.low %v6250_v1, %v6251_v41  ;;  %v21069_v63 = vsel %vm18583_vm15, %v21067_v19, %v21068_v23  ;;  %v21074_v56 = vld [vmem:[#allocation81_spill] sm:$0xff] }
 0x451   : > { %vm19226_vm12 = vcmp.lt.s32.totalorder %v21069_v63, 16  ;;  %vm5594_vm3 = vcmp.ne.s32.totalorder %v19122_v47, 0  ;;  %v4956_v37 = vmax.f32 %v4908_v61, 0.0  ;;  %v4909_v51 = vadd.f32 %v18486_v38, %v4761_v15 }
 0x452   : > { %v12613_v48 = vcombine.low %v6249_v46, %v6250_v1  ;;  %vm21073_vm11 = vnez %v21072_v7  ;;  %v6883_v0 = vshrl.u32 %v12614_v4, 16  ;;  %v5967_v45 = vsel %vm19130_vm9, %v4958_v8, 0.0  ;;  %14411 = vmatmul.mubr.bf16.gmra.mrb[20].mxu1 %v12580_v3  ;;  %v14360_v8 = vpop.f32.mrb[36].mxu0  ;;  %v21091_v7 = vld [vmem:[#allocation11_spill] sm:$0xff] }
 0x453   : > { %v21076_v16 = vsel %vm21073_vm11, %v21074_v56, %v21075_v22  ;;  %v4959_v58 = vmax.f32 %v4911_v60, 0.0  ;;  %v21082_v32 = vsel %vm18619_vm1, %v21080_v40, %v21081_v6  ;;  %v6886_v41 = vshll.u32 %v12614_v4, 16  ;;  %vm21085_vm11 = vmmov %vm21058_vm8  ;;  %14414 = vmatprep.mubr.bf16.mxu1 %v12581_v50  ;;  %v4774_v10 = vpop.f32.mrb[37].mxu0  ;;  %v21092_v56 = vld [vmem:[#allocation82_spill] sm:$0xff] }
 0x454   : > { %vm19238_vm4 = vcmp.lt.s32.totalorder %v21076_v16, 16  ;;  %vm19249_vm15 = vcmp.lt.s32.totalorder %v21082_v32, 16  ;;  %v19255_v61 = vsel %vm21085_vm11, %v19135_v57, %v6862_v33  ;;  %v5965_v52 = vsel %vm19144_vm10, %v4956_v37, 0.0  ;;  %v6255_v19 = vld [vmem:[#allocation2 + $0x88] sm:$0xf]  ;;  %v14361_v63 = vpop.f32.mrb[38].mxu0 }
 0x455   : > { %v4957_v20 = vmax.f32 %v4909_v51, 0.0  ;;  %v6874_v46 = vshrl.u32 %v12613_v48, 16  ;;  %v6877_v1 = vshll.u32 %v12613_v48, 16  ;;  %vm21086_vm9 = vcmp.ne.s32.totalorder %v18876_v14, 0  ;;  %v19276_v42 = vld [vmem:[#allocation2 + $0x8c] sm:$0xf] }
 0x456   : > { %vm21087_vm1 = vcmp.lt.s32.totalorder %v18876_v14, 0  ;;  %v5968_v35 = vsel %vm19157_vm5, %v4959_v58, 0.0  ;;  %v19271_v57 = vsel %vm21085_vm11, %v6862_v33, %v19217_v27  ;;  %v6885_v34 = vrot.slane %v6883_v0, 3  ;;  %v6253_v37 = vld [vmem:[#allocation2 + $0x80] sm:$0xf]  ;;  %v4777_v6 = vpop.f32.mrb[39].mxu0 }
 0x457   : > { %vm19263_vm8 = vmand %vm21087_vm1, %vm21086_vm9  ;;  %v6888_v36 = vrot.slane %v6886_v41, 4  ;;  %v13208_v30 = vpack.c.bf16 %v5968_v35, %v5967_v45  ;;  %v5966_v4 = vsel %vm19168_vm2, %v4957_v20, 0.0  ;;  %v6876_v60 = vrot.slane %v6874_v46, 3  ;;  %v6254_v51 = vld [vmem:[#allocation2 + $0x84] sm:$0xf]  ;;  %v21099_v46 = vld [vmem:[#allocation8_spill] sm:$0xff] }
 0x458   : > { %v6879_v15 = vrot.slane %v6877_v1, 4  ;;  %v13203_v3 = vpack.c.bf16 %v5966_v4, %v5965_v52  ;;  %v4914_v50 = vadd.f32 %v14360_v8, %v18486_v38  ;;  %v5785_v33 = vsel %vm19263_vm8, %v18961_v18, %v18876_v14  ;;  %v21096_v52 = vld [vmem:[#allocation9_spill] sm:$0xff]  ;;  %v21098_v20 = vld [vmem:[#allocation14_spill] sm:$0xff] }
 0x459   : > { %v19283_v23 = vadd.s32 24, %v19122_v47  ;;  %13377 = vst [vmem:[#allocation2 + $0x98] sm:$0xff] %v13208_v30   ;;  %v4912_v38 = vadd.f32 %v19288_v26, %v4774_v10  ;;  %v21093_v22 = vsel %vm18640_vm0, %v21091_v7, %v21092_v56  ;;  %v12616_v0 = vcombine.low %v6255_v19, %v19276_v42  ;;  %v21104_v4 = vld [vmem:[#allocation85_spill] sm:$0xff] }
 0x45a   : > { %vm19296_vm10 = vcmp.lt.s32.totalorder %v21093_v22, 16  ;;  %v6880_v45 = vor.u32 %v6879_v15, %v6876_v60  ;;  %v19301_v58 = vor.u32 %v6888_v36, %v6885_v34  ;;  %13376 = vst [vmem:[#allocation2 + $0x90] sm:$0xff] %v13203_v3   ;;  %v4962_v2 = vmax.f32 %v4914_v50, 0.0  ;;  %v21108_v50 = vld [vmem:[#allocation6_spill] sm:$0xff]  ;;  %v14364_v22 = vpop.f32.mrb[40].mxu0 }
 0x45b   : > { %v4915_v40 = vadd.f32 %v19288_v26, %v14361_v63  ;;  %v12582_v32 = vcombine.low %v19195_v59, %v6253_v37  ;;  %v12583_v41 = vcombine.low %v6254_v51, %v6255_v19  ;;  %vm21097_vm2 = vnez %v21096_v52 }
 0x45c   : > { %v21100_v1 = vsel %vm21097_vm2, %v21098_v20, %v21099_v46  ;;  %v4960_v30 = vmax.f32 %v4912_v38, 0.0  ;;  %v4913_v34 = vadd.f32 %v19288_v26, %v4777_v6  ;;  %v12615_v36 = vcombine.low %v6253_v37, %v6254_v51 }
 0x45d   : > { %vm19310_vm0 = vcmp.lt.s32.totalorder %v21100_v1, 16  ;;  %vm21103_vm5 = vnez %v20976_v25  ;;  %v6901_v60 = vshrl.u32 %v12616_v0, 16  ;;  %v5971_v15 = vsel %vm19210_vm14, %v4962_v2, 0.0  ;;  %14415 = vmatmul.mubr.bf16.gmra.mrb[24].mxu1 %v12582_v32  ;;  %v4790_v32 = vpop.f32.mrb[41].mxu0 }
 0x45e   : > { %v21105_v8 = vsel %vm21103_vm5, %v18703_v31, %v21104_v4  ;;  %v4963_v3 = vmax.f32 %v4915_v40, 0.0  ;;  %v21109_v10 = vsel %vm19021_vm7, %v18779_v49, %v21108_v50  ;;  %v6904_v31 = vshll.u32 %v12616_v0, 16  ;;  %14418 = vmatprep.mubr.bf16.mxu1 %v12583_v41  ;;  %v14365_v20 = vpop.f32.mrb[42].mxu0 }
 0x45f   : > { %vm19320_vm9 = vcmp.lt.s32.totalorder %v21105_v8, 16  ;;  %vm19331_vm1 = vcmp.lt.s32.totalorder %v21109_v10, 16  ;;  %vm21112_vm11 = vcmp.lt.s32.totalorder %v19119_v13, 0  ;;  %vm21115_vm14 = vsmask.f32 4352 }
 0x460   : > { %vm19339_vm2 = vmand %vm21112_vm11, %vm5596_vm6  ;;  %v19345_v39 = vsel %vm21115_vm14, %v19217_v27, %v6880_v45  ;;  %v5969_v49 = vsel %vm19226_vm12, %v4960_v30, 0.0  ;;  %v4961_v44 = vmax.f32 %v4913_v34, 0.0  ;;  %v6892_v38 = vshrl.u32 %v12615_v36, 16  ;;  %v6259_v41 = vld [vmem:[#allocation2 + $0x98] sm:$0xf] }
 0x461   : > { %v6895_v63 = vshll.u32 %v12615_v36, 16  ;;  %vm21116_vm7 = vcmp.lt.s32.totalorder %v19122_v47, 0  ;;  %v5972_v51 = vsel %vm19238_vm4, %v4963_v3, 0.0  ;;  %vm21119_vm6 = vmmov %vm21115_vm14  ;;  %v6903_v28 = vrot.slane %v6901_v60, 3  ;;  %v19374_v5 = vld [vmem:[#allocation2 + $0x9c] sm:$0xf] }
 0x462   : > { %vm19353_vm5 = vmand %vm21116_vm7, %vm5594_vm3  ;;  %v19361_v27 = vsel %vm21119_vm6, %v6880_v45, %v19301_v58  ;;  %v6906_v48 = vrot.slane %v6904_v31, 4  ;;  %v13218_v7 = vpack.c.bf16 %v5972_v51, %v5971_v15  ;;  %v5970_v56 = vsel %vm19249_vm15, %v4961_v44, 0.0  ;;  %v6257_v46 = vld [vmem:[#allocation2 + $0x90] sm:$0xf]  ;;  %v6258_v1 = vld [vmem:[#allocation2 + $0x94] sm:$0xf] }
 0x463   : > { %v6894_v0 = vrot.slane %v6892_v38, 3  ;;  %v6897_v2 = vrot.slane %v6895_v63, 4  ;;  %v13213_v40 = vpack.c.bf16 %v5970_v56, %v5969_v49  ;;  %v4918_v6 = vadd.f32 %v19288_v26, %v14364_v22  ;;  %v4793_v36 = vpop.f32.mrb[43].mxu0  ;;  %vm21126_vm3 = vmmov %vm21119_vm6 }
 0x464   : > { %v5788_v12 = vsel %vm19339_vm2, %v19202_v21, %v19119_v13  ;;  %v5786_v45 = vsel %vm19353_vm5, %v19283_v23, %v19122_v47  ;;  %13379 = vst [vmem:[#allocation2 + $0xa8] sm:$0xff] %v13218_v7   ;;  %v4916_v52 = vadd.f32 %v19288_v26, %v4790_v32  ;;  %vm19382_vm4 = vcmp.lt.s32.totalorder %v5787_v24, 16  ;;  %vm21127_vm8 = vmmov %vm21126_vm3  ;;  %v14368_v38 = vpop.f32.mrb[44].mxu0 }
 0x465   : > { %v12618_v21 = vcombine.low %v6259_v41, %v19374_v5  ;;  %v6898_v47 = vor.u32 %v6897_v2, %v6894_v0  ;;  %v6907_v23 = vor.u32 %v6906_v48, %v6903_v28  ;;  %13378 = vst [vmem:[#allocation2 + $0xa0] sm:$0xff] %v13213_v40   ;;  %v4966_v30 = vmax.f32 %v4918_v6, 0.0  ;;  %v4806_v28 = vpop.f32.mrb[45].mxu0 }
 0x466   : > { %v4919_v34 = vadd.f32 %v19288_v26, %v14365_v20  ;;  %v12584_v4 = vcombine.low %v19276_v42, %v6257_v46  ;;  %v12585_v8 = vcombine.low %v6258_v1, %v6259_v41  ;;  %vm19394_vm13 = vcmp.lt.s32.totalorder %v5785_v33, 16  ;;  %v14369_v22 = vpop.f32.mrb[46].mxu0 }
 0x467   : > { %v4964_v62 = vmax.f32 %v4916_v52, 0.0  ;;  %v4917_v9 = vadd.f32 %v19288_v26, %v4793_v36  ;;  %v12617_v24 = vcombine.low %v6257_v46, %v6258_v1  ;;  %vm19399_vm12 = vcmp.lt.s32.totalorder %v5788_v12, 16  ;;  %v4809_v12 = vpop.f32.mrb[47].mxu0 }
 0x468   : > { %v6919_v15 = vshrl.u32 %v12618_v21, 16  ;;  %v5975_v42 = vsel %vm19296_vm10, %v4966_v30, 0.0  ;;  %v4967_v11 = vmax.f32 %v4919_v34, 0.0  ;;  %14419 = vmatmul.mubr.bf16.gmra.mrb[28].mxu1 %v12584_v4  ;;  %v6922_v3 = vshll.u32 %v12618_v21, 16  ;;  %vm21130_vm10 = vmmov %vm21126_vm3 }
 0x469   : > { %v19407_v14 = vsel %vm21126_vm3, %v19301_v58, %v6898_v47  ;;  %v5973_v18 = vsel %vm19310_vm0, %v4964_v62, 0.0  ;;  %v4965_v33 = vmax.f32 %v4917_v9, 0.0  ;;  %14422 = vmatprep.mubr.bf16.mxu1 %v12585_v8  ;;  %v6910_v50 = vshrl.u32 %v12617_v24, 16  ;;  %vm21131_vm0 = vmmov %vm21126_vm3 }
 0x46a   : > { %v6913_v10 = vshll.u32 %v12617_v24, 16  ;;  %v5976_v31 = vsel %vm19320_vm9, %v4967_v11, 0.0  ;;  %v19414_v16 = vsel %vm21127_vm8, %v6898_v47, %v6907_v23  ;;  %v6921_v19 = vrot.slane %v6919_v15, 3  ;;  %vm21132_vm9 = vmmov %vm21131_vm0 }
 0x46b   : > { %v6924_v49 = vrot.slane %v6922_v3, 4  ;;  %v13228_v44 = vpack.c.bf16 %v5976_v31, %v5975_v42  ;;  %v5974_v58 = vsel %vm19331_vm1, %v4965_v33, 0.0  ;;  %v6912_v63 = vrot.slane %v6910_v50, 3  ;;  %v6263_v59 = vld [vmem:[#allocation2 + $0xa8] sm:$0xf]  ;;  %vm21133_vm1 = vmmov %vm21131_vm0 }
 0x46c   : > { %v6915_v35 = vrot.slane %v6913_v10, 4  ;;  %v13223_v37 = vpack.c.bf16 %v5974_v58, %v5973_v18  ;;  %v4922_v51 = vadd.f32 %v19288_v26, %v14368_v38  ;;  %vm19419_vm15 = vcmp.lt.s32.totalorder %v5786_v45, 16  ;;  %v6264_v7 = vld [vmem:[#allocation2 + $0xac] sm:$0xf]  ;;  %v6261_v0 = vld [vmem:[#allocation2 + $0xa0] sm:$0xf]  ;;  %vm21134_vm11 = vmmov %vm21131_vm0 }
 0x46d   : > { %13381 = vst [vmem:[#allocation2 + $0xb8] sm:$0xff] %v13228_v44   ;;  %v4920_v56 = vadd.f32 %v19288_v26, %v4806_v28  ;;  %v6262_v25 = vld [vmem:[#allocation2 + $0xa4] sm:$0xf]  ;;  %v12620_v2 = vcombine.low %v6263_v59, %v6264_v7  ;;  %v6925_v6 = vor.u32 %v6924_v49, %v6921_v19  ;;  %v4923_v41 = vadd.f32 %v19288_v26, %v14369_v22  ;;  %vm21135_vm2 = vmmov %vm21131_vm0 }
 0x46e   : > { %v6916_v40 = vor.u32 %v6915_v35, %v6912_v63  ;;  %13380 = vst [vmem:[#allocation2 + $0xb0] sm:$0xff] %v13223_v37   ;;  %v4970_v32 = vmax.f32 %v4922_v51, 0.0  ;;  %v12586_v45 = vcombine.low %v19374_v5, %v6261_v0  ;;  %v12587_v52 = vcombine.low %v6262_v25, %v6263_v59  ;;  %vm21137_vm14 = vmmov %vm21131_vm0 }
 0x46f   : > { %v4968_v20 = vmax.f32 %v4920_v56, 0.0  ;;  %v4921_v46 = vadd.f32 %v19288_v26, %v4809_v12  ;;  %v12619_v1 = vcombine.low %v6261_v0, %v6262_v25  ;;  %v6937_v21 = vshrl.u32 %v12620_v2, 16  ;;  %v21136_v12 = vld [vmem:[#allocation79_spill] sm:$0xff] }
 0x470   : > { %v5979_v47 = vsel %vm19382_vm4, %v4970_v32, 0.0  ;;  %v4971_v30 = vmax.f32 %v4923_v41, 0.0  ;;  %14423 = vmatmul.mubr.bf16.gmra.mrb[32].mxu1 %v12586_v45  ;;  %v6940_v34 = vshll.u32 %v12620_v2, 16  ;;  %v19430_v36 = vsel %vm21130_vm10, %v6907_v23, %v6916_v40 }
 0x471   : > { %v5977_v4 = vsel %vm19394_vm13, %v4968_v20, 0.0  ;;  %v4969_v8 = vmax.f32 %v4921_v46, 0.0  ;;  %14426 = vmatprep.mubr.bf16.mxu1 %v12587_v52  ;;  %v6928_v5 = vshrl.u32 %v12619_v1, 16  ;;  %v6931_v62 = vshll.u32 %v12619_v1, 16  ;;  %v16038_v46 = vld [vmem:[%s20382_s3 + $0x88] sm:$0xff]  }
 0x472   : > { %v5980_v26 = vsel %vm19399_vm12, %v4971_v30, 0.0  ;;  %v19437_v9 = vsel %vm21131_vm0, %v6916_v40, %v6925_v6  ;;  %v6939_v13 = vrot.slane %v6937_v21, 3  ;;  %v6942_v24 = vrot.slane %v6940_v34, 4  ;;  %v21138_v21 = vld [vmem:[#allocation16_spill] sm:$0xff] }
 0x473   : > { %v13238_v15 = vpack.c.bf16 %v5980_v26, %v5979_v47  ;;  %v5978_v23 = vsel %vm19419_vm15, %v4969_v8, 0.0  ;;  %v6930_v42 = vrot.slane %v6928_v5, 3  ;;  %v6933_v11 = vrot.slane %v6931_v62, 4  ;;  %v21139_v47 = vld [vmem:[#allocation15_spill] sm:$0xff]  ;;  %v16040_v34 = vld [vmem:[%s20382_s3 + $0x98] sm:$0xff]   ;;  %v21141_v8 = vld [vmem:[#allocation18_spill] sm:$0xff] }
 0x474   : > { %v13233_v29 = vpack.c.bf16 %v5978_v23, %v5977_v4  ;;  %v6267_v3 = vld [vmem:[#allocation2 + $0xb8] sm:$0xf]  ;;  %v6268_v18 = vld [vmem:[#allocation2 + $0xbc] sm:$0xf]  ;;  %v6943_v33 = vor.u32 %v6942_v24, %v6939_v13  ;;  %v16039_v30 = vld [vmem:[%s20382_s3 + $0x90] sm:$0xff]  }
 0x475   : > { %13383 = vst [vmem:[#allocation2 + $0xc8] sm:$0xff] %v13238_v15   ;;  %v6265_v50 = vld [vmem:[#allocation2 + $0xb0] sm:$0xf]  ;;  %v6266_v10 = vld [vmem:[#allocation2 + $0xb4] sm:$0xf]  ;;  %v12622_v60 = vcombine.low %v6267_v3, %v6268_v18  ;;  %v6934_v31 = vor.u32 %v6933_v11, %v6930_v42  ;;  %v16042_v5 = vld [vmem:[%s20382_s3 + $0xa8] sm:$0xff]  }
 0x476   : > { %13382 = vst [vmem:[#allocation2 + $0xc0] sm:$0xff] %v13233_v29   ;;  %v12588_v19 = vcombine.low %v6264_v7, %v6265_v50  ;;  %v12589_v49 = vcombine.low %v6266_v10, %v6267_v3  ;;  %v12621_v44 = vcombine.low %v6265_v50, %v6266_v10  ;;  %v21140_v4 = vld [vmem:[#allocation7_spill] sm:$0xff]  ;;  %v21143_v26 = vld [vmem:[#allocation10_spill] sm:$0xff]  ;;  %v16044_v24 = vld [vmem:[%s20382_s3 + $0xb8] sm:$0xff]   ;;  %vm21172_vm7 = vsmask.f32 7424 }
 0x477   : > { %v6955_v58 = vshrl.u32 %v12622_v60, 16  ;;  %v6958_v38 = vshll.u32 %v12622_v60, 16  ;;  %v19442_v63 = vsel %vm21132_vm9, %v6925_v6, %v6934_v31  ;;  %v19445_v35 = vsel %vm21133_vm1, %v6934_v31, %v6943_v33  ;;  %v21142_v62 = vld [vmem:[#allocation19_spill] sm:$0xff]  ;;  %v19490_v15 = vld [vmem:[%s20382_s3 + $0xc0] sm:$0xff]   ;;  %v19501_v23 = vld [vmem:[#allocation2 + $0x18] sm:$0xf] }
 0x478   : > { %14427 = vmatmul.mubr.bf16.gmra.mrb[36].mxu1 %v12588_v19  ;;  %v6946_v37 = vshrl.u32 %v12621_v44, 16  ;;  %v6949_v51 = vshll.u32 %v12621_v44, 16  ;;  %v16043_v13 = vld [vmem:[%s20382_s3 + $0xb0] sm:$0xff]   ;;  %v19503_v42 = vld [vmem:[#allocation2 + $0x1c] sm:$0xf]  ;;  %vm21173_vm5 = vmmov %vm21172_vm7 }
 0x479   : > { %14430 = vmatprep.mubr.bf16.mxu1 %v12589_v49  ;;  %v6957_v28 = vrot.slane %v6955_v58, 3  ;;  %v6960_v48 = vrot.slane %v6958_v38, 4  ;;  %v19506_v11 = vld [vmem:[#allocation2 + $0x20] sm:$0xf]  ;;  %v19508_v29 = vld [vmem:[#allocation2 + $0x24] sm:$0xf]  ;;  %vm21174_vm6 = vmmov %vm21173_vm5 }
 0x47a   : > { %v6948_v59 = vrot.slane %v6946_v37, 3  ;;  %v6951_v56 = vrot.slane %v6949_v51, 4  ;;  %v19519_v3 = vld [vmem:[#allocation2 + $0x38] sm:$0xf]  ;;  %v19527_v50 = vld [vmem:[#allocation2 + $0x48] sm:$0xf]  ;;  %vm21175_vm4 = vmmov %vm21173_vm5 }
 0x47b   : > { %v6961_v22 = vor.u32 %v6960_v48, %v6957_v28  ;;  %v19529_v10 = vld [vmem:[#allocation2 + $0x4c] sm:$0xf]  ;;  %v19531_v60 = vld [vmem:[#allocation2 + $0x50] sm:$0xf]  ;;  %v19535_v31 = vld [vmem:[#allocation2 + $0x58] sm:$0xf] }
 0x47c   : > { %v6952_v7 = vor.u32 %v6951_v56, %v6948_v59  ;;  %v19537_v19 = vld [vmem:[#allocation2 + $0x5c] sm:$0xf]  ;;  %v19545_v38 = vld [vmem:[#allocation2 + $0x60] sm:$0xf]  ;;  %v19547_v37 = vld [vmem:[#allocation2 + $0x64] sm:$0xf] }
 0x47d   : > { %v6269_v0 = vld [vmem:[#allocation2 + $0xc0] sm:$0xf]  ;;  %21144 = vst [vmem:[#allocation21_spill] sm:$0xff] %v19537_v19  ;;  %21145 = vst [vmem:[#allocation20_spill] sm:$0xff] %v19547_v37  ;;  %v19549_v51 = vld [vmem:[#allocation2 + $0x68] sm:$0xf] }
 0x47e   : > { %v12590_v25 = vcombine.low %v6268_v18, %v6269_v0  ;;  %v12623_v2 = vcombine.low %v6269_v0, %v6269_v0  ;;  %v19448_v40 = vsel %vm21134_vm11, %v6943_v33, %v6952_v7  ;;  %v19451_v6 = vsel %vm21135_vm2, %v6952_v7, %v6961_v22  ;;  %v19521_v18 = vld [vmem:[#allocation2 + $0x3c] sm:$0xf]  ;;  %v19523_v33 = vld [vmem:[#allocation2 + $0x40] sm:$0xf]  ;;  %21146 = vst [vmem:[#allocation12_spill] sm:$0xff] %v19549_v51  ;;  %v16046_v44 = vld [vmem:[#allocation2 + $0xc] sm:$0xff]  }
 0x47f   : > { %v19551_v28 = vld [vmem:[#allocation2 + $0x6c] sm:$0xf]  ;;  %v19553_v48 = vld [vmem:[#allocation2 + $0x70] sm:$0xf]  ;;  %v19555_v59 = vld [vmem:[#allocation2 + $0x74] sm:$0xf] }
 0x480   : > { %14431 = vmatmul.mubr.bf16.gmra.mrb[40].mxu1 %v12590_v25  ;;  %v6964_v32 = vshrl.u32 %v12623_v2, 16  ;;  %v6967_v41 = vshll.u32 %v12623_v2, 16  ;;  %21147 = vst [vmem:[#allocation25_spill] sm:$0xff] %v19551_v28  ;;  %21148 = vst [vmem:[#allocation23_spill] sm:$0xff] %v19553_v48  ;;  %v19557_v56 = vld [vmem:[#allocation2 + $0x78] sm:$0xf] }
 0x481   : > { %14450 = vmatprep.mubr.bf16.mxu1 %v21136_v12  ;;  %21149 = vst [vmem:[#allocation17_spill] sm:$0xff] %v19555_v59  ;;  %21150 = vst [vmem:[#allocation13_spill] sm:$0xff] %v19557_v56  ;;  %v19561_v7 = vld [vmem:[#allocation2 + $0x80] sm:$0xf]  ;;  %v19563_v0 = vld [vmem:[#allocation2 + $0x84] sm:$0xf] }
 0x482   : > { %v6966_v45 = vrot.slane %v6964_v32, 3  ;;  %v6969_v52 = vrot.slane %v6967_v41, 4  ;;  %21152 = vst [vmem:[#allocation24_spill] sm:$0xff] %v19561_v7  ;;  %21153 = vst [vmem:[#allocation22_spill] sm:$0xff] %v19563_v0  ;;  %v19565_v25 = vld [vmem:[#allocation2 + $0x88] sm:$0xf] }
 0x483   : > { %21154 = vst [vmem:[#allocation38_spill] sm:$0xff] %v19565_v25  ;;  %v19567_v2 = vld [vmem:[#allocation2 + $0x8c] sm:$0xf]  ;;  %v19571_v41 = vld [vmem:[#allocation2 + $0x90] sm:$0xf]  ;;  %v7466_v49 = vshll.u32 %v16046_v44, 16  ;;  %vm21176_vm13 = vmmov %vm21175_vm4 }
 0x484   : > { %v6970_v20 = vor.u32 %v6969_v52, %v6966_v45  ;;  %21155 = vst [vmem:[#allocation31_spill] sm:$0xff] %v19567_v2  ;;  %21156 = vst [vmem:[#allocation26_spill] sm:$0xff] %v19571_v41  ;;  %v19573_v12 = vld [vmem:[#allocation2 + $0x94] sm:$0xf]  ;;  %v19575_v45 = vld [vmem:[#allocation2 + $0x98] sm:$0xf] }
 0x485   : > { %21157 = vst [vmem:[#allocation40_spill] sm:$0xff] %v19573_v12  ;;  %21158 = vst [vmem:[#allocation32_spill] sm:$0xff] %v19575_v45  ;;  %v19577_v52 = vld [vmem:[#allocation2 + $0x9c] sm:$0xf]  ;;  %v16048_v58 = vld [vmem:[#allocation2 + $0x14] sm:$0xff]  }
 0x486   : > { %v19458_v1 = vsel %vm21137_vm14, %v6961_v22, %v6970_v20  ;;  %v19559_v22 = vld [vmem:[#allocation2 + $0x7c] sm:$0xf]  ;;  %21159 = vst [vmem:[#allocation28_spill] sm:$0xff] %v19577_v52  ;;  %v19579_v20 = vld [vmem:[#allocation2 + $0xa0] sm:$0xf]  ;;  %vm21177_vm12 = vmmov %vm21175_vm4 }
 0x487   : > { %21151 = vst [vmem:[#allocation27_spill] sm:$0xff] %v19559_v22  ;;  %21160 = vst [vmem:[#allocation41_spill] sm:$0xff] %v19579_v20  ;;  %v19743_v52 = vld [vmem:[#allocation2 + $0x3c] sm:$0xf]  ;;  %v19749_v20 = vld [vmem:[#allocation2 + $0x64] sm:$0xf] }
 0x488   : > { %14451 = vmatmul.mubr.bf16.vlgmr.msra.gmra.mrb[44].mxu1 %v21138_v21  ;;  %v19583_v21 = vld [vmem:[#allocation2 + $0xa4] sm:$0xf]  ;;  %vm21178_vm3 = vmmov %vm21175_vm4  ;;  %21203 = vst [vmem:[#allocation61_spill] sm:$0xff] %v19749_v20  ;;  %v19751_v12 = vld [vmem:[#allocation2 + $0x68] sm:$0xf] }
 0x489   : > { %14499 = vmatpush3.bf16.msra.mxu1 %v19106_v54  ;;  %14454 = vmatprep.mubr.bf16.mxu1 %v21139_v47  ;;  %v16041_v54 = vld [vmem:[%s20382_s3 + $0xa0] sm:$0xff]   ;;  %21161 = vst [vmem:[#allocation35_spill] sm:$0xff] %v19583_v21  ;;  %v19585_v47 = vld [vmem:[#allocation2 + $0xa8] sm:$0xf]  ;;  %vm21183_vm8 = vmmov %vm21178_vm3 }
 0x48a   : > { %14500 = vmatprep.subr.bf16.mxu1 %v16038_v46  ;;  %21162 = vst [vmem:[#allocation29_spill] sm:$0xff] %v19585_v47  ;;  %vm21184_vm15 = vmmov %vm21178_vm3  ;;  %v19713_v47 = vld [vmem:[#allocation2 + $0x20] sm:$0xf]  ;;  %v19753_v45 = vld [vmem:[#allocation2 + $0x70] sm:$0xf] }
 0x48b   : > { %21185 = vst [vmem:[#allocation51_spill] sm:$0xff] %v19713_v47  ;;  %vm21188_vm10 = vmmov %vm21178_vm3  ;;  %v19757_v2 = vld [vmem:[#allocation2 + $0x78] sm:$0xf]  ;;  %v19765_v0 = vld [vmem:[#allocation2 + $0x88] sm:$0xf] }
 0x48c   : > { %vm21193_vm0 = vmmov %vm21178_vm3  ;;  %21204 = vst [vmem:[#allocation70_spill] sm:$0xff] %v19751_v12  ;;  %v19773_v59 = vld [vmem:[#allocation2 + $0x5c] sm:$0xf]  ;;  %v19775_v56 = vld [vmem:[#allocation2 + $0x6c] sm:$0xf] }
 0x48d   : > { %14501 = vmatpush3.bf16.msra.mxu1 %v16038_v46  ;;  %v19619_v46 = vld [vmem:[#allocation2 + $0xc8] sm:$0xf]  ;;  %21205 = vst [vmem:[#allocation66_spill] sm:$0xff] %v19753_v45  ;;  %21207 = vst [vmem:[#allocation71_spill] sm:$0xff] %v19757_v2  ;;  %v19777_v41 = vld [vmem:[#allocation2 + $0x90] sm:$0xf] }
 0x48e   : > { %14502 = vmatprep.subr.bf16.mxu1 %v16039_v30  ;;  %21170 = vst [vmem:[#allocation44_spill] sm:$0xff] %v19619_v46  ;;  %v7474_v46 = vshll.u32 %v16048_v58, 16  ;;  %21210 = vst [vmem:[#allocation72_spill] sm:$0xff] %v19765_v0  ;;  %v19779_v47 = vld [vmem:[#allocation2 + $0x94] sm:$0xf]  ;;  %v21277_v12 = vld [vmem:[#allocation41_spill] sm:$0xff] }
 0x48f   : > { %21211 = vst [vmem:[#allocation75_spill] sm:$0xff] %v19773_v59  ;;  %21212 = vst [vmem:[#allocation74_spill] sm:$0xff] %v19775_v56  ;;  %v19783_v28 = vld [vmem:[#allocation2 + $0x7c] sm:$0xf]  ;;  %v19785_v48 = vld [vmem:[#allocation2 + $0x8c] sm:$0xf] }
 0x490   : > { %14455 = vmatmul.mubr.bf16.gmra.mrb[0].mxu1 %v21140_v4  ;;  %v19611_v4 = vld [vmem:[#allocation2 + $0xc4] sm:$0xf]  ;;  %21213 = vst [vmem:[#allocation73_spill] sm:$0xff] %v19777_v41  ;;  %21214 = vst [vmem:[#allocation4_spill] sm:$0xff] %v19779_v47  ;;  %v19787_v25 = vld [vmem:[#allocation2 + $0xa0] sm:$0xf] }
 0x491   : > { %14458 = vmatprep.mubr.bf16.mxu1 %v21141_v8  ;;  %14503 = vmatpush3.bf16.msra.mxu1 %v16039_v30  ;;  %v19587_v30 = vld [vmem:[#allocation2 + $0xac] sm:$0xf]  ;;  %v19594_v8 = vld [vmem:[#allocation2 + $0xb0] sm:$0xf]  ;;  %21169 = vst [vmem:[#allocation46_spill] sm:$0xff] %v19611_v4  ;;  %v7476_v4 = vrot.slane %v7474_v46, 1  ;;  %vm21221_vm9 = vmmov %vm21193_vm0 }
 0x492   : > { %14504 = vmatprep.subr.bf16.mxu1 %v16040_v34  ;;  %21163 = vst [vmem:[#allocation42_spill] sm:$0xff] %v19587_v30  ;;  %21164 = vst [vmem:[#allocation37_spill] sm:$0xff] %v19594_v8  ;;  %v19735_v8 = vld [vmem:[#allocation2 + $0x48] sm:$0xf]  ;;  %v19789_v22 = vld [vmem:[#allocation2 + $0xa4] sm:$0xf] }
 0x493   : > { %21197 = vst [vmem:[#allocation53_spill] sm:$0xff] %v19735_v8  ;;  %21216 = vst [vmem:[#allocation76_spill] sm:$0xff] %v19783_v28  ;;  %v19802_v37 = vld [vmem:[#allocation2 + $0xb0] sm:$0xf]  ;;  %v19804_v51 = vld [vmem:[#allocation2 + $0xb4] sm:$0xf] }
 0x494   : > { %21217 = vst [vmem:[#allocation3_spill] sm:$0xff] %v19785_v48  ;;  %21218 = vst [vmem:[#allocation81_spill] sm:$0xff] %v19787_v25  ;;  %v19806_v19 = vld [vmem:[#allocation2 + $0xb8] sm:$0xf]  ;;  %v19814_v8 = vld [vmem:[#allocation2 + $0xc8] sm:$0xf] }
 0x495   : > { %14505 = vmatpush3.bf16.msra.mxu1 %v16040_v34  ;;  %21219 = vst [vmem:[#allocation77_spill] sm:$0xff] %v19789_v22  ;;  %21223 = vst [vmem:[#allocation78_spill] sm:$0xff] %v19802_v37  ;;  %v21271_v28 = vld [vmem:[#allocation26_spill] sm:$0xff]  ;;  %v21274_v45 = vld [vmem:[#allocation32_spill] sm:$0xff] }
 0x496   : > { %14506 = vmatprep.subr.bf16.mxu1 %v16041_v54  ;;  %21224 = vst [vmem:[#allocation84_spill] sm:$0xff] %v19804_v51  ;;  %21225 = vst [vmem:[#allocation11_spill] sm:$0xff] %v19806_v19  ;;  %v12699_v51 = vcombine.low %v19503_v42, %v19506_v11 }
 0x497   : > { %21228 = vst [vmem:[#allocation14_spill] sm:$0xff] %v19814_v8  ;;  %vm21229_vm1 = vmmov %vm21193_vm0 }
 0x498   : > { %14459 = vmatmul.mubr.bf16.gmra.mrb[4].mxu1 %v21142_v62  ;;  %vm21237_vm11 = vmmov %vm21193_vm0 }
 0x499   : > { %14462 = vmatprep.mubr.bf16.mxu1 %v21143_v26  ;;  %14507 = vmatpush3.bf16.msra.mxu1 %v16041_v54  ;;  %v19596_v54 = vld [vmem:[#allocation2 + $0xb4] sm:$0xf]  ;;  %v16045_v26 = vld [vmem:[#allocation2 + $0x4] sm:$0xff]   ;;  %vm21238_vm2 = vmmov %vm21193_vm0 }
 0x49a   : > { %14508 = vmatprep.subr.bf16.mxu1 %v16042_v5  ;;  %21165 = vst [vmem:[#allocation30_spill] sm:$0xff] %v19596_v54  ;;  %v7459_v32 = vshrl.u32 %v16045_v26, 16  ;;  %vm21239_vm14 = vmmov %vm21193_vm0 }
 0x49d   : > { %14509 = vmatpush3.bf16.msra.mxu1 %v16042_v5  ;;  %v19598_v5 = vld [vmem:[#allocation2 + $0xb8] sm:$0xf] }
 0x49e   : > { %14510 = vmatprep.subr.bf16.mxu1 %v16043_v13  ;;  %21166 = vst [vmem:[#allocation43_spill] sm:$0xff] %v19598_v5 }
 0x4a0   : > { %14463 = vmatmul.mubr.bf16.gmra.mrb[8].mxu1 %v19097_v17  ;;  %v19497_v17 = vld [vmem:[#allocation2 + $0x10] sm:$0xf] }
 0x4a1   : > { %14466 = vmatprep.mubr.bf16.mxu1 %v19110_v43  ;;  %14511 = vmatpush3.bf16.msra.mxu1 %v16043_v13  ;;  %v19499_v43 = vld [vmem:[#allocation2 + $0x14] sm:$0xf]  ;;  %v19621_v13 = vld [vmem:[#allocation2 + $0xcc] sm:$0xf] }
 0x4a2   : > { %14512 = vmatprep.subr.bf16.mxu1 %v16044_v24  ;;  %21171 = vst [vmem:[#allocation34_spill] sm:$0xff] %v19621_v13  ;;  %v7468_v13 = vrot.slane %v7466_v49, 1  ;;  %v16052_v49 = vld [vmem:[%s20382_s3 + $0xc8] sm:$0xff]  }
 0x4a5   : > { %14513 = vmatpush3.bf16.msra.mxu1 %v16044_v24  ;;  %v19607_v24 = vld [vmem:[#allocation2 + $0xbc] sm:$0xf] }
 0x4a6   : > { %14562 = vmatprep.subr.bf16.mxu1 %v19490_v15  ;;  %21167 = vst [vmem:[#allocation39_spill] sm:$0xff] %v19607_v24  ;;  %v16051_v24 = vld [vmem:[#allocation2 + $0x2c] sm:$0xff]  }
 0x4a8   : > { %14467 = vmatmul.mubr.bf16.gmra.mrb[12].mxu1 %v19174_v55  ;;  %v19510_v55 = vld [vmem:[#allocation2 + $0x28] sm:$0xf] }
 0x4a9   : > { %14470 = vmatprep.mubr.bf16.mxu1 %v19190_v53  ;;  %v19513_v53 = vld [vmem:[#allocation2 + $0x2c] sm:$0xf] }
 0x4b0   : > { %14471 = vmatmul.mubr.bf16.gmra.mrb[16].mxu1 %v19255_v61  ;;  %v19515_v61 = vld [vmem:[#allocation2 + $0x30] sm:$0xf] }
 0x4b1   : > { %14474 = vmatprep.mubr.bf16.mxu1 %v19271_v57  ;;  %v19517_v57 = vld [vmem:[#allocation2 + $0x34] sm:$0xf] }
 0x4b8   : > { %14475 = vmatmul.mubr.bf16.gmra.mrb[20].mxu1 %v19345_v39  ;;  %v19525_v39 = vld [vmem:[#allocation2 + $0x44] sm:$0xf] }
 0x4b9   : > { %14478 = vmatprep.mubr.bf16.mxu1 %v19361_v27  ;;  %v19533_v27 = vld [vmem:[#allocation2 + $0x54] sm:$0xf] }
 0x4c0   : > { %14479 = vmatmul.mubr.bf16.gmra.mrb[24].mxu1 %v19407_v14  ;;  %v19609_v14 = vld [vmem:[#allocation2 + $0xc0] sm:$0xf] }
 0x4c1   : > { %14482 = vmatprep.mubr.bf16.mxu1 %v19414_v16  ;;  %21168 = vst [vmem:[#allocation33_spill] sm:$0xff] %v19609_v14  ;;  %v7461_v16 = vshll.u32 %v16045_v26, 16  ;;  %v16050_v14 = vld [vmem:[#allocation2 + $0x24] sm:$0xff]   ;;  %v7478_v26 = vshrl.u32 %v16048_v58, 16  ;;  %v16053_v58 = vld [vmem:[#allocation2 + $0x34] sm:$0xff]  }
 0x4c3   : > { %v7463_v62 = vrot.slane %v7461_v16, 1  ;;  %v7480_v5 = vor.u32 %v7478_v26, %v7476_v4 }
 0x4c5   : > { %v7464_v34 = vor.u32 %v7463_v62, %v7459_v32  ;;  %v16055_v62 = vld [vmem:[%s20382_s3 + $0xd0] sm:$0xff]  }
 0x4c8   : > { %14483 = vmatmul.mubr.bf16.gmra.mrb[28].mxu1 %v19430_v36  ;;  %v16049_v36 = vld [vmem:[#allocation2 + $0x1c] sm:$0xff]  }
 0x4c9   : > { %14486 = vmatprep.mubr.bf16.mxu1 %v19437_v9  ;;  %v7469_v9 = vsel %vm21172_vm7, %v7464_v34, %v7468_v13  ;;  %v7498_v34 = vshll.u32 %v16051_v24, 16  ;;  %vm21240_vm7 = vmmov %vm21193_vm0 }
 0x4d0   : > { %14487 = vmatmul.mubr.bf16.gmra.mrb[32].mxu1 %v19442_v63  ;;  %v7482_v63 = vshll.u32 %v16049_v36, 16 }
 0x4d1   : > { %14490 = vmatprep.mubr.bf16.mxu1 %v19445_v35  ;;  %v7470_v35 = vshrl.u32 %v16046_v44, 16  ;;  %v7486_v44 = vshrl.u32 %v16049_v36, 16 }
 0x4d2   : > { %v7484_v16 = vrot.slane %v7482_v63, 1  ;;  %v7500_v63 = vrot.slane %v7498_v34, 1 }
 0x4d8   : > { %14491 = vmatmul.mubr.bf16.gmra.mrb[36].mxu1 %v19448_v40  ;;  %v7472_v40 = vor.u32 %v7470_v35, %v7468_v13  ;;  %v7488_v13 = vor.u32 %v7486_v44, %v7484_v16  ;;  %v16054_v35 = vld [vmem:[#allocation2 + $0x3c] sm:$0xff]   ;;  %v16057_v44 = vld [vmem:[#allocation2 + $0x4c] sm:$0xff]  }
 0x4d9   : > { %14494 = vmatprep.mubr.bf16.mxu1 %v19451_v6  ;;  %v7490_v6 = vshll.u32 %v16050_v14, 16  ;;  %v7514_v26 = vshll.u32 %v16054_v35, 16 }
 0x4da   : > { %v7477_v32 = vsel %vm21173_vm5, %v7472_v40, %v7476_v4  ;;  %v7506_v40 = vshll.u32 %v16053_v58, 16  ;;  %vm21241_vm5 = vmmov %vm21193_vm0 }
 0x4db   : > { %v7492_v46 = vrot.slane %v7490_v6, 1  ;;  %v7502_v6 = vshrl.u32 %v16051_v24, 16  ;;  %v7516_v34 = vrot.slane %v7514_v26, 1  ;;  %v16068_v24 = vld [vmem:[%s20382_s3 + $0xe8] sm:$0xff]  }
 0x4e0   : > { %14495 = vmatmul.mubr.bf16.gmra.mrb[40].mxu1 %v19458_v1  ;;  %v7485_v1 = vsel %vm21174_vm6, %v7480_v5, %v7484_v16  ;;  %v7493_v5 = vsel %vm21175_vm4, %v7488_v13, %v7492_v46  ;;  %v16056_v16 = vld [vmem:[#allocation2 + $0x44] sm:$0xff]   ;;  %vm21242_vm6 = vmmov %vm21193_vm0 }
 0x4e1   : > { %14514 = vmatprep.mubr.bf16.mxu1 %v7469_v9  ;;  %v7494_v9 = vshrl.u32 %v16050_v14, 16  ;;  %v7508_v14 = vrot.slane %v7506_v40, 1  ;;  %v7522_v13 = vshll.u32 %v16056_v16, 16  ;;  %v7518_v40 = vshrl.u32 %v16054_v35, 16  ;;  %v19686_v35 = vld [vmem:[#allocation2 + $0x6c] sm:$0xff]   ;;  %vm21243_vm4 = vmmov %vm21193_vm0 }
 0x4e3   : > { %v7496_v4 = vor.u32 %v7494_v9, %v7492_v46 }
 0x4e5   : > { %v7501_v36 = vsel %vm21176_vm13, %v7496_v4, %v7500_v63  ;;  %v7530_v4 = vshll.u32 %v16057_v44, 16  ;;  %vm21244_vm13 = vmmov %vm21193_vm0 }
 0x4e8   : > { %14515 = vmatmul.mubr.bf16.vlgmr.msra.gmra.mrb[44].mxu1 %v7477_v32  ;;  %v7504_v32 = vor.u32 %v7502_v6, %v7500_v63  ;;  %v16058_v63 = vld [vmem:[#allocation2 + $0x54] sm:$0xff]   ;;  %v7526_v6 = vshrl.u32 %v16056_v16, 16 }
 0x4e9   : > { %14563 = vmatpush3.bf16.msra.mxu1 %v19490_v15  ;;  %14518 = vmatprep.mubr.bf16.mxu1 %v7485_v1  ;;  %v16060_v15 = vld [vmem:[%s20382_s3 + $0xd8] sm:$0xff]   ;;  %v7510_v1 = vshrl.u32 %v16053_v58, 16  ;;  %v7524_v58 = vrot.slane %v7522_v13, 1 }
 0x4ea   : > { %14564 = vmatprep.subr.bf16.mxu1 %v16052_v49 }
 0x4eb   : > { %v7512_v46 = vor.u32 %v7510_v1, %v7508_v14  ;;  %v19682_v1 = vld [vmem:[#allocation2 + $0x64] sm:$0xff]   ;;  %v7528_v13 = vor.u32 %v7526_v6, %v7524_v58  ;;  %v19699_v6 = vld [vmem:[#allocation2 + $0x7c] sm:$0xff]  }
 0x4ed   : > { %14565 = vmatpush3.bf16.msra.mxu1 %v16052_v49  ;;  %v16063_v49 = vld [vmem:[%s20382_s3 + $0xe0] sm:$0xff]   ;;  %v7517_v9 = vsel %vm21178_vm3, %v7512_v46, %v7516_v34  ;;  %vm21246_vm3 = vmmov %vm21193_vm0 }
 0x4ee   : > { %14566 = vmatprep.subr.bf16.mxu1 %v16055_v62 }
 0x4f0   : > { %14519 = vmatmul.mubr.bf16.gmra.mrb[0].mxu1 %v7493_v5  ;;  %v19678_v5 = vpop.f32.mrb[48].mxu0 }
 0x4f1   : > { %14522 = vmatprep.mubr.bf16.mxu1 %v7501_v36  ;;  %14567 = vmatpush3.bf16.msra.mxu1 %v16055_v62  ;;  %v7509_v62 = vsel %vm21177_vm12, %v7504_v32, %v7508_v14  ;;  %21179 = vst [vmem:[#allocation47_spill] sm:$0xff] %v19678_v5  ;;  %v7520_v36 = vor.u32 %v7518_v40, %v7516_v34  ;;  %v19680_v26 = vpop.f32.mrb[49].mxu0  ;;  %v7532_v14 = vrot.slane %v7530_v4, 1  ;;  %v16059_v32 = vld [vmem:[#allocation2 + $0x5c] sm:$0xff]   ;;  %v7554_v40 = vshll.u32 %v19682_v1, 16  ;;  %vm21245_vm12 = vmmov %vm21193_vm0 }
 0x4f2   : > { %14568 = vmatprep.subr.bf16.mxu1 %v16060_v15  ;;  %21180 = vst [vmem:[#allocation45_spill] sm:$0xff] %v19680_v26  ;;  %v19684_v46 = vpop.f32.mrb[50].mxu0  ;;  %v16076_v34 = vld [vmem:[%s20382_s3 + $0xf8] sm:$0xff]   ;;  %v7546_v4 = vshll.u32 %v16059_v32, 16  ;;  %v7550_v5 = vshrl.u32 %v16059_v32, 16 }
 0x4f3   : > { %21181 = vst [vmem:[#allocation36_spill] sm:$0xff] %v19684_v46  ;;  %v7525_v16 = vsel %vm21183_vm8, %v7520_v36, %v7524_v58  ;;  %v7534_v46 = vshrl.u32 %v16057_v44, 16  ;;  %v19704_v58 = vld [vmem:[%s20382_s3 + $0x100] sm:$0xff]   ;;  %v7558_v44 = vshrl.u32 %v19682_v1, 16  ;;  %v19720_v1 = vld [vmem:[#allocation2 + $0x1c] sm:$0xf]  ;;  %vm21247_vm8 = vmmov %vm21193_vm0 }
 0x4f4   : > { %21189 = vst [vmem:[#allocation52_spill] sm:$0xff] %v19720_v1  ;;  %v19781_v1 = vld [vmem:[#allocation2 + $0x98] sm:$0xf] }
 0x4f5   : > { %14569 = vmatpush3.bf16.msra.mxu1 %v16060_v15  ;;  %v16071_v15 = vld [vmem:[%s20382_s3 + $0xf0] sm:$0xff]   ;;  %v7536_v36 = vor.u32 %v7534_v46, %v7532_v14  ;;  %21215 = vst [vmem:[#allocation80_spill] sm:$0xff] %v19781_v1 }
 0x4f6   : > { %14570 = vmatprep.subr.bf16.mxu1 %v16063_v49  ;;  %v19722_v46 = vld [vmem:[#allocation2 + $0x30] sm:$0xf] }
 0x4f7   : > { %21190 = vst [vmem:[#allocation49_spill] sm:$0xff] %v19722_v46  ;;  %v19791_v46 = vld [vmem:[#allocation2 + $0xa8] sm:$0xf] }
 0x4f8   : > { %14523 = vmatmul.mubr.bf16.gmra.mrb[4].mxu1 %v7509_v62  ;;  %v7538_v62 = vshll.u32 %v16058_v63, 16  ;;  %21220 = vst [vmem:[#allocation5_spill] sm:$0xff] %v19791_v46  ;;  %v16067_v46 = vld [vmem:[#allocation2 + $0x8c] sm:$0xff]  }
 0x4f9   : > { %14526 = vmatprep.mubr.bf16.mxu1 %v7517_v9  ;;  %14571 = vmatpush3.bf16.msra.mxu1 %v16063_v49  ;;  %v19688_v49 = vpop.f32.mrb[51].mxu0  ;;  %v7533_v9 = vsel %vm21184_vm15, %v7528_v13, %v7532_v14  ;;  %v7542_v13 = vshrl.u32 %v16058_v63, 16  ;;  %v19715_v63 = vld [vmem:[#allocation2 + $0x24] sm:$0xf]  ;;  %v19717_v14 = vld [vmem:[#allocation2 + $0x28] sm:$0xf] }
 0x4fa   : > { %14572 = vmatprep.subr.bf16.mxu1 %v16068_v24  ;;  %21182 = vst [vmem:[#allocation54_spill] sm:$0xff] %v19688_v49  ;;  %v19697_v49 = vld [vmem:[#allocation2 + $0x74] sm:$0xff]   ;;  %v7540_v26 = vrot.slane %v7538_v62, 1  ;;  %21186 = vst [vmem:[#allocation48_spill] sm:$0xff] %v19715_v63  ;;  %v19733_v62 = vld [vmem:[#allocation2 + $0x44] sm:$0xf] }
 0x4fb   : > { %21187 = vst [vmem:[#allocation55_spill] sm:$0xff] %v19717_v14  ;;  %21196 = vst [vmem:[#allocation57_spill] sm:$0xff] %v19733_v62  ;;  %v19800_v63 = vld [vmem:[#allocation2 + $0x9c] sm:$0xf]  ;;  %v7574_v37 = vshrl.u32 %v19697_v49, 16  ;;  %v7594_v8 = vshll.u32 %v16067_v46, 16 }
 0x4fc   : > { %v7544_v30 = vor.u32 %v7542_v13, %v7540_v26  ;;  %v7541_v32 = vsel %vm21188_vm10, %v7536_v36, %v7540_v26  ;;  %v19731_v13 = vld [vmem:[#allocation2 + $0x40] sm:$0xf]  ;;  %v19737_v26 = vld [vmem:[#allocation2 + $0x50] sm:$0xf]  ;;  %v19739_v36 = vld [vmem:[#allocation2 + $0x54] sm:$0xf] }
 0x4fd   : > { %14573 = vmatpush3.bf16.msra.mxu1 %v16068_v24  ;;  %v7562_v24 = vshll.u32 %v19686_v35, 16  ;;  %21195 = vst [vmem:[#allocation60_spill] sm:$0xff] %v19731_v13  ;;  %21198 = vst [vmem:[#allocation67_spill] sm:$0xff] %v19737_v26  ;;  %v19810_v13 = vld [vmem:[#allocation2 + $0xc0] sm:$0xf] }
 0x4fe   : > { %14574 = vmatprep.subr.bf16.mxu1 %v16071_v15  ;;  %21199 = vst [vmem:[#allocation63_spill] sm:$0xff] %v19739_v36  ;;  %21222 = vst [vmem:[#allocation83_spill] sm:$0xff] %v19800_v63  ;;  %v19828_v36 = vld [vmem:[#allocation2 + $0xcc] sm:$0xf]  ;;  %v19830_v26 = vld [vmem:[#allocation2 + $0xd0] sm:$0xf] }
 0x4ff   : > { %v19707_v54 = vrot.slane %v7562_v24, 1  ;;  %v19729_v24 = vld [vmem:[#allocation2 + $0x2c] sm:$0xf]  ;;  %21226 = vst [vmem:[#allocation82_spill] sm:$0xff] %v19810_v13  ;;  %21231 = vst [vmem:[#allocation85_spill] sm:$0xff] %v19828_v36  ;;  %v16070_v36 = vld [vmem:[#allocation2 + $0x9c] sm:$0xff]  }
 0x500   : > { %14527 = vmatmul.mubr.bf16.gmra.mrb[8].mxu1 %v7525_v16  ;;  %v7548_v16 = vrot.slane %v7546_v4, 1  ;;  %v19724_v4 = vld [vmem:[#allocation2 + $0x34] sm:$0xf]  ;;  %21194 = vst [vmem:[#allocation50_spill] sm:$0xff] %v19729_v24  ;;  %21232 = vst [vmem:[#allocation6_spill] sm:$0xff] %v19830_v26 }
 0x501   : > { %14530 = vmatprep.mubr.bf16.mxu1 %v7533_v9  ;;  %14575 = vmatpush3.bf16.msra.mxu1 %v16071_v15  ;;  %v7556_v9 = vrot.slane %v7554_v40, 1  ;;  %21191 = vst [vmem:[#allocation58_spill] sm:$0xff] %v19724_v4  ;;  %v19726_v40 = vld [vmem:[#allocation2 + $0x38] sm:$0xf]  ;;  %v21235_v4 = vshrl.u32 %v19686_v35, 16 }
 0x502   : > { %14576 = vmatprep.subr.bf16.mxu1 %v16076_v34  ;;  %21192 = vst [vmem:[#allocation56_spill] sm:$0xff] %v19726_v40  ;;  %v19741_v15 = vld [vmem:[#allocation2 + $0x58] sm:$0xf]  ;;  %v7552_v21 = vor.u32 %v7550_v5, %v7548_v16  ;;  %v19761_v5 = vld [vmem:[#allocation2 + $0x80] sm:$0xf] }
 0x503   : > { %21200 = vst [vmem:[#allocation59_spill] sm:$0xff] %v19741_v15  ;;  %21208 = vst [vmem:[#allocation69_spill] sm:$0xff] %v19761_v5  ;;  %v7560_v14 = vor.u32 %v7558_v44, %v7556_v9  ;;  %v19812_v40 = vld [vmem:[#allocation2 + $0xc4] sm:$0xf]  ;;  %v19826_v15 = vld [vmem:[#allocation2 + $0xac] sm:$0xf]  ;;  %v7568_v2 = vor.u32 %v21235_v4, %v19707_v54 }
 0x504   : > { %v7557_v24 = vsel %vm21221_vm9, %v7552_v21, %v7556_v9  ;;  %21227 = vst [vmem:[#allocation9_spill] sm:$0xff] %v19812_v40  ;;  %21230 = vst [vmem:[#allocation8_spill] sm:$0xff] %v19826_v15  ;;  %v21234_v9 = vshll.u32 %v19697_v49, 16  ;;  %v16069_v4 = vld [vmem:[#allocation2 + $0x94] sm:$0xff]   ;;  %v7596_v49 = vrot.slane %v7594_v8, 1 }
 0x505   : > { %14577 = vmatpush3.bf16.msra.mxu1 %v16076_v34  ;;  %v7549_v34 = vsel %vm21193_vm0, %v7544_v30, %v7548_v16  ;;  %v19747_v30 = vld [vmem:[#allocation2 + $0x60] sm:$0xf]  ;;  %v19763_v16 = vld [vmem:[#allocation2 + $0x84] sm:$0xf]  ;;  %v7565_v7 = vsel %vm21229_vm1, %v7560_v14, %v19707_v54  ;;  %v7582_v54 = vshrl.u32 %v19699_v6, 16 }
 0x506   : > { %14626 = vmatprep.subr.bf16.mxu1 %v19704_v58  ;;  %21202 = vst [vmem:[#allocation65_spill] sm:$0xff] %v19747_v30  ;;  %21209 = vst [vmem:[#allocation64_spill] sm:$0xff] %v19763_v16  ;;  %v7572_v0 = vrot.slane %v21234_v9, 1  ;;  %v16066_v16 = vld [vmem:[#allocation2 + $0x84] sm:$0xff]   ;;  %v21236_v9 = vshll.u32 %v19699_v6, 16  ;;  %v7606_v6 = vshrl.u32 %v16069_v4, 16 }
 0x507   : > { %v7586_v19 = vshll.u32 %v16066_v16, 16  ;;  %v7590_v26 = vshrl.u32 %v16066_v16, 16  ;;  %vm21248_vm15 = vsmask.f32 4352  ;;  %v16286_v30 = vld [vmem:[#allocation2 + $0xa4] sm:$0xf] }
 0x508   : > { %14531 = vmatmul.mubr.bf16.gmra.mrb[12].mxu1 %v7541_v32  ;;  %v19745_v32 = vld [vmem:[#allocation2 + $0x4c] sm:$0xf]  ;;  %v7580_v15 = vrot.slane %v21236_v9, 1  ;;  %v7573_v44 = vsel %vm21237_vm11, %v7568_v2, %v7572_v0  ;;  %v7602_v9 = vshll.u32 %v16069_v4, 16  ;;  %v7610_v2 = vshll.u32 %v16070_v36, 16  ;;  %vm21249_vm10 = vmmov %vm21248_vm15 }
 0x509   : > { %14534 = vmatprep.mubr.bf16.mxu1 %v7549_v34  ;;  %21201 = vst [vmem:[#allocation68_spill] sm:$0xff] %v19745_v32  ;;  %v19755_v34 = vld [vmem:[#allocation2 + $0x74] sm:$0xf]  ;;  %v7588_v35 = vrot.slane %v7586_v19, 1  ;;  %vm21250_vm0 = vmmov %vm21249_vm10  ;;  %v16288_v32 = vld [vmem:[#allocation2 + $0xac] sm:$0xf] }
 0x50a   : > { %21206 = vst [vmem:[#allocation62_spill] sm:$0xff] %v19755_v34  ;;  %v7584_v21 = vor.u32 %v7582_v54, %v7580_v15  ;;  %v7612_v19 = vrot.slane %v7610_v2, 1  ;;  %v7614_v54 = vshrl.u32 %v16070_v36, 16  ;;  %v12698_v36 = vcombine.low %v19499_v43, %v19501_v23  ;;  %vm21251_vm9 = vmmov %vm21250_vm0 }
 0x50b   : > { %v7592_v40 = vor.u32 %v7590_v26, %v7588_v35  ;;  %vm21252_vm1 = vmmov %vm21250_vm0 }
 0x50c   : > { %vm21253_vm11 = vmmov %vm21250_vm0 }
 0x510   : > { %14535 = vmatmul.mubr.bf16.gmra.mrb[16].mxu1 %v7557_v24  ;;  %v19838_v24 = vld [vmem:[#allocation2 + $0xbc] sm:$0xf] }
 0x511   : > { %14538 = vmatprep.mubr.bf16.mxu1 %v7565_v7  ;;  %21233 = vst [vmem:[#allocation79_spill] sm:$0xff] %v19838_v24  ;;  %v7576_v7 = vor.u32 %v7574_v37, %v7572_v0  ;;  %v7589_v37 = vsel %vm21239_vm14, %v7584_v21, %v7588_v35  ;;  %v7597_v0 = vsel %vm21240_vm7, %v7592_v40, %v7596_v49  ;;  %v16073_v24 = vld [vmem:[#allocation2 + $0xac] sm:$0xff]   ;;  %v16074_v40 = vld [vmem:[#allocation2 + $0xb4] sm:$0xff]   ;;  %vm21258_vm14 = vmmov %vm21250_vm0 }
 0x512   : > { %v7626_v21 = vshll.u32 %v16073_v24, 16  ;;  %v7634_v4 = vshll.u32 %v16074_v40, 16  ;;  %vm21261_vm7 = vmmov %vm21250_vm0 }
 0x513   : > { %v7581_v14 = vsel %vm21238_vm2, %v7576_v7, %v7580_v15  ;;  %v7604_v7 = vrot.slane %v7602_v9, 1  ;;  %vm21255_vm2 = vmmov %vm21250_vm0 }
 0x515   : > { %v7608_v15 = vor.u32 %v7606_v6, %v7604_v7 }
 0x517   : > { %v7613_v26 = vsel %vm21242_vm6, %v7608_v15, %v7612_v19  ;;  %v7630_v15 = vshrl.u32 %v16073_v24, 16  ;;  %vm21267_vm6 = vmmov %vm21250_vm0 }
 0x518   : > { %14539 = vmatmul.mubr.bf16.gmra.mrb[20].mxu1 %v7573_v44  ;;  %v7598_v44 = vshrl.u32 %v16067_v46, 16  ;;  %v16075_v46 = vld [vmem:[#allocation2 + $0xbc] sm:$0xff]  }
 0x519   : > { %14542 = vmatprep.mubr.bf16.mxu1 %v7581_v14  ;;  %v16072_v14 = vld [vmem:[#allocation2 + $0xa4] sm:$0xff]   ;;  %v7642_v6 = vshll.u32 %v16075_v46, 16 }
 0x51a   : > { %v7600_v13 = vor.u32 %v7598_v44, %v7596_v49  ;;  %v7618_v16 = vshll.u32 %v16072_v14, 16  ;;  %v7622_v9 = vshrl.u32 %v16072_v14, 16  ;;  %v7999_v49 = vld [vmem:[#allocation2 + $0xc] sm:$0x8]  ;;  %v7638_v14 = vshrl.u32 %v16074_v40, 16 }
 0x51b   : > { %v12700_v40 = vcombine.low %v19508_v29, %v19510_v55 }
 0x51c   : > { %v7605_v8 = vsel %vm21241_vm5, %v7600_v13, %v7604_v7  ;;  %v7620_v35 = vrot.slane %v7618_v16, 1  ;;  %v12697_v13 = vcombine.low %v7999_v49, %v19497_v17  ;;  %vm21264_vm5 = vmmov %vm21250_vm0 }
 0x51e   : > { %v7624_v2 = vor.u32 %v7622_v9, %v7620_v35  ;;  %v8200_v9 = vshll.u32 %v12698_v36, 16 }
 0x520   : > { %14543 = vmatmul.mubr.bf16.gmra.mrb[24].mxu1 %v7589_v37  ;;  %v7616_v37 = vor.u32 %v7614_v54, %v7612_v19  ;;  %v7636_v19 = vrot.slane %v7634_v4, 1  ;;  %v8197_v54 = vshrl.u32 %v12698_v36, 16  ;;  %v8206_v36 = vshrl.u32 %v12699_v51, 16 }
 0x521   : > { %14546 = vmatprep.mubr.bf16.mxu1 %v7597_v0  ;;  %v7628_v0 = vrot.slane %v7626_v21, 1  ;;  %v8192_v21 = vshll.u32 %v12697_v13, 16 }
 0x522   : > { %v7621_v44 = vsel %vm21243_vm4, %v7616_v37, %v7620_v35  ;;  %v7640_v35 = vor.u32 %v7638_v14, %v7636_v19  ;;  %v16077_v37 = vld [vmem:[#allocation2 + $0xc4] ss:$0 sps:$4 sm:$0x11]   ;;  %v8199_v4 = vrot.slane %v8197_v54, 3  ;;  %v8215_v14 = vshrl.u32 %v12700_v40, 16  ;;  %vm21270_vm4 = vmmov %vm21250_vm0 }
 0x523   : > { %v7629_v7 = vsel %vm21244_vm13, %v7624_v2, %v7628_v0  ;;  %v7632_v16 = vor.u32 %v7630_v15, %v7628_v0  ;;  %v8194_v24 = vrot.slane %v8192_v21, 4  ;;  %v8202_v0 = vrot.slane %v8200_v9, 4  ;;  %vm21273_vm13 = vmmov %vm21250_vm0 }
 0x524   : > { %v8209_v15 = vshll.u32 %v12699_v51, 16  ;;  %v12701_v54 = vcombine.low %v19513_v53, %v19515_v61  ;;  %v12702_v51 = vcombine.low %v19517_v57, %v19519_v3 }
 0x525   : > { %v7637_v49 = vsel %vm21245_vm12, %v7632_v16, %v7636_v19  ;;  %v8203_v16 = vor.u32 %v8202_v0, %v8199_v4  ;;  %vm21276_vm12 = vmmov %vm21250_vm0 }
 0x526   : > { %v8211_v21 = vrot.slane %v8209_v15, 4  ;;  %v8233_v4 = vshrl.u32 %v12702_v51, 16  ;;  %v8236_v0 = vshll.u32 %v12702_v51, 16 }
 0x528   : > { %14547 = vmatmul.mubr.bf16.gmra.mrb[28].mxu1 %v7605_v8  ;;  %v7644_v8 = vrot.slane %v7642_v6, 1  ;;  %v7646_v6 = vshrl.u32 %v16075_v46, 16  ;;  %v8217_v46 = vrot.slane %v8215_v14, 3  ;;  %v8235_v15 = vrot.slane %v8233_v4, 3 }
 0x529   : > { %14550 = vmatprep.mubr.bf16.mxu1 %v7613_v26  ;;  %v8189_v26 = vshrl.u32 %v12697_v13, 16  ;;  %v7650_v13 = vshll.u32 %v16077_v37, 16  ;;  %v12704_v14 = vcombine.low %v19525_v39, %v19527_v50 }
 0x52b   : > { %v8191_v2 = vrot.slane %v8189_v26, 3  ;;  %v8218_v26 = vshll.u32 %v12700_v40, 16  ;;  %v16085_v40 = vld [vmem:[%s20382_s3 + $0x108] sm:$0xff]  }
 0x52d   : > { %v8195_v19 = vor.u32 %v8194_v24, %v8191_v2  ;;  %v8220_v37 = vrot.slane %v8218_v26, 4  ;;  %v8227_v2 = vshll.u32 %v12701_v54, 16 }
 0x52f   : > { %v8204_v9 = vsel %vm21248_vm15, %v8195_v19, %v8203_v16  ;;  %v8221_v24 = vor.u32 %v8220_v37, %v8217_v46  ;;  %v8238_v19 = vrot.slane %v8236_v0, 4  ;;  %v16093_v46 = vld [vmem:[%s20382_s3 + $0x118] sm:$0xff]   ;;  %v12706_v0 = vcombine.low %v19533_v27, %v19535_v31  ;;  %vm21281_vm15 = vmmov %vm21250_vm0 }
 0x530   : > { %14551 = vmatmul.mubr.bf16.gmra.mrb[32].mxu1 %v7621_v44  ;;  %v7645_v44 = vsel %vm21246_vm3, %v7640_v35, %v7644_v8  ;;  %v7652_v35 = vrot.slane %v7650_v13, 1  ;;  %v8229_v13 = vrot.slane %v8227_v2, 4  ;;  %vm21279_vm3 = vmmov %vm21250_vm0 }
 0x531   : > { %14554 = vmatprep.mubr.bf16.mxu1 %v7629_v7  ;;  %v7648_v7 = vor.u32 %v7646_v6, %v7644_v8 }
 0x533   : > { %v7653_v22 = vsel %vm21247_vm8, %v7648_v7, %v7652_v35  ;;  %v12703_v7 = vcombine.low %v19521_v18, %v19523_v33  ;;  %vm21280_vm8 = vmmov %vm21250_vm0 }
 0x535   : > { %v8242_v35 = vshrl.u32 %v12703_v7, 16 }
 0x537   : > { %v8244_v37 = vrot.slane %v8242_v35, 3 }
 0x538   : > { %14555 = vmatmul.mubr.bf16.gmra.mrb[36].mxu1 %v7637_v49  ;;  %v8208_v49 = vrot.slane %v8206_v36, 3 }
 0x539   : > { %14558 = vmatprep.mubr.bf16.mxu1 %v7645_v44  ;;  %v8224_v44 = vshrl.u32 %v12701_v54, 16  ;;  %v8251_v54 = vshrl.u32 %v12704_v14, 16 }
 0x53a   : > { %v8212_v8 = vor.u32 %v8211_v21, %v8208_v49  ;;  %v8245_v49 = vshll.u32 %v12703_v7, 16  ;;  %v8239_v21 = vor.u32 %v8238_v19, %v8235_v15  ;;  %v8269_v7 = vshrl.u32 %v12706_v0, 16  ;;  %v16101_v15 = vld [vmem:[%s20382_s3 + $0x128] sm:$0xff]  }
 0x53b   : > { %v8226_v6 = vrot.slane %v8224_v44, 3  ;;  %v8253_v2 = vrot.slane %v8251_v54, 3 }
 0x53c   : > { %v8222_v36 = vsel %vm21250_vm0, %v8212_v8, %v8221_v24  ;;  %v8247_v51 = vrot.slane %v8245_v49, 4  ;;  %v8271_v54 = vrot.slane %v8269_v7, 3  ;;  %v21259_v7 = vld [vmem:[#allocation23_spill] sm:$0xff] }
 0x53d   : > { %v8230_v26 = vor.u32 %v8229_v13, %v8226_v6 }
 0x53f   : > { %v8240_v44 = vsel %vm21252_vm1, %v8230_v26, %v8239_v21  ;;  %vm21284_vm1 = vmmov %vm21250_vm0 }
 0x540   : > { %14559 = vmatmul.mubr.bf16.gmra.mrb[40].mxu1 %v7653_v22  ;;  %v8213_v22 = vsel %vm21249_vm10, %v8203_v16, %v8212_v8  ;;  %v16088_v16 = vld [vmem:[%s20382_s3 + $0x110] sm:$0xff]   ;;  %v12705_v8 = vcombine.low %v19529_v10, %v19531_v60  ;;  %vm21282_vm10 = vmmov %vm21250_vm0 }
 0x541   : > { %14578 = vmatprep.mubr.bf16.mxu1 %v8204_v9  ;;  %v8254_v9 = vshll.u32 %v12704_v14, 16 }
 0x542   : > { %v8263_v6 = vshll.u32 %v12705_v8, 16 }
 0x543   : > { %v8256_v4 = vrot.slane %v8254_v9, 4 }
 0x545   : > { %v8257_v13 = vor.u32 %v8256_v4, %v8253_v2 }
 0x548   : > { %14579 = vmatmul.mubr.bf16.vlgmr.msra.gmra.mrb[44].mxu1 %v8213_v22  ;;  %v8260_v22 = vshrl.u32 %v12705_v8, 16 }
 0x549   : > { %14627 = vmatpush3.bf16.msra.mxu1 %v19704_v58  ;;  %14582 = vmatprep.mubr.bf16.mxu1 %v8222_v36  ;;  %v8231_v58 = vsel %vm21251_vm9, %v8221_v24, %v8230_v26  ;;  %v16096_v24 = vld [vmem:[%s20382_s3 + $0x120] sm:$0xff]   ;;  %v8272_v36 = vshll.u32 %v12706_v0, 16  ;;  %vm21283_vm9 = vmmov %vm21250_vm0 }
 0x54a   : > { %14628 = vmatprep.subr.bf16.mxu1 %v16085_v40  ;;  %v8262_v14 = vrot.slane %v8260_v22, 3  ;;  %v21254_v26 = vld [vmem:[#allocation21_spill] sm:$0xff] }
 0x54b   : > { %v12707_v35 = vcombine.low %v21254_v26, %v19545_v38  ;;  %v8274_v9 = vrot.slane %v8272_v36, 4  ;;  %v21260_v36 = vld [vmem:[#allocation25_spill] sm:$0xff] }
 0x54d   : > { %14629 = vmatpush3.bf16.msra.mxu1 %v16085_v40  ;;  %v8248_v40 = vor.u32 %v8247_v51, %v8244_v37  ;;  %v21257_v37 = vld [vmem:[#allocation20_spill] sm:$0xff]  ;;  %v8278_v8 = vshrl.u32 %v12707_v35, 16  ;;  %v8275_v2 = vor.u32 %v8274_v9, %v8271_v54  ;;  %v21263_v54 = vld [vmem:[#allocation17_spill] sm:$0xff] }
 0x54e   : > { %14630 = vmatprep.subr.bf16.mxu1 %v16088_v16 }
 0x54f   : > { %v8249_v19 = vsel %vm21253_vm11, %v8239_v21, %v8248_v40  ;;  %v8258_v49 = vsel %vm21255_vm2, %v8248_v40, %v8257_v13  ;;  %v16104_v21 = vld [vmem:[%s20382_s3 + $0x130] sm:$0xff]   ;;  %v16109_v40 = vld [vmem:[%s20382_s3 + $0x138] sm:$0xff]   ;;  %vm21285_vm11 = vmmov %vm21250_vm0 }
 0x550   : > { %14583 = vmatmul.mubr.bf16.gmra.mrb[0].mxu1 %v8231_v58  ;;  %v21256_v58 = vld [vmem:[#allocation12_spill] sm:$0xff]  ;;  %vm21286_vm2 = vmmov %vm21250_vm0 }
 0x551   : > { %14586 = vmatprep.mubr.bf16.mxu1 %v8240_v44  ;;  %14631 = vmatpush3.bf16.msra.mxu1 %v16088_v16  ;;  %v8265_v16 = vrot.slane %v8263_v6, 4  ;;  %v8281_v44 = vshll.u32 %v12707_v35, 16 }
 0x552   : > { %14632 = vmatprep.subr.bf16.mxu1 %v16093_v46 }
 0x553   : > { %v8266_v51 = vor.u32 %v8265_v16, %v8262_v14  ;;  %v8283_v6 = vrot.slane %v8281_v44, 4 }
 0x555   : > { %14633 = vmatpush3.bf16.msra.mxu1 %v16093_v46  ;;  %v12708_v46 = vcombine.low %v21257_v37, %v21256_v58  ;;  %v8267_v22 = vsel %vm21258_vm14, %v8257_v13, %v8266_v51  ;;  %v8276_v14 = vsel %vm21261_vm7, %v8266_v51, %v8275_v2  ;;  %v19937_v13 = vld [vmem:[%s20382_s3 + $0x140] sm:$0xff]   ;;  %vm21287_vm14 = vmmov %vm21250_vm0  ;;  %vm21323_vm7 = vsmask.f32 7424 }
 0x556   : > { %14634 = vmatprep.subr.bf16.mxu1 %v16096_v24 }
 0x557   : > { %v8287_v4 = vshrl.u32 %v12708_v46, 16  ;;  %v8290_v0 = vshll.u32 %v12708_v46, 16 }
 0x558   : > { %14587 = vmatmul.mubr.bf16.gmra.mrb[4].mxu1 %v8249_v19  ;;  %v12709_v19 = vcombine.low %v21260_v36, %v21259_v7 }
 0x559   : > { %14590 = vmatprep.mubr.bf16.mxu1 %v8258_v49  ;;  %14635 = vmatpush3.bf16.msra.mxu1 %v16096_v24  ;;  %v8280_v24 = vrot.slane %v8278_v8, 3  ;;  %v8289_v16 = vrot.slane %v8287_v4, 3  ;;  %v8292_v35 = vrot.slane %v8290_v0, 4  ;;  %v21262_v49 = vld [vmem:[#allocation13_spill] sm:$0xff] }
 0x55a   : > { %14636 = vmatprep.subr.bf16.mxu1 %v16101_v15  ;;  %v8296_v46 = vshrl.u32 %v12709_v19, 16  ;;  %v8299_v8 = vshll.u32 %v12709_v19, 16  ;;  %v21269_v19 = vld [vmem:[#allocation22_spill] sm:$0xff] }
 0x55b   : > { %v8284_v9 = vor.u32 %v8283_v6, %v8280_v24  ;;  %v8293_v44 = vor.u32 %v8292_v35, %v8289_v16  ;;  %v21268_v6 = vld [vmem:[#allocation38_spill] sm:$0xff] }
 0x55c   : > { %v8298_v4 = vrot.slane %v8296_v46, 3  ;;  %v8301_v0 = vrot.slane %v8299_v8, 4  ;;  %v12712_v16 = vcombine.low %v21269_v19, %v21268_v6 }
 0x55d   : > { %14637 = vmatpush3.bf16.msra.mxu1 %v16101_v15  ;;  %v12710_v15 = vcombine.low %v21263_v54, %v21262_v49  ;;  %v8285_v51 = vsel %vm21264_vm5, %v8275_v2, %v8284_v9  ;;  %v8294_v1 = vsel %vm21267_vm6, %v8284_v9, %v8293_v44  ;;  %vm21324_vm5 = vmmov %vm21323_vm7 }
 0x55e   : > { %14638 = vmatprep.subr.bf16.mxu1 %v16104_v21  ;;  %v8302_v35 = vor.u32 %v8301_v0, %v8298_v4  ;;  %v8323_v48 = vshrl.u32 %v12712_v16, 16  ;;  %v8326_v2 = vshll.u32 %v12712_v16, 16  ;;  %vm21325_vm6 = vmmov %vm21324_vm5 }
 0x55f   : > { %v8308_v25 = vshll.u32 %v12710_v15, 16 }
 0x560   : > { %14591 = vmatmul.mubr.bf16.gmra.mrb[8].mxu1 %v8267_v22  ;;  %v8305_v22 = vshrl.u32 %v12710_v15, 16  ;;  %v8303_v46 = vsel %vm21270_vm4, %v8293_v44, %v8302_v35  ;;  %v8325_v9 = vrot.slane %v8323_v48, 3  ;;  %vm21326_vm4 = vmmov %vm21324_vm5 }
 0x561   : > { %14594 = vmatprep.mubr.bf16.mxu1 %v8276_v14  ;;  %14639 = vmatpush3.bf16.msra.mxu1 %v16104_v21  ;;  %v21265_v21 = vld [vmem:[#allocation24_spill] sm:$0xff]  ;;  %v21266_v14 = vld [vmem:[#allocation27_spill] sm:$0xff]  ;;  %v8310_v24 = vrot.slane %v8308_v25, 4 }
 0x562   : > { %14640 = vmatprep.subr.bf16.mxu1 %v16109_v40  ;;  %v12711_v63 = vcombine.low %v21266_v14, %v21265_v21  ;;  %v8307_v47 = vrot.slane %v8305_v22, 3  ;;  %v8328_v22 = vrot.slane %v8326_v2, 4 }
 0x564   : > { %v8317_v15 = vshll.u32 %v12711_v63, 16  ;;  %v8311_v41 = vor.u32 %v8310_v24, %v8307_v47  ;;  %v8329_v24 = vor.u32 %v8328_v22, %v8325_v9 }
 0x565   : > { %14641 = vmatpush3.bf16.msra.mxu1 %v16109_v40  ;;  %v8314_v40 = vshrl.u32 %v12711_v63, 16 }
 0x566   : > { %14690 = vmatprep.subr.bf16.mxu1 %v19937_v13  ;;  %v8319_v5 = vrot.slane %v8317_v15, 4  ;;  %v8312_v25 = vsel %vm21273_vm13, %v8302_v35, %v8311_v41  ;;  %vm21327_vm13 = vmmov %vm21326_vm4 }
 0x567   : > { %v8316_v8 = vrot.slane %v8314_v40, 3 }
 0x568   : > { %14595 = vmatmul.mubr.bf16.gmra.mrb[12].mxu1 %v8285_v51  ;;  %v21272_v51 = vld [vmem:[#allocation31_spill] sm:$0xff] }
 0x569   : > { %14598 = vmatprep.mubr.bf16.mxu1 %v8294_v1  ;;  %v12713_v34 = vcombine.low %v21272_v51, %v21271_v28  ;;  %v21275_v1 = vld [vmem:[#allocation40_spill] sm:$0xff]  ;;  %v8320_v63 = vor.u32 %v8319_v5, %v8316_v8 }
 0x56a   : > { %v12714_v4 = vcombine.low %v21275_v1, %v21274_v45 }
 0x56b   : > { %v8332_v47 = vshrl.u32 %v12713_v34, 16  ;;  %v8335_v0 = vshll.u32 %v12713_v34, 16  ;;  %v8321_v40 = vsel %vm21276_vm12, %v8311_v41, %v8320_v63  ;;  %v8330_v48 = vsel %vm21279_vm3, %v8320_v63, %v8329_v24  ;;  %vm21328_vm12 = vmmov %vm21326_vm4 }
 0x56c   : > { %v8341_v16 = vshrl.u32 %v12714_v4, 16  ;;  %v8344_v44 = vshll.u32 %v12714_v4, 16  ;;  %vm21329_vm3 = vmmov %vm21326_vm4 }
 0x56d   : > { %v8334_v15 = vrot.slane %v8332_v47, 3  ;;  %v8337_v56 = vrot.slane %v8335_v0, 4 }
 0x56e   : > { %v8343_v35 = vrot.slane %v8341_v16, 3  ;;  %v8346_v2 = vrot.slane %v8344_v44, 4 }
 0x56f   : > { %v8338_v34 = vor.u32 %v8337_v56, %v8334_v15 }
 0x570   : > { %14599 = vmatmul.mubr.bf16.gmra.mrb[16].mxu1 %v8303_v46  ;;  %v21278_v46 = vld [vmem:[#allocation28_spill] sm:$0xff]  ;;  %v8347_v22 = vor.u32 %v8346_v2, %v8343_v35 }
 0x571   : > { %14602 = vmatprep.mubr.bf16.mxu1 %v8312_v25  ;;  %v12715_v20 = vcombine.low %v21278_v46, %v21277_v12  ;;  %v16287_v25 = vld [vmem:[#allocation2 + $0xa8] sm:$0xf]  ;;  %v8339_v47 = vsel %vm21280_vm8, %v8329_v24, %v8338_v34  ;;  %vm21330_vm8 = vmmov %vm21329_vm3 }
 0x572   : > { %v12716_v5 = vcombine.low %v16286_v30, %v16287_v25  ;;  %v8348_v63 = vsel %vm21281_vm15, %v8338_v34, %v8347_v22  ;;  %v16290_v30 = vld [vmem:[#allocation2 + $0xb4] sm:$0xf]  ;;  %vm21331_vm15 = vmmov %vm21329_vm3 }
 0x573   : > { %v8350_v8 = vshrl.u32 %v12715_v20, 16  ;;  %v8353_v9 = vshll.u32 %v12715_v20, 16 }
 0x574   : > { %v8359_v4 = vshrl.u32 %v12716_v5, 16  ;;  %v8362_v41 = vshll.u32 %v12716_v5, 16 }
 0x575   : > { %v8352_v0 = vrot.slane %v8350_v8, 3  ;;  %v8355_v59 = vrot.slane %v8353_v9, 4 }
 0x576   : > { %v8361_v16 = vrot.slane %v8359_v4, 3  ;;  %v8364_v44 = vrot.slane %v8362_v41, 4 }
 0x577   : > { %v8356_v20 = vor.u32 %v8355_v59, %v8352_v0 }
 0x578   : > { %14603 = vmatmul.mubr.bf16.gmra.mrb[20].mxu1 %v8321_v40  ;;  %v16289_v40 = vld [vmem:[#allocation2 + $0xb0] sm:$0xf]  ;;  %v8365_v2 = vor.u32 %v8364_v44, %v8361_v16 }
 0x579   : > { %14606 = vmatprep.mubr.bf16.mxu1 %v8330_v48  ;;  %v12717_v62 = vcombine.low %v16288_v32, %v16289_v40  ;;  %v16291_v48 = vld [vmem:[#allocation2 + $0xb8] sm:$0xf]  ;;  %v8357_v5 = vsel %vm21282_vm10, %v8347_v22, %v8356_v20  ;;  %v16292_v32 = vld [vmem:[#allocation2 + $0xbc] sm:$0xf]  ;;  %vm21332_vm10 = vmmov %vm21329_vm3 }
 0x57a   : > { %v12718_v56 = vcombine.low %v16290_v30, %v16291_v48  ;;  %v8366_v34 = vsel %vm21250_vm0, %v8356_v20, %v8365_v2  ;;  %v16294_v30 = vld [vmem:[#allocation2 + $0xc4] sm:$0xf]  ;;  %vm21333_vm0 = vmmov %vm21329_vm3 }
 0x57b   : > { %v8368_v15 = vshrl.u32 %v12717_v62, 16  ;;  %v8371_v35 = vshll.u32 %v12717_v62, 16 }
 0x57c   : > { %v8377_v25 = vshrl.u32 %v12718_v56, 16  ;;  %v8380_v24 = vshll.u32 %v12718_v56, 16 }
 0x57d   : > { %v8370_v8 = vrot.slane %v8368_v15, 3  ;;  %v8373_v9 = vrot.slane %v8371_v35, 4 }
 0x57e   : > { %v8379_v4 = vrot.slane %v8377_v25, 3  ;;  %v8382_v41 = vrot.slane %v8380_v24, 4 }
 0x57f   : > { %v8374_v62 = vor.u32 %v8373_v9, %v8370_v8 }
 0x580   : > { %14607 = vmatmul.mubr.bf16.gmra.mrb[24].mxu1 %v8339_v47  ;;  %v16293_v47 = vld [vmem:[#allocation2 + $0xc0] sm:$0xf]  ;;  %v8383_v44 = vor.u32 %v8382_v41, %v8379_v4 }
 0x581   : > { %14610 = vmatprep.mubr.bf16.mxu1 %v8348_v63  ;;  %v12719_v40 = vcombine.low %v16292_v32, %v16293_v47  ;;  %v16295_v63 = vld [vmem:[#allocation2 + $0xc8] sm:$0xf]  ;;  %v8375_v56 = vsel %vm21283_vm9, %v8365_v2, %v8374_v62  ;;  %v16296_v32 = vld [vmem:[#allocation2 + $0xcc] sm:$0xf]  ;;  %vm21334_vm9 = vmmov %vm21333_vm0 }
 0x582   : > { %v12720_v59 = vcombine.low %v16294_v30, %v16295_v63  ;;  %v8384_v20 = vsel %vm21284_vm1, %v8374_v62, %v8383_v44  ;;  %v16117_v62 = vld [vmem:[%s20382_s3 + $0x148] sm:$0xff]   ;;  %vm21335_vm1 = vmmov %vm21333_vm0 }
 0x583   : > { %v8386_v0 = vshrl.u32 %v12719_v40, 16  ;;  %v8389_v16 = vshll.u32 %v12719_v40, 16 }
 0x584   : > { %v8395_v48 = vshrl.u32 %v12720_v59, 16  ;;  %v8398_v22 = vshll.u32 %v12720_v59, 16  ;;  %v21288_v59 = vcombine.low %v19497_v17, %v19499_v43  ;;  %v16120_v17 = vld [vmem:[%s20382_s3 + $0x150] sm:$0xff]   ;;  %v16125_v43 = vld [vmem:[%s20382_s3 + $0x158] sm:$0xff]  }
 0x585   : > { %v8388_v15 = vrot.slane %v8386_v0, 3  ;;  %v8391_v35 = vrot.slane %v8389_v16, 4  ;;  %v21289_v0 = vcombine.low %v19501_v23, %v19503_v42  ;;  %v21290_v16 = vcombine.low %v19506_v11, %v19508_v29  ;;  %v16128_v11 = vld [vmem:[%s20382_s3 + $0x160] sm:$0xff]   ;;  %v16133_v29 = vld [vmem:[%s20382_s3 + $0x168] sm:$0xff]  }
 0x586   : > { %v8397_v25 = vrot.slane %v8395_v48, 3  ;;  %v8400_v24 = vrot.slane %v8398_v22, 4  ;;  %v21291_v23 = vcombine.low %v19510_v55, %v19513_v53  ;;  %v21292_v42 = vcombine.low %v19515_v61, %v19517_v57  ;;  %v16136_v61 = vld [vmem:[%s20382_s3 + $0x170] sm:$0xff]   ;;  %v16141_v57 = vld [vmem:[%s20382_s3 + $0x178] sm:$0xff]  }
 0x587   : > { %v8392_v47 = vor.u32 %v8391_v35, %v8388_v15  ;;  %v21293_v55 = vcombine.low %v19519_v3, %v19521_v18  ;;  %v21294_v53 = vcombine.low %v19523_v33, %v19525_v39  ;;  %v21295_v3 = vcombine.low %v19527_v50, %v19529_v10  ;;  %v16145_v33 = vld [vmem:[%s20382_s3 + $0x180] sm:$0xff]  }
 0x588   : > { %14611 = vmatmul.mubr.bf16.gmra.mrb[28].mxu1 %v8357_v5  ;;  %v12721_v5 = vcombine.low %v16296_v32, %v16296_v32  ;;  %v8401_v9 = vor.u32 %v8400_v24, %v8397_v25  ;;  %v21296_v18 = vcombine.low %v19531_v60, %v19533_v27  ;;  %v21297_v39 = vcombine.low %v19535_v31, %v21254_v26  ;;  %v21317_v48 = vld [vmem:[#allocation33_spill] sm:$0xff]  ;;  %v21320_v25 = vld [vmem:[#allocation44_spill] sm:$0xff]  ;;  %v21321_v24 = vld [vmem:[#allocation34_spill] sm:$0xff] }
 0x589   : > { %14614 = vmatprep.mubr.bf16.mxu1 %v8366_v34  ;;  %v8393_v40 = vsel %vm21285_vm11, %v8383_v44, %v8392_v47  ;;  %v21298_v50 = vcombine.low %v19545_v38, %v21257_v37  ;;  %v21299_v10 = vcombine.low %v21256_v58, %v21260_v36  ;;  %v21300_v60 = vcombine.low %v21259_v7, %v21263_v54  ;;  %v21306_v37 = vld [vmem:[#allocation35_spill] sm:$0xff]  ;;  %v21308_v36 = vld [vmem:[#allocation29_spill] sm:$0xff]  ;;  %vm21336_vm11 = vmmov %vm21333_vm0 }
 0x58a   : > { %v8404_v34 = vshrl.u32 %v12721_v5, 16  ;;  %v8407_v8 = vshll.u32 %v12721_v5, 16  ;;  %v8402_v2 = vsel %vm21286_vm2, %v8392_v47, %v8401_v9  ;;  %v21301_v27 = vcombine.low %v21262_v49, %v21266_v14  ;;  %v21309_v49 = vld [vmem:[#allocation42_spill] sm:$0xff]  ;;  %vm21337_vm2 = vmmov %vm21333_vm0 }
 0x58b   : > { %v21302_v31 = vcombine.low %v21265_v21, %v21269_v19  ;;  %v21303_v38 = vcombine.low %v21268_v6, %v21272_v51  ;;  %v21304_v26 = vcombine.low %v21271_v28, %v21275_v1  ;;  %v21305_v58 = vcombine.low %v21274_v45, %v21278_v46  ;;  %v21311_v21 = vld [vmem:[#allocation37_spill] sm:$0xff]  ;;  %v21312_v14 = vld [vmem:[#allocation30_spill] sm:$0xff]  ;;  %v21314_v51 = vld [vmem:[#allocation43_spill] sm:$0xff] }
 0x58c   : > { %v8406_v4 = vrot.slane %v8404_v34, 3  ;;  %v8409_v41 = vrot.slane %v8407_v8, 4  ;;  %v21307_v7 = vcombine.low %v21277_v12, %v21306_v37  ;;  %v21310_v54 = vcombine.low %v21308_v36, %v21309_v49  ;;  %v16144_v28 = vld [vmem:[#allocation2 + $0x18] sm:$0xff]   ;;  %v21315_v1 = vld [vmem:[#allocation39_spill] sm:$0xff]  ;;  %v16146_v46 = vld [vmem:[#allocation2 + $0x20] sm:$0xff]  }
 0x58d   : > { %v21313_v6 = vcombine.low %v21311_v21, %v21312_v14  ;;  %v21316_v44 = vcombine.low %v21314_v51, %v21315_v1  ;;  %v21318_v12 = vld [vmem:[#allocation46_spill] sm:$0xff]  ;;  %v9340_v15 = vshll.u32 %v16144_v28, 16  ;;  %v9348_v32 = vshll.u32 %v16146_v46, 16  ;;  %v16155_v49 = vld [vmem:[#allocation2 + $0x58] sm:$0xff]   ;;  %v16169_v51 = vld [vmem:[%s20382_s3 + $0x1b0] sm:$0xff]  }
 0x58e   : > { %v8410_v30 = vor.u32 %v8409_v41, %v8406_v4  ;;  %v21319_v22 = vcombine.low %v21317_v48, %v21318_v12  ;;  %v21322_v47 = vcombine.low %v21320_v25, %v21321_v24  ;;  %v9344_v41 = vshrl.u32 %v16144_v28, 16  ;;  %v16157_v12 = vld [vmem:[#allocation2 + $0x68] sm:$0xff]   ;;  %v20095_v25 = vld [vmem:[%s20382_s3 + $0x1c0] sm:$0xff]  }
 0x58f   : > { %v9342_v5 = vrot.slane %v9340_v15, 1  ;;  %v9350_v8 = vrot.slane %v9348_v32, 1  ;;  %v9404_v28 = vshll.u32 %v16155_v49, 16  ;;  %v16159_v32 = vld [vmem:[#allocation2 + $0x70] sm:$0xff]   ;;  %v9408_v24 = vshrl.u32 %v16155_v49, 16 }
 0x590   : > { %14615 = vmatmul.mubr.bf16.gmra.mrb[32].mxu1 %v8375_v56  ;;  %v8411_v63 = vsel %vm21287_vm14, %v8401_v9, %v8410_v30  ;;  %v16148_v9 = vld [vmem:[#allocation2 + $0x30] sm:$0xff]   ;;  %vm21338_vm14 = vmmov %vm21333_vm0 }
 0x591   : > { %14618 = vmatprep.mubr.bf16.mxu1 %v8384_v20  ;;  %v16147_v20 = vld [vmem:[#allocation2 + $0x28] sm:$0xff]   ;;  %v9364_v30 = vshll.u32 %v16148_v9, 16  ;;  %v9406_v48 = vrot.slane %v9404_v28, 1 }
 0x592   : > { %v9356_v4 = vshll.u32 %v16147_v20, 16 }
 0x598   : > { %14619 = vmatmul.mubr.bf16.gmra.mrb[36].mxu1 %v8393_v40  ;;  %v9352_v40 = vshrl.u32 %v16146_v46, 16 }
 0x599   : > { %14622 = vmatprep.mubr.bf16.mxu1 %v8402_v2 }
 0x59a   : > { %v9354_v2 = vor.u32 %v9352_v40, %v9350_v8  ;;  %v16160_v40 = vld [vmem:[#allocation2 + $0x78] sm:$0xff]  }
 0x5a0   : > { %14623 = vmatmul.mubr.bf16.gmra.mrb[40].mxu1 %v8411_v63  ;;  %v9346_v63 = vor.u32 %v9344_v41, %v9342_v5 }
 0x5a1   : > { %14642 = vmatprep.mubr.bf16.mxu1 %v21288_v59  ;;  %v9358_v59 = vrot.slane %v9356_v4, 1 }
 0x5a8   : > { %14643 = vmatmul.mubr.bf16.vlgmr.msra.gmra.mrb[44].mxu1 %v21289_v0  ;;  %v16150_v0 = vld [vmem:[%s20382_s3 + $0x188] sm:$0xff]  }
 0x5a9   : > { %14691 = vmatpush3.bf16.msra.mxu1 %v19937_v13  ;;  %14646 = vmatprep.mubr.bf16.mxu1 %v21290_v16  ;;  %v16143_v13 = vld [vmem:[#allocation2 + $0x10] sm:$0xff]   ;;  %v9351_v16 = vsel %vm21324_vm5, %v9346_v63, %v9350_v8  ;;  %v9410_v8 = vor.u32 %v9408_v24, %v9406_v48  ;;  %v9432_v63 = vshrl.u32 %v16159_v32, 16  ;;  %vm21340_vm5 = vmmov %vm21333_vm0 }
 0x5aa   : > { %14692 = vmatprep.subr.bf16.mxu1 %v16117_v62  ;;  %v9335_v19 = vshll.u32 %v16143_v13, 16  ;;  %v9333_v56 = vshrl.u32 %v16143_v13, 16 }
 0x5ac   : > { %v9337_v45 = vrot.slane %v9335_v19, 1 }
 0x5ad   : > { %14693 = vmatpush3.bf16.msra.mxu1 %v16117_v62  ;;  %v16149_v62 = vld [vmem:[#allocation2 + $0x38] sm:$0xff]  }
 0x5ae   : > { %14694 = vmatprep.subr.bf16.mxu1 %v16120_v17  ;;  %v9338_v35 = vor.u32 %v9337_v45, %v9333_v56 }
 0x5b0   : > { %14647 = vmatmul.mubr.bf16.gmra.mrb[0].mxu1 %v21291_v23  ;;  %v9343_v34 = vsel %vm21323_vm7, %v9338_v35, %v9342_v5  ;;  %v16151_v23 = vld [vmem:[#allocation2 + $0x40] sm:$0xff]   ;;  %vm21339_vm7 = vmmov %vm21333_vm0 }
 0x5b1   : > { %14650 = vmatprep.mubr.bf16.mxu1 %v21292_v42  ;;  %14695 = vmatpush3.bf16.msra.mxu1 %v16120_v17  ;;  %v9359_v17 = vsel %vm21325_vm6, %v9354_v2, %v9358_v59  ;;  %v9368_v42 = vshrl.u32 %v16148_v9, 16  ;;  %vm21341_vm6 = vmmov %vm21333_vm0 }
 0x5b2   : > { %14696 = vmatprep.subr.bf16.mxu1 %v16125_v43 }
 0x5b5   : > { %14697 = vmatpush3.bf16.msra.mxu1 %v16125_v43  ;;  %v9366_v43 = vrot.slane %v9364_v30, 1  ;;  %v16162_v30 = vld [vmem:[#allocation2 + $0x80] sm:$0xff]  }
 0x5b6   : > { %14698 = vmatprep.subr.bf16.mxu1 %v16128_v11 }
 0x5b8   : > { %14651 = vmatmul.mubr.bf16.gmra.mrb[4].mxu1 %v21293_v55  ;;  %v9360_v55 = vshrl.u32 %v16147_v20, 16  ;;  %v9420_v20 = vshll.u32 %v16157_v12, 16 }
 0x5b9   : > { %14654 = vmatprep.mubr.bf16.mxu1 %v21294_v53  ;;  %14699 = vmatpush3.bf16.msra.mxu1 %v16128_v11  ;;  %v9372_v11 = vshll.u32 %v16149_v62, 16  ;;  %v9370_v53 = vor.u32 %v9368_v42, %v9366_v43 }
 0x5ba   : > { %14700 = vmatprep.subr.bf16.mxu1 %v16133_v29  ;;  %v9422_v9 = vrot.slane %v9420_v20, 1 }
 0x5bd   : > { %14701 = vmatpush3.bf16.msra.mxu1 %v16133_v29  ;;  %v16153_v29 = vld [vmem:[%s20382_s3 + $0x190] sm:$0xff]  }
 0x5be   : > { %14702 = vmatprep.subr.bf16.mxu1 %v16136_v61 }
 0x5c0   : > { %14655 = vmatmul.mubr.bf16.gmra.mrb[8].mxu1 %v21295_v3  ;;  %v9374_v3 = vrot.slane %v9372_v11, 1 }
 0x5c1   : > { %14658 = vmatprep.mubr.bf16.mxu1 %v21296_v18  ;;  %14703 = vmatpush3.bf16.msra.mxu1 %v16136_v61  ;;  %v9380_v61 = vshll.u32 %v16151_v23, 16  ;;  %v16152_v18 = vld [vmem:[#allocation2 + $0x48] sm:$0xff]  }
 0x5c2   : > { %14704 = vmatprep.subr.bf16.mxu1 %v16141_v57  ;;  %v9392_v1 = vshrl.u32 %v16152_v18, 16 }
 0x5c5   : > { %14705 = vmatpush3.bf16.msra.mxu1 %v16141_v57  ;;  %v9362_v57 = vor.u32 %v9360_v55, %v9358_v59  ;;  %v9436_v59 = vshll.u32 %v16160_v40, 16  ;;  %v16164_v55 = vld [vmem:[#allocation2 + $0x90] sm:$0xff]  }
 0x5c6   : > { %14754 = vmatprep.subr.bf16.mxu1 %v16145_v33 }
 0x5c8   : > { %14659 = vmatmul.mubr.bf16.gmra.mrb[12].mxu1 %v21297_v39  ;;  %v9367_v39 = vsel %vm21326_vm4, %v9362_v57, %v9366_v43  ;;  %v9438_v43 = vrot.slane %v9436_v59, 1  ;;  %v9440_v57 = vshrl.u32 %v16160_v40, 16  ;;  %vm21342_vm4 = vmmov %vm21333_vm0  ;;  %v9873_v40 = vld [vmem:[#allocation2 + $0x18] sm:$0x8] }
 0x5c9   : > { %14662 = vmatprep.mubr.bf16.mxu1 %v21298_v50  ;;  %v9375_v50 = vsel %vm21327_vm13, %v9370_v53, %v9374_v3  ;;  %v9448_v53 = vshrl.u32 %v16162_v30, 16  ;;  %vm21343_vm13 = vmmov %vm21333_vm0 }
 0x5d0   : > { %14663 = vmatmul.mubr.bf16.gmra.mrb[16].mxu1 %v21299_v10  ;;  %v9382_v10 = vrot.slane %v9380_v61, 1 }
 0x5d1   : > { %14666 = vmatprep.mubr.bf16.mxu1 %v21300_v60  ;;  %v16154_v60 = vld [vmem:[#allocation2 + $0x50] sm:$0xff]  }
 0x5d2   : > { %v9396_v37 = vshll.u32 %v16154_v60, 16  ;;  %v9400_v19 = vshrl.u32 %v16154_v60, 16 }
 0x5d4   : > { %v9398_v14 = vrot.slane %v9396_v37, 1 }
 0x5d8   : > { %14667 = vmatmul.mubr.bf16.gmra.mrb[20].mxu1 %v21301_v27  ;;  %v9384_v27 = vshrl.u32 %v16151_v23, 16  ;;  %v16163_v23 = vld [vmem:[#allocation2 + $0x88] sm:$0xff]  }
 0x5d9   : > { %14670 = vmatprep.mubr.bf16.mxu1 %v21302_v31  ;;  %v9388_v31 = vshll.u32 %v16152_v18, 16  ;;  %v9452_v61 = vshll.u32 %v16163_v23, 16  ;;  %v9460_v18 = vshll.u32 %v16164_v55, 16 }
 0x5db   : > { %v9390_v36 = vrot.slane %v9388_v31, 1  ;;  %v16167_v31 = vld [vmem:[#allocation2 + $0xa0] sm:$0xff]  }
 0x5dd   : > { %v9394_v46 = vor.u32 %v9392_v1, %v9390_v36 }
 0x5df   : > { %v9399_v56 = vsel %vm21330_vm8, %v9394_v46, %v9398_v14  ;;  %vm21346_vm8 = vmmov %vm21333_vm0 }
 0x5e0   : > { %14671 = vmatmul.mubr.bf16.gmra.mrb[24].mxu1 %v21303_v38  ;;  %v16161_v38 = vld [vmem:[%s20382_s3 + $0x1a0] sm:$0xff]  }
 0x5e1   : > { %14674 = vmatprep.mubr.bf16.mxu1 %v21304_v26  ;;  %v9376_v26 = vshrl.u32 %v16149_v62, 16  ;;  %v9424_v62 = vshrl.u32 %v16157_v12, 16 }
 0x5e8   : > { %14675 = vmatmul.mubr.bf16.gmra.mrb[28].mxu1 %v21305_v58  ;;  %v9386_v58 = vor.u32 %v9384_v27, %v9382_v10  ;;  %v9462_v27 = vrot.slane %v9460_v18, 1  ;;  %v16300_v18 = vld [vmem:[#allocation2 + $0x28] sm:$0xf] }
 0x5e9   : > { %14678 = vmatprep.mubr.bf16.mxu1 %v21307_v7  ;;  %v9378_v7 = vor.u32 %v9376_v26, %v9374_v3 }
 0x5ea   : > { %v9391_v21 = vsel %vm21329_vm3, %v9386_v58, %v9390_v36  ;;  %v9456_v58 = vshrl.u32 %v16163_v23, 16  ;;  %vm21345_vm3 = vmmov %vm21333_vm0 }
 0x5eb   : > { %v9383_v13 = vsel %vm21328_vm12, %v9378_v7, %v9382_v10  ;;  %v9476_v7 = vshll.u32 %v16167_v31, 16  ;;  %vm21344_vm12 = vmmov %vm21333_vm0 }
 0x5f0   : > { %14679 = vmatmul.mubr.bf16.gmra.mrb[32].mxu1 %v21310_v54  ;;  %v16166_v54 = vld [vmem:[%s20382_s3 + $0x1a8] sm:$0xff]  }
 0x5f1   : > { %14682 = vmatprep.mubr.bf16.mxu1 %v21313_v6  ;;  %v16156_v6 = vld [vmem:[#allocation2 + $0x60] sm:$0xff]  }
 0x5f2   : > { %v9412_v45 = vshll.u32 %v16156_v6, 16  ;;  %v9416_v5 = vshrl.u32 %v16156_v6, 16  ;;  %v16170_v6 = vld [vmem:[#allocation2 + $0xb0] sm:$0xff]  }
 0x5f4   : > { %v9414_v35 = vrot.slane %v9412_v45, 1 }
 0x5f6   : > { %v9415_v4 = vsel %vm21332_vm10, %v9410_v8, %v9414_v35  ;;  %v16173_v8 = vld [vmem:[#allocation2 + $0xc8] sm:$0xff]  }
 0x5f8   : > { %14683 = vmatmul.mubr.bf16.gmra.mrb[36].mxu1 %v21316_v44  ;;  %v9402_v44 = vor.u32 %v9400_v19, %v9398_v14  ;;  %v9478_v14 = vrot.slane %v9476_v7, 1  ;;  %v9480_v19 = vshrl.u32 %v16167_v31, 16  ;;  %v16303_v31 = vld [vmem:[#allocation2 + $0x34] sm:$0xf] }
 0x5f9   : > { %14686 = vmatprep.mubr.bf16.mxu1 %v21319_v22  ;;  %v16174_v22 = vld [vmem:[%s20382_s3 + $0x1b8] sm:$0xff]  }
 0x5fa   : > { %v9407_v15 = vsel %vm21331_vm15, %v9402_v44, %v9406_v48  ;;  %v9482_v1 = vor.u32 %v9480_v19, %v9478_v14  ;;  %v9492_v44 = vshll.u32 %v16170_v6, 16  ;;  %v16171_v48 = vld [vmem:[#allocation2 + $0xb8] sm:$0xff]   ;;  %vm21347_vm15 = vsmask.f32 4352 }
 0x5fb   : > { %vm21348_vm10 = vmmov %vm21347_vm15 }
 0x600   : > { %14687 = vmatmul.mubr.bf16.gmra.mrb[40].mxu1 %v21322_v47  ;;  %v9418_v47 = vor.u32 %v9416_v5, %v9414_v35  ;;  %v9496_v35 = vshrl.u32 %v16170_v6, 16 }
 0x601   : > { %14706 = vmatprep.mubr.bf16.mxu1 %v9343_v34  ;;  %v9428_v34 = vshll.u32 %v16159_v32, 16  ;;  %v9500_v32 = vshll.u32 %v16171_v48, 16 }
 0x602   : > { %v9423_v41 = vsel %vm21333_vm0, %v9418_v47, %v9422_v9  ;;  %vm21349_vm0 = vmmov %vm21348_vm10 }
 0x603   : > { %v9430_v2 = vrot.slane %v9428_v34, 1  ;;  %v9502_v34 = vrot.slane %v9500_v32, 1 }
 0x608   : > { %14707 = vmatmul.mubr.bf16.vlgmr.msra.gmra.mrb[44].mxu1 %v9351_v16  ;;  %v9444_v16 = vshll.u32 %v16162_v30, 16  ;;  %v16298_v30 = vld [vmem:[#allocation2 + $0x24] sm:$0xf] }
 0x609   : > { %14755 = vmatpush3.bf16.msra.mxu1 %v16145_v33  ;;  %14710 = vmatprep.mubr.bf16.mxu1 %v9359_v17  ;;  %v16158_v33 = vld [vmem:[%s20382_s3 + $0x198] sm:$0xff]   ;;  %v9426_v17 = vor.u32 %v9424_v62, %v9422_v9  ;;  %v9516_v62 = vshll.u32 %v16173_v8, 16 }
 0x60a   : > { %14756 = vmatprep.subr.bf16.mxu1 %v16150_v0 }
 0x60b   : > { %v9431_v42 = vsel %vm21334_vm9, %v9426_v17, %v9430_v2  ;;  %v9504_v17 = vshrl.u32 %v16171_v48, 16  ;;  %vm21350_vm9 = vmmov %vm21349_vm0 }
 0x60d   : > { %14757 = vmatpush3.bf16.msra.mxu1 %v16150_v0  ;;  %v9434_v0 = vor.u32 %v9432_v63, %v9430_v2  ;;  %v16297_v2 = vld [vmem:[#allocation2 + $0x20] sm:$0xf] }
 0x60e   : > { %14758 = vmatprep.subr.bf16.mxu1 %v16153_v29  ;;  %v12844_v63 = vcombine.low %v16297_v2, %v16298_v30 }
 0x60f   : > { %v9439_v11 = vsel %vm21335_vm1, %v9434_v0, %v9438_v43  ;;  %v16299_v0 = vld [vmem:[#allocation2 + $0x1c] sm:$0xf]  ;;  %vm21351_vm1 = vmmov %vm21349_vm0 }
 0x610   : > { %14711 = vmatmul.mubr.bf16.gmra.mrb[0].mxu1 %v9367_v39  ;;  %v9454_v39 = vrot.slane %v9452_v61, 1 }
 0x611   : > { %14714 = vmatprep.mubr.bf16.mxu1 %v9375_v50  ;;  %14759 = vmatpush3.bf16.msra.mxu1 %v16153_v29  ;;  %v9446_v29 = vrot.slane %v9444_v16, 1  ;;  %v16165_v50 = vld [vmem:[#allocation2 + $0x98] sm:$0xff]   ;;  %v12843_v16 = vcombine.low %v9873_v40, %v16299_v0  ;;  %v16311_v0 = vld [vmem:[#allocation2 + $0x54] sm:$0xf] }
 0x612   : > { %14760 = vmatprep.subr.bf16.mxu1 %v16158_v33  ;;  %v9468_v26 = vshll.u32 %v16165_v50, 16  ;;  %v9458_v36 = vor.u32 %v9456_v58, %v9454_v39 }
 0x613   : > { %v9450_v3 = vor.u32 %v9448_v53, %v9446_v29  ;;  %v10063_v53 = vshrl.u32 %v12843_v16, 16  ;;  %v10066_v61 = vshll.u32 %v12843_v16, 16 }
 0x614   : > { %v9470_v49 = vrot.slane %v9468_v26, 1  ;;  %v9520_v26 = vshrl.u32 %v16173_v8, 16 }
 0x615   : > { %14761 = vmatpush3.bf16.msra.mxu1 %v16158_v33  ;;  %v9442_v33 = vor.u32 %v9440_v57, %v9438_v43  ;;  %v9455_v60 = vsel %vm21337_vm2, %v9450_v3, %v9454_v39  ;;  %v16175_v43 = vld [vmem:[#allocation2 + $0xd0] ss:$0 sps:$4 sm:$0x11]   ;;  %v10065_v58 = vrot.slane %v10063_v53, 3  ;;  %v16191_v53 = vld [vmem:[%s20382_s3 + $0x1d8] sm:$0xff]   ;;  %vm21353_vm2 = vmmov %vm21349_vm0 }
 0x616   : > { %14762 = vmatprep.subr.bf16.mxu1 %v16161_v38  ;;  %v9524_v3 = vshll.u32 %v16175_v43, 16 }
 0x617   : > { %v9447_v10 = vsel %vm21336_vm11, %v9442_v33, %v9446_v29  ;;  %v9506_v29 = vor.u32 %v9504_v17, %v9502_v34  ;;  %v16301_v33 = vld [vmem:[#allocation2 + $0x2c] sm:$0xf]  ;;  %v16186_v17 = vld [vmem:[%s20382_s3 + $0x1d0] sm:$0xff]   ;;  %vm21352_vm11 = vmmov %vm21349_vm0 }
 0x618   : > { %14715 = vmatmul.mubr.bf16.gmra.mrb[4].mxu1 %v9383_v13  ;;  %v9463_v13 = vsel %vm21338_vm14, %v9458_v36, %v9462_v27  ;;  %v12845_v39 = vcombine.low %v16300_v18, %v16301_v33  ;;  %v9526_v36 = vrot.slane %v9524_v3, 1  ;;  %v16312_v3 = vld [vmem:[#allocation2 + $0x58] sm:$0xf]  ;;  %v16313_v18 = vld [vmem:[#allocation2 + $0x5c] sm:$0xf]  ;;  %vm21354_vm14 = vmmov %vm21349_vm0 }
 0x619   : > { %14718 = vmatprep.mubr.bf16.mxu1 %v9391_v21  ;;  %14763 = vmatpush3.bf16.msra.mxu1 %v16161_v38  ;;  %v9464_v38 = vshrl.u32 %v16164_v55, 16  ;;  %v9518_v55 = vrot.slane %v9516_v62, 1  ;;  %v16310_v62 = vld [vmem:[#allocation2 + $0x50] sm:$0xf]  ;;  %v12851_v33 = vcombine.low %v16312_v3, %v16313_v18 }
 0x61a   : > { %14764 = vmatprep.subr.bf16.mxu1 %v16166_v54  ;;  %v12850_v16 = vcombine.low %v16310_v62, %v16311_v0  ;;  %v20147_v62 = vld [vmem:[%s20382_s3 + $0x200] sm:$0xff]  }
 0x61b   : > { %v9466_v37 = vor.u32 %v9464_v38, %v9462_v27  ;;  %v16302_v27 = vld [vmem:[#allocation2 + $0x30] sm:$0xf]  ;;  %v9522_v7 = vor.u32 %v9520_v26, %v9518_v55 }
 0x61c   : > { %v12846_v38 = vcombine.low %v16302_v27, %v16303_v31  ;;  %v16315_v27 = vld [vmem:[#allocation2 + $0x64] sm:$0xf] }
 0x61d   : > { %14765 = vmatpush3.bf16.msra.mxu1 %v16166_v54  ;;  %v16168_v54 = vld [vmem:[#allocation2 + $0xa8] sm:$0xff]   ;;  %v9471_v21 = vsel %vm21339_vm7, %v9466_v37, %v9470_v49  ;;  %v10068_v37 = vrot.slane %v10066_v61, 4  ;;  %v9527_v19 = vsel %vm21346_vm8, %v9522_v7, %v9526_v36  ;;  %vm21355_vm7 = vmmov %vm21349_vm0 }
 0x61e   : > { %14766 = vmatprep.subr.bf16.mxu1 %v16169_v51  ;;  %v9484_v28 = vshll.u32 %v16168_v54, 16  ;;  %v9488_v5 = vshrl.u32 %v16168_v54, 16  ;;  %v10083_v54 = vshll.u32 %v12845_v39, 16  ;;  %vm21362_vm8 = vmmov %vm21349_vm0 }
 0x61f   : > { %v10069_v6 = vor.u32 %v10068_v37, %v10065_v58  ;;  %v10134_v58 = vshrl.u32 %v12851_v33, 16  ;;  %v10137_v37 = vshll.u32 %v12851_v33, 16  ;;  %v16326_v33 = vld [vmem:[#allocation2 + $0x90] sm:$0xf] }
 0x620   : > { %14719 = vmatmul.mubr.bf16.gmra.mrb[8].mxu1 %v9399_v56  ;;  %v9486_v46 = vrot.slane %v9484_v28, 1  ;;  %v9494_v56 = vrot.slane %v9492_v44, 1  ;;  %v16305_v44 = vld [vmem:[#allocation2 + $0x3c] sm:$0xf] }
 0x621   : > { %14722 = vmatprep.mubr.bf16.mxu1 %v9407_v15  ;;  %14767 = vmatpush3.bf16.msra.mxu1 %v16169_v51  ;;  %v9472_v51 = vshrl.u32 %v16165_v50, 16  ;;  %v16172_v15 = vld [vmem:[#allocation2 + $0xc0] sm:$0xff]  }
 0x622   : > { %14768 = vmatprep.subr.bf16.mxu1 %v16174_v22  ;;  %v9498_v20 = vor.u32 %v9496_v35, %v9494_v56  ;;  %v9508_v24 = vshll.u32 %v16172_v15, 16  ;;  %v9490_v47 = vor.u32 %v9488_v5, %v9486_v46  ;;  %v9512_v59 = vshrl.u32 %v16172_v15, 16 }
 0x623   : > { %v9474_v45 = vor.u32 %v9472_v51, %v9470_v49  ;;  %v10080_v49 = vshrl.u32 %v12845_v39, 16  ;;  %v10085_v51 = vrot.slane %v10083_v54, 4  ;;  %v16199_v54 = vld [vmem:[%s20382_s3 + $0x1e8] sm:$0xff]  }
 0x624   : > { %v9495_v9 = vsel %vm21342_vm4, %v9490_v47, %v9494_v56  ;;  %v16307_v56 = vld [vmem:[#allocation2 + $0x44] sm:$0xf]  ;;  %vm21358_vm4 = vmmov %vm21349_vm0 }
 0x625   : > { %14769 = vmatpush3.bf16.msra.mxu1 %v16174_v22  ;;  %v9479_v12 = vsel %vm21340_vm5, %v9474_v45, %v9478_v14  ;;  %v9487_v22 = vsel %vm21341_vm6, %v9482_v1, %v9486_v46  ;;  %v10092_v14 = vshll.u32 %v12846_v38, 16  ;;  %v10082_v28 = vrot.slane %v10080_v49, 3  ;;  %v16304_v1 = vld [vmem:[#allocation2 + $0x38] sm:$0xf]  ;;  %vm21356_vm5 = vmmov %vm21349_vm0 }
 0x626   : > { %14818 = vmatprep.subr.bf16.mxu1 %v20095_v25  ;;  %v12847_v45 = vcombine.low %v16304_v1, %v16305_v44  ;;  %vm21357_vm6 = vmmov %vm21349_vm0 }
 0x627   : > { %v10086_v35 = vor.u32 %v10085_v51, %v10082_v28 }
 0x628   : > { %14723 = vmatmul.mubr.bf16.gmra.mrb[12].mxu1 %v9415_v4  ;;  %v9503_v4 = vsel %vm21343_vm13, %v9498_v20, %v9502_v34  ;;  %v10098_v32 = vshrl.u32 %v12847_v45, 16  ;;  %v10101_v5 = vshll.u32 %v12847_v45, 16  ;;  %v16183_v34 = vld [vmem:[%s20382_s3 + $0x1c8] sm:$0xff]   ;;  %v16318_v45 = vld [vmem:[#allocation2 + $0x70] sm:$0xf]  ;;  %vm21359_vm13 = vmmov %vm21349_vm0 }
 0x629   : > { %14726 = vmatprep.mubr.bf16.mxu1 %v9423_v41  ;;  %v9510_v41 = vrot.slane %v9508_v24, 1 }
 0x62a   : > { %v10103_v40 = vrot.slane %v10101_v5, 4 }
 0x62b   : > { %v9514_v23 = vor.u32 %v9512_v59, %v9510_v41  ;;  %v9511_v57 = vsel %vm21344_vm12, %v9506_v29, %v9510_v41  ;;  %v16309_v41 = vld [vmem:[#allocation2 + $0x4c] sm:$0xf]  ;;  %v10125_v29 = vshrl.u32 %v12850_v16, 16  ;;  %vm21360_vm12 = vmmov %vm21349_vm0 }
 0x62d   : > { %v9519_v50 = vsel %vm21345_vm3, %v9514_v23, %v9518_v55  ;;  %v10128_v55 = vshll.u32 %v12850_v16, 16  ;;  %vm21361_vm3 = vmmov %vm21349_vm0 }
 0x630   : > { %14727 = vmatmul.mubr.bf16.gmra.mrb[16].mxu1 %v9431_v42  ;;  %v10071_v42 = vshrl.u32 %v12844_v63, 16 }
 0x631   : > { %14730 = vmatprep.mubr.bf16.mxu1 %v9439_v11  ;;  %v10074_v11 = vshll.u32 %v12844_v63, 16 }
 0x638   : > { %14731 = vmatmul.mubr.bf16.gmra.mrb[20].mxu1 %v9447_v10  ;;  %v10073_v10 = vrot.slane %v10071_v42, 3 }
 0x639   : > { %14734 = vmatprep.mubr.bf16.mxu1 %v9455_v60  ;;  %v10076_v60 = vrot.slane %v10074_v11, 4 }
 0x640   : > { %14735 = vmatmul.mubr.bf16.gmra.mrb[24].mxu1 %v9463_v13  ;;  %v10077_v13 = vor.u32 %v10076_v60, %v10073_v10  ;;  %v10130_v10 = vrot.slane %v10128_v55, 4  ;;  %v16314_v60 = vld [vmem:[#allocation2 + $0x60] sm:$0xf] }
 0x641   : > { %14738 = vmatprep.mubr.bf16.mxu1 %v9471_v21  ;;  %v10089_v21 = vshrl.u32 %v12846_v38, 16  ;;  %v12852_v31 = vcombine.low %v16314_v60, %v16315_v27  ;;  %v16194_v38 = vld [vmem:[%s20382_s3 + $0x1e0] sm:$0xff]  }
 0x642   : > { %v10078_v46 = vsel %vm21347_vm15, %v10069_v6, %v10077_v13  ;;  %v10087_v8 = vsel %vm21348_vm10, %v10077_v13, %v10086_v35  ;;  %v16316_v6 = vld [vmem:[#allocation2 + $0x68] sm:$0xf]  ;;  %vm21363_vm15 = vmmov %vm21349_vm0 }
 0x643   : > { %v10091_v48 = vrot.slane %v10089_v21, 3  ;;  %v10143_v36 = vshrl.u32 %v12852_v31, 16  ;;  %v10146_v49 = vshll.u32 %v12852_v31, 16  ;;  %v10136_v21 = vrot.slane %v10134_v58, 3  ;;  %vm21364_vm10 = vmmov %vm21349_vm0 }
 0x645   : > { %v10145_v1 = vrot.slane %v10143_v36, 3  ;;  %v10148_v44 = vrot.slane %v10146_v49, 4  ;;  %v16328_v36 = vld [vmem:[#allocation2 + $0x98] sm:$0xf]  ;;  %v16329_v49 = vld [vmem:[#allocation2 + $0x9c] sm:$0xf] }
 0x648   : > { %14739 = vmatmul.mubr.bf16.gmra.mrb[28].mxu1 %v9479_v12  ;;  %v10094_v12 = vrot.slane %v10092_v14, 4  ;;  %v10139_v14 = vrot.slane %v10137_v37, 4 }
 0x649   : > { %14742 = vmatprep.mubr.bf16.mxu1 %v9487_v22  ;;  %v16306_v22 = vld [vmem:[#allocation2 + $0x40] sm:$0xf] }
 0x64a   : > { %v12848_v15 = vcombine.low %v16306_v22, %v16307_v56  ;;  %v10095_v20 = vor.u32 %v10094_v12, %v10091_v48  ;;  %v16202_v12 = vld [vmem:[%s20382_s3 + $0x1f0] sm:$0xff]   ;;  %v10140_v22 = vor.u32 %v10139_v14, %v10136_v21 }
 0x64c   : > { %v10107_v24 = vshrl.u32 %v12848_v15, 16  ;;  %v10110_v47 = vshll.u32 %v12848_v15, 16  ;;  %v10096_v30 = vsel %vm21349_vm0, %v10086_v35, %v10095_v20  ;;  %v10149_v35 = vor.u32 %v10148_v44, %v10145_v1 }
 0x64e   : > { %v10109_v63 = vrot.slane %v10107_v24, 3  ;;  %v10112_v59 = vrot.slane %v10110_v47, 4 }
 0x650   : > { %14743 = vmatmul.mubr.bf16.gmra.mrb[32].mxu1 %v9495_v9  ;;  %v10100_v9 = vrot.slane %v10098_v32, 3  ;;  %v10113_v11 = vor.u32 %v10112_v59, %v10109_v63  ;;  %v16323_v63 = vld [vmem:[#allocation2 + $0x84] sm:$0xf] }
 0x651   : > { %14746 = vmatprep.mubr.bf16.mxu1 %v9503_v4  ;;  %v16308_v4 = vld [vmem:[#allocation2 + $0x48] sm:$0xf] }
 0x652   : > { %v12849_v2 = vcombine.low %v16308_v4, %v16309_v41  ;;  %v10104_v43 = vor.u32 %v10103_v40, %v10100_v9  ;;  %v16321_v9 = vld [vmem:[#allocation2 + $0x7c] sm:$0xf]  ;;  %v10150_v4 = vsel %vm21355_vm7, %v10140_v22, %v10149_v35  ;;  %vm21438_vm7 = vsmask.f32 7424 }
 0x654   : > { %v10116_v23 = vshrl.u32 %v12849_v2, 16  ;;  %v10119_v42 = vshll.u32 %v12849_v2, 16  ;;  %v10114_v39 = vsel %vm21351_vm1, %v10104_v43, %v10113_v11  ;;  %vm21366_vm1 = vmmov %vm21349_vm0 }
 0x656   : > { %v10118_v61 = vrot.slane %v10116_v23, 3 }
 0x658   : > { %14747 = vmatmul.mubr.bf16.gmra.mrb[36].mxu1 %v9511_v57  ;;  %v10121_v57 = vrot.slane %v10119_v42, 4 }
 0x659   : > { %14750 = vmatprep.mubr.bf16.mxu1 %v9519_v50  ;;  %v10127_v50 = vrot.slane %v10125_v29, 3 }
 0x65a   : > { %v10122_v26 = vor.u32 %v10121_v57, %v10118_v61 }
 0x65b   : > { %v10131_v7 = vor.u32 %v10130_v10, %v10127_v50 }
 0x65c   : > { %v10123_v13 = vsel %vm21352_vm11, %v10113_v11, %v10122_v26  ;;  %vm21367_vm11 = vmmov %vm21349_vm0 }
 0x65d   : > { %v10132_v51 = vsel %vm21353_vm2, %v10122_v26, %v10131_v7  ;;  %v10141_v24 = vsel %vm21354_vm14, %v10131_v7, %v10140_v22  ;;  %vm21368_vm2 = vmmov %vm21349_vm0 }
 0x65e   : > { %vm21369_vm14 = vmmov %vm21349_vm0 }
 0x660   : > { %14751 = vmatmul.mubr.bf16.gmra.mrb[40].mxu1 %v9527_v19  ;;  %v16317_v19 = vld [vmem:[#allocation2 + $0x6c] sm:$0xf] }
 0x661   : > { %14770 = vmatprep.mubr.bf16.mxu1 %v10078_v46  ;;  %v12853_v28 = vcombine.low %v16316_v6, %v16317_v19  ;;  %v16319_v46 = vld [vmem:[#allocation2 + $0x74] sm:$0xf]  ;;  %v16330_v6 = vld [vmem:[#allocation2 + $0xa0] sm:$0xf]  ;;  %v16331_v19 = vld [vmem:[#allocation2 + $0xa4] sm:$0xf] }
 0x662   : > { %v12854_v48 = vcombine.low %v16318_v45, %v16319_v46 }
 0x663   : > { %v10152_v56 = vshrl.u32 %v12853_v28, 16  ;;  %v10155_v15 = vshll.u32 %v12853_v28, 16  ;;  %v12860_v28 = vcombine.low %v16330_v6, %v16331_v19 }
 0x664   : > { %v10161_v32 = vshrl.u32 %v12854_v48, 16  ;;  %v10164_v5 = vshll.u32 %v12854_v48, 16 }
 0x665   : > { %v10154_v47 = vrot.slane %v10152_v56, 3  ;;  %v10215_v46 = vshrl.u32 %v12860_v28, 16  ;;  %v10218_v48 = vshll.u32 %v12860_v28, 16 }
 0x666   : > { %v10163_v41 = vrot.slane %v10161_v32, 3  ;;  %v10166_v2 = vrot.slane %v10164_v5, 4 }
 0x668   : > { %14771 = vmatmul.mubr.bf16.vlgmr.msra.gmra.mrb[44].mxu1 %v10087_v8  ;;  %v16320_v8 = vld [vmem:[#allocation2 + $0x78] sm:$0xf] }
 0x669   : > { %14819 = vmatpush3.bf16.msra.mxu1 %v20095_v25  ;;  %14774 = vmatprep.mubr.bf16.mxu1 %v10096_v30  ;;  %v10105_v25 = vsel %vm21350_vm9, %v10095_v20, %v10104_v43  ;;  %v16207_v20 = vld [vmem:[%s20382_s3 + $0x1f8] sm:$0xff]   ;;  %v12855_v40 = vcombine.low %v16320_v8, %v16321_v9  ;;  %v16322_v30 = vld [vmem:[#allocation2 + $0x80] sm:$0xf]  ;;  %v10167_v43 = vor.u32 %v10166_v2, %v10163_v41  ;;  %vm21365_vm9 = vmmov %vm21349_vm0 }
 0x66a   : > { %14820 = vmatprep.subr.bf16.mxu1 %v16183_v34  ;;  %v12856_v59 = vcombine.low %v16322_v30, %v16323_v63 }
 0x66b   : > { %v10170_v16 = vshrl.u32 %v12855_v40, 16 }
 0x66c   : > { %v10179_v23 = vshrl.u32 %v12856_v59, 16  ;;  %v10182_v42 = vshll.u32 %v12856_v59, 16 }
 0x66d   : > { %14821 = vmatpush3.bf16.msra.mxu1 %v16183_v34  ;;  %v10157_v34 = vrot.slane %v10155_v15, 4  ;;  %v10172_v29 = vrot.slane %v10170_v16, 3  ;;  %v16332_v15 = vld [vmem:[#allocation2 + $0xa8] sm:$0xf]  ;;  %v16336_v16 = vld [vmem:[#allocation2 + $0xb8] sm:$0xf] }
 0x66e   : > { %14822 = vmatprep.subr.bf16.mxu1 %v16186_v17  ;;  %v10181_v3 = vrot.slane %v10179_v23, 3  ;;  %v10184_v18 = vrot.slane %v10182_v42, 4 }
 0x66f   : > { %v10158_v0 = vor.u32 %v10157_v34, %v10154_v47  ;;  %v16334_v47 = vld [vmem:[#allocation2 + $0xb0] sm:$0xf]  ;;  %v16335_v34 = vld [vmem:[#allocation2 + $0xb4] sm:$0xf] }
 0x670   : > { %14775 = vmatmul.mubr.bf16.gmra.mrb[0].mxu1 %v10105_v25  ;;  %v16325_v25 = vld [vmem:[#allocation2 + $0x8c] sm:$0xf]  ;;  %v10185_v31 = vor.u32 %v10184_v18, %v10181_v3  ;;  %v12862_v8 = vcombine.low %v16334_v47, %v16335_v34  ;;  %v21370_v34 = vld [vmem:[#allocation52_spill] sm:$0xff] }
 0x671   : > { %14778 = vmatprep.mubr.bf16.mxu1 %v10114_v39  ;;  %14823 = vmatpush3.bf16.msra.mxu1 %v16186_v17  ;;  %v10173_v17 = vshll.u32 %v12855_v40, 16  ;;  %v10159_v11 = vsel %vm21356_vm5, %v10149_v35, %v10158_v0  ;;  %v10168_v57 = vsel %vm21357_vm6, %v10158_v0, %v10167_v43  ;;  %v16327_v39 = vld [vmem:[#allocation2 + $0x94] sm:$0xf]  ;;  %v16333_v35 = vld [vmem:[#allocation2 + $0xac] sm:$0xf]  ;;  %vm21439_vm5 = vmmov %vm21438_vm7 }
 0x672   : > { %14824 = vmatprep.subr.bf16.mxu1 %v16191_v53  ;;  %v12858_v50 = vcombine.low %v16326_v33, %v16327_v39  ;;  %v12861_v32 = vcombine.low %v16332_v15, %v16333_v35  ;;  %v10233_v2 = vshrl.u32 %v12862_v8, 16  ;;  %v10236_v30 = vshll.u32 %v12862_v8, 16  ;;  %v20158_v39 = vld [vmem:[#allocation2 + $0xd4] sm:$0xf]  ;;  %v21371_v8 = vld [vmem:[#allocation51_spill] sm:$0xff]  ;;  %vm21440_vm6 = vmmov %vm21439_vm5 }
 0x673   : > { %v10175_v55 = vrot.slane %v10173_v17, 4  ;;  %v16337_v17 = vld [vmem:[#allocation2 + $0xbc] sm:$0xf] }
 0x674   : > { %v10200_v26 = vshll.u32 %v12858_v50, 16  ;;  %v10224_v40 = vshrl.u32 %v12861_v32, 16  ;;  %v10235_v42 = vrot.slane %v10233_v2, 3 }
 0x675   : > { %14825 = vmatpush3.bf16.msra.mxu1 %v16191_v53  ;;  %v16324_v53 = vld [vmem:[#allocation2 + $0x88] sm:$0xf]  ;;  %v10176_v10 = vor.u32 %v10175_v55, %v10172_v29  ;;  %v16338_v29 = vld [vmem:[#allocation2 + $0xc0] sm:$0xf]  ;;  %v16339_v55 = vld [vmem:[#allocation2 + $0xc4] sm:$0xf] }
 0x676   : > { %14826 = vmatprep.subr.bf16.mxu1 %v16194_v38  ;;  %v12857_v61 = vcombine.low %v16324_v53, %v16325_v25  ;;  %v10202_v14 = vrot.slane %v10200_v26, 4  ;;  %v10226_v59 = vrot.slane %v10224_v40, 3  ;;  %v12864_v53 = vcombine.low %v16338_v29, %v16339_v55  ;;  %v16215_v40 = vld [vmem:[%s20382_s3 + $0x208] sm:$0xff]   ;;  %v21384_v55 = vld [vmem:[#allocation57_spill] sm:$0xff] }
 0x677   : > { %v10177_v58 = vsel %vm21358_vm4, %v10167_v43, %v10176_v10  ;;  %v12863_v43 = vcombine.low %v16336_v16, %v16337_v17  ;;  %v16223_v16 = vld [vmem:[%s20382_s3 + $0x218] sm:$0xff]   ;;  %v21379_v17 = vld [vmem:[#allocation58_spill] sm:$0xff]  ;;  %vm21441_vm4 = vmmov %vm21439_vm5 }
 0x678   : > { %14779 = vmatmul.mubr.bf16.gmra.mrb[4].mxu1 %v10123_v13  ;;  %v10188_v60 = vshrl.u32 %v12857_v61, 16  ;;  %v10191_v27 = vshll.u32 %v12857_v61, 16  ;;  %v10186_v13 = vsel %vm21359_vm13, %v10176_v10, %v10185_v31  ;;  %v10251_v18 = vshrl.u32 %v12864_v53, 16  ;;  %v16231_v29 = vld [vmem:[%s20382_s3 + $0x228] sm:$0xff]   ;;  %vm21442_vm13 = vmmov %vm21441_vm4 }
 0x679   : > { %14782 = vmatprep.mubr.bf16.mxu1 %v10132_v51  ;;  %14827 = vmatpush3.bf16.msra.mxu1 %v16194_v38  ;;  %v10197_v38 = vshrl.u32 %v12858_v50, 16  ;;  %v10242_v61 = vshrl.u32 %v12863_v43, 16  ;;  %v10254_v33 = vshll.u32 %v12864_v53, 16  ;;  %v21385_v53 = vld [vmem:[#allocation53_spill] sm:$0xff] }
 0x67a   : > { %14828 = vmatprep.subr.bf16.mxu1 %v16199_v54  ;;  %v10190_v37 = vrot.slane %v10188_v60, 3  ;;  %v10193_v7 = vrot.slane %v10191_v27, 4  ;;  %v16340_v27 = vld [vmem:[#allocation2 + $0xc8] sm:$0xf] }
 0x67b   : > { %v10199_v21 = vrot.slane %v10197_v38, 3  ;;  %v10244_v10 = vrot.slane %v10242_v61, 3  ;;  %v21387_v61 = vld [vmem:[#allocation68_spill] sm:$0xff] }
 0x67c   : > { %v10194_v51 = vor.u32 %v10193_v7, %v10190_v37  ;;  %v10256_v37 = vrot.slane %v10254_v33, 4  ;;  %v16342_v7 = vld [vmem:[#allocation2 + $0xd0] sm:$0xf] }
 0x67d   : > { %14829 = vmatpush3.bf16.msra.mxu1 %v16199_v54  ;;  %v12859_v54 = vcombine.low %v16328_v36, %v16329_v49  ;;  %v10203_v45 = vor.u32 %v10202_v14, %v10199_v21  ;;  %v12866_v36 = vcombine.low %v16342_v7, %v20158_v39  ;;  %v20163_v49 = vld [vmem:[#allocation2 + $0xd8] sm:$0xf]  ;;  %v21390_v33 = vld [vmem:[#allocation63_spill] sm:$0xff]  ;;  %v21400_v7 = vld [vmem:[#allocation66_spill] sm:$0xff] }
 0x67e   : > { %14830 = vmatprep.subr.bf16.mxu1 %v16202_v12  ;;  %v12867_v28 = vcombine.low %v20163_v49, %v20163_v49 }
 0x67f   : > { %v10206_v1 = vshrl.u32 %v12859_v54, 16  ;;  %v10209_v44 = vshll.u32 %v12859_v54, 16  ;;  %v10204_v5 = vsel %vm21361_vm3, %v10194_v51, %v10203_v45  ;;  %v10269_v6 = vshrl.u32 %v12866_v36, 16  ;;  %vm21444_vm3 = vmmov %vm21441_vm4 }
 0x680   : > { %14783 = vmatmul.mubr.bf16.gmra.mrb[8].mxu1 %v10141_v24  ;;  %v10220_v24 = vrot.slane %v10218_v48, 4  ;;  %v10272_v19 = vshll.u32 %v12866_v36, 16 }
 0x681   : > { %14786 = vmatprep.mubr.bf16.mxu1 %v10150_v4  ;;  %14831 = vmatpush3.bf16.msra.mxu1 %v16202_v12  ;;  %v10195_v12 = vsel %vm21360_vm12, %v10185_v31, %v10194_v51  ;;  %v10208_v22 = vrot.slane %v10206_v1, 3  ;;  %v10211_v56 = vrot.slane %v10209_v44, 4  ;;  %v10227_v4 = vshll.u32 %v12861_v32, 16  ;;  %v16341_v31 = vld [vmem:[#allocation2 + $0xcc] sm:$0xf]  ;;  %vm21443_vm12 = vmmov %vm21441_vm4 }
 0x682   : > { %14832 = vmatprep.subr.bf16.mxu1 %v16207_v20  ;;  %v12865_v38 = vcombine.low %v16340_v27, %v16341_v31  ;;  %v10274_v48 = vrot.slane %v10272_v19, 4  ;;  %v21394_v27 = vld [vmem:[#allocation65_spill] sm:$0xff] }
 0x683   : > { %v10212_v9 = vor.u32 %v10211_v56, %v10208_v22  ;;  %v10229_v0 = vrot.slane %v10227_v4, 4  ;;  %v10281_v22 = vshll.u32 %v12867_v28, 16  ;;  %v21373_v4 = vld [vmem:[#allocation48_spill] sm:$0xff] }
 0x684   : > { %v10263_v21 = vshll.u32 %v12865_v38, 16 }
 0x685   : > { %14833 = vmatpush3.bf16.msra.mxu1 %v16207_v20  ;;  %v10217_v20 = vrot.slane %v10215_v46, 3  ;;  %v10213_v63 = vsel %vm21362_vm8, %v10203_v45, %v10212_v9  ;;  %v10230_v25 = vor.u32 %v10229_v0, %v10226_v59  ;;  %v10271_v46 = vrot.slane %v10269_v6, 3  ;;  %v16218_v0 = vld [vmem:[%s20382_s3 + $0x210] sm:$0xff]   ;;  %v21406_v6 = vld [vmem:[#allocation69_spill] sm:$0xff]  ;;  %vm21445_vm8 = vmmov %vm21444_vm3 }
 0x686   : > { %14882 = vmatprep.subr.bf16.mxu1 %v20147_v62  ;;  %v10265_v44 = vrot.slane %v10263_v21, 4  ;;  %v10283_v32 = vrot.slane %v10281_v22, 4 }
 0x687   : > { %v10221_v41 = vor.u32 %v10220_v24, %v10217_v20  ;;  %v10275_v15 = vor.u32 %v10274_v48, %v10271_v46  ;;  %v21414_v48 = vld [vmem:[#allocation4_spill] sm:$0xff] }
 0x688   : > { %14787 = vmatmul.mubr.bf16.gmra.mrb[12].mxu1 %v10159_v11  ;;  %v10238_v11 = vrot.slane %v10236_v30, 4  ;;  %v21376_v30 = vld [vmem:[#allocation50_spill] sm:$0xff] }
 0x689   : > { %14790 = vmatprep.mubr.bf16.mxu1 %v10168_v57  ;;  %v10222_v23 = vsel %vm21363_vm15, %v10212_v9, %v10221_v41  ;;  %v10245_v57 = vshll.u32 %v12863_v43, 16  ;;  %v10231_v50 = vsel %vm21364_vm10, %v10221_v41, %v10230_v25  ;;  %v21372_v9 = vcombine.low %v21370_v34, %v21371_v8  ;;  %v21374_v41 = vld [vmem:[#allocation55_spill] sm:$0xff]  ;;  %v21380_v43 = vld [vmem:[#allocation56_spill] sm:$0xff]  ;;  %vm21446_vm15 = vmmov %vm21444_vm3 }
 0x68a   : > { %v10239_v3 = vor.u32 %v10238_v11, %v10235_v42  ;;  %v21375_v2 = vcombine.low %v21373_v4, %v21374_v41  ;;  %v16226_v11 = vld [vmem:[%s20382_s3 + $0x220] sm:$0xff]   ;;  %v21426_v8 = vld [vmem:[#allocation84_spill] sm:$0xff]  ;;  %v21429_v41 = vld [vmem:[#allocation79_spill] sm:$0xff] }
 0x68b   : > { %v10247_v60 = vrot.slane %v10245_v57, 4  ;;  %v21388_v57 = vld [vmem:[#allocation67_spill] sm:$0xff]  ;;  %v16241_v4 = vld [vmem:[#allocation2 + $0x1c] sm:$0xff]   ;;  %vm21447_vm10 = vmmov %vm21444_vm3 }
 0x68c   : > { %v10240_v26 = vsel %vm21349_vm0, %v10230_v25, %v10239_v3  ;;  %v21386_v25 = vcombine.low %v21384_v55, %v21385_v53  ;;  %v12915_v53 = vcombine.low %v20158_v39, %v20163_v49  ;;  %vm21448_vm0 = vmmov %vm21444_vm3 }
 0x68d   : > { %v10248_v54 = vor.u32 %v10247_v60, %v10244_v10  ;;  %v21393_v60 = vld [vmem:[#allocation75_spill] sm:$0xff] }
 0x68e   : > { %v21395_v31 = vcombine.low %v21393_v60, %v21394_v27 }
 0x68f   : > { %v10249_v51 = vsel %vm21365_vm9, %v10239_v3, %v10248_v54  ;;  %v16234_v3 = vld [vmem:[%s20382_s3 + $0x230] sm:$0xff]   ;;  %vm21449_vm9 = vmmov %vm21448_vm0 }
 0x690   : > { %14791 = vmatmul.mubr.bf16.gmra.mrb[16].mxu1 %v10177_v58  ;;  %v10253_v58 = vrot.slane %v10251_v18, 3  ;;  %v16239_v18 = vld [vmem:[%s20382_s3 + $0x238] sm:$0xff]  }
 0x691   : > { %14794 = vmatprep.mubr.bf16.mxu1 %v10186_v13  ;;  %v10260_v13 = vshrl.u32 %v12865_v38, 16  ;;  %v21396_v38 = vld [vmem:[#allocation61_spill] sm:$0xff] }
 0x692   : > { %v10257_v14 = vor.u32 %v10256_v37, %v10253_v58  ;;  %v21399_v37 = vld [vmem:[#allocation74_spill] sm:$0xff] }
 0x693   : > { %v10262_v1 = vrot.slane %v10260_v13, 3  ;;  %v21401_v36 = vcombine.low %v21399_v37, %v21400_v7  ;;  %v21403_v13 = vld [vmem:[#allocation71_spill] sm:$0xff] }
 0x694   : > { %v10258_v45 = vsel %vm21366_vm1, %v10248_v54, %v10257_v14  ;;  %v21402_v54 = vld [vmem:[#allocation62_spill] sm:$0xff]  ;;  %v16247_v7 = vld [vmem:[#allocation2 + $0x4c] sm:$0xff]   ;;  %vm21450_vm1 = vmmov %vm21448_vm0 }
 0x695   : > { %v10266_v56 = vor.u32 %v10265_v44, %v10262_v1  ;;  %v21404_v21 = vcombine.low %v21402_v54, %v21403_v13  ;;  %v21411_v44 = vld [vmem:[#allocation3_spill] sm:$0xff] }
 0x697   : > { %v10276_v20 = vsel %vm21368_vm2, %v10266_v56, %v10275_v15  ;;  %vm21452_vm2 = vmmov %vm21448_vm0 }
 0x698   : > { %14795 = vmatmul.mubr.bf16.gmra.mrb[20].mxu1 %v10195_v12  ;;  %v10278_v12 = vshrl.u32 %v12867_v28, 16  ;;  %v21408_v28 = vld [vmem:[#allocation64_spill] sm:$0xff] }
 0x699   : > { %14798 = vmatprep.mubr.bf16.mxu1 %v10204_v5  ;;  %v10267_v5 = vsel %vm21367_vm11, %v10257_v14, %v10266_v56  ;;  %v21405_v14 = vld [vmem:[#allocation76_spill] sm:$0xff]  ;;  %v21417_v56 = vld [vmem:[#allocation83_spill] sm:$0xff]  ;;  %vm21451_vm11 = vmmov %vm21448_vm0 }
 0x69a   : > { %v10280_v35 = vrot.slane %v10278_v12, 3  ;;  %v21407_v19 = vcombine.low %v21405_v14, %v21406_v6  ;;  %v21415_v12 = vld [vmem:[#allocation80_spill] sm:$0xff]  ;;  %v11254_v14 = vshll.u32 %v16247_v7, 16 }
 0x69b   : > { %v21416_v22 = vcombine.low %v21414_v48, %v21415_v12 }
 0x69c   : > { %v10284_v24 = vor.u32 %v10283_v32, %v10280_v35  ;;  %v21420_v32 = vld [vmem:[#allocation77_spill] sm:$0xff] }
 0x69e   : > { %v10285_v47 = vsel %vm21369_vm14, %v10275_v15, %v10284_v24  ;;  %v21418_v15 = vld [vmem:[#allocation81_spill] sm:$0xff]  ;;  %v21423_v24 = vld [vmem:[#allocation8_spill] sm:$0xff]  ;;  %vm21453_vm14 = vmmov %vm21448_vm0 }
 0x69f   : > { %v21419_v35 = vcombine.low %v21417_v56, %v21418_v15 }
 0x6a0   : > { %14799 = vmatmul.mubr.bf16.gmra.mrb[24].mxu1 %v10213_v63  ;;  %v21377_v63 = vld [vmem:[#allocation49_spill] sm:$0xff] }
 0x6a1   : > { %14802 = vmatprep.mubr.bf16.mxu1 %v10222_v23  ;;  %v21378_v59 = vcombine.low %v21376_v30, %v21377_v63  ;;  %v21381_v23 = vcombine.low %v21379_v17, %v21380_v43  ;;  %v11209_v63 = vshll.u32 %v16241_v4, 16 }
 0x6a3   : > { %v11211_v43 = vrot.slane %v11209_v63, 1 }
 0x6a8   : > { %14803 = vmatmul.mubr.bf16.gmra.mrb[28].mxu1 %v10231_v50  ;;  %v21391_v50 = vld [vmem:[#allocation59_spill] sm:$0xff] }
 0x6a9   : > { %14806 = vmatprep.mubr.bf16.mxu1 %v10240_v26  ;;  %v21392_v10 = vcombine.low %v21390_v33, %v21391_v50  ;;  %v21397_v26 = vld [vmem:[#allocation70_spill] sm:$0xff]  ;;  %v16245_v33 = vld [vmem:[#allocation2 + $0x3c] sm:$0xff]  }
 0x6aa   : > { %v21398_v58 = vcombine.low %v21396_v38, %v21397_v26 }
 0x6b0   : > { %14807 = vmatmul.mubr.bf16.gmra.mrb[32].mxu1 %v10249_v51  ;;  %v21409_v51 = vld [vmem:[#allocation72_spill] sm:$0xff] }
 0x6b1   : > { %14810 = vmatprep.mubr.bf16.mxu1 %v10258_v45  ;;  %v21410_v1 = vcombine.low %v21408_v28, %v21409_v51  ;;  %v21412_v45 = vld [vmem:[#allocation73_spill] sm:$0xff]  ;;  %v16248_v28 = vld [vmem:[#allocation2 + $0x54] sm:$0xff]  }
 0x6b2   : > { %v21413_v46 = vcombine.low %v21411_v44, %v21412_v45  ;;  %v11256_v44 = vrot.slane %v11254_v14, 1  ;;  %v16249_v45 = vld [vmem:[#allocation2 + $0x5c] sm:$0xff]   ;;  %v11262_v48 = vshll.u32 %v16248_v28, 16 }
 0x6b3   : > { %v11270_v56 = vshll.u32 %v16249_v45, 16 }
 0x6b8   : > { %14811 = vmatmul.mubr.bf16.gmra.mrb[36].mxu1 %v10267_v5  ;;  %v21421_v5 = vld [vmem:[#allocation5_spill] sm:$0xff] }
 0x6b9   : > { %14814 = vmatprep.mubr.bf16.mxu1 %v10276_v20  ;;  %v21422_v20 = vcombine.low %v21420_v32, %v21421_v5  ;;  %v16250_v32 = vld [vmem:[#allocation2 + $0x64] sm:$0xff]  }
 0x6c0   : > { %14815 = vmatmul.mubr.bf16.gmra.mrb[40].mxu1 %v10285_v47  ;;  %v21424_v47 = vld [vmem:[#allocation78_spill] sm:$0xff] }
 0x6c1   : > { %14834 = vmatprep.mubr.bf16.mxu1 %v21372_v9  ;;  %v21425_v34 = vcombine.low %v21423_v24, %v21424_v47  ;;  %v21427_v9 = vld [vmem:[#allocation11_spill] sm:$0xff]  ;;  %v11272_v24 = vrot.slane %v11270_v56, 1 }
 0x6c2   : > { %v16251_v47 = vld [vmem:[#allocation2 + $0x6c] sm:$0xff]  }
 0x6c8   : > { %14835 = vmatmul.mubr.bf16.vlgmr.msra.gmra.mrb[44].mxu1 %v21375_v2  ;;  %v21430_v2 = vld [vmem:[#allocation82_spill] sm:$0xff] }
 0x6c9   : > { %14883 = vmatpush3.bf16.msra.mxu1 %v20147_v62  ;;  %14838 = vmatprep.mubr.bf16.mxu1 %v21378_v59  ;;  %v21382_v62 = vld [vmem:[#allocation60_spill] sm:$0xff]  ;;  %v21431_v30 = vcombine.low %v21429_v41, %v21430_v2  ;;  %v16242_v59 = vld [vmem:[#allocation2 + $0x24] sm:$0xff]  }
 0x6ca   : > { %14884 = vmatprep.subr.bf16.mxu1 %v16215_v40  ;;  %v21383_v42 = vcombine.low %v19743_v52, %v21382_v62  ;;  %v21389_v52 = vcombine.low %v21387_v61, %v21388_v57  ;;  %v21435_v62 = vld [vmem:[#allocation85_spill] sm:$0xff]  ;;  %v11214_v55 = vshll.u32 %v16242_v59, 16  ;;  %v11218_v60 = vshrl.u32 %v16242_v59, 16 }
 0x6cc   : > { %v11216_v57 = vrot.slane %v11214_v55, 1  ;;  %v16254_v55 = vld [vmem:[#allocation2 + $0x84] sm:$0xff]  }
 0x6cd   : > { %14885 = vmatpush3.bf16.msra.mxu1 %v16215_v40  ;;  %v21428_v40 = vcombine.low %v21426_v8, %v21427_v9  ;;  %v11278_v8 = vshll.u32 %v16250_v32, 16  ;;  %v11266_v9 = vshrl.u32 %v16248_v28, 16  ;;  %v16259_v28 = vld [vmem:[#allocation2 + $0xac] sm:$0xff]  }
 0x6ce   : > { %14886 = vmatprep.subr.bf16.mxu1 %v16218_v0  ;;  %v11220_v38 = vor.u32 %v11218_v60, %v11216_v57 }
 0x6cf   : > { %v11280_v2 = vrot.slane %v11278_v8, 1 }
 0x6d0   : > { %14839 = vmatmul.mubr.bf16.gmra.mrb[0].mxu1 %v21381_v23  ;;  %v16243_v23 = vld [vmem:[#allocation2 + $0x2c] sm:$0xff]  }
 0x6d1   : > { %14842 = vmatprep.mubr.bf16.mxu1 %v21383_v42  ;;  %14887 = vmatpush3.bf16.msra.mxu1 %v16218_v0  ;;  %v21432_v0 = vld [vmem:[#allocation9_spill] sm:$0xff]  ;;  %v21436_v42 = vld [vmem:[#allocation6_spill] sm:$0xff]  ;;  %v11222_v61 = vshll.u32 %v16243_v23, 16  ;;  %v11226_v50 = vshrl.u32 %v16243_v23, 16  ;;  %v11282_v23 = vshrl.u32 %v16250_v32, 16 }
 0x6d2   : > { %14888 = vmatprep.subr.bf16.mxu1 %v16223_v16  ;;  %v16261_v32 = vld [vmem:[#allocation2 + $0xbc] sm:$0xff]  }
 0x6d5   : > { %14889 = vmatpush3.bf16.msra.mxu1 %v16223_v16  ;;  %v21433_v16 = vld [vmem:[#allocation14_spill] sm:$0xff] }
 0x6d6   : > { %14890 = vmatprep.subr.bf16.mxu1 %v16226_v11  ;;  %v21434_v17 = vcombine.low %v21432_v0, %v21433_v16  ;;  %v16253_v16 = vld [vmem:[#allocation2 + $0x7c] sm:$0xff]  }
 0x6d8   : > { %14843 = vmatmul.mubr.bf16.gmra.mrb[4].mxu1 %v21386_v25 }
 0x6d9   : > { %14846 = vmatprep.mubr.bf16.mxu1 %v21389_v52  ;;  %14891 = vmatpush3.bf16.msra.mxu1 %v16226_v11  ;;  %v21437_v11 = vcombine.low %v21435_v62, %v21436_v42  ;;  %v16244_v52 = vld [vmem:[#allocation2 + $0x34] sm:$0xff]   ;;  %v11302_v42 = vshll.u32 %v16253_v16, 16 }
 0x6da   : > { %14892 = vmatprep.subr.bf16.mxu1 %v16231_v29  ;;  %v11234_v13 = vshrl.u32 %v16244_v52, 16 }
 0x6dd   : > { %14893 = vmatpush3.bf16.msra.mxu1 %v16231_v29  ;;  %v11207_v29 = vshrl.u32 %v16241_v4, 16  ;;  %v11286_v4 = vshll.u32 %v16251_v47, 16 }
 0x6de   : > { %14894 = vmatprep.subr.bf16.mxu1 %v16234_v3 }
 0x6df   : > { %v11212_v25 = vor.u32 %v11211_v43, %v11207_v29  ;;  %v11288_v0 = vrot.slane %v11286_v4, 1 }
 0x6e0   : > { %14847 = vmatmul.mubr.bf16.gmra.mrb[8].mxu1 %v21392_v10  ;;  %v11230_v10 = vshll.u32 %v16244_v52, 16  ;;  %v11306_v52 = vshrl.u32 %v16253_v16, 16 }
 0x6e1   : > { %14850 = vmatprep.mubr.bf16.mxu1 %v21395_v31  ;;  %14895 = vmatpush3.bf16.msra.mxu1 %v16234_v3  ;;  %v11217_v3 = vsel %vm21438_vm7, %v11212_v25, %v11216_v57  ;;  %v11238_v31 = vshll.u32 %v16245_v33, 16  ;;  %v16255_v57 = vld [vmem:[#allocation2 + $0x8c] sm:$0xff]   ;;  %vm21454_vm7 = vmmov %vm21448_vm0 }
 0x6e2   : > { %14896 = vmatprep.subr.bf16.mxu1 %v16239_v18  ;;  %v11232_v26 = vrot.slane %v11230_v10, 1 }
 0x6e3   : > { %v11240_v37 = vrot.slane %v11238_v31, 1 }
 0x6e4   : > { %v11236_v6 = vor.u32 %v11234_v13, %v11232_v26 }
 0x6e5   : > { %14897 = vmatpush3.bf16.msra.mxu1 %v16239_v18  ;;  %v11224_v18 = vrot.slane %v11222_v61, 1  ;;  %v11304_v61 = vrot.slane %v11302_v42, 1 }
 0x6e6   : > { %v11241_v51 = vsel %vm21441_vm4, %v11236_v6, %v11240_v37  ;;  %vm21457_vm4 = vmmov %vm21448_vm0 }
 0x6e7   : > { %v11228_v27 = vor.u32 %v11226_v50, %v11224_v18  ;;  %v11225_v39 = vsel %vm21439_vm5, %v11220_v38, %v11224_v18  ;;  %v11318_v50 = vshll.u32 %v16255_v57, 16  ;;  %vm21455_vm5 = vmmov %vm21448_vm0 }
 0x6e8   : > { %14851 = vmatmul.mubr.bf16.gmra.mrb[12].mxu1 %v21398_v58  ;;  %v16246_v58 = vld [vmem:[#allocation2 + $0x44] sm:$0xff]  }
 0x6e9   : > { %14854 = vmatprep.mubr.bf16.mxu1 %v21401_v36  ;;  %v11233_v49 = vsel %vm21440_vm6, %v11228_v27, %v11232_v26  ;;  %v11242_v36 = vshrl.u32 %v16245_v33, 16  ;;  %v11246_v54 = vshll.u32 %v16246_v58, 16  ;;  %v11250_v12 = vshrl.u32 %v16246_v58, 16  ;;  %v16256_v27 = vld [vmem:[#allocation2 + $0x94] sm:$0xff]   ;;  %v16257_v58 = vld [vmem:[#allocation2 + $0x9c] sm:$0xff]   ;;  %vm21456_vm6 = vmmov %vm21448_vm0 }
 0x6ea   : > { %v11308_v33 = vor.u32 %v11306_v52, %v11304_v61  ;;  %v11320_v26 = vrot.slane %v11318_v50, 1 }
 0x6f0   : > { %14855 = vmatmul.mubr.bf16.gmra.mrb[16].mxu1 %v21404_v21  ;;  %v11244_v21 = vor.u32 %v11242_v36, %v11240_v37  ;;  %v11314_v37 = vshrl.u32 %v16254_v55, 16  ;;  %v11334_v36 = vshll.u32 %v16257_v58, 16 }
 0x6f1   : > { %14858 = vmatprep.mubr.bf16.mxu1 %v21407_v19  ;;  %v11248_v19 = vrot.slane %v11246_v54, 1 }
 0x6f3   : > { %v11252_v15 = vor.u32 %v11250_v12, %v11248_v19 }
 0x6f5   : > { %v11257_v5 = vsel %vm21443_vm12, %v11252_v15, %v11256_v44  ;;  %vm21459_vm12 = vmmov %vm21448_vm0 }
 0x6f8   : > { %14859 = vmatmul.mubr.bf16.gmra.mrb[20].mxu1 %v21410_v1  ;;  %v11249_v1 = vsel %vm21442_vm13, %v11244_v21, %v11248_v19  ;;  %v16258_v21 = vld [vmem:[#allocation2 + $0xa4] sm:$0xff]   ;;  %v11336_v19 = vrot.slane %v11334_v36, 1  ;;  %vm21458_vm13 = vmmov %vm21448_vm0 }
 0x6f9   : > { %14862 = vmatprep.mubr.bf16.mxu1 %v21413_v46  ;;  %v11258_v46 = vshrl.u32 %v16247_v7, 16 }
 0x700   : > { %14863 = vmatmul.mubr.bf16.gmra.mrb[24].mxu1 %v21416_v22  ;;  %v11260_v22 = vor.u32 %v11258_v46, %v11256_v44  ;;  %v11330_v44 = vshrl.u32 %v16256_v27, 16  ;;  %v11350_v46 = vshll.u32 %v16259_v28, 16 }
 0x701   : > { %14866 = vmatprep.mubr.bf16.mxu1 %v21419_v35  ;;  %v11264_v35 = vrot.slane %v11262_v48, 1 }
 0x703   : > { %v11268_v41 = vor.u32 %v11266_v9, %v11264_v35 }
 0x705   : > { %v11273_v63 = vsel %vm21445_vm8, %v11268_v41, %v11272_v24  ;;  %vm21461_vm8 = vmmov %vm21448_vm0 }
 0x708   : > { %14867 = vmatmul.mubr.bf16.gmra.mrb[28].mxu1 %v21422_v20  ;;  %v11265_v20 = vsel %vm21444_vm3, %v11260_v22, %v11264_v35  ;;  %v16260_v22 = vld [vmem:[#allocation2 + $0xb4] sm:$0xff]   ;;  %v11352_v35 = vrot.slane %v11350_v46, 1  ;;  %vm21460_vm3 = vmmov %vm21448_vm0 }
 0x709   : > { %14870 = vmatprep.mubr.bf16.mxu1 %v21425_v34  ;;  %v11274_v34 = vshrl.u32 %v16249_v45, 16 }
 0x710   : > { %14871 = vmatmul.mubr.bf16.gmra.mrb[32].mxu1 %v21428_v40  ;;  %v11276_v40 = vor.u32 %v11274_v34, %v11272_v24  ;;  %v11346_v24 = vshrl.u32 %v16258_v21, 16  ;;  %v11366_v34 = vshll.u32 %v16261_v32, 16 }
 0x711   : > { %14874 = vmatprep.mubr.bf16.mxu1 %v21431_v30  ;;  %v16252_v30 = vld [vmem:[#allocation2 + $0x74] sm:$0xff]  }
 0x712   : > { %v11281_v59 = vsel %vm21446_vm15, %v11276_v40, %v11280_v2  ;;  %v11294_v43 = vshll.u32 %v16252_v30, 16  ;;  %v11298_v18 = vshrl.u32 %v16252_v30, 16  ;;  %v16262_v40 = vld [vmem:[#allocation2 + $0xc4] sm:$0xff]   ;;  %v16263_v30 = vld [vmem:[#allocation2 + $0xcc] sm:$0xff]  }
 0x714   : > { %v11296_v29 = vrot.slane %v11294_v43, 1  ;;  %v16264_v43 = vld [vmem:[#allocation2 + $0xd4] sm:$0xff]  }
 0x716   : > { %v11300_v10 = vor.u32 %v11298_v18, %v11296_v29  ;;  %v11394_v18 = vshrl.u32 %v16264_v43, 16 }
 0x718   : > { %14875 = vmatmul.mubr.bf16.gmra.mrb[36].mxu1 %v21434_v17  ;;  %v11290_v17 = vshrl.u32 %v16251_v47, 16  ;;  %v11305_v31 = vsel %vm21449_vm9, %v11300_v10, %v11304_v61  ;;  %v11386_v61 = vshrl.u32 %v16263_v30, 16 }
 0x719   : > { %14878 = vmatprep.mubr.bf16.mxu1 %v21437_v11  ;;  %v11284_v11 = vor.u32 %v11282_v23, %v11280_v2  ;;  %v11368_v2 = vrot.slane %v11366_v34, 1 }
 0x71a   : > { %v11292_v62 = vor.u32 %v11290_v17, %v11288_v0  ;;  %v11382_v17 = vshll.u32 %v16263_v30, 16 }
 0x71c   : > { %v11297_v25 = vsel %vm21448_vm0, %v11292_v62, %v11296_v29  ;;  %v11384_v29 = vrot.slane %v11382_v17, 1 }
 0x71e   : > { %v11388_v52 = vor.u32 %v11386_v61, %v11384_v29 }
 0x720   : > { %14879 = vmatmul.mubr.bf16.gmra.mrb[40].mxu1 %v12915_v53  ;;  %v11289_v53 = vsel %vm21447_vm10, %v11284_v11, %v11288_v0  ;;  %v11362_v0 = vshrl.u32 %v16260_v22, 16 }
 0x721   : > { %14898 = vmatprep.mubr.bf16.mxu1 %v11217_v3  ;;  %v11310_v3 = vshll.u32 %v16254_v55, 16  ;;  %v11390_v55 = vshll.u32 %v16264_v43, 16 }
 0x723   : > { %v11312_v60 = vrot.slane %v11310_v3, 1  ;;  %v11392_v3 = vrot.slane %v11390_v55, 1 }
 0x725   : > { %v11313_v38 = vsel %vm21450_vm1, %v11308_v33, %v11312_v60  ;;  %v11316_v54 = vor.u32 %v11314_v37, %v11312_v60  ;;  %v11393_v10 = vsel %vm21460_vm3, %v11388_v52, %v11392_v3  ;;  %v11396_v60 = vor.u32 %v11394_v18, %v11392_v3  ;;  %v21463_v37 = vld [vmem:[#allocation45_spill] sm:$0xff] }
 0x727   : > { %v11321_v14 = vsel %vm21451_vm11, %v11316_v54, %v11320_v26 }
 0x728   : > { %14899 = vmatmul.mubr.bf16.vlgmr.msra.gmra.mrb[44].mxu1 %v11225_v39  ;;  %v11322_v39 = vshrl.u32 %v16255_v57, 16 }
 0x729   : > { %14902 = vmatprep.mubr.bf16.mxu1 %v11233_v49  ;;  %v11326_v49 = vshll.u32 %v16256_v27, 16 }
 0x72a   : > { %v11324_v7 = vor.u32 %v11322_v39, %v11320_v26  ;;  %v20292_v26 = vld [vmem:[%s20383_s4] ss:$0 sm:$0xff] }
 0x72b   : > { %v11328_v13 = vrot.slane %v11326_v49, 1 }
 0x72d   : > { %v11329_v6 = vsel %vm21452_vm2, %v11324_v7, %v11328_v13  ;;  %v11332_v48 = vor.u32 %v11330_v44, %v11328_v13  ;;  %v21464_v13 = vld [vmem:[#allocation36_spill] sm:$0xff] }
 0x72f   : > { %v11337_v56 = vsel %vm21453_vm14, %v11332_v48, %v11336_v19 }
 0x730   : > { %14903 = vmatmul.mubr.bf16.gmra.mrb[0].mxu1 %v11241_v51  ;;  %v11338_v51 = vshrl.u32 %v16257_v58, 16  ;;  %v21462_v58 = vld [vmem:[#allocation47_spill] sm:$0xff] }
 0x731   : > { %14906 = vmatprep.mubr.bf16.mxu1 %v11249_v1  ;;  %v11342_v1 = vshll.u32 %v16258_v21, 16 }
 0x732   : > { %v11340_v45 = vor.u32 %v11338_v51, %v11336_v19  ;;  %v21465_v19 = vld [vmem:[#allocation54_spill] sm:$0xff] }
 0x733   : > { %v11344_v12 = vrot.slane %v11342_v1, 1 }
 0x735   : > { %v11345_v15 = vsel %vm21454_vm7, %v11340_v45, %v11344_v12  ;;  %v11348_v8 = vor.u32 %v11346_v24, %v11344_v12 }
 0x737   : > { %v11353_v4 = vsel %vm21455_vm5, %v11348_v8, %v11352_v35 }
 0x738   : > { %14907 = vmatmul.mubr.bf16.gmra.mrb[4].mxu1 %v11257_v5  ;;  %v11354_v5 = vshrl.u32 %v16259_v28, 16 }
 0x739   : > { %14910 = vmatprep.mubr.bf16.mxu1 %v11265_v20  ;;  %v11358_v20 = vshll.u32 %v16260_v22, 16 }
 0x73a   : > { %v11356_v47 = vor.u32 %v11354_v5, %v11352_v35 }
 0x73b   : > { %v11360_v9 = vrot.slane %v11358_v20, 1 }
 0x73d   : > { %v11361_v41 = vsel %vm21456_vm6, %v11356_v47, %v11360_v9  ;;  %v11364_v23 = vor.u32 %v11362_v0, %v11360_v9 }
 0x73f   : > { %v11369_v42 = vsel %vm21457_vm4, %v11364_v23, %v11368_v2 }
 0x740   : > { %14911 = vmatmul.mubr.bf16.gmra.mrb[8].mxu1 %v11273_v63  ;;  %v11370_v63 = vshrl.u32 %v16261_v32, 16 }
 0x741   : > { %14914 = vmatprep.mubr.bf16.mxu1 %v11281_v59  ;;  %v11374_v59 = vshll.u32 %v16262_v40, 16 }
 0x742   : > { %v11372_v16 = vor.u32 %v11370_v63, %v11368_v2 }
 0x743   : > { %v11376_v62 = vrot.slane %v11374_v59, 1 }
 0x745   : > { %v11377_v11 = vsel %vm21458_vm13, %v11372_v16, %v11376_v62 }
 0x748   : > { %14915 = vmatmul.mubr.bf16.gmra.mrb[12].mxu1 %v11289_v53  ;;  %v11378_v53 = vshrl.u32 %v16262_v40, 16 }
 0x749   : > { %14918 = vmatprep.mubr.bf16.mxu1 %v11297_v25  ;;  %v16265_v25 = vld [vmem:[#allocation2 + $0xdc] ss:$0 sps:$4 sm:$0x11]  }
 0x74a   : > { %v11380_v57 = vor.u32 %v11378_v53, %v11376_v62  ;;  %v11398_v33 = vshll.u32 %v16265_v25, 16 }
 0x74c   : > { %v11385_v50 = vsel %vm21459_vm12, %v11380_v57, %v11384_v29  ;;  %v11400_v27 = vrot.slane %v11398_v33, 1 }
 0x750   : > { %14919 = vmatmul.mubr.bf16.gmra.mrb[16].mxu1 %v11305_v31  ;;  %v11401_v31 = vsel %vm21461_vm8, %v11396_v60, %v11400_v27 }
 0x751   : > { %14922 = vmatprep.mubr.bf16.mxu1 %v11313_v38 }
 0x758   : > { %14923 = vmatmul.mubr.bf16.gmra.mrb[20].mxu1 %v11321_v14 }
 0x759   : > { %14926 = vmatprep.mubr.bf16.mxu1 %v11329_v6 }
 0x760   : > { %14927 = vmatmul.mubr.bf16.gmra.mrb[24].mxu1 %v11337_v56 }
 0x761   : > { %14930 = vmatprep.mubr.bf16.mxu1 %v11345_v15 }
 0x768   : > { %14931 = vmatmul.mubr.bf16.gmra.mrb[28].mxu1 %v11353_v4 }
 0x769   : > { %14934 = vmatprep.mubr.bf16.mxu1 %v11361_v41 }
 0x770   : > { %14935 = vmatmul.mubr.bf16.gmra.mrb[32].mxu1 %v11369_v42 }
 0x771   : > { %14938 = vmatprep.mubr.bf16.mxu1 %v11377_v11 }
 0x778   : > { %14939 = vmatmul.mubr.bf16.gmra.mrb[36].mxu1 %v11385_v50 }
 0x779   : > { %14942 = vmatprep.mubr.bf16.mxu1 %v11393_v10 }
 0x780   : > { %14943 = vmatmul.mubr.bf16.gmra.mrb[40].mxu1 %v11401_v31 }
 0x7fb   : > { %v14900_v38 = vpop.f32.mrb[44].mxu1 }
 0x7fc   : > { %v14962_v39 = vadd.f32 %v14900_v38, %v21462_v58  ;;  %v11508_v49 = vpop.f32.mrb[45].mxu1 }
 0x7fd   : > { %v14963_v7 = vadd.f32 %v11508_v49, %v21463_v37  ;;  %v14901_v36 = vpop.f32.mrb[46].mxu1 }
 0x7fe   : > { %v11756_v54 = vadd.f32 %v14962_v39, %v20292_v26  ;;  %v14964_v21 = vadd.f32 %v14901_v36, %v21464_v13  ;;  %v11511_v14 = vpop.f32.mrb[47].mxu1 }
 0x7ff   : > { %v11754_v6 = vadd.f32 %v14963_v7, %v20292_v26  ;;  %v14965_v28 = vadd.f32 %v11511_v14, %v21465_v19 }
 0x800   : > { %v11757_v51 = vadd.f32 %v14964_v21, %v20292_v26  ;;  %v11804_v44 = vmax.f32 %v11756_v54, 0.0 }
 0x801   : > { %v11755_v1 = vadd.f32 %v14965_v28, %v20292_v26  ;;  %v11802_v46 = vmax.f32 %v11754_v6, 0.0 }
 0x802   : > { %v11805_v45 = vmax.f32 %v11757_v51, 0.0 }
 0x803   : > { %v11803_v48 = vmax.f32 %v11755_v1, 0.0  ;;  %v14904_v12 = vpop.f32.mrb[0].mxu1 }
 0x804   : > { %v13248_v22 = vpack.c.bf16 %v11805_v45, %v11804_v44  ;;  %v11760_v56 = vadd.f32 %v14904_v12, %v20292_v26  ;;  %v11524_v15 = vpop.f32.mrb[1].mxu1 }
 0x805   : > { %v13243_v35 = vpack.c.bf16 %v11803_v48, %v11802_v46  ;;  %v11758_v32 = vadd.f32 %v20292_v26, %v11524_v15  ;;  %v14905_v5 = vpop.f32.mrb[2].mxu1 }
 0x806   : > { %13384 = vst [vmem:[%s20306_s11 + $0x8] sm:$0xff] %v13248_v22   ;;  %v11761_v20 = vadd.f32 %v14905_v5, %v20292_v26  ;;  %v11527_v24 = vpop.f32.mrb[3].mxu1  ;;  %v11808_v34 = vmax.f32 %v11760_v56, 0.0 }
 0x807   : > { %13244 = vst [vmem:[%s20306_s11] sm:$0xff] %v13243_v35   ;;  %v11759_v47 = vadd.f32 %v20292_v26, %v11527_v24  ;;  %v11806_v9 = vmax.f32 %v11758_v32, 0.0 }
 0x808   : > { %v11809_v8 = vmax.f32 %v11761_v20, 0.0 }
 0x809   : > { %v11807_v40 = vmax.f32 %v11759_v47, 0.0 }
 0x80a   : > { %v13258_v4 = vpack.c.bf16 %v11809_v8, %v11808_v34 }
 0x80b   : > { %v13253_v41 = vpack.c.bf16 %v11807_v40, %v11806_v9  ;;  %v14908_v2 = vpop.f32.mrb[4].mxu1 }
 0x80c   : > { %13386 = vst [vmem:[%s20306_s11 + $0x18] sm:$0xff] %v13258_v4   ;;  %v11764_v30 = vadd.f32 %v14908_v2, %v20292_v26  ;;  %v11540_v63 = vpop.f32.mrb[5].mxu1 }
 0x80d   : > { %13385 = vst [vmem:[%s20306_s11 + $0x10] sm:$0xff] %v13253_v41   ;;  %v11762_v59 = vadd.f32 %v20292_v26, %v11540_v63  ;;  %v14909_v0 = vpop.f32.mrb[6].mxu1 }
 0x80e   : > { %v11765_v16 = vadd.f32 %v14909_v0, %v20292_v26  ;;  %v11543_v17 = vpop.f32.mrb[7].mxu1  ;;  %v11812_v23 = vmax.f32 %v11764_v30, 0.0 }
 0x80f   : > { %v11763_v43 = vadd.f32 %v20292_v26, %v11543_v17  ;;  %v11810_v42 = vmax.f32 %v11762_v59, 0.0 }
 0x810   : > { %v11813_v62 = vmax.f32 %v11765_v16, 0.0 }
 0x811   : > { %v11811_v11 = vmax.f32 %v11763_v43, 0.0 }
 0x812   : > { %v13268_v29 = vpack.c.bf16 %v11813_v62, %v11812_v23 }
 0x813   : > { %v13263_v55 = vpack.c.bf16 %v11811_v11, %v11810_v42  ;;  %v14912_v53 = vpop.f32.mrb[8].mxu1 }
 0x814   : > { %13388 = vst [vmem:[%s20306_s11 + $0x28] sm:$0xff] %v13268_v29   ;;  %v11768_v25 = vadd.f32 %v14912_v53, %v20292_v26  ;;  %v11556_v61 = vpop.f32.mrb[9].mxu1 }
 0x815   : > { %13387 = vst [vmem:[%s20306_s11 + $0x20] sm:$0xff] %v13263_v55   ;;  %v11766_v57 = vadd.f32 %v20292_v26, %v11556_v61  ;;  %v14913_v52 = vpop.f32.mrb[10].mxu1 }
 0x816   : > { %v11769_v3 = vadd.f32 %v14913_v52, %v20292_v26  ;;  %v11559_v18 = vpop.f32.mrb[11].mxu1  ;;  %v11816_v50 = vmax.f32 %v11768_v25, 0.0 }
 0x817   : > { %v11767_v33 = vadd.f32 %v20292_v26, %v11559_v18  ;;  %v11814_v60 = vmax.f32 %v11766_v57, 0.0 }
 0x818   : > { %v11817_v10 = vmax.f32 %v11769_v3, 0.0 }
 0x819   : > { %v11815_v27 = vmax.f32 %v11767_v33, 0.0 }
 0x81a   : > { %v13278_v31 = vpack.c.bf16 %v11817_v10, %v11816_v50 }
 0x81b   : > { %v13273_v38 = vpack.c.bf16 %v11815_v27, %v11814_v60  ;;  %v14916_v58 = vpop.f32.mrb[12].mxu1 }
 0x81c   : > { %13390 = vst [vmem:[%s20306_s11 + $0x38] sm:$0xff] %v13278_v31   ;;  %v11772_v39 = vadd.f32 %v14916_v58, %v20292_v26  ;;  %v11572_v49 = vpop.f32.mrb[13].mxu1 }
 0x81d   : > { %13389 = vst [vmem:[%s20306_s11 + $0x30] sm:$0xff] %v13273_v38   ;;  %v11770_v37 = vadd.f32 %v20292_v26, %v11572_v49  ;;  %v14917_v7 = vpop.f32.mrb[14].mxu1 }
 0x81e   : > { %v11773_v36 = vadd.f32 %v14917_v7, %v20292_v26  ;;  %v11575_v54 = vpop.f32.mrb[15].mxu1  ;;  %v11820_v21 = vmax.f32 %v11772_v39, 0.0 }
 0x81f   : > { %v11771_v13 = vadd.f32 %v20292_v26, %v11575_v54  ;;  %v11818_v6 = vmax.f32 %v11770_v37, 0.0 }
 0x820   : > { %v11821_v14 = vmax.f32 %v11773_v36, 0.0 }
 0x821   : > { %v11819_v19 = vmax.f32 %v11771_v13, 0.0 }
 0x822   : > { %v13288_v28 = vpack.c.bf16 %v11821_v14, %v11820_v21 }
 0x823   : > { %v13283_v51 = vpack.c.bf16 %v11819_v19, %v11818_v6  ;;  %v14920_v1 = vpop.f32.mrb[16].mxu1 }
 0x824   : > { %13392 = vst [vmem:[%s20306_s11 + $0x48] sm:$0xff] %v13288_v28   ;;  %v11776_v44 = vadd.f32 %v14920_v1, %v20292_v26  ;;  %v11588_v45 = vpop.f32.mrb[17].mxu1 }
 0x825   : > { %13391 = vst [vmem:[%s20306_s11 + $0x40] sm:$0xff] %v13283_v51   ;;  %v11774_v46 = vadd.f32 %v20292_v26, %v11588_v45  ;;  %v14921_v48 = vpop.f32.mrb[18].mxu1 }
 0x826   : > { %v11777_v12 = vadd.f32 %v14921_v48, %v20292_v26  ;;  %v11591_v22 = vpop.f32.mrb[19].mxu1  ;;  %v11824_v15 = vmax.f32 %v11776_v44, 0.0 }
 0x827   : > { %v11775_v56 = vadd.f32 %v20292_v26, %v11591_v22  ;;  %v11822_v32 = vmax.f32 %v11774_v46, 0.0 }
 0x828   : > { %v11825_v35 = vmax.f32 %v11777_v12, 0.0 }
 0x829   : > { %v11823_v5 = vmax.f32 %v11775_v56, 0.0 }
 0x82a   : > { %v13298_v20 = vpack.c.bf16 %v11825_v35, %v11824_v15 }
 0x82b   : > { %v13293_v24 = vpack.c.bf16 %v11823_v5, %v11822_v32  ;;  %v14924_v47 = vpop.f32.mrb[20].mxu1 }
 0x82c   : > { %13394 = vst [vmem:[%s20306_s11 + $0x58] sm:$0xff] %v13298_v20   ;;  %v11780_v34 = vadd.f32 %v14924_v47, %v20292_v26  ;;  %v11604_v8 = vpop.f32.mrb[21].mxu1 }
 0x82d   : > { %13393 = vst [vmem:[%s20306_s11 + $0x50] sm:$0xff] %v13293_v24   ;;  %v11778_v9 = vadd.f32 %v20292_v26, %v11604_v8  ;;  %v14925_v40 = vpop.f32.mrb[22].mxu1 }
 0x82e   : > { %v11781_v4 = vadd.f32 %v14925_v40, %v20292_v26  ;;  %v11607_v41 = vpop.f32.mrb[23].mxu1  ;;  %v11828_v30 = vmax.f32 %v11780_v34, 0.0 }
 0x82f   : > { %v11779_v2 = vadd.f32 %v20292_v26, %v11607_v41  ;;  %v11826_v59 = vmax.f32 %v11778_v9, 0.0 }
 0x830   : > { %v11829_v63 = vmax.f32 %v11781_v4, 0.0 }
 0x831   : > { %v11827_v0 = vmax.f32 %v11779_v2, 0.0 }
 0x832   : > { %v13308_v16 = vpack.c.bf16 %v11829_v63, %v11828_v30 }
 0x833   : > { %v13303_v17 = vpack.c.bf16 %v11827_v0, %v11826_v59  ;;  %v14928_v43 = vpop.f32.mrb[24].mxu1 }
 0x834   : > { %13396 = vst [vmem:[%s20306_s11 + $0x68] sm:$0xff] %v13308_v16   ;;  %v11784_v23 = vadd.f32 %v14928_v43, %v20292_v26  ;;  %v11620_v62 = vpop.f32.mrb[25].mxu1 }
 0x835   : > { %13395 = vst [vmem:[%s20306_s11 + $0x60] sm:$0xff] %v13303_v17   ;;  %v11782_v42 = vadd.f32 %v20292_v26, %v11620_v62  ;;  %v14929_v11 = vpop.f32.mrb[26].mxu1 }
 0x836   : > { %v11785_v29 = vadd.f32 %v14929_v11, %v20292_v26  ;;  %v11623_v55 = vpop.f32.mrb[27].mxu1  ;;  %v11832_v25 = vmax.f32 %v11784_v23, 0.0 }
 0x837   : > { %v11783_v53 = vadd.f32 %v20292_v26, %v11623_v55  ;;  %v11830_v57 = vmax.f32 %v11782_v42, 0.0 }
 0x838   : > { %v11833_v61 = vmax.f32 %v11785_v29, 0.0 }
 0x839   : > { %v11831_v52 = vmax.f32 %v11783_v53, 0.0 }
 0x83a   : > { %v13318_v3 = vpack.c.bf16 %v11833_v61, %v11832_v25 }
 0x83b   : > { %v13313_v18 = vpack.c.bf16 %v11831_v52, %v11830_v57  ;;  %v14932_v33 = vpop.f32.mrb[28].mxu1 }
 0x83c   : > { %13398 = vst [vmem:[%s20306_s11 + $0x78] sm:$0xff] %v13318_v3   ;;  %v11788_v50 = vadd.f32 %v14932_v33, %v20292_v26  ;;  %v11636_v10 = vpop.f32.mrb[29].mxu1 }
 0x83d   : > { %13397 = vst [vmem:[%s20306_s11 + $0x70] sm:$0xff] %v13313_v18   ;;  %v11786_v60 = vadd.f32 %v20292_v26, %v11636_v10  ;;  %v14933_v27 = vpop.f32.mrb[30].mxu1 }
 0x83e   : > { %v11789_v31 = vadd.f32 %v14933_v27, %v20292_v26  ;;  %v11639_v38 = vpop.f32.mrb[31].mxu1  ;;  %v11836_v39 = vmax.f32 %v11788_v50, 0.0 }
 0x83f   : > { %v11787_v58 = vadd.f32 %v20292_v26, %v11639_v38  ;;  %v11834_v37 = vmax.f32 %v11786_v60, 0.0 }
 0x840   : > { %v11837_v49 = vmax.f32 %v11789_v31, 0.0 }
 0x841   : > { %v11835_v7 = vmax.f32 %v11787_v58, 0.0 }
 0x842   : > { %v13328_v36 = vpack.c.bf16 %v11837_v49, %v11836_v39 }
 0x843   : > { %v13323_v54 = vpack.c.bf16 %v11835_v7, %v11834_v37  ;;  %v14936_v13 = vpop.f32.mrb[32].mxu1 }
 0x844   : > { %13400 = vst [vmem:[%s20306_s11 + $0x88] sm:$0xff] %v13328_v36   ;;  %v11792_v21 = vadd.f32 %v14936_v13, %v20292_v26  ;;  %v11652_v14 = vpop.f32.mrb[33].mxu1 }
 0x845   : > { %13399 = vst [vmem:[%s20306_s11 + $0x80] sm:$0xff] %v13323_v54   ;;  %v11790_v6 = vadd.f32 %v20292_v26, %v11652_v14  ;;  %v14937_v19 = vpop.f32.mrb[34].mxu1 }
 0x846   : > { %v11793_v28 = vadd.f32 %v14937_v19, %v20292_v26  ;;  %v11655_v51 = vpop.f32.mrb[35].mxu1  ;;  %v11840_v44 = vmax.f32 %v11792_v21, 0.0 }
 0x847   : > { %v11791_v1 = vadd.f32 %v20292_v26, %v11655_v51  ;;  %v11838_v46 = vmax.f32 %v11790_v6, 0.0 }
 0x848   : > { %v11841_v45 = vmax.f32 %v11793_v28, 0.0 }
 0x849   : > { %v11839_v48 = vmax.f32 %v11791_v1, 0.0 }
 0x84a   : > { %v13338_v12 = vpack.c.bf16 %v11841_v45, %v11840_v44 }
 0x84b   : > { %v13333_v22 = vpack.c.bf16 %v11839_v48, %v11838_v46  ;;  %v14940_v56 = vpop.f32.mrb[36].mxu1 }
 0x84c   : > { %13402 = vst [vmem:[%s20306_s11 + $0x98] sm:$0xff] %v13338_v12   ;;  %v11796_v15 = vadd.f32 %v14940_v56, %v20292_v26  ;;  %v11668_v35 = vpop.f32.mrb[37].mxu1 }
 0x84d   : > { %13401 = vst [vmem:[%s20306_s11 + $0x90] sm:$0xff] %v13333_v22   ;;  %v11794_v32 = vadd.f32 %v20292_v26, %v11668_v35  ;;  %v14941_v5 = vpop.f32.mrb[38].mxu1 }
 0x84e   : > { %v11797_v20 = vadd.f32 %v14941_v5, %v20292_v26  ;;  %v11671_v24 = vpop.f32.mrb[39].mxu1  ;;  %v11844_v34 = vmax.f32 %v11796_v15, 0.0 }
 0x84f   : > { %v11795_v47 = vadd.f32 %v20292_v26, %v11671_v24  ;;  %v11842_v9 = vmax.f32 %v11794_v32, 0.0 }
 0x850   : > { %v11845_v8 = vmax.f32 %v11797_v20, 0.0 }
 0x851   : > { %v11843_v40 = vmax.f32 %v11795_v47, 0.0 }
 0x852   : > { %v13348_v4 = vpack.c.bf16 %v11845_v8, %v11844_v34 }
 0x853   : > { %v13343_v41 = vpack.c.bf16 %v11843_v40, %v11842_v9  ;;  %v14944_v2 = vpop.f32.mrb[40].mxu1 }
 0x854   : > { %13404 = vst [vmem:[%s20306_s11 + $0xa8] sm:$0xff] %v13348_v4   ;;  %v11800_v30 = vadd.f32 %v14944_v2, %v20292_v26  ;;  %v11684_v63 = vpop.f32.mrb[41].mxu1 }
 0x855   : > { %13403 = vst [vmem:[%s20306_s11 + $0xa0] sm:$0xff] %v13343_v41   ;;  %v11798_v59 = vadd.f32 %v20292_v26, %v11684_v63  ;;  %v14945_v0 = vpop.f32.mrb[42].mxu1 }
 0x856   : > { %v11801_v16 = vadd.f32 %v14945_v0, %v20292_v26  ;;  %v11687_v17 = vpop.f32.mrb[43].mxu1  ;;  %v11848_v23 = vmax.f32 %v11800_v30, 0.0 }
 0x857   : > { %v11799_v43 = vadd.f32 %v20292_v26, %v11687_v17  ;;  %v11846_v42 = vmax.f32 %v11798_v59, 0.0 }
 0x858   : > { %v11849_v62 = vmax.f32 %v11801_v16, 0.0 }
 0x859   : > { %v11847_v11 = vmax.f32 %v11799_v43, 0.0 }
 0x85a   : > { %v13358_v29 = vpack.c.bf16 %v11849_v62, %v11848_v23 }
 0x85b   : > { %v13353_v55 = vpack.c.bf16 %v11847_v11, %v11846_v42 }
 0x85c   : > { %13406 = vst [vmem:[%s20306_s11 + $0xb8] sm:$0xff] %v13358_v29  }
 0x85d   : > { %13405 = vst [vmem:[%s20306_s11 + $0xb0] sm:$0xff] %v13353_v55  }
 0x85e PF: > { %s15_s18 = sadd.s32 1, %s16349_s18  }
 0x85f   : > { %p12_p4 = scmp.ge.s32.totalorder %s15_s18, 4  }
 0x861   :  { %14 = sbr.rel (!%p12_p4) target bundleno = 1 (0x1), region = 86 }

</bundles_post_ra>
